<compile_context>
chip_gen: v5e
topology: v5e:2x2
jax: 0.10.0
libtpu: 0.0.40
codegen_flags: <defaults>
</compile_context>

<pallas_src>
import functools
import math

import jax
import jax.numpy as jnp
from jax.experimental import pallas as pl
from jax.experimental.pallas import tpu as pltpu


def gqa_batch_kernel(h_ref, w_ref, b_ref, o_ref, *,
                     num_heads, n_group, head_dim, d_model,
                     compute_dtype, approx_recip):
    """One batch element; all KV groups handled in this step.

    h_ref : (1, seq, d_model)                activations (compute dtype)
    w_ref : (d_model, d_model + 2*kv_dim)    fused [Wq | Wk | Wv], (in, out) layout
    b_ref : (1, d_model + 2*kv_dim)          fused bias, f32
    o_ref : (1, seq, d_model)                output, f32
    """
    seq = h_ref.shape[1]
    rep = num_heads // n_group
    kv_dim = n_group * head_dim

    h = h_ref[0]                                               # (seq, d_model)

    # Single fused QKV projection: lane-dense N = d_model + 2*kv_dim matmul,
    # f32 accumulation via preferred_element_type; bias added in f32.
    qkv = jnp.dot(h, w_ref[...], preferred_element_type=jnp.float32)
    qkv = qkv + b_ref[...]                                     # (seq, d_model + 2*kv_dim)

    scale = 1.0 / math.sqrt(head_dim)
    q_all = qkv[:, :d_model] * scale                           # (seq, d_model)   f32
    k_all = qkv[:, d_model:d_model + kv_dim].astype(compute_dtype)   # (seq, kv_dim)
    v_all = qkv[:, d_model + kv_dim:].astype(compute_dtype)          # (seq, kv_dim)

    # Unrolled loop over KV groups (small static trip count).
    for g in range(n_group):
        # Stack the group's `rep` query heads along rows: row r*seq + s is
        # query position s of head (g*rep + r) -> one big MXU matmul per group.
        q_stack = jnp.concatenate(
            [q_all[:, (g * rep + r) * head_dim:(g * rep + r + 1) * head_dim]
             for r in range(rep)], axis=0
        ).astype(compute_dtype)                                # (rep*seq, head_dim)
        kg = k_all[:, g * head_dim:(g + 1) * head_dim]         # (seq, head_dim)
        vg = v_all[:, g * head_dim:(g + 1) * head_dim]         # (seq, head_dim)

        # scores[r*seq+s, t] = <q_h[s], k_g[t]> : contract last dims, no K^T.
        s = jax.lax.dot_general(
            q_stack, kg, (((1,), (1,)), ((), ())),
            preferred_element_type=jnp.float32)                # (rep*seq, seq) f32

        # Numerically-stable softmax over keys (f32); fold the 1/sum
        # normalization into the (much smaller) P@V result.
        m = jnp.max(s, axis=-1, keepdims=True)
        p = jnp.exp(s - m)
        l = jnp.sum(p, axis=-1, keepdims=True)
        inv_l = pl.reciprocal(l, approx=approx_recip)          # (rep*seq, 1)

        o = jnp.dot(p.astype(compute_dtype), vg,
                    preferred_element_type=jnp.float32)        # (rep*seq, head_dim)
        o = o * inv_l

        # Direct per-head slice stores (no concatenate-then-copy epilogue):
        # head (g*rep + r) lands at output columns [col, col + head_dim).
        for r in range(rep):
            col = (g * rep + r) * head_dim
            o_ref[0, :, col:col + head_dim] = (
                o[r * seq:(r + 1) * seq, :].astype(o_ref.dtype))


def gqa_attention(h, wq, bq, wk, bk, wv, bv, *, num_heads, n_group,
                  use_bf16=True):
    """GQA forward.  PyTorch Linear layout: W is (out, in), y = x @ W.T + b."""
    bs, seq, d_model = h.shape
    assert d_model % num_heads == 0 and num_heads % n_group == 0
    head_dim = d_model // num_heads
    kv_dim = n_group * head_dim
    qkv_out = d_model + 2 * kv_dim
    assert wq.shape == (d_model, d_model)
    assert wk.shape == (kv_dim, d_model) and wv.shape == (kv_dim, d_model)
    # BlockSpec / layout preconditions (no masking path implemented).
    assert d_model % 128 == 0, "d_model must be a multiple of 128 lanes"
    assert seq % 16 == 0, "seq must be a multiple of 16 (bf16 sublane tile)"

    compute_dtype = jnp.bfloat16 if use_bf16 else jnp.float32

    # One-time layout plumbing (outside the kernel): transpose each weight to
    # (in, out) and fuse [Wq | Wk | Wv] so the kernel runs ONE projection
    # matmul per batch step.  Bias fused the same way (kept in f32).
    w_fused = jnp.concatenate([wq.T, wk.T, wv.T], axis=1).astype(compute_dtype)
    b_fused = jnp.concatenate([bq, bk, bv]).reshape(1, qkv_out).astype(jnp.float32)

    # bf16 MXU operands halve HBM/VMEM traffic; accumulation + softmax stay f32.
    h_c = h.astype(compute_dtype)

    kernel = functools.partial(
        gqa_batch_kernel, num_heads=num_heads, n_group=n_group,
        head_dim=head_dim, d_model=d_model,
        compute_dtype=compute_dtype, approx_recip=use_bf16)

    return pl.pallas_call(
        kernel,
        out_shape=jax.ShapeDtypeStruct((bs, seq, d_model), jnp.float32),
        grid_spec=pltpu.PrefetchScalarGridSpec(
            num_scalar_prefetch=0,
            grid=(bs,),
            in_specs=[
                pl.BlockSpec((1, seq, d_model), lambda b: (b, 0, 0)),
                # Constant block index -> fused weights / bias stay resident
                # in VMEM across every batch step (single HBM fetch).
                pl.BlockSpec((d_model, qkv_out), lambda b: (0, 0)),
                pl.BlockSpec((1, qkv_out), lambda b: (0, 0)),
            ],
            out_specs=pl.BlockSpec((1, seq, d_model), lambda b: (b, 0, 0)),
        ),
        compiler_params=pltpu.CompilerParams(
            dimension_semantics=("parallel",),
        ),
    )(h_c, w_fused, b_fused)


def gqa_reference(h, wq, bq, wk, bk, wv, bv, *, num_heads, n_group):
    """Pure-JAX reference mirroring the PyTorch forward exactly (f32)."""
    bs, seq, d_model = h.shape
    head_dim = d_model // num_heads
    rep = num_heads // n_group
    q = h @ wq.T + bq
    k = h @ wk.T + bk
    v = h @ wv.T + bv
    q = q.reshape(bs, seq, num_heads, head_dim).transpose(0, 2, 1, 3)
    # repeat(1,1,1,rep).view(...) == each group's K/V used by rep consecutive heads
    k = jnp.repeat(k.reshape(bs, seq, n_group, head_dim), rep, axis=2).transpose(0, 2, 1, 3)
    v = jnp.repeat(v.reshape(bs, seq, n_group, head_dim), rep, axis=2).transpose(0, 2, 1, 3)
    s = jnp.einsum('bhqd,bhkd->bhqk', q, k) / math.sqrt(head_dim)
    a = jax.nn.softmax(s, axis=-1)
    o = jnp.einsum('bhqk,bhkd->bhqd', a, v)
    return o.transpose(0, 2, 1, 3).reshape(bs, seq, d_model)


if __name__ == "__main__":
    # Module defaults: d_model=512, num_heads=8, n_group=4 -> head_dim=64, rep=2.
    bs, seq = 2, 128
    d_model, num_heads, n_group = 512, 8, 4
    head_dim = d_model // num_heads
    kv_dim = n_group * head_dim

    key = jax.random.PRNGKey(0)
    k_h, k_wq, k_bq, k_wk, k_bk, k_wv, k_bv = jax.random.split(key, 7)

    h = jax.random.normal(k_h, (bs, seq, d_model), dtype=jnp.float32)
    # PyTorch Linear weight layout: (out_features, in_features).
    wq = jax.random.normal(k_wq, (d_model, d_model), dtype=jnp.float32) * 0.05
    bq = jax.random.normal(k_bq, (d_model,), dtype=jnp.float32) * 0.05
    wk = jax.random.normal(k_wk, (kv_dim, d_model), dtype=jnp.float32) * 0.05
    bk = jax.random.normal(k_bk, (kv_dim,), dtype=jnp.float32) * 0.05
    wv = jax.random.normal(k_wv, (kv_dim, d_model), dtype=jnp.float32) * 0.05
    bv = jax.random.normal(k_bv, (kv_dim,), dtype=jnp.float32) * 0.05

    ref = gqa_reference(h, wq, bq, wk, bk, wv, bv,
                        num_heads=num_heads, n_group=n_group)

    # Exact path (f32 operands, exact reciprocal): tight check of semantics.
    out_f32 = gqa_attention(h, wq, bq, wk, bk, wv, bv,
                            num_heads=num_heads, n_group=n_group,
                            use_bf16=False)
    out_f32 = jax.block_until_ready(out_f32)
    assert out_f32.shape == (bs, seq, d_model)
    err_f32 = float(jnp.max(jnp.abs(out_f32 - ref)))
    assert err_f32 < 1e-3, f"f32 path max abs err {err_f32}"

    # Fast path (bf16 MXU operands, approx reciprocal): relaxed tolerance plus
    # a mean-error guard so a single outlier can't hide systematic drift.
    out_bf16 = gqa_attention(h, wq, bq, wk, bk, wv, bv,
                             num_heads=num_heads, n_group=n_group,
                             use_bf16=True)
    out_bf16 = jax.block_until_ready(out_bf16)
    assert out_bf16.shape == (bs, seq, d_model)
    err_bf16 = float(jnp.max(jnp.abs(out_bf16 - ref)))
    mean_bf16 = float(jnp.mean(jnp.abs(out_bf16 - ref)))
    assert err_bf16 < 1e-1, f"bf16 path max abs err {err_bf16}"
    assert mean_bf16 < 2e-2, f"bf16 path mean abs err {mean_bf16}"

    print("KERNEL_OK")
</pallas_src>

<mosaic_0001>
module attributes {stable_mosaic.version = 11 : i64} {
  func.func @gqa_batch_kernel(%arg0: i32, %arg1: memref<1x128x512xf32, #tpu.memory_space<vmem>>, %arg2: memref<512x1024xf32, #tpu.memory_space<vmem>>, %arg3: memref<1x1024xf32, #tpu.memory_space<vmem>>, %arg4: memref<1x128x512xf32, #tpu.memory_space<vmem>>) attributes {dimension_semantics = [#tpu.dimension_semantics<parallel>], iteration_bounds = array<i64: 2>, scalar_prefetch = 0 : i64, scratch_operands = 0 : i64, tpu.core_type = #tpu.core_type<tc>, window_params = [{transform_indices = @transform_0, window_bounds = array<i64: 1, 128, 512>}, {pipeline_mode = #tpu.pipeline_mode<synchronous>, transform_indices = @transform_1, window_bounds = array<i64: 512, 1024>}, {pipeline_mode = #tpu.pipeline_mode<synchronous>, transform_indices = @transform_2, window_bounds = array<i64: 1, 1024>}, {transform_indices = @transform_3, window_bounds = array<i64: 1, 128, 512>}]} {
    %c0 = arith.constant 0 : index
    %c0_0 = arith.constant 0 : index
    %c0_1 = arith.constant 0 : index
    %0 = vector.load %arg1[%c0, %c0_0, %c0_1] : memref<1x128x512xf32, #tpu.memory_space<vmem>>, vector<1x128x512xf32>
    %1 = vector.shape_cast %0 : vector<1x128x512xf32> to vector<128x512xf32>
    %c0_2 = arith.constant 0 : index
    %c0_3 = arith.constant 0 : index
    %2 = vector.load %arg2[%c0_2, %c0_3] : memref<512x1024xf32, #tpu.memory_space<vmem>>, vector<512x1024xf32>
    %cst = arith.constant dense<0.000000e+00> : vector<128x1024xf32>
    %3 = tpu.matmul %1, %2, %cst {dimension_numbers = #tpu.dot_dimension_numbers<[1], [0], [0], [1], [0, 0, 1, 1], [], []>} : vector<128x512xf32>, vector<512x1024xf32>, vector<128x1024xf32> -> vector<128x1024xf32>
    %c0_4 = arith.constant 0 : index
    %c0_5 = arith.constant 0 : index
    %4 = vector.load %arg3[%c0_4, %c0_5] : memref<1x1024xf32, #tpu.memory_space<vmem>>, vector<1x1024xf32>
    %5 = vector.broadcast %4 : vector<1x1024xf32> to vector<128x1024xf32>
    %6 = arith.addf %3, %5 : vector<128x1024xf32>
    %7 = vector.extract_strided_slice %6 {offsets = [0, 0], sizes = [128, 512], strides = [1, 1]} : vector<128x1024xf32> to vector<128x512xf32>
    %cst_6 = arith.constant 1.250000e-01 : f32
    %8 = vector.broadcast %cst_6 : f32 to vector<128x512xf32>
    %9 = arith.mulf %7, %8 : vector<128x512xf32>
    %10 = vector.extract_strided_slice %6 {offsets = [0, 512], sizes = [128, 256], strides = [1, 1]} : vector<128x1024xf32> to vector<128x256xf32>
    %11 = vector.extract_strided_slice %6 {offsets = [0, 768], sizes = [128, 256], strides = [1, 1]} : vector<128x1024xf32> to vector<128x256xf32>
    %12 = vector.extract_strided_slice %9 {offsets = [0, 0], sizes = [128, 64], strides = [1, 1]} : vector<128x512xf32> to vector<128x64xf32>
    %13 = vector.extract_strided_slice %9 {offsets = [0, 64], sizes = [128, 64], strides = [1, 1]} : vector<128x512xf32> to vector<128x64xf32>
    %14 = tpu.concatenate %12, %13 in 0 : vector<128x64xf32>, vector<128x64xf32> -> vector<256x64xf32>
    %15 = vector.extract_strided_slice %10 {offsets = [0, 0], sizes = [128, 64], strides = [1, 1]} : vector<128x256xf32> to vector<128x64xf32>
    %16 = vector.extract_strided_slice %11 {offsets = [0, 0], sizes = [128, 64], strides = [1, 1]} : vector<128x256xf32> to vector<128x64xf32>
    %cst_7 = arith.constant dense<0.000000e+00> : vector<256x128xf32>
    %17 = tpu.matmul %14, %15, %cst_7 {dimension_numbers = #tpu.dot_dimension_numbers<[1], [1], [0], [0], [0, 0, 1, 0], [], []>} : vector<256x64xf32>, vector<128x64xf32>, vector<256x128xf32> -> vector<256x128xf32>
    %cst_8 = arith.constant dense<0xFF800000> : vector<256xf32>
    %18 = vector.multi_reduction <maximumf>, %17, %cst_8 [1] : vector<256x128xf32> to vector<256xf32>
    %19 = vector.shape_cast %18 : vector<256xf32> to vector<256x1xf32>
    %20 = vector.broadcast %19 : vector<256x1xf32> to vector<256x128xf32>
    %21 = arith.subf %17, %20 : vector<256x128xf32>
    %22 = math.exp %21 : vector<256x128xf32>
    %cst_9 = arith.constant dense<0.000000e+00> : vector<256xf32>
    %23 = vector.multi_reduction <add>, %22, %cst_9 [1] : vector<256x128xf32> to vector<256xf32>
    %24 = vector.shape_cast %23 : vector<256xf32> to vector<256x1xf32>
    %25 = tpu.reciprocal %24 : vector<256x1xf32> -> vector<256x1xf32>
    %cst_10 = arith.constant dense<0.000000e+00> : vector<256x64xf32>
    %26 = tpu.matmul %22, %16, %cst_10 {dimension_numbers = #tpu.dot_dimension_numbers<[1], [0], [0], [1], [0, 0, 1, 1], [], []>} : vector<256x128xf32>, vector<128x64xf32>, vector<256x64xf32> -> vector<256x64xf32>
    %27 = vector.broadcast %25 : vector<256x1xf32> to vector<256x64xf32>
    %28 = arith.mulf %26, %27 : vector<256x64xf32>
    %29 = vector.extract_strided_slice %28 {offsets = [0, 0], sizes = [128, 64], strides = [1, 1]} : vector<256x64xf32> to vector<128x64xf32>
    %c0_11 = arith.constant 0 : index
    %c0_12 = arith.constant 0 : index
    %c0_13 = arith.constant 0 : index
    %30 = vector.load %arg4[%c0_11, %c0_12, %c0_13] : memref<1x128x512xf32, #tpu.memory_space<vmem>>, vector<1x128x64xf32>
    %31 = vector.shape_cast %30 : vector<1x128x64xf32> to vector<128x64xf32>
    %32 = vector.shape_cast %29 : vector<128x64xf32> to vector<1x128x64xf32>
    tpu.vector_store %arg4[%c0_11, %c0_12, %c0_13], %32 {strides = array<i32>} : memref<1x128x512xf32, #tpu.memory_space<vmem>>, vector<1x128x64xf32>,
    %33 = vector.extract_strided_slice %28 {offsets = [128, 0], sizes = [128, 64], strides = [1, 1]} : vector<256x64xf32> to vector<128x64xf32>
    %c0_14 = arith.constant 0 : index
    %c0_15 = arith.constant 0 : index
    %c64 = arith.constant 64 : index
    %34 = vector.load %arg4[%c0_14, %c0_15, %c64] : memref<1x128x512xf32, #tpu.memory_space<vmem>>, vector<1x128x64xf32>
    %35 = vector.shape_cast %34 : vector<1x128x64xf32> to vector<128x64xf32>
    %36 = vector.shape_cast %33 : vector<128x64xf32> to vector<1x128x64xf32>
    tpu.vector_store %arg4[%c0_14, %c0_15, %c64], %36 {strides = array<i32>} : memref<1x128x512xf32, #tpu.memory_space<vmem>>, vector<1x128x64xf32>,
    %37 = vector.extract_strided_slice %9 {offsets = [0, 128], sizes = [128, 64], strides = [1, 1]} : vector<128x512xf32> to vector<128x64xf32>
    %38 = vector.extract_strided_slice %9 {offsets = [0, 192], sizes = [128, 64], strides = [1, 1]} : vector<128x512xf32> to vector<128x64xf32>
    %39 = tpu.concatenate %37, %38 in 0 : vector<128x64xf32>, vector<128x64xf32> -> vector<256x64xf32>
    %40 = vector.extract_strided_slice %10 {offsets = [0, 64], sizes = [128, 64], strides = [1, 1]} : vector<128x256xf32> to vector<128x64xf32>
    %41 = vector.extract_strided_slice %11 {offsets = [0, 64], sizes = [128, 64], strides = [1, 1]} : vector<128x256xf32> to vector<128x64xf32>
    %cst_16 = arith.constant dense<0.000000e+00> : vector<256x128xf32>
    %42 = tpu.matmul %39, %40, %cst_16 {dimension_numbers = #tpu.dot_dimension_numbers<[1], [1], [0], [0], [0, 0, 1, 0], [], []>} : vector<256x64xf32>, vector<128x64xf32>, vector<256x128xf32> -> vector<256x128xf32>
    %cst_17 = arith.constant dense<0xFF800000> : vector<256xf32>
    %43 = vector.multi_reduction <maximumf>, %42, %cst_17 [1] : vector<256x128xf32> to vector<256xf32>
    %44 = vector.shape_cast %43 : vector<256xf32> to vector<256x1xf32>
    %45 = vector.broadcast %44 : vector<256x1xf32> to vector<256x128xf32>
    %46 = arith.subf %42, %45 : vector<256x128xf32>
    %47 = math.exp %46 : vector<256x128xf32>
    %cst_18 = arith.constant dense<0.000000e+00> : vector<256xf32>
    %48 = vector.multi_reduction <add>, %47, %cst_18 [1] : vector<256x128xf32> to vector<256xf32>
    %49 = vector.shape_cast %48 : vector<256xf32> to vector<256x1xf32>
    %50 = tpu.reciprocal %49 : vector<256x1xf32> -> vector<256x1xf32>
    %cst_19 = arith.constant dense<0.000000e+00> : vector<256x64xf32>
    %51 = tpu.matmul %47, %41, %cst_19 {dimension_numbers = #tpu.dot_dimension_numbers<[1], [0], [0], [1], [0, 0, 1, 1], [], []>} : vector<256x128xf32>, vector<128x64xf32>, vector<256x64xf32> -> vector<256x64xf32>
    %52 = vector.broadcast %50 : vector<256x1xf32> to vector<256x64xf32>
    %53 = arith.mulf %51, %52 : vector<256x64xf32>
    %54 = vector.extract_strided_slice %53 {offsets = [0, 0], sizes = [128, 64], strides = [1, 1]} : vector<256x64xf32> to vector<128x64xf32>
    %c0_20 = arith.constant 0 : index
    %c0_21 = arith.constant 0 : index
    %c128 = arith.constant 128 : index
    %55 = vector.load %arg4[%c0_20, %c0_21, %c128] : memref<1x128x512xf32, #tpu.memory_space<vmem>>, vector<1x128x64xf32>
    %56 = vector.shape_cast %55 : vector<1x128x64xf32> to vector<128x64xf32>
    %57 = vector.shape_cast %54 : vector<128x64xf32> to vector<1x128x64xf32>
    tpu.vector_store %arg4[%c0_20, %c0_21, %c128], %57 {strides = array<i32>} : memref<1x128x512xf32, #tpu.memory_space<vmem>>, vector<1x128x64xf32>,
    %58 = vector.extract_strided_slice %53 {offsets = [128, 0], sizes = [128, 64], strides = [1, 1]} : vector<256x64xf32> to vector<128x64xf32>
    %c0_22 = arith.constant 0 : index
    %c0_23 = arith.constant 0 : index
    %c192 = arith.constant 192 : index
    %59 = vector.load %arg4[%c0_22, %c0_23, %c192] : memref<1x128x512xf32, #tpu.memory_space<vmem>>, vector<1x128x64xf32>
    %60 = vector.shape_cast %59 : vector<1x128x64xf32> to vector<128x64xf32>
    %61 = vector.shape_cast %58 : vector<128x64xf32> to vector<1x128x64xf32>
    tpu.vector_store %arg4[%c0_22, %c0_23, %c192], %61 {strides = array<i32>} : memref<1x128x512xf32, #tpu.memory_space<vmem>>, vector<1x128x64xf32>,
    %62 = vector.extract_strided_slice %9 {offsets = [0, 256], sizes = [128, 64], strides = [1, 1]} : vector<128x512xf32> to vector<128x64xf32>
    %63 = vector.extract_strided_slice %9 {offsets = [0, 320], sizes = [128, 64], strides = [1, 1]} : vector<128x512xf32> to vector<128x64xf32>
    %64 = tpu.concatenate %62, %63 in 0 : vector<128x64xf32>, vector<128x64xf32> -> vector<256x64xf32>
    %65 = vector.extract_strided_slice %10 {offsets = [0, 128], sizes = [128, 64], strides = [1, 1]} : vector<128x256xf32> to vector<128x64xf32>
    %66 = vector.extract_strided_slice %11 {offsets = [0, 128], sizes = [128, 64], strides = [1, 1]} : vector<128x256xf32> to vector<128x64xf32>
    %cst_24 = arith.constant dense<0.000000e+00> : vector<256x128xf32>
    %67 = tpu.matmul %64, %65, %cst_24 {dimension_numbers = #tpu.dot_dimension_numbers<[1], [1], [0], [0], [0, 0, 1, 0], [], []>} : vector<256x64xf32>, vector<128x64xf32>, vector<256x128xf32> -> vector<256x128xf32>
    %cst_25 = arith.constant dense<0xFF800000> : vector<256xf32>
    %68 = vector.multi_reduction <maximumf>, %67, %cst_25 [1] : vector<256x128xf32> to vector<256xf32>
    %69 = vector.shape_cast %68 : vector<256xf32> to vector<256x1xf32>
    %70 = vector.broadcast %69 : vector<256x1xf32> to vector<256x128xf32>
    %71 = arith.subf %67, %70 : vector<256x128xf32>
    %72 = math.exp %71 : vector<256x128xf32>
    %cst_26 = arith.constant dense<0.000000e+00> : vector<256xf32>
    %73 = vector.multi_reduction <add>, %72, %cst_26 [1] : vector<256x128xf32> to vector<256xf32>
    %74 = vector.shape_cast %73 : vector<256xf32> to vector<256x1xf32>
    %75 = tpu.reciprocal %74 : vector<256x1xf32> -> vector<256x1xf32>
    %cst_27 = arith.constant dense<0.000000e+00> : vector<256x64xf32>
    %76 = tpu.matmul %72, %66, %cst_27 {dimension_numbers = #tpu.dot_dimension_numbers<[1], [0], [0], [1], [0, 0, 1, 1], [], []>} : vector<256x128xf32>, vector<128x64xf32>, vector<256x64xf32> -> vector<256x64xf32>
    %77 = vector.broadcast %75 : vector<256x1xf32> to vector<256x64xf32>
    %78 = arith.mulf %76, %77 : vector<256x64xf32>
    %79 = vector.extract_strided_slice %78 {offsets = [0, 0], sizes = [128, 64], strides = [1, 1]} : vector<256x64xf32> to vector<128x64xf32>
    %c0_28 = arith.constant 0 : index
    %c0_29 = arith.constant 0 : index
    %c256 = arith.constant 256 : index
    %80 = vector.load %arg4[%c0_28, %c0_29, %c256] : memref<1x128x512xf32, #tpu.memory_space<vmem>>, vector<1x128x64xf32>
    %81 = vector.shape_cast %80 : vector<1x128x64xf32> to vector<128x64xf32>
    %82 = vector.shape_cast %79 : vector<128x64xf32> to vector<1x128x64xf32>
    tpu.vector_store %arg4[%c0_28, %c0_29, %c256], %82 {strides = array<i32>} : memref<1x128x512xf32, #tpu.memory_space<vmem>>, vector<1x128x64xf32>,
    %83 = vector.extract_strided_slice %78 {offsets = [128, 0], sizes = [128, 64], strides = [1, 1]} : vector<256x64xf32> to vector<128x64xf32>
    %c0_30 = arith.constant 0 : index
    %c0_31 = arith.constant 0 : index
    %c320 = arith.constant 320 : index
    %84 = vector.load %arg4[%c0_30, %c0_31, %c320] : memref<1x128x512xf32, #tpu.memory_space<vmem>>, vector<1x128x64xf32>
    %85 = vector.shape_cast %84 : vector<1x128x64xf32> to vector<128x64xf32>
    %86 = vector.shape_cast %83 : vector<128x64xf32> to vector<1x128x64xf32>
    tpu.vector_store %arg4[%c0_30, %c0_31, %c320], %86 {strides = array<i32>} : memref<1x128x512xf32, #tpu.memory_space<vmem>>, vector<1x128x64xf32>,
    %87 = vector.extract_strided_slice %9 {offsets = [0, 384], sizes = [128, 64], strides = [1, 1]} : vector<128x512xf32> to vector<128x64xf32>
    %88 = vector.extract_strided_slice %9 {offsets = [0, 448], sizes = [128, 64], strides = [1, 1]} : vector<128x512xf32> to vector<128x64xf32>
    %89 = tpu.concatenate %87, %88 in 0 : vector<128x64xf32>, vector<128x64xf32> -> vector<256x64xf32>
    %90 = vector.extract_strided_slice %10 {offsets = [0, 192], sizes = [128, 64], strides = [1, 1]} : vector<128x256xf32> to vector<128x64xf32>
    %91 = vector.extract_strided_slice %11 {offsets = [0, 192], sizes = [128, 64], strides = [1, 1]} : vector<128x256xf32> to vector<128x64xf32>
    %cst_32 = arith.constant dense<0.000000e+00> : vector<256x128xf32>
    %92 = tpu.matmul %89, %90, %cst_32 {dimension_numbers = #tpu.dot_dimension_numbers<[1], [1], [0], [0], [0, 0, 1, 0], [], []>} : vector<256x64xf32>, vector<128x64xf32>, vector<256x128xf32> -> vector<256x128xf32>
    %cst_33 = arith.constant dense<0xFF800000> : vector<256xf32>
    %93 = vector.multi_reduction <maximumf>, %92, %cst_33 [1] : vector<256x128xf32> to vector<256xf32>
    %94 = vector.shape_cast %93 : vector<256xf32> to vector<256x1xf32>
    %95 = vector.broadcast %94 : vector<256x1xf32> to vector<256x128xf32>
    %96 = arith.subf %92, %95 : vector<256x128xf32>
    %97 = math.exp %96 : vector<256x128xf32>
    %cst_34 = arith.constant dense<0.000000e+00> : vector<256xf32>
    %98 = vector.multi_reduction <add>, %97, %cst_34 [1] : vector<256x128xf32> to vector<256xf32>
    %99 = vector.shape_cast %98 : vector<256xf32> to vector<256x1xf32>
    %100 = tpu.reciprocal %99 : vector<256x1xf32> -> vector<256x1xf32>
    %cst_35 = arith.constant dense<0.000000e+00> : vector<256x64xf32>
    %101 = tpu.matmul %97, %91, %cst_35 {dimension_numbers = #tpu.dot_dimension_numbers<[1], [0], [0], [1], [0, 0, 1, 1], [], []>} : vector<256x128xf32>, vector<128x64xf32>, vector<256x64xf32> -> vector<256x64xf32>
    %102 = vector.broadcast %100 : vector<256x1xf32> to vector<256x64xf32>
    %103 = arith.mulf %101, %102 : vector<256x64xf32>
    %104 = vector.extract_strided_slice %103 {offsets = [0, 0], sizes = [128, 64], strides = [1, 1]} : vector<256x64xf32> to vector<128x64xf32>
    %c0_36 = arith.constant 0 : index
    %c0_37 = arith.constant 0 : index
    %c384 = arith.constant 384 : index
    %105 = vector.load %arg4[%c0_36, %c0_37, %c384] : memref<1x128x512xf32, #tpu.memory_space<vmem>>, vector<1x128x64xf32>
    %106 = vector.shape_cast %105 : vector<1x128x64xf32> to vector<128x64xf32>
    %107 = vector.shape_cast %104 : vector<128x64xf32> to vector<1x128x64xf32>
    tpu.vector_store %arg4[%c0_36, %c0_37, %c384], %107 {strides = array<i32>} : memref<1x128x512xf32, #tpu.memory_space<vmem>>, vector<1x128x64xf32>,
    %108 = vector.extract_strided_slice %103 {offsets = [128, 0], sizes = [128, 64], strides = [1, 1]} : vector<256x64xf32> to vector<128x64xf32>
    %c0_38 = arith.constant 0 : index
    %c0_39 = arith.constant 0 : index
    %c448 = arith.constant 448 : index
    %109 = vector.load %arg4[%c0_38, %c0_39, %c448] : memref<1x128x512xf32, #tpu.memory_space<vmem>>, vector<1x128x64xf32>
    %110 = vector.shape_cast %109 : vector<1x128x64xf32> to vector<128x64xf32>
    %111 = vector.shape_cast %108 : vector<128x64xf32> to vector<1x128x64xf32>
    tpu.vector_store %arg4[%c0_38, %c0_39, %c448], %111 {strides = array<i32>} : memref<1x128x512xf32, #tpu.memory_space<vmem>>, vector<1x128x64xf32>,
    return
  }
  func.func @transform_0(%arg0: i32) -> (i32, i32, i32) {
    %c0_i32 = arith.constant 0 : i32
    %c0_i32_0 = arith.constant 0 : i32
    %c0_i32_1 = arith.constant 0 : i32
    return %arg0, %c0_i32, %c0_i32_0 : i32, i32, i32
  }
  func.func @transform_1(%arg0: i32) -> (i32, i32) {
    %c0_i32 = arith.constant 0 : i32
    %c0_i32_0 = arith.constant 0 : i32
    %c0_i32_1 = arith.constant 0 : i32
    return %c0_i32, %c0_i32_0 : i32, i32
  }
  func.func @transform_2(%arg0: i32) -> (i32, i32) {
    %c0_i32 = arith.constant 0 : i32
    %c0_i32_0 = arith.constant 0 : i32
    %c0_i32_1 = arith.constant 0 : i32
    return %c0_i32, %c0_i32_0 : i32, i32
  }
  func.func @transform_3(%arg0: i32) -> (i32, i32, i32) {
    %c0_i32 = arith.constant 0 : i32
    %c0_i32_0 = arith.constant 0 : i32
    %c0_i32_1 = arith.constant 0 : i32
    return %arg0, %c0_i32, %c0_i32_0 : i32, i32, i32
  }
}

</mosaic_0001>

<bundles_post_ra>
// kernel: tpu_custom_call.1
= control target key start
LH: loop header
LB: loop body
LE: loop exit
PB: predicated region body
PF: predicated region fallthrough
CT: control target
= control target key end

     0   :  { %8 = vsyncpa [#allocation3], 0  ;;  %s15005_s0 = inlined_call_operand.hbm [shape: f32[2,128,512], index: 0, kind: input, shape index: {}]   ;;  %s15006_s1 = inlined_call_operand.hbm [shape: f32[512,1024], index: 1, kind: input, shape index: {}]   ;;  %s15007_s2 = inlined_call_operand.hbm [shape: f32[1,1024], index: 2, kind: input, shape index: {}]   ;;  %s15008_s3 = inlined_call_operand.hbm [shape: f32[2,128,512], index: 3, kind: output, shape index: {}]  }
   0x1   :  { %10 = vsyncpa [#allocation3 + $0x1], 0 }
   0x2   :  { %11 = vsyncpa [#allocation6], 0 }
   0x3   :  { %12 = vsyncpa [#allocation4], 0 }
   0x4   :  { %14 = vsyncpa [#allocation4 + $0x1], 0  ;;  %s9238_s12 = smov 0   ;;  %s9240_s13 = smov 0  }
   0x5   :  { %s9242_s14 = smov 0   ;;  %s9244_s15 = smov 0  }
   0x6 LB: > { %s9259_s16 = sadd.s32 4294967295, %s9207_s15   ;;  %s7974_s17 = sadd.s32 4294967294, %s9207_s15   ;;  %s9207_s15 = sphi %s9244_s15, %s15836_s15   ;;  %s9203_s14 = sphi %s9242_s14, %s15835_s14   ;;  %s9199_s13 = sphi %s9240_s13, %s15834_s13   ;;  %s9195_s12 = sphi %s9238_s12, %s15833_s12  }
   0x7   : > { %p40_p0 = scmp.ne.s32.totalorder %s9199_s13, %s9195_s12  ;;  %p41_p1 = scmp.eq.s32.totalorder %s9259_s16, 0 }
   0x8   : > { %p106_p2 = scmp.eq.s32.totalorder %s9259_s16, 1  ;;  %p112_p3 = scmp.eq.s32.totalorder %s7974_s17, 1 }
   0x9   : > { %p9268_p4 = por %p41_p1, %p40_p0  ;;  %p7975_p5 = scmp.ge.s32.totalorder %s9207_s15, 1 }
   0xa   : > { %p9273_p6 = por %p112_p3, %p40_p0  ;;  %p119_p7 = scmp.lt.s32.totalorder %s9207_s15, 3 }
   0xb   : > { %s130_s22 = sshll.u32 %s15006_s1, 4  ;;  %s9209_s24 = smov [#allocation5]   ;;  %s131_s22 = int_to_ptr.hbm [resolvable:$true] %s130_s22 }
   0xc   : > { %p9281_p8 = pnand %p7975_p5, %p119_p7  ;;  %s132_s25 = sshll.u32 %s9209_s24, 4  ;;  %s133_s25 = int_to_ptr.vmem [resolvable:$true] %s132_s25 }
   0xd   : > { %s145_s28 = sshll.u32 %s15007_s2, 4  ;;  %s9210_s29 = smov 1024   ;;  %s146_s28 = int_to_ptr.hbm [resolvable:$true] %s145_s28 }
   0xe   : > { %p8198_p9 = pneg %p9281_p8  ;;  %s9211_s30 = smov 64  }
   0xf   : > { %s9212_s4 = smov [#allocation7]   ;;  %s9294_s6 = sadd.s32 1, %s9207_s15  }
  0x10   : > { %p8199_p10 = pnand %p8198_p9, %p41_p1  ;;  %s147_s5 = sshll.u32 %s9212_s4, 4  ;;  %s148_s5 = int_to_ptr.vmem [resolvable:$true] %s147_s5 }
  0x11   : > { %s27_s7 = sadd.s32 1, %s9203_s14  ;;  %s24_s8 = ssub.s32 %s9207_s15, %s9294_s6 }
  0x12   : > { %8201 = dma.hbm_to_vmem [thread:$0]  (!%p8199_p10), %s131_s22, 65536, %s133_s25, [#allocation6], %s9210_s29, %s9210_s29, %s9211_s30  }
  0x13   : > { %8204 = dma.hbm_to_vmem [thread:$0]  (!%p8199_p10), %s146_s28, 128, %s148_s5, [#allocation6]  }
  0x14   : > { %p34_p12 = scmp.ne.s32.totalorder %s9203_s14, %s9199_s13  ;;  %p25_p13 = scmp.eq.s32.totalorder %s24_s8, 0 }
  0x15   : > { %p35_p0 = scmp.eq.s32.totalorder %s9207_s15, 0  ;;  %p8215_p5 = scmp.lt.s32.totalorder %s9207_s15, 2 }
  0x16   : > { %p9304_p3 = por %p106_p2, %p34_p12  ;;  %s158_s11 = sand.u32 1, %s9203_s14  }
  0x17   : > { %s9310_s10 = scalar_select %p25_p13, %s9203_s14, %s27_s7  }
  0x18   : > { %p36_p7 = por %p35_p0, %p34_p12  ;;  %s7979_s17 = sshll.u32 %s158_s11, 9 }
  0x19   : > { %s8184_s20 = sshll.u32 %s9207_s15, 9  ;;  %s162_s25 = scalar_lea.vmem [#allocation2], %s7979_s17 }
  0x1a   : > { %s167_s24 = scalar_lea.hbm %s15005_s0, %s8184_s20  ;;  %s170_s26 = sshll.u32 %s162_s25, 4  ;;  %s171_s26 = int_to_ptr.vmem [resolvable:$true] %s170_s26 }
  0x1b   : > { %s168_s27 = sshll.u32 %s167_s24, 4  ;;  %p9317_p2 = pnand %p8215_p5, %p36_p7  ;;  %s169_s27 = int_to_ptr.hbm [resolvable:$true] %s168_s27 }
  0x1c   : > { %s159_s29 = scalar_lea.sflag [#allocation3], %s158_s11  ;;  %s9107_s30 = sshra.s32 %s169_s27, 4  ;;  %s9108_s30 = int_to_ptr.hbm [resolvable:$true] %s9107_s30 }
  0x1d   : > { %s9109_s4 = scalar_lea.hbm %s9108_s30, 512  ;;  %p9111_p10 = pneg %p9317_p2 }
  0x1e   : > { %p9110_p9 = scmp.ne.s32.totalorder %s9108_s30, %s9109_s4  ;;  %s9114_s8 = scalar_lea.hbm %s15005_s0, 1024 }
  0x1f   : > { %p9115_p0 = scmp.lt.s32.totalorder %s9108_s30, %s15005_s0  ;;  %p9116_p5 = scmp.lt.s32.totalorder %s9114_s8, %s9109_s4 }
  0x20   : > { %p9112_p12 = pnand %p9111_p10, %p9110_p9 }
  0x21   : > { %p9117_p7 = por %p9116_p5, %p9115_p0 }
  0x22   : > { %p9113_p13 = pneg %p9112_p12 }
  0x24   : > { %p9118_p11 = pnand %p9117_p7, %p9113_p13 }
  0x26   : > { %9121 = shalt.err (!%p9118_p11)
}
  0x27   : > { %s9213_s11 = smov 512   ;;  %s9214_s21 = smov 32  }
  0x28   : > { %8208 = dma.hbm_to_vmem [thread:$0]  (!%p9317_p2), %s169_s27, 8192, %s171_s26, %s159_s29, %s9213_s11, %s9213_s11, %s9214_s21  }
  0x29   : > { %182 = sbr.rel (%p9281_p8) target bundleno = 2829 (0xb0d), region = 32 }
  0x2e   : > { %s9334_s22 = sand.u32 1, %s9199_s13  }
  0x2f   : > { %s7983_s24 = sshll.u32 %s9334_s22, 9  ;;  %s185_s25 = scalar_lea.sflag [#allocation3], %s9334_s22 }
  0x30   : > { %s9340_s30 = scalar_lea.vmem [#allocation2], %s7983_s24 }
  0x31   : > { %9182 = dma.done.wait (%p9268_p4), %s185_s25, 8192  }
  0x32   : > { %9184 = vsyncadd (%p9268_p4), %s185_s25, 4294959104 }
  0x33   : > { %9186 = dma.done.wait (%p41_p1), [#allocation6], 65664  }
  0x34   : > { %9188 = vsyncadd (%p41_p1), [#allocation6], 4294901632  ;;  %v406_v0 = vld [vmem:[#allocation5 + $0x3c0] sm:$0xff]  ;;  %v9354_v63 = vld [vmem:[%s9340_s30 + $0x10] sm:$0xff]  ;;  %s9215_s18 = smov 64   ;;  %vm3008_vm0 = vcmask 523264  }
  0x35   : > { %v662_v1 = vld [vmem:[#allocation5 + $0xbc0] sm:$0xff]  ;;  %816 = vmatpush.msra.mxu0 %v406_v0  ;;  %v407_v0 = vld [vmem:[#allocation5 + $0x3c8] sm:$0xff]  ;;  %s12038_s23 = scalar_lea.vmem [#allocation8], %s7983_s24  ;;  %s8185_s26 = sshll.u32 %s9259_s16, 9 }
  0x36   : > { %v398_v2 = vld [vmem:[#allocation5 + $0x380] sm:$0xff]  ;;  %946 = vmatpush.msra.mxu2 %v662_v1  ;;  %s7878_s29 = scalar_lea.hbm %s15008_s3, %s8185_s26  ;;  %s7879_s4 = sshll.u32 %s12038_s23, 4  ;;  %s7880_s4 = int_to_ptr.vmem [resolvable:$true] %s7879_s4 }
  0x37   : > { %v534_v3 = vld [vmem:[#allocation5 + $0x7c0] sm:$0xff]  ;;  %817 = vmatpush.msra.mxu0 %v398_v2  ;;  %s7881_s5 = sshll.u32 %s7878_s29, 4  ;;  %s7867_s7 = scalar_lea.sflag [#allocation4], %s9334_s22  ;;  %s7882_s5 = int_to_ptr.hbm [resolvable:$true] %s7881_s5 }
  0x38   : > { %v654_v4 = vld [vmem:[#allocation5 + $0xb80] sm:$0xff]  ;;  %881 = vmatpush.msra.mxu1 %v534_v3  ;;  %v9357_v3 = vld [vmem:[%s9340_s30 + $0x8] sm:$0xff]  ;;  %s9151_s8 = sshra.s32 %s7882_s5, 4  ;;  %s9157_s11 = scalar_lea.hbm %s15008_s3, 1024  ;;  %s9152_s8 = int_to_ptr.hbm [resolvable:$true] %s9151_s8 }
  0x39   : > { %v790_v5 = vld [vmem:[#allocation5 + $0xfc0] sm:$0xff]  ;;  %947 = vmatpush.msra.mxu2 %v654_v4  ;;  %v9362_v4 = vld [vmem:[%s9340_s30 + $0x18] sm:$0xff]  ;;  %s9153_s17 = scalar_lea.hbm %s9152_s8, 512  ;;  %p9158_p11 = scmp.lt.s32.totalorder %s9152_s8, %s15008_s3 }
  0x3a   : > { %1011 = vmatpush.msra.mxu3 %v790_v5  ;;  %v390_v6 = vld [vmem:[#allocation5 + $0x340] sm:$0xff]  ;;  %v399_v5 = vld [vmem:[#allocation5 + $0x388] sm:$0xff]  ;;  %p9154_p1 = scmp.ne.s32.totalorder %s9152_s8, %s9153_s17  ;;  %p9159_p2 = scmp.lt.s32.totalorder %s9157_s11, %s9153_s17 }
  0x3b   : > { %v526_v7 = vld [vmem:[#allocation5 + $0x780] sm:$0xff]  ;;  %818 = vmatpush.msra.mxu0 %v390_v6  ;;  %v663_v6 = vld [vmem:[#allocation5 + $0xbc8] sm:$0xff] }
  0x3c   : > { %v646_v8 = vld [vmem:[#allocation5 + $0xb40] sm:$0xff]  ;;  %882 = vmatpush.msra.mxu1 %v526_v7  ;;  %v791_v7 = vld [vmem:[#allocation5 + $0xfc8] sm:$0xff]  ;;  %p9155_p4 = pnand %p9154_p1, %p9304_p3  ;;  %p9160_p9 = por %p9159_p2, %p9158_p11 }
  0x3d   : > { %v782_v9 = vld [vmem:[#allocation5 + $0xf80] sm:$0xff]  ;;  %948 = vmatpush.msra.mxu2 %v646_v8  ;;  %v391_v8 = vld [vmem:[#allocation5 + $0x348] sm:$0xff] }
  0x3e   : > { %v518_v10 = vld [vmem:[#allocation5 + $0x740] sm:$0xff]  ;;  %1012 = vmatpush.msra.mxu3 %v782_v9  ;;  %v535_v9 = vld [vmem:[#allocation5 + $0x7c8] sm:$0xff]  ;;  %p9156_p8 = pneg %p9155_p4 }
  0x3f   : > { %v382_v11 = vld [vmem:[#allocation5 + $0x300] sm:$0xff]  ;;  %883 = vmatpush.msra.mxu1 %v518_v10  ;;  %v655_v10 = vld [vmem:[#allocation5 + $0xb88] sm:$0xff] }
  0x40   : > { %v638_v12 = vld [vmem:[#allocation5 + $0xb00] sm:$0xff]  ;;  %819 = vmatpush.msra.mxu0 %v382_v11  ;;  %v783_v11 = vld [vmem:[#allocation5 + $0xf88] sm:$0xff]  ;;  %p9161_p10 = pnand %p9160_p9, %p9156_p8 }
  0x41   : > { %v774_v13 = vld [vmem:[#allocation5 + $0xf40] sm:$0xff]  ;;  %949 = vmatpush.msra.mxu2 %v638_v12  ;;  %v383_v12 = vld [vmem:[#allocation5 + $0x308] sm:$0xff] }
  0x42   : > { %v510_v14 = vld [vmem:[#allocation5 + $0x700] sm:$0xff]  ;;  %1013 = vmatpush.msra.mxu3 %v774_v13  ;;  %v527_v13 = vld [vmem:[#allocation5 + $0x788] sm:$0xff] }
  0x43   : > { %v766_v15 = vld [vmem:[#allocation5 + $0xf00] sm:$0xff]  ;;  %884 = vmatpush.msra.mxu1 %v510_v14 }
  0x44   : > { %v374_v16 = vld [vmem:[#allocation5 + $0x2c0] sm:$0xff]  ;;  %1014 = vmatpush.msra.mxu3 %v766_v15  ;;  %v9370_v15 = vld [vmem:[%s9340_s30 + $0x30] sm:$0xff] }
  0x45   : > { %v630_v17 = vld [vmem:[#allocation5 + $0xac0] sm:$0xff]  ;;  %820 = vmatpush.msra.mxu0 %v374_v16  ;;  %v647_v16 = vld [vmem:[#allocation5 + $0xb48] sm:$0xff] }
  0x46   : > { %v502_v18 = vld [vmem:[#allocation5 + $0x6c0] sm:$0xff]  ;;  %950 = vmatpush.msra.mxu2 %v630_v17  ;;  %v775_v17 = vld [vmem:[#allocation5 + $0xf48] sm:$0xff] }
  0x47   : > { %v758_v19 = vld [vmem:[#allocation5 + $0xec0] sm:$0xff]  ;;  %885 = vmatpush.msra.mxu1 %v502_v18  ;;  %v9373_v18 = vld [vmem:[%s9340_s30 + $0x28] sm:$0xff] }
  0x48   : > { %v366_v20 = vld [vmem:[#allocation5 + $0x280] sm:$0xff]  ;;  %1015 = vmatpush.msra.mxu3 %v758_v19  ;;  %v375_v19 = vld [vmem:[#allocation5 + $0x2c8] sm:$0xff] }
  0x49   : > { %v622_v21 = vld [vmem:[#allocation5 + $0xa80] sm:$0xff]  ;;  %821 = vmatpush.msra.mxu0 %v366_v20  ;;  %v9378_v20 = vld [vmem:[%s9340_s30 + $0x38] sm:$0xff] }
  0x4a   : > { %v494_v22 = vld [vmem:[#allocation5 + $0x680] sm:$0xff]  ;;  %951 = vmatpush.msra.mxu2 %v622_v21  ;;  %v519_v21 = vld [vmem:[#allocation5 + $0x748] sm:$0xff] }
  0x4b   : > { %v750_v23 = vld [vmem:[#allocation5 + $0xe80] sm:$0xff]  ;;  %886 = vmatpush.msra.mxu1 %v494_v22  ;;  %v639_v22 = vld [vmem:[#allocation5 + $0xb08] sm:$0xff] }
  0x4c   : > { %v358_v24 = vld [vmem:[#allocation5 + $0x240] sm:$0xff]  ;;  %1016 = vmatpush.msra.mxu3 %v750_v23  ;;  %v767_v23 = vld [vmem:[#allocation5 + $0xf08] sm:$0xff] }
  0x4d   : > { %v614_v25 = vld [vmem:[#allocation5 + $0xa40] sm:$0xff]  ;;  %822 = vmatpush.msra.mxu0 %v358_v24  ;;  %v367_v24 = vld [vmem:[#allocation5 + $0x288] sm:$0xff] }
  0x4e   : > { %v486_v26 = vld [vmem:[#allocation5 + $0x640] sm:$0xff]  ;;  %952 = vmatpush.msra.mxu2 %v614_v25  ;;  %v511_v25 = vld [vmem:[#allocation5 + $0x708] sm:$0xff] }
  0x4f   : > { %v742_v27 = vld [vmem:[#allocation5 + $0xe40] sm:$0xff]  ;;  %887 = vmatpush.msra.mxu1 %v486_v26  ;;  %v631_v26 = vld [vmem:[#allocation5 + $0xac8] sm:$0xff] }
  0x50   : > { %v350_v28 = vld [vmem:[#allocation5 + $0x200] sm:$0xff]  ;;  %1017 = vmatpush.msra.mxu3 %v742_v27  ;;  %v759_v27 = vld [vmem:[#allocation5 + $0xec8] sm:$0xff] }
  0x51   : > { %v606_v29 = vld [vmem:[#allocation5 + $0xa00] sm:$0xff]  ;;  %823 = vmatpush.msra.mxu0 %v350_v28 }
  0x52   : > { %v478_v30 = vld [vmem:[#allocation5 + $0x600] sm:$0xff]  ;;  %953 = vmatpush.msra.mxu2 %v606_v29  ;;  %v9386_v29 = vld [vmem:[%s9340_s30 + $0x50] sm:$0xff] }
  0x53   : > { %v734_v31 = vld [vmem:[#allocation5 + $0xe00] sm:$0xff]  ;;  %888 = vmatpush.msra.mxu1 %v478_v30  ;;  %v9389_v30 = vld [vmem:[%s9340_s30 + $0x48] sm:$0xff] }
  0x54   : > { %v342_v32 = vld [vmem:[#allocation5 + $0x1c0] sm:$0xff]  ;;  %1018 = vmatpush.msra.mxu3 %v734_v31  ;;  %v9394_v31 = vld [vmem:[%s9340_s30 + $0x58] sm:$0xff] }
  0x55   : > { %v598_v33 = vld [vmem:[#allocation5 + $0x9c0] sm:$0xff]  ;;  %824 = vmatpush.msra.mxu0 %v342_v32  ;;  %v359_v32 = vld [vmem:[#allocation5 + $0x248] sm:$0xff] }
  0x56   : > { %v470_v34 = vld [vmem:[#allocation5 + $0x5c0] sm:$0xff]  ;;  %954 = vmatpush.msra.mxu2 %v598_v33  ;;  %v503_v33 = vld [vmem:[#allocation5 + $0x6c8] sm:$0xff] }
  0x57   : > { %v726_v35 = vld [vmem:[#allocation5 + $0xdc0] sm:$0xff]  ;;  %889 = vmatpush.msra.mxu1 %v470_v34  ;;  %v623_v34 = vld [vmem:[#allocation5 + $0xa88] sm:$0xff] }
  0x58   : > { %v334_v36 = vld [vmem:[#allocation5 + $0x180] sm:$0xff]  ;;  %1019 = vmatpush.msra.mxu3 %v726_v35  ;;  %v751_v35 = vld [vmem:[#allocation5 + $0xe88] sm:$0xff] }
  0x59   : > { %v590_v37 = vld [vmem:[#allocation5 + $0x980] sm:$0xff]  ;;  %825 = vmatpush.msra.mxu0 %v334_v36 }
  0x5a   : > { %v462_v38 = vld [vmem:[#allocation5 + $0x580] sm:$0xff]  ;;  %955 = vmatpush.msra.mxu2 %v590_v37  ;;  %v9402_v37 = vld [vmem:[%s9340_s30 + $0x70] sm:$0xff] }
  0x5b   : > { %v718_v39 = vld [vmem:[#allocation5 + $0xd80] sm:$0xff]  ;;  %890 = vmatpush.msra.mxu1 %v462_v38  ;;  %v9405_v38 = vld [vmem:[%s9340_s30 + $0x68] sm:$0xff] }
  0x5c   : > { %v326_v40 = vld [vmem:[#allocation5 + $0x140] sm:$0xff]  ;;  %1020 = vmatpush.msra.mxu3 %v718_v39  ;;  %v9410_v39 = vld [vmem:[%s9340_s30 + $0x78] sm:$0xff] }
  0x5d   : > { %v582_v41 = vld [vmem:[#allocation5 + $0x940] sm:$0xff]  ;;  %826 = vmatpush.msra.mxu0 %v326_v40  ;;  %v351_v40 = vld [vmem:[#allocation5 + $0x208] sm:$0xff] }
  0x5e   : > { %v454_v42 = vld [vmem:[#allocation5 + $0x540] sm:$0xff]  ;;  %956 = vmatpush.msra.mxu2 %v582_v41  ;;  %v495_v41 = vld [vmem:[#allocation5 + $0x688] sm:$0xff] }
  0x5f   : > { %v710_v43 = vld [vmem:[#allocation5 + $0xd40] sm:$0xff]  ;;  %891 = vmatpush.msra.mxu1 %v454_v42  ;;  %v615_v42 = vld [vmem:[#allocation5 + $0xa48] sm:$0xff] }
  0x60   : > { %v318_v44 = vld [vmem:[#allocation5 + $0x100] sm:$0xff]  ;;  %1021 = vmatpush.msra.mxu3 %v710_v43  ;;  %v743_v43 = vld [vmem:[#allocation5 + $0xe48] sm:$0xff] }
  0x61   : > { %v574_v45 = vld [vmem:[#allocation5 + $0x900] sm:$0xff]  ;;  %827 = vmatpush.msra.mxu0 %v318_v44 }
  0x62   : > { %v446_v46 = vld [vmem:[#allocation5 + $0x500] sm:$0xff]  ;;  %957 = vmatpush.msra.mxu2 %v574_v45  ;;  %v9418_v45 = vld [vmem:[%s9340_s30 + $0x90] sm:$0xff] }
  0x63   : > { %v702_v47 = vld [vmem:[#allocation5 + $0xd00] sm:$0xff]  ;;  %892 = vmatpush.msra.mxu1 %v446_v46  ;;  %v9421_v46 = vld [vmem:[%s9340_s30 + $0x88] sm:$0xff] }
  0x64   : > { %v310_v48 = vld [vmem:[#allocation5 + $0xc0] sm:$0xff]  ;;  %1022 = vmatpush.msra.mxu3 %v702_v47  ;;  %v9426_v47 = vld [vmem:[%s9340_s30 + $0x98] sm:$0xff] }
  0x65   : > { %v566_v49 = vld [vmem:[#allocation5 + $0x8c0] sm:$0xff]  ;;  %828 = vmatpush.msra.mxu0 %v310_v48  ;;  %v343_v48 = vld [vmem:[#allocation5 + $0x1c8] sm:$0xff] }
  0x66   : > { %v438_v50 = vld [vmem:[#allocation5 + $0x4c0] sm:$0xff]  ;;  %958 = vmatpush.msra.mxu2 %v566_v49  ;;  %v487_v49 = vld [vmem:[#allocation5 + $0x648] sm:$0xff] }
  0x67   : > { %v694_v51 = vld [vmem:[#allocation5 + $0xcc0] sm:$0xff]  ;;  %893 = vmatpush.msra.mxu1 %v438_v50  ;;  %v607_v50 = vld [vmem:[#allocation5 + $0xa08] sm:$0xff] }
  0x68   : > { %v302_v52 = vld [vmem:[#allocation5 + $0x80] sm:$0xff]  ;;  %1023 = vmatpush.msra.mxu3 %v694_v51  ;;  %v735_v51 = vld [vmem:[#allocation5 + $0xe08] sm:$0xff] }
  0x69   : > { %v558_v53 = vld [vmem:[#allocation5 + $0x880] sm:$0xff]  ;;  %829 = vmatpush.msra.mxu0 %v302_v52 }
  0x6a   : > { %v430_v54 = vld [vmem:[#allocation5 + $0x480] sm:$0xff]  ;;  %959 = vmatpush.msra.mxu2 %v558_v53  ;;  %v9434_v53 = vld [vmem:[%s9340_s30 + $0xb0] sm:$0xff] }
  0x6b   : > { %v686_v55 = vld [vmem:[#allocation5 + $0xc80] sm:$0xff]  ;;  %894 = vmatpush.msra.mxu1 %v430_v54  ;;  %v9437_v54 = vld [vmem:[%s9340_s30 + $0xa8] sm:$0xff] }
  0x6c   : > { %v294_v56 = vld [vmem:[#allocation5 + $0x40] sm:$0xff]  ;;  %1024 = vmatpush.msra.mxu3 %v686_v55  ;;  %v9442_v55 = vld [vmem:[%s9340_s30 + $0xb8] sm:$0xff] }
  0x6d   : > { %v550_v57 = vld [vmem:[#allocation5 + $0x840] sm:$0xff]  ;;  %830 = vmatpush.msra.mxu0 %v294_v56  ;;  %v335_v56 = vld [vmem:[#allocation5 + $0x188] sm:$0xff] }
  0x6e   : > { %v422_v58 = vld [vmem:[#allocation5 + $0x440] sm:$0xff]  ;;  %960 = vmatpush.msra.mxu2 %v550_v57  ;;  %v479_v57 = vld [vmem:[#allocation5 + $0x608] sm:$0xff] }
  0x6f   : > { %v678_v59 = vld [vmem:[#allocation5 + $0xc40] sm:$0xff]  ;;  %895 = vmatpush.msra.mxu1 %v422_v58  ;;  %v599_v58 = vld [vmem:[#allocation5 + $0x9c8] sm:$0xff] }
  0x70   : > { %v286_v60 = vld [vmem:[#allocation5] sm:$0xff]  ;;  %1025 = vmatpush.msra.mxu3 %v678_v59  ;;  %v727_v59 = vld [vmem:[#allocation5 + $0xdc8] sm:$0xff] }
  0x71   : > { %v542_v61 = vld [vmem:[#allocation5 + $0x800] sm:$0xff]  ;;  %831 = vmatpush.msra.mxu0 %v286_v60 }
  0x72   : > { %v9351_v62 = vld [vmem:[%s9340_s30] sm:$0xff]  ;;  %961 = vmatpush.msra.mxu2 %v542_v61  ;;  %v9450_v61 = vld [vmem:[%s9340_s30 + $0xd0] sm:$0xff] }
  0x73   : > { %v414_v1 = vld [vmem:[#allocation5 + $0x400] sm:$0xff]  ;;  %832 = vmatmul.f32.vlgmr.msra.gmra.mxu0 %v9351_v62  ;;  %962 = vmatmul.f32.vlgmr.msra.gmra.mxu2 %v9354_v63 }
  0x74   : > { %v670_v2 = vld [vmem:[#allocation5 + $0xc00] sm:$0xff]  ;;  %1076 = vmatpush.msrb.mxu0 %v407_v0  ;;  %896 = vmatpush.msra.mxu1 %v414_v1  ;;  %v9453_v0 = vld [vmem:[%s9340_s30 + $0xc8] sm:$0xff]  ;;  %v9458_v1 = vld [vmem:[%s9340_s30 + $0xd8] sm:$0xff] }
  0x75   : > { %1026 = vmatpush.msra.mxu3 %v670_v2  ;;  %897 = vmatmul.f32.vlgmr.msra.gmra.mxu1 %v9357_v3  ;;  %v9367_v14 = vld [vmem:[%s9340_s30 + $0x20] sm:$0xff]  ;;  %v327_v2 = vld [vmem:[#allocation5 + $0x148] sm:$0xff] }
  0x76   : > { %1027 = vmatmul.f32.vlgmr.msra.gmra.mxu3 %v9362_v4  ;;  %1077 = vmatpush.msrb.mxu0 %v399_v5  ;;  %v9383_v28 = vld [vmem:[%s9340_s30 + $0x40] sm:$0xff]  ;;  %v471_v5 = vld [vmem:[#allocation5 + $0x5c8] sm:$0xff] }
  0x77   : > { %1206 = vmatpush.msrb.mxu2 %v663_v6  ;;  %1271 = vmatpush.msrb.mxu3 %v791_v7  ;;  %v9399_v36 = vld [vmem:[%s9340_s30 + $0x60] sm:$0xff]  ;;  %v591_v6 = vld [vmem:[#allocation5 + $0x988] sm:$0xff] }
  0x78   : > { %1078 = vmatpush.msrb.mxu0 %v391_v8  ;;  %1141 = vmatpush.msrb.mxu1 %v535_v9  ;;  %v9415_v44 = vld [vmem:[%s9340_s30 + $0x80] sm:$0xff]  ;;  %v719_v7 = vld [vmem:[#allocation5 + $0xd88] sm:$0xff]  ;;  %v9466_v9 = vld [vmem:[%s9340_s30 + $0xf0] sm:$0xff] }
  0x79   : > { %1207 = vmatpush.msrb.mxu2 %v655_v10  ;;  %1272 = vmatpush.msrb.mxu3 %v783_v11  ;;  %v9431_v52 = vld [vmem:[%s9340_s30 + $0xa0] sm:$0xff]  ;;  %v9469_v10 = vld [vmem:[%s9340_s30 + $0xe8] sm:$0xff]  ;;  %v9474_v11 = vld [vmem:[%s9340_s30 + $0xf8] sm:$0xff] }
  0x7a   : > { %1079 = vmatpush.msrb.mxu0 %v383_v12  ;;  %1142 = vmatpush.msrb.mxu1 %v527_v13  ;;  %v9447_v60 = vld [vmem:[%s9340_s30 + $0xc0] sm:$0xff]  ;;  %v319_v12 = vld [vmem:[#allocation5 + $0x108] sm:$0xff] }
  0x7b   : > { %835 = vmatmul.f32.gmra.mxu0 %v9367_v14  ;;  %965 = vmatmul.f32.gmra.mxu2 %v9370_v15  ;;  %v9463_v8 = vld [vmem:[%s9340_s30 + $0xe0] sm:$0xff]  ;;  %v463_v13 = vld [vmem:[#allocation5 + $0x588] sm:$0xff] }
  0x7c   : > { %1208 = vmatpush.msrb.mxu2 %v647_v16  ;;  %1273 = vmatpush.msrb.mxu3 %v775_v17  ;;  %v583_v16 = vld [vmem:[#allocation5 + $0x948] sm:$0xff] }
  0x7d   : > { %900 = vmatmul.f32.gmra.mxu1 %v9373_v18  ;;  %1080 = vmatpush.msrb.mxu0 %v375_v19  ;;  %v711_v17 = vld [vmem:[#allocation5 + $0xd48] sm:$0xff]  ;;  %v9479_v19 = vld [vmem:[%s9340_s30 + $0x100] sm:$0xff] }
  0x7e   : > { %1030 = vmatmul.f32.gmra.mxu3 %v9378_v20  ;;  %1143 = vmatpush.msrb.mxu1 %v519_v21  ;;  %v9482_v21 = vld [vmem:[%s9340_s30 + $0x110] sm:$0xff] }
  0x7f   : > { %1209 = vmatpush.msrb.mxu2 %v639_v22  ;;  %1274 = vmatpush.msrb.mxu3 %v767_v23  ;;  %v9485_v22 = vld [vmem:[%s9340_s30 + $0x108] sm:$0xff]  ;;  %v9490_v23 = vld [vmem:[%s9340_s30 + $0x118] sm:$0xff] }
  0x80   : > { %1081 = vmatpush.msrb.mxu0 %v367_v24  ;;  %1144 = vmatpush.msrb.mxu1 %v511_v25  ;;  %v311_v24 = vld [vmem:[#allocation5 + $0xc8] sm:$0xff] }
  0x81   : > { %1210 = vmatpush.msrb.mxu2 %v631_v26  ;;  %1275 = vmatpush.msrb.mxu3 %v759_v27  ;;  %v455_v25 = vld [vmem:[#allocation5 + $0x548] sm:$0xff] }
  0x82   : > { %1082 = vmatpush.msrb.mxu0 %v359_v32  ;;  %1145 = vmatpush.msrb.mxu1 %v503_v33  ;;  %v575_v26 = vld [vmem:[#allocation5 + $0x908] sm:$0xff]  ;;  %v9495_v32 = vld [vmem:[%s9340_s30 + $0x120] sm:$0xff]  ;;  %v9498_v33 = vld [vmem:[%s9340_s30 + $0x130] sm:$0xff] }
  0x83   : > { %838 = vmatmul.f32.gmra.mxu0 %v9383_v28  ;;  %968 = vmatmul.f32.gmra.mxu2 %v9386_v29  ;;  %v703_v27 = vld [vmem:[#allocation5 + $0xd08] sm:$0xff] }
  0x84   : > { %1211 = vmatpush.msrb.mxu2 %v623_v34  ;;  %1276 = vmatpush.msrb.mxu3 %v751_v35  ;;  %v9501_v34 = vld [vmem:[%s9340_s30 + $0x128] sm:$0xff]  ;;  %v9506_v35 = vld [vmem:[%s9340_s30 + $0x138] sm:$0xff] }
  0x85   : > { %903 = vmatmul.f32.gmra.mxu1 %v9389_v30  ;;  %1083 = vmatpush.msrb.mxu0 %v351_v40  ;;  %v303_v40 = vld [vmem:[#allocation5 + $0x88] sm:$0xff] }
  0x86   : > { %1033 = vmatmul.f32.gmra.mxu3 %v9394_v31  ;;  %1146 = vmatpush.msrb.mxu1 %v495_v41  ;;  %v447_v41 = vld [vmem:[#allocation5 + $0x508] sm:$0xff] }
  0x87   : > { %1212 = vmatpush.msrb.mxu2 %v615_v42  ;;  %1277 = vmatpush.msrb.mxu3 %v743_v43  ;;  %v567_v42 = vld [vmem:[#allocation5 + $0x8c8] sm:$0xff] }
  0x88   : > { %1084 = vmatpush.msrb.mxu0 %v343_v48  ;;  %1147 = vmatpush.msrb.mxu1 %v487_v49  ;;  %v695_v43 = vld [vmem:[#allocation5 + $0xcc8] sm:$0xff]  ;;  %v9511_v48 = vld [vmem:[%s9340_s30 + $0x140] sm:$0xff]  ;;  %v9514_v49 = vld [vmem:[%s9340_s30 + $0x150] sm:$0xff] }
  0x89   : > { %1213 = vmatpush.msrb.mxu2 %v607_v50  ;;  %1278 = vmatpush.msrb.mxu3 %v735_v51  ;;  %v9517_v50 = vld [vmem:[%s9340_s30 + $0x148] sm:$0xff]  ;;  %v9522_v51 = vld [vmem:[%s9340_s30 + $0x158] sm:$0xff] }
  0x8a   : > { %1085 = vmatpush.msrb.mxu0 %v335_v56  ;;  %1148 = vmatpush.msrb.mxu1 %v479_v57  ;;  %v295_v56 = vld [vmem:[#allocation5 + $0x48] sm:$0xff] }
  0x8b   : > { %841 = vmatmul.f32.gmra.mxu0 %v9399_v36  ;;  %971 = vmatmul.f32.gmra.mxu2 %v9402_v37  ;;  %v439_v57 = vld [vmem:[#allocation5 + $0x4c8] sm:$0xff] }
  0x8c   : > { %1214 = vmatpush.msrb.mxu2 %v599_v58  ;;  %1279 = vmatpush.msrb.mxu3 %v727_v59  ;;  %v559_v58 = vld [vmem:[#allocation5 + $0x888] sm:$0xff] }
  0x8d   : > { %906 = vmatmul.f32.gmra.mxu1 %v9405_v38  ;;  %1086 = vmatpush.msrb.mxu0 %v327_v2  ;;  %v687_v59 = vld [vmem:[#allocation5 + $0xc88] sm:$0xff]  ;;  %v9527_v2 = vld [vmem:[%s9340_s30 + $0x160] sm:$0xff] }
  0x8e   : > { %1036 = vmatmul.f32.gmra.mxu3 %v9410_v39  ;;  %1149 = vmatpush.msrb.mxu1 %v471_v5  ;;  %v9530_v5 = vld [vmem:[%s9340_s30 + $0x170] sm:$0xff] }
  0x8f   : > { %1215 = vmatpush.msrb.mxu2 %v591_v6  ;;  %1280 = vmatpush.msrb.mxu3 %v719_v7  ;;  %v9533_v6 = vld [vmem:[%s9340_s30 + $0x168] sm:$0xff]  ;;  %v9538_v7 = vld [vmem:[%s9340_s30 + $0x178] sm:$0xff] }
  0x90   : > { %1087 = vmatpush.msrb.mxu0 %v319_v12  ;;  %1150 = vmatpush.msrb.mxu1 %v463_v13  ;;  %v287_v12 = vld [vmem:[#allocation5 + $0x8] sm:$0xff] }
  0x91   : > { %1216 = vmatpush.msrb.mxu2 %v583_v16  ;;  %1281 = vmatpush.msrb.mxu3 %v711_v17  ;;  %v431_v13 = vld [vmem:[#allocation5 + $0x488] sm:$0xff]  ;;  %v9543_v17 = vld [vmem:[%s9340_s30 + $0x180] sm:$0xff] }
  0x92   : > { %1088 = vmatpush.msrb.mxu0 %v311_v24  ;;  %1151 = vmatpush.msrb.mxu1 %v455_v25  ;;  %v551_v16 = vld [vmem:[#allocation5 + $0x848] sm:$0xff]  ;;  %v9546_v24 = vld [vmem:[%s9340_s30 + $0x190] sm:$0xff] }
  0x93   : > { %844 = vmatmul.f32.gmra.mxu0 %v9415_v44  ;;  %974 = vmatmul.f32.gmra.mxu2 %v9418_v45  ;;  %v679_v25 = vld [vmem:[#allocation5 + $0xc48] sm:$0xff] }
  0x94   : > { %1217 = vmatpush.msrb.mxu2 %v575_v26  ;;  %1282 = vmatpush.msrb.mxu3 %v703_v27  ;;  %v9549_v26 = vld [vmem:[%s9340_s30 + $0x188] sm:$0xff] }
  0x95   : > { %909 = vmatmul.f32.gmra.mxu1 %v9421_v46  ;;  %1089 = vmatpush.msrb.mxu0 %v303_v40  ;;  %15198 = vst [vmem:[#allocation12_spill] sm:$0xff] %v9549_v26  ;;  %v423_v27 = vld [vmem:[#allocation5 + $0x448] sm:$0xff] }
  0x96   : > { %1039 = vmatmul.f32.gmra.mxu3 %v9426_v47  ;;  %1152 = vmatpush.msrb.mxu1 %v447_v41  ;;  %v543_v40 = vld [vmem:[#allocation5 + $0x808] sm:$0xff]  ;;  %v9554_v41 = vld [vmem:[%s9340_s30 + $0x198] sm:$0xff] }
  0x97   : > { %1218 = vmatpush.msrb.mxu2 %v567_v42  ;;  %1283 = vmatpush.msrb.mxu3 %v695_v43  ;;  %15199 = vst [vmem:[#allocation13_spill] sm:$0xff] %v9554_v41  ;;  %v408_v42 = vld [vmem:[#allocation5 + $0x3d0] sm:$0xff]  ;;  %v415_v43 = vld [vmem:[#allocation5 + $0x408] sm:$0xff] }
  0x98   : > { %1090 = vmatpush.msrb.mxu0 %v295_v56  ;;  %1153 = vmatpush.msrb.mxu1 %v439_v57  ;;  %v671_v56 = vld [vmem:[#allocation5 + $0xc08] sm:$0xff]  ;;  %v9559_v57 = vld [vmem:[%s9340_s30 + $0x1a0] sm:$0xff] }
  0x99   : > { %1219 = vmatpush.msrb.mxu2 %v559_v58  ;;  %1284 = vmatpush.msrb.mxu3 %v687_v59  ;;  %15200 = vst [vmem:[#allocation14_spill] sm:$0xff] %v9559_v57  ;;  %v9562_v58 = vld [vmem:[%s9340_s30 + $0x1b0] sm:$0xff]  ;;  %v9565_v59 = vld [vmem:[%s9340_s30 + $0x1a8] sm:$0xff] }
  0x9a   : > { %1091 = vmatpush.msrb.mxu0 %v287_v12  ;;  %1154 = vmatpush.msrb.mxu1 %v431_v13  ;;  %15201 = vst [vmem:[#allocation15_spill] sm:$0xff] %v9562_v58  ;;  %v9570_v12 = vld [vmem:[%s9340_s30 + $0x1b8] sm:$0xff]  ;;  %v400_v13 = vld [vmem:[#allocation5 + $0x390] sm:$0xff] }
  0x9b   : > { %847 = vmatmul.f32.gmra.mxu0 %v9431_v52  ;;  %977 = vmatmul.f32.gmra.mxu2 %v9434_v53  ;;  %15202 = vst [vmem:[#allocation16_spill] sm:$0xff] %v9565_v59 }
  0x9c   : > { %1220 = vmatpush.msrb.mxu2 %v551_v16  ;;  %1285 = vmatpush.msrb.mxu3 %v679_v25  ;;  %15203 = vst [vmem:[#allocation17_spill] sm:$0xff] %v9570_v12  ;;  %v664_v16 = vld [vmem:[#allocation5 + $0xbd0] sm:$0xff]  ;;  %v9575_v25 = vld [vmem:[%s9340_s30 + $0x1c0] sm:$0xff] }
  0x9d   : > { %912 = vmatmul.f32.gmra.mxu1 %v9437_v54  ;;  %1336 = vmatpush.msra.mxu0 %v408_v42  ;;  %15204 = vst [vmem:[#allocation18_spill] sm:$0xff] %v9575_v25  ;;  %v9586_v42 = vld [vmem:[%s9340_s30 + $0x1d8] sm:$0xff] }
  0x9e   : > { %1042 = vmatmul.f32.gmra.mxu3 %v9442_v55  ;;  %1155 = vmatpush.msrb.mxu1 %v423_v27  ;;  %v9578_v27 = vld [vmem:[%s9340_s30 + $0x1d0] sm:$0xff]  ;;  %15207 = vst [vmem:[#allocation21_spill] sm:$0xff] %v9586_v42 }
  0x9f   : > { %1221 = vmatpush.msrb.mxu2 %v543_v40  ;;  %1286 = vmatpush.msrb.mxu3 %v671_v56  ;;  %15205 = vst [vmem:[#allocation19_spill] sm:$0xff] %v9578_v27  ;;  %v9581_v40 = vld [vmem:[%s9340_s30 + $0x1c8] sm:$0xff]  ;;  %v392_v56 = vld [vmem:[#allocation5 + $0x350] sm:$0xff] }
  0xa0   : > { %1156 = vmatpush.msrb.mxu1 %v415_v43  ;;  %1337 = vmatpush.msra.mxu0 %v400_v13  ;;  %15206 = vst [vmem:[#allocation20_spill] sm:$0xff] %v9581_v40  ;;  %v792_v43 = vld [vmem:[#allocation5 + $0xfd0] sm:$0xff] }
  0xa1   : > { %1466 = vmatpush.msra.mxu2 %v664_v16  ;;  %v536_v13 = vld [vmem:[#allocation5 + $0x7d0] sm:$0xff]  ;;  %1531 = vmatpush.msra.mxu3 %v792_v43  ;;  %v9604_v43 = vld [vmem:[%s9340_s30 + $0x1f8] sm:$0xff] }
  0xa2   : > { %1338 = vmatpush.msra.mxu0 %v392_v56  ;;  %1401 = vmatpush.msra.mxu1 %v536_v13  ;;  %v656_v16 = vld [vmem:[#allocation5 + $0xb90] sm:$0xff]  ;;  %15212 = vst [vmem:[#allocation26_spill] sm:$0xff] %v9604_v43 }
  0xa3   : > { %850 = vmatmul.f32.gmra.mxu0 %v9447_v60  ;;  %980 = vmatmul.f32.gmra.mxu2 %v9450_v61  ;;  %v528_v56 = vld [vmem:[#allocation5 + $0x790] sm:$0xff] }
  0xa4   : > { %1467 = vmatpush.msra.mxu2 %v656_v16  ;;  %1402 = vmatpush.msra.mxu1 %v528_v56  ;;  %v648_v16 = vld [vmem:[#allocation5 + $0xb50] sm:$0xff] }
  0xa5   : > { %915 = vmatmul.f32.gmra.mxu1 %v9453_v0 }
  0xa6   : > { %1045 = vmatmul.f32.gmra.mxu3 %v9458_v1  ;;  %1468 = vmatpush.msra.mxu2 %v648_v16  ;;  %v640_v16 = vld [vmem:[#allocation5 + $0xb10] sm:$0xff] }
  0xa8   : > { %1469 = vmatpush.msra.mxu2 %v640_v16 }
  0xab   : > { %853 = vmatmul.f32.gmra.mxu0 %v9463_v8  ;;  %983 = vmatmul.f32.gmra.mxu2 %v9466_v9 }
  0xad   : > { %918 = vmatmul.f32.gmra.mxu1 %v9469_v10 }
  0xae   : > { %1048 = vmatmul.f32.gmra.mxu3 %v9474_v11 }
  0xb3   : > { %856 = vmatmul.f32.gmra.mxu0 %v9479_v19  ;;  %986 = vmatmul.f32.gmra.mxu2 %v9482_v21 }
  0xb5   : > { %921 = vmatmul.f32.gmra.mxu1 %v9485_v22 }
  0xb6   : > { %1051 = vmatmul.f32.gmra.mxu3 %v9490_v23 }
  0xbb   : > { %859 = vmatmul.f32.gmra.mxu0 %v9495_v32  ;;  %989 = vmatmul.f32.gmra.mxu2 %v9498_v33 }
  0xbd   : > { %924 = vmatmul.f32.gmra.mxu1 %v9501_v34 }
  0xbe   : > { %1054 = vmatmul.f32.gmra.mxu3 %v9506_v35 }
  0xc3   : > { %862 = vmatmul.f32.gmra.mxu0 %v9511_v48  ;;  %992 = vmatmul.f32.gmra.mxu2 %v9514_v49 }
  0xc5   : > { %927 = vmatmul.f32.gmra.mxu1 %v9517_v50 }
  0xc6   : > { %1057 = vmatmul.f32.gmra.mxu3 %v9522_v51 }
  0xcb   : > { %865 = vmatmul.f32.gmra.mxu0 %v9527_v2  ;;  %995 = vmatmul.f32.gmra.mxu2 %v9530_v5 }
  0xcd   : > { %930 = vmatmul.f32.gmra.mxu1 %v9533_v6 }
  0xce   : > { %1060 = vmatmul.f32.gmra.mxu3 %v9538_v7 }
  0xd3   : > { %868 = vmatmul.f32.gmra.mxu0 %v9543_v17  ;;  %998 = vmatmul.f32.gmra.mxu2 %v9546_v24 }
  0xd5   : > { %933 = vmatmul.f32.gmra.mxu1 %v9549_v26  ;;  %v768_v26 = vld [vmem:[#allocation5 + $0xf10] sm:$0xff] }
  0xd6   : > { %1063 = vmatmul.f32.gmra.mxu3 %v9554_v41 }
  0xdb   : > { %871 = vmatmul.f32.gmra.mxu0 %v9559_v57  ;;  %1001 = vmatmul.f32.gmra.mxu2 %v9562_v58  ;;  %v784_v58 = vld [vmem:[#allocation5 + $0xf90] sm:$0xff] }
  0xdc   : > { %1532 = vmatpush.msra.mxu3 %v784_v58  ;;  %v776_v58 = vld [vmem:[#allocation5 + $0xf50] sm:$0xff] }
  0xdd   : > { %936 = vmatmul.f32.gmra.mxu1 %v9565_v59  ;;  %v9594_v59 = vld [vmem:[%s9340_s30 + $0x1f0] sm:$0xff] }
  0xde   : > { %1066 = vmatmul.f32.gmra.mxu3 %v9570_v12  ;;  %v9591_v12 = vld [vmem:[%s9340_s30 + $0x1e0] sm:$0xff]  ;;  %15209 = vst [vmem:[#allocation23_spill] sm:$0xff] %v9594_v59  ;;  %v520_v57 = vld [vmem:[#allocation5 + $0x750] sm:$0xff] }
  0xdf   : > { %15208 = vst [vmem:[#allocation22_spill] sm:$0xff] %v9591_v12  ;;  %1533 = vmatpush.msra.mxu3 %v776_v58  ;;  %1403 = vmatpush.msra.mxu1 %v520_v57 }
  0xe1   : > { %1534 = vmatpush.msra.mxu3 %v768_v26 }
  0xe3   : > { %874 = vmatmul.f32.gmra.mxu0 %v9575_v25  ;;  %1004 = vmatmul.f32.gmra.mxu2 %v9578_v27  ;;  %v9597_v27 = vld [vmem:[%s9340_s30 + $0x1e8] sm:$0xff]  ;;  %v9599_v25 = vld [vmem:[#allocation7] sm:$0xff] }
  0xe4   : > { %15210 = vst [vmem:[#allocation24_spill] sm:$0xff] %v9597_v27  ;;  %v9608_v13 = vperm.slane %v9599_v25, 0 }
  0xe5   : > { %939 = vmatmul.f32.gmra.mxu1 %v9581_v40  ;;  %15211 = vst [vmem:[#allocation25_spill] sm:$0xff] %v9599_v25 }
  0xe6   : > { %1069 = vmatmul.f32.gmra.mxu3 %v9586_v42  ;;  %v384_v42 = vld [vmem:[#allocation5 + $0x310] sm:$0xff] }
  0xe7   : > { %1339 = vmatpush.msra.mxu0 %v384_v42  ;;  %v376_v42 = vld [vmem:[#allocation5 + $0x2d0] sm:$0xff] }
  0xe9   : > { %1340 = vmatpush.msra.mxu0 %v376_v42  ;;  %v504_v42 = vld [vmem:[#allocation5 + $0x6d0] sm:$0xff] }
  0xeb   : > { %877 = vmatmul.f32.gmra.mxu0 %v9591_v12  ;;  %1007 = vmatmul.f32.gmra.mxu2 %v9594_v59 }
  0xed   : > { %942 = vmatmul.f32.gmra.mxu1 %v9597_v27 }
  0xee   : > { %1072 = vmatmul.f32.gmra.mxu3 %v9604_v43 }
  0xf0   : > { %v833_v40 = vpop.f32.mrf.mxu0 }
  0xf1   : > { %v834_v12 = vadd.f32 %v833_v40, %v9608_v13 }
  0xf2   : > { %v898_v59 = vpop.f32.mrf.mxu1 }
  0xf3   : > { %1092 = vmatmul.f32.vlgmr.msrb.gmra.mxu0 %v9351_v62  ;;  %1222 = vmatmul.f32.vlgmr.msrb.gmra.mxu2 %v9354_v63  ;;  %v899_v27 = vadd.f32 %v898_v59, %v834_v12 }
  0xf5   : > { %1157 = vmatmul.f32.vlgmr.msrb.gmra.mxu1 %v9357_v3  ;;  %v368_v3 = vld [vmem:[#allocation5 + $0x290] sm:$0xff] }
  0xf6   : > { %1287 = vmatmul.f32.vlgmr.msrb.gmra.mxu3 %v9362_v4  ;;  %v963_v56 = vpop.f32.mrf.mxu2  ;;  %1341 = vmatpush.msra.mxu0 %v368_v3  ;;  %v512_v4 = vld [vmem:[#allocation5 + $0x710] sm:$0xff] }
  0xf7   : > { %v964_v43 = vadd.f32 %v963_v56, %v899_v27  ;;  %1404 = vmatpush.msra.mxu1 %v512_v4 }
  0xf8   : > { %v836_v40 = vpop.f32.mrf.mxu0 }
  0xf9   : > { %v837_v62 = vadd.f32 %v836_v40, %v9608_v13  ;;  %v1028_v25 = vpop.f32.mrf.mxu3  ;;  %1405 = vmatpush.msra.mxu1 %v504_v42 }
  0xfa   : > { %v1029_v63 = vadd.f32 %v1028_v25, %v964_v43  ;;  %v901_v41 = vpop.f32.mrf.mxu1 }
  0xfb   : > { %1095 = vmatmul.f32.gmra.mxu0 %v9367_v14  ;;  %1225 = vmatmul.f32.gmra.mxu2 %v9370_v15  ;;  %v902_v57 = vadd.f32 %v901_v41, %v837_v62  ;;  %v632_v14 = vld [vmem:[#allocation5 + $0xad0] sm:$0xff] }
  0xfc   : > { %v9619_v59 = vmul.f32 0.125, %v1029_v63  ;;  %1470 = vmatpush.msra.mxu2 %v632_v14  ;;  %v360_v41 = vld [vmem:[#allocation5 + $0x250] sm:$0xff] }
  0xfd   : > { %1160 = vmatmul.f32.gmra.mxu1 %v9373_v18  ;;  %1342 = vmatpush.msra.mxu0 %v360_v41  ;;  %v488_v41 = vld [vmem:[#allocation5 + $0x650] sm:$0xff] }
  0xfe   : > { %15213 = vst [vmem:[#allocation27_spill] sm:$0xff] %v9619_v59  ;;  %1290 = vmatmul.f32.gmra.mxu3 %v9378_v20  ;;  %2976 = vrot.lane.b32.xlu0 %v9619_v59, %s9215_s18  ;;  %v966_v12 = vpop.f32.mrf.mxu2  ;;  %v760_v20 = vld [vmem:[#allocation5 + $0xed0] sm:$0xff]  ;;  %v545_v59 = vld [vmem:[#allocation5 + $0x818] sm:$0xff] }
  0xff   : > { %v967_v25 = vadd.f32 %v966_v12, %v902_v57  ;;  %1535 = vmatpush.msra.mxu3 %v760_v20  ;;  %v352_v57 = vld [vmem:[#allocation5 + $0x210] sm:$0xff] }
 0x100   : > { %v839_v15 = vpop.f32.mrf.mxu0  ;;  %v496_v12 = vld [vmem:[#allocation5 + $0x690] sm:$0xff]  ;;  %1343 = vmatpush.msra.mxu0 %v352_v57 }
 0x101   : > { %v840_v27 = vadd.f32 %v839_v15, %v9608_v13  ;;  %v1031_v26 = vpop.f32.mrf.mxu3  ;;  %1406 = vmatpush.msra.mxu1 %v496_v12  ;;  %v344_v20 = vld [vmem:[#allocation5 + $0x1d0] sm:$0xff] }
 0x102   : > { %v1032_v43 = vadd.f32 %v1031_v26, %v967_v25  ;;  %v904_v58 = vpop.f32.mrf.mxu1  ;;  %1344 = vmatpush.msra.mxu0 %v344_v20 }
 0x103   : > { %1098 = vmatmul.f32.gmra.mxu0 %v9383_v28  ;;  %1228 = vmatmul.f32.gmra.mxu2 %v9386_v29  ;;  %v905_v56 = vadd.f32 %v904_v58, %v840_v27  ;;  %v624_v28 = vld [vmem:[#allocation5 + $0xa90] sm:$0xff] }
 0x104   : > { %v9628_v18 = vmul.f32 0.125, %v1032_v43  ;;  %1471 = vmatpush.msra.mxu2 %v624_v28  ;;  %1407 = vmatpush.msra.mxu1 %v488_v41 }
 0x105   : > { %1163 = vmatmul.f32.gmra.mxu1 %v9389_v30 }
 0x106   : > { %15214 = vst [vmem:[#allocation28_spill] sm:$0xff] %v9628_v18  ;;  %1293 = vmatmul.f32.gmra.mxu3 %v9394_v31  ;;  %2978 = vrot.lane.b32.xlu0 %v9628_v18, %s9215_s18  ;;  %v969_v16 = vpop.f32.mrf.mxu2  ;;  %v752_v31 = vld [vmem:[#allocation5 + $0xe90] sm:$0xff]  ;;  %v681_v18 = vld [vmem:[#allocation5 + $0xc58] sm:$0xff] }
 0x107   : > { %v970_v40 = vadd.f32 %v969_v16, %v905_v56  ;;  %1536 = vmatpush.msra.mxu3 %v752_v31 }
 0x108   : > { %v842_v29 = vpop.f32.mrf.mxu0 }
 0x109   : > { %v843_v62 = vadd.f32 %v842_v29, %v9608_v13  ;;  %v1034_v63 = vpop.f32.mrf.mxu3 }
 0x10a   : > { %v1035_v3 = vadd.f32 %v1034_v63, %v970_v40  ;;  %v907_v4 = vpop.f32.mrf.mxu1  ;;  %v336_v63 = vld [vmem:[#allocation5 + $0x190] sm:$0xff] }
 0x10b   : > { %1101 = vmatmul.f32.gmra.mxu0 %v9399_v36  ;;  %1231 = vmatmul.f32.gmra.mxu2 %v9402_v37  ;;  %v908_v25 = vadd.f32 %v907_v4, %v843_v62  ;;  %v616_v36 = vld [vmem:[#allocation5 + $0xa50] sm:$0xff] }
 0x10c   : > { %v9637_v30 = vmul.f32 0.125, %v1035_v3  ;;  %1472 = vmatpush.msra.mxu2 %v616_v36  ;;  %v480_v3 = vld [vmem:[#allocation5 + $0x610] sm:$0xff]  ;;  %1345 = vmatpush.msra.mxu0 %v336_v63 }
 0x10d   : > { %1166 = vmatmul.f32.gmra.mxu1 %v9405_v38  ;;  %v328_v36 = vld [vmem:[#allocation5 + $0x150] sm:$0xff] }
 0x10e   : > { %15215 = vst [vmem:[#allocation29_spill] sm:$0xff] %v9637_v30  ;;  %1296 = vmatmul.f32.gmra.mxu3 %v9410_v39  ;;  %2980 = vrot.lane.b32.xlu1 %v9637_v30, %s9215_s18  ;;  %v972_v14 = vpop.f32.mrf.mxu2  ;;  %v744_v39 = vld [vmem:[#allocation5 + $0xe50] sm:$0xff] }
 0x10f   : > { %v973_v15 = vadd.f32 %v972_v14, %v908_v25  ;;  %1537 = vmatpush.msra.mxu3 %v744_v39  ;;  %1408 = vmatpush.msra.mxu1 %v480_v3  ;;  %v456_v63 = vld [vmem:[#allocation5 + $0x550] sm:$0xff] }
 0x110   : > { %v845_v37 = vpop.f32.mrf.mxu0  ;;  %1346 = vmatpush.msra.mxu0 %v328_v36 }
 0x111   : > { %v846_v27 = vadd.f32 %v845_v37, %v9608_v13  ;;  %v1037_v26 = vpop.f32.mrf.mxu3  ;;  %v472_v37 = vld [vmem:[#allocation5 + $0x5d0] sm:$0xff] }
 0x112   : > { %v1038_v43 = vadd.f32 %v1037_v26, %v973_v15  ;;  %v910_v58 = vpop.f32.mrf.mxu1  ;;  %1409 = vmatpush.msra.mxu1 %v472_v37 }
 0x113   : > { %1104 = vmatmul.f32.gmra.mxu0 %v9415_v44  ;;  %1234 = vmatmul.f32.gmra.mxu2 %v9418_v45  ;;  %v911_v42 = vadd.f32 %v910_v58, %v846_v27  ;;  %v608_v44 = vld [vmem:[#allocation5 + $0xa10] sm:$0xff] }
 0x114   : > { %v9646_v38 = vmul.f32 0.125, %v1038_v43  ;;  %1473 = vmatpush.msra.mxu2 %v608_v44 }
 0x115   : > { %1169 = vmatmul.f32.gmra.mxu1 %v9421_v46 }
 0x116   : > { %15216 = vst [vmem:[#allocation30_spill] sm:$0xff] %v9646_v38  ;;  %1299 = vmatmul.f32.gmra.mxu3 %v9426_v47  ;;  %2982 = vrot.lane.b32.xlu1 %v9646_v38, %s9215_s18  ;;  %v975_v56 = vpop.f32.mrf.mxu2  ;;  %v736_v47 = vld [vmem:[#allocation5 + $0xe10] sm:$0xff]  ;;  %v9987_v38 = vld [vmem:[%s9340_s30 + $0x160] sm:$0xff] }
 0x117   : > { %v976_v16 = vadd.f32 %v975_v56, %v911_v42  ;;  %1538 = vmatpush.msra.mxu3 %v736_v47  ;;  %v320_v42 = vld [vmem:[#allocation5 + $0x110] sm:$0xff] }
 0x118   : > { %v848_v45 = vpop.f32.mrf.mxu0  ;;  %v464_v56 = vld [vmem:[#allocation5 + $0x590] sm:$0xff]  ;;  %1347 = vmatpush.msra.mxu0 %v320_v42 }
 0x119   : > { %v849_v40 = vadd.f32 %v848_v45, %v9608_v13  ;;  %v1040_v28 = vpop.f32.mrf.mxu3  ;;  %1410 = vmatpush.msra.mxu1 %v464_v56  ;;  %v312_v47 = vld [vmem:[#allocation5 + $0xd0] sm:$0xff] }
 0x11a   : > { %v1041_v29 = vadd.f32 %v1040_v28, %v976_v16  ;;  %v913_v62 = vpop.f32.mrf.mxu1  ;;  %1348 = vmatpush.msra.mxu0 %v312_v47  ;;  %v544_v47 = vld [vmem:[#allocation5 + $0x810] sm:$0xff] }
 0x11b   : > { %1107 = vmatmul.f32.gmra.mxu0 %v9431_v52  ;;  %1237 = vmatmul.f32.gmra.mxu2 %v9434_v53  ;;  %v914_v4 = vadd.f32 %v913_v62, %v849_v40  ;;  %v600_v52 = vld [vmem:[#allocation5 + $0x9d0] sm:$0xff] }
 0x11c   : > { %v9655_v46 = vmul.f32 0.125, %v1041_v29  ;;  %1474 = vmatpush.msra.mxu2 %v600_v52  ;;  %1411 = vmatpush.msra.mxu1 %v456_v63  ;;  %v409_v63 = vld [vmem:[#allocation5 + $0x3d8] sm:$0xff] }
 0x11d   : > { %1172 = vmatmul.f32.gmra.mxu1 %v9437_v54 }
 0x11e   : > { %15217 = vst [vmem:[#allocation31_spill] sm:$0xff] %v9655_v46  ;;  %1302 = vmatmul.f32.gmra.mxu3 %v9442_v55  ;;  %2984 = vrot.lane.b32.xlu2 %v9655_v46, %s9215_s18  ;;  %v978_v31 = vpop.f32.mrf.mxu2  ;;  %v728_v55 = vld [vmem:[#allocation5 + $0xdd0] sm:$0xff] }
 0x11f   : > { %v979_v57 = vadd.f32 %v978_v31, %v914_v4  ;;  %1539 = vmatpush.msra.mxu3 %v728_v55 }
 0x120   : > { %v851_v53 = vpop.f32.mrf.mxu0 }
 0x121   : > { %v852_v12 = vadd.f32 %v851_v53, %v9608_v13  ;;  %v1043_v25 = vpop.f32.mrf.mxu3 }
 0x122   : > { %v1044_v14 = vadd.f32 %v1043_v25, %v979_v57  ;;  %v916_v15 = vpop.f32.mrf.mxu1  ;;  %v304_v25 = vld [vmem:[#allocation5 + $0x90] sm:$0xff] }
 0x123   : > { %1110 = vmatmul.f32.gmra.mxu0 %v9447_v60  ;;  %1240 = vmatmul.f32.gmra.mxu2 %v9450_v61  ;;  %v917_v27 = vadd.f32 %v916_v15, %v852_v12  ;;  %v592_v60 = vld [vmem:[#allocation5 + $0x990] sm:$0xff] }
 0x124   : > { %v9664_v54 = vmul.f32 0.125, %v1044_v14  ;;  %1475 = vmatpush.msra.mxu2 %v592_v60  ;;  %v448_v14 = vld [vmem:[#allocation5 + $0x510] sm:$0xff]  ;;  %1349 = vmatpush.msra.mxu0 %v304_v25  ;;  %v15227_v25 = vld [vmem:[#allocation14_spill] sm:$0xff] }
 0x125   : > { %1175 = vmatmul.f32.gmra.mxu1 %v9453_v0  ;;  %v296_v60 = vld [vmem:[#allocation5 + $0x50] sm:$0xff] }
 0x126   : > { %15218 = vst [vmem:[#allocation32_spill] sm:$0xff] %v9664_v54  ;;  %1305 = vmatmul.f32.gmra.mxu3 %v9458_v1  ;;  %2986 = vrot.lane.b32.xlu2 %v9664_v54, %s9215_s18  ;;  %v981_v26 = vpop.f32.mrf.mxu2  ;;  %v720_v1 = vld [vmem:[#allocation5 + $0xd90] sm:$0xff]  ;;  %v9966_v54 = vld [vmem:[%s9340_s30 + $0x140] sm:$0xff] }
 0x127   : > { %v982_v43 = vadd.f32 %v981_v26, %v917_v27  ;;  %1540 = vmatpush.msra.mxu3 %v720_v1  ;;  %1412 = vmatpush.msra.mxu1 %v448_v14  ;;  %v15228_v14 = vld [vmem:[#allocation15_spill] sm:$0xff] }
 0x128   : > { %v854_v61 = vpop.f32.mrf.mxu0  ;;  %1350 = vmatpush.msra.mxu0 %v296_v60 }
 0x129   : > { %v855_v58 = vadd.f32 %v854_v61, %v9608_v13  ;;  %v1046_v39 = vpop.f32.mrf.mxu3  ;;  %v440_v61 = vld [vmem:[#allocation5 + $0x4d0] sm:$0xff] }
 0x12a   : > { %v1047_v20 = vadd.f32 %v1046_v39, %v982_v43  ;;  %v919_v41 = vpop.f32.mrf.mxu1  ;;  %1413 = vmatpush.msra.mxu1 %v440_v61 }
 0x12b   : > { %1113 = vmatmul.f32.gmra.mxu0 %v9463_v8  ;;  %1243 = vmatmul.f32.gmra.mxu2 %v9466_v9  ;;  %v920_v16 = vadd.f32 %v919_v41, %v855_v58  ;;  %v584_v8 = vld [vmem:[#allocation5 + $0x950] sm:$0xff] }
 0x12c   : > { %v9673_v0 = vmul.f32 0.125, %v1047_v20  ;;  %1476 = vmatpush.msra.mxu2 %v584_v8 }
 0x12d   : > { %1178 = vmatmul.f32.gmra.mxu1 %v9469_v10 }
 0x12e   : > { %15219 = vst [vmem:[#allocation33_spill] sm:$0xff] %v9673_v0  ;;  %1308 = vmatmul.f32.gmra.mxu3 %v9474_v11  ;;  %2988 = vrot.lane.b32.xlu0 %v9673_v0, %s9215_s18  ;;  %v984_v44 = vpop.f32.mrf.mxu2  ;;  %v712_v11 = vld [vmem:[#allocation5 + $0xd50] sm:$0xff] }
 0x12f   : > { %v985_v45 = vadd.f32 %v984_v44, %v920_v16  ;;  %1541 = vmatpush.msra.mxu3 %v712_v11  ;;  %v288_v16 = vld [vmem:[#allocation5 + $0x10] sm:$0xff] }
 0x130   : > { %v857_v9 = vpop.f32.mrf.mxu0  ;;  %v432_v44 = vld [vmem:[#allocation5 + $0x490] sm:$0xff]  ;;  %1351 = vmatpush.msra.mxu0 %v288_v16 }
 0x131   : > { %v858_v40 = vadd.f32 %v857_v9, %v9608_v13  ;;  %v1049_v28 = vpop.f32.mrf.mxu3  ;;  %1414 = vmatpush.msra.mxu1 %v432_v44  ;;  %v680_v11 = vld [vmem:[#allocation5 + $0xc50] sm:$0xff] }
 0x132   : > { %v1050_v29 = vadd.f32 %v1049_v28, %v985_v45  ;;  %v922_v62 = vpop.f32.mrf.mxu1  ;;  %1596 = vmatpush.msrb.mxu0 %v409_v63 }
 0x133   : > { %1116 = vmatmul.f32.gmra.mxu0 %v9479_v19  ;;  %1246 = vmatmul.f32.gmra.mxu2 %v9482_v21  ;;  %v923_v3 = vadd.f32 %v922_v62, %v858_v40  ;;  %v576_v19 = vld [vmem:[#allocation5 + $0x910] sm:$0xff] }
 0x134   : > { %v9682_v10 = vmul.f32 0.125, %v1050_v29  ;;  %1477 = vmatpush.msra.mxu2 %v576_v19  ;;  %v672_v19 = vld [vmem:[#allocation5 + $0xc10] sm:$0xff] }
 0x135   : > { %1181 = vmatmul.f32.gmra.mxu1 %v9485_v22 }
 0x136   : > { %15220 = vst [vmem:[#allocation34_spill] sm:$0xff] %v9682_v10  ;;  %1311 = vmatmul.f32.gmra.mxu3 %v9490_v23  ;;  %2990 = vrot.lane.b32.xlu1 %v9682_v10, %s9215_s18  ;;  %v987_v4 = vpop.f32.mrf.mxu2  ;;  %v704_v23 = vld [vmem:[#allocation5 + $0xd10] sm:$0xff]  ;;  %v9945_v10 = vld [vmem:[%s9340_s30 + $0x120] sm:$0xff] }
 0x137   : > { %v988_v31 = vadd.f32 %v987_v4, %v923_v3  ;;  %1542 = vmatpush.msra.mxu3 %v704_v23  ;;  %v416_v3 = vld [vmem:[#allocation5 + $0x410] sm:$0xff] }
 0x138   : > { %v860_v21 = vpop.f32.mrf.mxu0 }
 0x139   : > { %v861_v57 = vadd.f32 %v860_v21, %v9608_v13  ;;  %v1052_v52 = vpop.f32.mrf.mxu3  ;;  %v15226_v21 = vld [vmem:[#allocation13_spill] sm:$0xff] }
 0x13a   : > { %v1053_v53 = vadd.f32 %v1052_v52, %v988_v31  ;;  %v925_v12 = vpop.f32.mrf.mxu1  ;;  %v15225_v31 = vld [vmem:[#allocation12_spill] sm:$0xff] }
 0x13b   : > { %1119 = vmatmul.f32.gmra.mxu0 %v9495_v32  ;;  %1249 = vmatmul.f32.gmra.mxu2 %v9498_v33  ;;  %v926_v15 = vadd.f32 %v925_v12, %v861_v57  ;;  %v568_v32 = vld [vmem:[#allocation5 + $0x8d0] sm:$0xff] }
 0x13c   : > { %v9691_v22 = vmul.f32 0.125, %v1053_v53  ;;  %1478 = vmatpush.msra.mxu2 %v568_v32  ;;  %v15230_v32 = vld [vmem:[#allocation16_spill] sm:$0xff] }
 0x13d   : > { %1184 = vmatmul.f32.gmra.mxu1 %v9501_v34 }
 0x13e   : > { %15221 = vst [vmem:[#allocation35_spill] sm:$0xff] %v9691_v22  ;;  %1314 = vmatmul.f32.gmra.mxu3 %v9506_v35  ;;  %2992 = vrot.lane.b32.xlu2 %v9691_v22, %s9215_s18  ;;  %v990_v55 = vpop.f32.mrf.mxu2  ;;  %v696_v35 = vld [vmem:[#allocation5 + $0xcd0] sm:$0xff] }
 0x13f   : > { %v991_v36 = vadd.f32 %v990_v55, %v926_v15  ;;  %1543 = vmatpush.msra.mxu3 %v696_v35  ;;  %v401_v55 = vld [vmem:[#allocation5 + $0x398] sm:$0xff] }
 0x140   : > { %v863_v33 = vpop.f32.mrf.mxu0  ;;  %1597 = vmatpush.msrb.mxu0 %v401_v55  ;;  %v777_v55 = vld [vmem:[#allocation5 + $0xf58] sm:$0xff] }
 0x141   : > { %v864_v37 = vadd.f32 %v863_v33, %v9608_v13  ;;  %v1055_v27 = vpop.f32.mrf.mxu3  ;;  %v15231_v33 = vld [vmem:[#allocation17_spill] sm:$0xff] }
 0x142   : > { %v1056_v26 = vadd.f32 %v1055_v27, %v991_v36  ;;  %v928_v43 = vpop.f32.mrf.mxu1 }
 0x143   : > { %1122 = vmatmul.f32.gmra.mxu0 %v9511_v48  ;;  %1252 = vmatmul.f32.gmra.mxu2 %v9514_v49  ;;  %v929_v58 = vadd.f32 %v928_v43, %v864_v37  ;;  %v560_v48 = vld [vmem:[#allocation5 + $0x890] sm:$0xff] }
 0x144   : > { %v9700_v34 = vmul.f32 0.125, %v1056_v26  ;;  %1479 = vmatpush.msra.mxu2 %v560_v48  ;;  %v665_v26 = vld [vmem:[#allocation5 + $0xbd8] sm:$0xff] }
 0x145   : > { %1187 = vmatmul.f32.gmra.mxu1 %v9517_v50 }
 0x146   : > { %15222 = vst [vmem:[#allocation36_spill] sm:$0xff] %v9700_v34  ;;  %1317 = vmatmul.f32.gmra.mxu3 %v9522_v51  ;;  %2994 = vrot.lane.b32.xlu0 %v9700_v34, %s9215_s18  ;;  %v993_v39 = vpop.f32.mrf.mxu2  ;;  %v688_v51 = vld [vmem:[#allocation5 + $0xc90] sm:$0xff] }
 0x147   : > { %v994_v20 = vadd.f32 %v993_v39, %v929_v58  ;;  %1544 = vmatpush.msra.mxu3 %v688_v51  ;;  %v15232_v39 = vld [vmem:[#allocation18_spill] sm:$0xff]  ;;  %v15236_v51 = vld [vmem:[#allocation21_spill] sm:$0xff] }
 0x148   : > { %v866_v49 = vpop.f32.mrf.mxu0 }
 0x149   : > { %v867_v41 = vadd.f32 %v866_v49, %v9608_v13  ;;  %v1058_v1 = vpop.f32.mrf.mxu3  ;;  %1545 = vmatpush.msra.mxu3 %v680_v11  ;;  %v793_v49 = vld [vmem:[#allocation5 + $0xfd8] sm:$0xff] }
 0x14a   : > { %v1059_v42 = vadd.f32 %v1058_v1, %v994_v20  ;;  %v931_v56 = vpop.f32.mrf.mxu1  ;;  %v15233_v20 = vld [vmem:[#allocation19_spill] sm:$0xff]  ;;  %v537_v1 = vld [vmem:[#allocation5 + $0x7d8] sm:$0xff] }
 0x14b   : > { %1125 = vmatmul.f32.gmra.mxu0 %v9527_v2  ;;  %1255 = vmatmul.f32.gmra.mxu2 %v9530_v5  ;;  %v932_v45 = vadd.f32 %v931_v56, %v867_v41  ;;  %v552_v2 = vld [vmem:[#allocation5 + $0x850] sm:$0xff]  ;;  %v393_v41 = vld [vmem:[#allocation5 + $0x358] sm:$0xff]  ;;  %v15235_v56 = vld [vmem:[#allocation20_spill] sm:$0xff] }
 0x14c   : > { %v9709_v50 = vmul.f32 0.125, %v1059_v42  ;;  %1480 = vmatpush.msra.mxu2 %v552_v2  ;;  %1546 = vmatpush.msra.mxu3 %v672_v19  ;;  %v785_v11 = vld [vmem:[#allocation5 + $0xf98] sm:$0xff] }
 0x14d   : > { %1190 = vmatmul.f32.gmra.mxu1 %v9533_v6  ;;  %v424_v6 = vld [vmem:[#allocation5 + $0x450] sm:$0xff]  ;;  %1598 = vmatpush.msrb.mxu0 %v393_v41 }
 0x14e   : > { %15223 = vst [vmem:[#allocation37_spill] sm:$0xff] %v9709_v50  ;;  %1320 = vmatmul.f32.gmra.mxu3 %v9538_v7  ;;  %2996 = vrot.lane.b32.xlu1 %v9709_v50, %s9215_s18  ;;  %v996_v8 = vpop.f32.mrf.mxu2  ;;  %v9781_v41 = vld [vmem:[%s9340_s30 + $0x30] sm:$0xff]  ;;  %v9934_v50 = vld [vmem:[%s9340_s30 + $0x108] sm:$0xff] }
 0x14f   : > { %v997_v9 = vadd.f32 %v996_v8, %v932_v45  ;;  %1415 = vmatpush.msra.mxu1 %v424_v6  ;;  %1481 = vmatpush.msra.mxu2 %v544_v47  ;;  %v657_v45 = vld [vmem:[#allocation5 + $0xb98] sm:$0xff] }
 0x150   : > { %v869_v5 = vpop.f32.mrf.mxu0  ;;  %1791 = vmatpush.msrb.mxu3 %v793_v49  ;;  %v385_v6 = vld [vmem:[#allocation5 + $0x318] sm:$0xff]  ;;  %v9777_v49 = vld [vmem:[%s9340_s30 + $0x20] sm:$0xff] }
 0x151   : > { %v870_v40 = vadd.f32 %v869_v5, %v9608_v13  ;;  %v1061_v28 = vpop.f32.mrf.mxu3  ;;  %1416 = vmatpush.msra.mxu1 %v416_v3  ;;  %1726 = vmatpush.msrb.mxu2 %v665_v26  ;;  %v529_v47 = vld [vmem:[#allocation5 + $0x798] sm:$0xff]  ;;  %v15240_v3 = vld [vmem:[#allocation24_spill] sm:$0xff] }
 0x152   : > { %v1062_v29 = vadd.f32 %v1061_v28, %v997_v9  ;;  %v934_v62 = vpop.f32.mrf.mxu1  ;;  %v15237_v28 = vld [vmem:[#allocation22_spill] sm:$0xff]  ;;  %1792 = vmatpush.msrb.mxu3 %v785_v11  ;;  %1599 = vmatpush.msrb.mxu0 %v385_v6  ;;  %v9798_v6 = vld [vmem:[%s9340_s30 + $0x40] sm:$0xff] }
 0x153   : > { %1128 = vmatmul.f32.gmra.mxu0 %v9543_v17  ;;  %1258 = vmatmul.f32.gmra.mxu2 %v9546_v24  ;;  %v935_v4 = vadd.f32 %v934_v62, %v870_v40 }
 0x154   : > { %v9718_v7 = vmul.f32 0.125, %v1062_v29  ;;  %1661 = vmatpush.msrb.mxu1 %v537_v1  ;;  %1727 = vmatpush.msrb.mxu2 %v657_v45  ;;  %v15238_v29 = vld [vmem:[#allocation23_spill] sm:$0xff]  ;;  %v9791_v45 = vld [vmem:[%s9340_s30 + $0x38] sm:$0xff] }
 0x155   : > { %1193 = vmatmul.f32.gmra.mxu1 %v15225_v31  ;;  %1793 = vmatpush.msrb.mxu3 %v777_v55 }
 0x156   : > { %15224 = vst [vmem:[#allocation38_spill] sm:$0xff] %v9718_v7  ;;  %1323 = vmatmul.f32.gmra.mxu3 %v15226_v21  ;;  %2998 = vrot.lane.b32.xlu2 %v9718_v7, %s9215_s18  ;;  %v999_v57 = vpop.f32.mrf.mxu2  ;;  %v9928_v7 = vld [vmem:[%s9340_s30 + $0x110] sm:$0xff] }
 0x157   : > { %v1000_v17 = vadd.f32 %v999_v57, %v935_v4  ;;  %v15241_v4 = vld [vmem:[#allocation25_spill] sm:$0xff]  ;;  %1662 = vmatpush.msrb.mxu1 %v529_v47  ;;  %v649_v57 = vld [vmem:[#allocation5 + $0xb58] sm:$0xff] }
 0x158   : > { %v872_v24 = vpop.f32.mrf.mxu0  ;;  %v9749_v31 = vperm.slane %v15241_v4, 1  ;;  %1728 = vmatpush.msrb.mxu2 %v649_v57  ;;  %v9802_v47 = vld [vmem:[%s9340_s30 + $0x50] sm:$0xff]  ;;  %v361_v4 = vld [vmem:[#allocation5 + $0x258] sm:$0xff] }
 0x159   : > { %v873_v52 = vadd.f32 %v872_v24, %v9608_v13  ;;  %v1064_v53 = vpop.f32.mrf.mxu3  ;;  %v9812_v57 = vld [vmem:[%s9340_s30 + $0x58] sm:$0xff] }
 0x15a   : > { %v1065_v12 = vadd.f32 %v1064_v53, %v1000_v17  ;;  %v937_v23 = vpop.f32.mrf.mxu1 }
 0x15b   : > { %1131 = vmatmul.f32.gmra.mxu0 %v15227_v25  ;;  %1261 = vmatmul.f32.gmra.mxu2 %v15228_v14  ;;  %v938_v36 = vadd.f32 %v937_v23, %v873_v52  ;;  %v9756_v23 = vld [vmem:[%s9340_s30] sm:$0xff]  ;;  %v9760_v25 = vld [vmem:[%s9340_s30 + $0x10] sm:$0xff] }
 0x15c   : > { %v9727_v15 = vmul.f32 0.125, %v1065_v12 }
 0x15d   : > { %1196 = vmatmul.f32.gmra.mxu1 %v15230_v32  ;;  %v521_v32 = vld [vmem:[#allocation5 + $0x758] sm:$0xff] }
 0x15e   : > { %15229 = vst [vmem:[#allocation12_spill] sm:$0xff] %v9727_v15  ;;  %1326 = vmatmul.f32.gmra.mxu3 %v15231_v33  ;;  %3000 = vrot.lane.b32.xlu0 %v9727_v15, %s9215_s18  ;;  %v1002_v37 = vpop.f32.mrf.mxu2  ;;  %v9924_v15 = vld [vmem:[%s9340_s30 + $0x100] sm:$0xff] }
 0x15f   : > { %v1003_v27 = vadd.f32 %v1002_v37, %v938_v36  ;;  %v377_v36 = vld [vmem:[#allocation5 + $0x2d8] sm:$0xff]  ;;  %v9766_v37 = vld [vmem:[%s9340_s30 + $0x8] sm:$0xff]  ;;  %1663 = vmatpush.msrb.mxu1 %v521_v32 }
 0x160   : > { %v875_v43 = vpop.f32.mrf.mxu0  ;;  %1600 = vmatpush.msrb.mxu0 %v377_v36 }
 0x161   : > { %v876_v35 = vadd.f32 %v875_v43, %v9608_v13  ;;  %v1067_v60 = vpop.f32.mrf.mxu3 }
 0x162   : > { %v1068_v61 = vadd.f32 %v1067_v60, %v1003_v27  ;;  %v940_v58 = vpop.f32.mrf.mxu1  ;;  %v9770_v27 = vld [vmem:[%s9340_s30 + $0x18] sm:$0xff] }
 0x163   : > { %1134 = vmatmul.f32.gmra.mxu0 %v15232_v39  ;;  %1264 = vmatmul.f32.gmra.mxu2 %v15233_v20  ;;  %v941_v42 = vadd.f32 %v940_v58, %v876_v35  ;;  %v641_v35 = vld [vmem:[#allocation5 + $0xb18] sm:$0xff] }
 0x164   : > { %v9736_v48 = vmul.f32 0.125, %v1068_v61  ;;  %1729 = vmatpush.msrb.mxu2 %v641_v35  ;;  %v753_v35 = vld [vmem:[#allocation5 + $0xe98] sm:$0xff] }
 0x165   : > { %1199 = vmatmul.f32.gmra.mxu1 %v15235_v56  ;;  %v369_v56 = vld [vmem:[#allocation5 + $0x298] sm:$0xff] }
 0x166   : > { %15234 = vst [vmem:[#allocation13_spill] sm:$0xff] %v9736_v48  ;;  %1329 = vmatmul.f32.gmra.mxu3 %v15236_v51  ;;  %3002 = vrot.lane.b32.xlu1 %v9736_v48, %s9215_s18  ;;  %v1005_v16 = vpop.f32.mrf.mxu2  ;;  %v513_v51 = vld [vmem:[#allocation5 + $0x718] sm:$0xff] }
 0x167   : > { %v1006_v44 = vadd.f32 %v1005_v16, %v941_v42  ;;  %v769_v42 = vld [vmem:[#allocation5 + $0xf18] sm:$0xff]  ;;  %1601 = vmatpush.msrb.mxu0 %v369_v56  ;;  %1664 = vmatpush.msrb.mxu1 %v513_v51 }
 0x168   : > { %v878_v8 = vpop.f32.mrf.mxu0  ;;  %1794 = vmatpush.msrb.mxu3 %v769_v42  ;;  %v617_v51 = vld [vmem:[#allocation5 + $0xa58] sm:$0xff] }
 0x169   : > { %v879_v9 = vadd.f32 %v878_v8, %v9608_v13  ;;  %v1070_v2 = vpop.f32.mrf.mxu3  ;;  %v15242_v13 = vld [vmem:[#allocation26_spill] sm:$0xff]  ;;  %1602 = vmatpush.msrb.mxu0 %v361_v4 }
 0x16a   : > { %v1071_v5 = vadd.f32 %v1070_v2, %v1006_v44  ;;  %v943_v40 = vpop.f32.mrf.mxu1  ;;  %v9787_v44 = vld [vmem:[%s9340_s30 + $0x28] sm:$0xff]  ;;  %v633_v2 = vld [vmem:[#allocation5 + $0xad8] sm:$0xff] }
 0x16b   : > { %1137 = vmatmul.f32.gmra.mxu0 %v15237_v28  ;;  %1267 = vmatmul.f32.gmra.mxu2 %v15238_v29  ;;  %v944_v63 = vadd.f32 %v943_v40, %v879_v9  ;;  %v489_v4 = vld [vmem:[#allocation5 + $0x658] sm:$0xff] }
 0x16c   : > { %v9745_v62 = vmul.f32 0.125, %v1071_v5  ;;  %1730 = vmatpush.msrb.mxu2 %v633_v2 }
 0x16d   : > { %1202 = vmatmul.f32.gmra.mxu1 %v15240_v3  ;;  %v761_v3 = vld [vmem:[#allocation5 + $0xed8] sm:$0xff] }
 0x16e   : > { %15239 = vst [vmem:[#allocation14_spill] sm:$0xff] %v9745_v62  ;;  %1332 = vmatmul.f32.gmra.mxu3 %v15242_v13  ;;  %3004 = vrot.lane.b32.xlu2 %v9745_v62, %s9215_s18  ;;  %v1008_v19 = vpop.f32.mrf.mxu2  ;;  %v505_v13 = vld [vmem:[#allocation5 + $0x6d8] sm:$0xff] }
 0x16f   : > { %v1009_v21 = vadd.f32 %v1008_v19, %v944_v63  ;;  %1795 = vmatpush.msrb.mxu3 %v761_v3  ;;  %1665 = vmatpush.msrb.mxu1 %v505_v13  ;;  %v345_v3 = vld [vmem:[#allocation5 + $0x1d8] sm:$0xff] }
 0x170   : > { %v1093_v17 = vpop.f32.mrf.mxu0 }
 0x171   : > { %v1073_v24 = vpop.f32.mrf.mxu3  ;;  %v1094_v52 = vadd.f32 %v1093_v17, %v9749_v31  ;;  %1796 = vmatpush.msrb.mxu3 %v753_v35 }
 0x172   : > { %v1074_v53 = vadd.f32 %v1073_v24, %v1009_v21  ;;  %v1158_v12 = vpop.f32.mrf.mxu1  ;;  %v9808_v21 = vld [vmem:[%s9340_s30 + $0x48] sm:$0xff] }
 0x173   : > { %1352 = vmatmul.f32.vlgmr.msra.gmra.mxu0 %v9756_v23  ;;  %1482 = vmatmul.f32.vlgmr.msra.gmra.mxu2 %v9760_v25  ;;  %v1159_v33 = vadd.f32 %v1158_v12, %v1094_v52  ;;  %v625_v52 = vld [vmem:[#allocation5 + $0xa98] sm:$0xff] }
 0x174   : > { %v9763_v14 = vmul.f32 0.125, %v1074_v53  ;;  %1731 = vmatpush.msrb.mxu2 %v625_v52 }
 0x175   : > { %1417 = vmatmul.f32.vlgmr.msra.gmra.mxu1 %v9766_v37 }
 0x176   : > { %15243 = vst [vmem:[#allocation15_spill] sm:$0xff] %v9763_v14  ;;  %1547 = vmatmul.f32.vlgmr.msra.gmra.mxu3 %v9770_v27  ;;  %3006 = vrot.lane.b32.xlu0 %v9763_v14, %s9215_s18  ;;  %v1223_v26 = vpop.f32.mrf.mxu2  ;;  %v9913_v14 = vld [vmem:[%s9340_s30 + $0xe8] sm:$0xff] }
 0x177   : > { %v1224_v43 = vadd.f32 %v1223_v26, %v1159_v33  ;;  %v9819_v33 = vld [vmem:[%s9340_s30 + $0x60] sm:$0xff]  ;;  %v9823_v26 = vld [vmem:[%s9340_s30 + $0x70] sm:$0xff]  ;;  %1732 = vmatpush.msrb.mxu2 %v617_v51  ;;  %v481_v51 = vld [vmem:[#allocation5 + $0x618] sm:$0xff] }
 0x178   : > { %v1096_v60 = vpop.f32.mrf.mxu0 }
 0x179   : > { %v1288_v61 = vpop.f32.mrf.mxu3  ;;  %v1097_v58 = vadd.f32 %v1096_v60, %v9749_v31  ;;  %v353_v60 = vld [vmem:[#allocation5 + $0x218] sm:$0xff] }
 0x17a   : > { %v1289_v39 = vadd.f32 %v1288_v61, %v1224_v43  ;;  %v1161_v20 = vpop.f32.mrf.mxu1  ;;  %v497_v61 = vld [vmem:[#allocation5 + $0x698] sm:$0xff]  ;;  %1603 = vmatpush.msrb.mxu0 %v353_v60  ;;  %v9861_v60 = vld [vmem:[%s9340_s30 + $0xa0] sm:$0xff] }
 0x17b   : > { %1355 = vmatmul.f32.gmra.mxu0 %v9777_v49  ;;  %1485 = vmatmul.f32.gmra.mxu2 %v9781_v41  ;;  %v1162_v16 = vadd.f32 %v1161_v20, %v1097_v58  ;;  %v9833_v20 = vld [vmem:[%s9340_s30 + $0x78] sm:$0xff] }
 0x17c   : > { %v9784_v1 = vmul.f32 0.125, %v1289_v39  ;;  %v9829_v39 = vld [vmem:[%s9340_s30 + $0x68] sm:$0xff]  ;;  %1666 = vmatpush.msrb.mxu1 %v497_v61  ;;  %1604 = vmatpush.msrb.mxu0 %v345_v3  ;;  %v9865_v61 = vld [vmem:[%s9340_s30 + $0xb0] sm:$0xff] }
 0x17d   : > { %1420 = vmatmul.f32.gmra.mxu1 %v9787_v44 }
 0x17e   : > { %15244 = vst [vmem:[#allocation16_spill] sm:$0xff] %v9784_v1  ;;  %1550 = vmatmul.f32.gmra.mxu3 %v9791_v45  ;;  %4164 = vrot.lane.b32.xlu0 %v9784_v1, %s9215_s18  ;;  %v1226_v8 = vpop.f32.mrf.mxu2  ;;  %v425_v1 = vld [vmem:[#allocation5 + $0x458] sm:$0xff] }
 0x17f   : > { %v1227_v9 = vadd.f32 %v1226_v8, %v1162_v16  ;;  %1667 = vmatpush.msrb.mxu1 %v489_v4 }
 0x180   : > { %v1099_v5 = vpop.f32.mrf.mxu0 }
 0x181   : > { %v1291_v40 = vpop.f32.mrf.mxu3  ;;  %v1100_v28 = vadd.f32 %v1099_v5, %v9749_v31  ;;  %1668 = vmatpush.msrb.mxu1 %v481_v51  ;;  %v9896_v51 = vld [vmem:[%s9340_s30 + $0xd8] sm:$0xff] }
 0x182   : > { %v1292_v29 = vadd.f32 %v1291_v40, %v1227_v9  ;;  %v1164_v11 = vpop.f32.mrf.mxu1  ;;  %v9840_v40 = vld [vmem:[%s9340_s30 + $0x80] sm:$0xff] }
 0x183   : > { %1358 = vmatmul.f32.gmra.mxu0 %v9798_v6  ;;  %1488 = vmatmul.f32.gmra.mxu2 %v9802_v47  ;;  %v1165_v19 = vadd.f32 %v1164_v11, %v1100_v28  ;;  %v9844_v28 = vld [vmem:[%s9340_s30 + $0x90] sm:$0xff]  ;;  %v745_v11 = vld [vmem:[#allocation5 + $0xe58] sm:$0xff] }
 0x184   : > { %v9805_v63 = vmul.f32 0.125, %v1292_v29  ;;  %1797 = vmatpush.msrb.mxu3 %v745_v11  ;;  %v601_v11 = vld [vmem:[#allocation5 + $0x9d8] sm:$0xff] }
 0x185   : > { %1423 = vmatmul.f32.gmra.mxu1 %v9808_v21 }
 0x186   : > { %15245 = vst [vmem:[#allocation17_spill] sm:$0xff] %v9805_v63  ;;  %1553 = vmatmul.f32.gmra.mxu3 %v9812_v57  ;;  %4166 = vrot.lane.b32.xlu2 %v9805_v63, %s9215_s18  ;;  %v1229_v17 = vpop.f32.mrf.mxu2 }
 0x187   : > { %v1230_v24 = vadd.f32 %v1229_v17, %v1165_v19  ;;  %v9850_v19 = vld [vmem:[%s9340_s30 + $0x88] sm:$0xff]  ;;  %v9854_v17 = vld [vmem:[%s9340_s30 + $0x98] sm:$0xff] }
 0x188   : > { %v1102_v53 = vpop.f32.mrf.mxu0 }
 0x189   : > { %v1294_v12 = vpop.f32.mrf.mxu3  ;;  %v1103_v55 = vadd.f32 %v1102_v53, %v9749_v31  ;;  %v609_v53 = vld [vmem:[#allocation5 + $0xa18] sm:$0xff] }
 0x18a   : > { %v1295_v36 = vadd.f32 %v1294_v12, %v1230_v24  ;;  %v1167_v32 = vpop.f32.mrf.mxu1  ;;  %1733 = vmatpush.msrb.mxu2 %v609_v53  ;;  %v9882_v53 = vld [vmem:[%s9340_s30 + $0xc0] sm:$0xff] }
 0x18b   : > { %1361 = vmatmul.f32.gmra.mxu0 %v9819_v33  ;;  %1491 = vmatmul.f32.gmra.mxu2 %v9823_v26  ;;  %v1168_v58 = vadd.f32 %v1167_v32, %v1103_v55 }
 0x18c   : > { %v9826_v43 = vmul.f32 0.125, %v1295_v36  ;;  %1734 = vmatpush.msrb.mxu2 %v601_v11 }
 0x18d   : > { %1426 = vmatmul.f32.gmra.mxu1 %v9829_v39 }
 0x18e   : > { %15246 = vst [vmem:[#allocation18_spill] sm:$0xff] %v9826_v43  ;;  %1556 = vmatmul.f32.gmra.mxu3 %v9833_v20  ;;  %4168 = vrot.lane.b32.xlu1 %v9826_v43, %s9215_s18  ;;  %v1232_v42 = vpop.f32.mrf.mxu2  ;;  %v9991_v43 = vld [vmem:[%s9340_s30 + $0x170] sm:$0xff] }
 0x18f   : > { %v1233_v56 = vadd.f32 %v1232_v42, %v1168_v58  ;;  %v737_v42 = vld [vmem:[#allocation5 + $0xe18] sm:$0xff] }
 0x190   : > { %v1105_v16 = vpop.f32.mrf.mxu0  ;;  %1798 = vmatpush.msrb.mxu3 %v737_v42 }
 0x191   : > { %v1297_v8 = vpop.f32.mrf.mxu3  ;;  %v1106_v9 = vadd.f32 %v1105_v16, %v9749_v31 }
 0x192   : > { %v1298_v2 = vadd.f32 %v1297_v8, %v1233_v56  ;;  %v1170_v5 = vpop.f32.mrf.mxu1  ;;  %v337_v56 = vld [vmem:[#allocation5 + $0x198] sm:$0xff]  ;;  %v9871_v8 = vld [vmem:[%s9340_s30 + $0xa8] sm:$0xff] }
 0x193   : > { %1364 = vmatmul.f32.gmra.mxu0 %v9840_v40  ;;  %1494 = vmatmul.f32.gmra.mxu2 %v9844_v28  ;;  %v1171_v13 = vadd.f32 %v1170_v5, %v1106_v9  ;;  %v9875_v9 = vld [vmem:[%s9340_s30 + $0xb8] sm:$0xff] }
 0x194   : > { %v9847_v29 = vmul.f32 0.125, %v1298_v2  ;;  %1605 = vmatpush.msrb.mxu0 %v337_v56  ;;  %v9892_v56 = vld [vmem:[%s9340_s30 + $0xc8] sm:$0xff] }
 0x195   : > { %1429 = vmatmul.f32.gmra.mxu1 %v9850_v19 }
 0x196   : > { %15247 = vst [vmem:[#allocation19_spill] sm:$0xff] %v9847_v29  ;;  %1559 = vmatmul.f32.gmra.mxu3 %v9854_v17  ;;  %4170 = vrot.lane.b32.xlu0 %v9847_v29, %s9215_s18  ;;  %v1235_v24 = vpop.f32.mrf.mxu2 }
 0x197   : > { %v1236_v52 = vadd.f32 %v1235_v24, %v1171_v13 }
 0x198   : > { %v1108_v12 = vpop.f32.mrf.mxu0 }
 0x199   : > { %v1300_v55 = vpop.f32.mrf.mxu3  ;;  %v1109_v36 = vadd.f32 %v1108_v12, %v9749_v31  ;;  %v9886_v12 = vld [vmem:[%s9340_s30 + $0xd0] sm:$0xff] }
 0x19a   : > { %v1301_v32 = vadd.f32 %v1300_v55, %v1236_v52  ;;  %v1173_v35 = vpop.f32.mrf.mxu1 }
 0x19b   : > { %1367 = vmatmul.f32.gmra.mxu0 %v9861_v60  ;;  %1497 = vmatmul.f32.gmra.mxu2 %v9865_v61  ;;  %v1174_v16 = vadd.f32 %v1173_v35, %v1109_v36  ;;  %v729_v36 = vld [vmem:[#allocation5 + $0xdd8] sm:$0xff] }
 0x19c   : > { %v9868_v58 = vmul.f32 0.125, %v1301_v32  ;;  %v329_v32 = vld [vmem:[#allocation5 + $0x158] sm:$0xff]  ;;  %1799 = vmatpush.msrb.mxu3 %v729_v36  ;;  %v9907_v36 = vld [vmem:[%s9340_s30 + $0xf0] sm:$0xff] }
 0x19d   : > { %1432 = vmatmul.f32.gmra.mxu1 %v9871_v8  ;;  %v473_v35 = vld [vmem:[#allocation5 + $0x5d8] sm:$0xff]  ;;  %1606 = vmatpush.msrb.mxu0 %v329_v32 }
 0x19e   : > { %15248 = vst [vmem:[#allocation20_spill] sm:$0xff] %v9868_v58  ;;  %1562 = vmatmul.f32.gmra.mxu3 %v9875_v9  ;;  %4172 = vrot.lane.b32.xlu2 %v9868_v58, %s9215_s18  ;;  %v1238_v2 = vpop.f32.mrf.mxu2  ;;  %v9970_v58 = vld [vmem:[%s9340_s30 + $0x150] sm:$0xff] }
 0x19f   : > { %v1239_v5 = vadd.f32 %v1238_v2, %v1174_v16  ;;  %1669 = vmatpush.msrb.mxu1 %v473_v35  ;;  %v721_v35 = vld [vmem:[#allocation5 + $0xd98] sm:$0xff] }
 0x1a0   : > { %v1111_v3 = vpop.f32.mrf.mxu0  ;;  %1800 = vmatpush.msrb.mxu3 %v721_v35 }
 0x1a1   : > { %v1303_v4 = vpop.f32.mrf.mxu3  ;;  %v1112_v13 = vadd.f32 %v1111_v3, %v9749_v31 }
 0x1a2   : > { %v1304_v24 = vadd.f32 %v1303_v4, %v1239_v5  ;;  %v1176_v52 = vpop.f32.mrf.mxu1  ;;  %v593_v5 = vld [vmem:[#allocation5 + $0x998] sm:$0xff] }
 0x1a3   : > { %1370 = vmatmul.f32.gmra.mxu0 %v9882_v53  ;;  %1500 = vmatmul.f32.gmra.mxu2 %v9886_v12  ;;  %v1177_v42 = vadd.f32 %v1176_v52, %v1112_v13  ;;  %v9903_v52 = vld [vmem:[%s9340_s30 + $0xe0] sm:$0xff] }
 0x1a4   : > { %v9889_v55 = vmul.f32 0.125, %v1304_v24  ;;  %1735 = vmatpush.msrb.mxu2 %v593_v5 }
 0x1a5   : > { %1435 = vmatmul.f32.gmra.mxu1 %v9892_v56 }
 0x1a6   : > { %15249 = vst [vmem:[#allocation21_spill] sm:$0xff] %v9889_v55  ;;  %1565 = vmatmul.f32.gmra.mxu3 %v9896_v51  ;;  %4174 = vrot.lane.b32.xlu1 %v9889_v55, %s9215_s18  ;;  %v1241_v16 = vpop.f32.mrf.mxu2 }
 0x1a7   : > { %v1242_v2 = vadd.f32 %v1241_v16, %v1177_v42  ;;  %v321_v42 = vld [vmem:[#allocation5 + $0x118] sm:$0xff] }
 0x1a8   : > { %v1114_v11 = vpop.f32.mrf.mxu0  ;;  %v465_v16 = vld [vmem:[#allocation5 + $0x598] sm:$0xff]  ;;  %1607 = vmatpush.msrb.mxu0 %v321_v42 }
 0x1a9   : > { %v1306_v3 = vpop.f32.mrf.mxu3  ;;  %v1115_v4 = vadd.f32 %v1114_v11, %v9749_v31  ;;  %1670 = vmatpush.msrb.mxu1 %v465_v16  ;;  %v713_v16 = vld [vmem:[#allocation5 + $0xd58] sm:$0xff] }
 0x1aa   : > { %v1307_v13 = vadd.f32 %v1306_v3, %v1242_v2  ;;  %v1179_v24 = vpop.f32.mrf.mxu1  ;;  %v9917_v2 = vld [vmem:[%s9340_s30 + $0xf8] sm:$0xff]  ;;  %1801 = vmatpush.msrb.mxu3 %v713_v16 }
 0x1ab   : > { %1373 = vmatmul.f32.gmra.mxu0 %v9903_v52  ;;  %1503 = vmatmul.f32.gmra.mxu2 %v9907_v36  ;;  %v1180_v5 = vadd.f32 %v1179_v24, %v1115_v4 }
 0x1ac   : > { %v9910_v32 = vmul.f32 0.125, %v1307_v13  ;;  %v585_v13 = vld [vmem:[#allocation5 + $0x958] sm:$0xff] }
 0x1ad   : > { %1438 = vmatmul.f32.gmra.mxu1 %v9913_v14  ;;  %1736 = vmatpush.msrb.mxu2 %v585_v13 }
 0x1ae   : > { %15250 = vst [vmem:[#allocation22_spill] sm:$0xff] %v9910_v32  ;;  %1568 = vmatmul.f32.gmra.mxu3 %v9917_v2  ;;  %4176 = vrot.lane.b32.xlu0 %v9910_v32, %s9215_s18  ;;  %v1244_v11 = vpop.f32.mrf.mxu2  ;;  %v9949_v32 = vld [vmem:[%s9340_s30 + $0x130] sm:$0xff] }
 0x1af   : > { %v1245_v3 = vadd.f32 %v1244_v11, %v1180_v5  ;;  %v313_v5 = vld [vmem:[#allocation5 + $0xd8] sm:$0xff] }
 0x1b0   : > { %v1117_v4 = vpop.f32.mrf.mxu0  ;;  %v457_v11 = vld [vmem:[#allocation5 + $0x558] sm:$0xff]  ;;  %1608 = vmatpush.msrb.mxu0 %v313_v5 }
 0x1b1   : > { %v1309_v24 = vpop.f32.mrf.mxu3  ;;  %v1118_v35 = vadd.f32 %v1117_v4, %v9749_v31  ;;  %1671 = vmatpush.msrb.mxu1 %v457_v11  ;;  %v705_v11 = vld [vmem:[#allocation5 + $0xd18] sm:$0xff] }
 0x1b2   : > { %v1310_v62 = vadd.f32 %v1309_v24, %v1245_v3  ;;  %v1182_v48 = vpop.f32.mrf.mxu1  ;;  %v9938_v3 = vld [vmem:[%s9340_s30 + $0x118] sm:$0xff]  ;;  %1802 = vmatpush.msrb.mxu3 %v705_v11 }
 0x1b3   : > { %1376 = vmatmul.f32.gmra.mxu0 %v9924_v15  ;;  %1506 = vmatmul.f32.gmra.mxu2 %v9928_v7  ;;  %v1183_v13 = vadd.f32 %v1182_v48, %v1118_v35  ;;  %v577_v24 = vld [vmem:[#allocation5 + $0x918] sm:$0xff] }
 0x1b4   : > { %v9931_v42 = vmul.f32 0.125, %v1310_v62  ;;  %1737 = vmatpush.msrb.mxu2 %v577_v24 }
 0x1b5   : > { %1441 = vmatmul.f32.gmra.mxu1 %v9934_v50 }
 0x1b6   : > { %15251 = vst [vmem:[#allocation23_spill] sm:$0xff] %v9931_v42  ;;  %1571 = vmatmul.f32.gmra.mxu3 %v9938_v3  ;;  %4178 = vrot.lane.b32.xlu2 %v9931_v42, %s9215_s18  ;;  %v1247_v62 = vpop.f32.mrf.mxu2  ;;  %v9955_v42 = vld [vmem:[%s9340_s30 + $0x128] sm:$0xff] }
 0x1b7   : > { %v1248_v4 = vadd.f32 %v1247_v62, %v1183_v13  ;;  %v305_v13 = vld [vmem:[#allocation5 + $0x98] sm:$0xff] }
 0x1b8   : > { %v1120_v48 = vpop.f32.mrf.mxu0  ;;  %v449_v62 = vld [vmem:[#allocation5 + $0x518] sm:$0xff]  ;;  %1609 = vmatpush.msrb.mxu0 %v305_v13 }
 0x1b9   : > { %v1312_v35 = vpop.f32.mrf.mxu3  ;;  %v1121_v16 = vadd.f32 %v1120_v48, %v9749_v31  ;;  %1672 = vmatpush.msrb.mxu1 %v449_v62  ;;  %v697_v62 = vld [vmem:[#allocation5 + $0xcd8] sm:$0xff] }
 0x1ba   : > { %v1313_v34 = vadd.f32 %v1312_v35, %v1248_v4  ;;  %v1185_v22 = vpop.f32.mrf.mxu1  ;;  %v9959_v4 = vld [vmem:[%s9340_s30 + $0x138] sm:$0xff]  ;;  %1803 = vmatpush.msrb.mxu3 %v697_v62 }
 0x1bb   : > { %1379 = vmatmul.f32.gmra.mxu0 %v9945_v10  ;;  %1509 = vmatmul.f32.gmra.mxu2 %v9949_v32  ;;  %v1186_v24 = vadd.f32 %v1185_v22, %v1121_v16  ;;  %v569_v35 = vld [vmem:[#allocation5 + $0x8d8] sm:$0xff] }
 0x1bc   : > { %v9952_v5 = vmul.f32 0.125, %v1313_v34  ;;  %1738 = vmatpush.msrb.mxu2 %v569_v35 }
 0x1bd   : > { %1444 = vmatmul.f32.gmra.mxu1 %v9955_v42 }
 0x1be   : > { %15252 = vst [vmem:[#allocation24_spill] sm:$0xff] %v9952_v5  ;;  %1574 = vmatmul.f32.gmra.mxu3 %v9959_v4  ;;  %4180 = vrot.lane.b32.xlu1 %v9952_v5, %s9215_s18  ;;  %v1250_v34 = vpop.f32.mrf.mxu2  ;;  %v9976_v5 = vld [vmem:[%s9340_s30 + $0x148] sm:$0xff] }
 0x1bf   : > { %v1251_v48 = vadd.f32 %v1250_v34, %v1186_v24  ;;  %v297_v24 = vld [vmem:[#allocation5 + $0x58] sm:$0xff] }
 0x1c0   : > { %v1123_v22 = vpop.f32.mrf.mxu0  ;;  %v441_v34 = vld [vmem:[#allocation5 + $0x4d8] sm:$0xff]  ;;  %1610 = vmatpush.msrb.mxu0 %v297_v24 }
 0x1c1   : > { %v1315_v16 = vpop.f32.mrf.mxu3  ;;  %v1124_v11 = vadd.f32 %v1123_v22, %v9749_v31  ;;  %1673 = vmatpush.msrb.mxu1 %v441_v34  ;;  %v689_v34 = vld [vmem:[#allocation5 + $0xc98] sm:$0xff] }
 0x1c2   : > { %v1316_v0 = vadd.f32 %v1315_v16, %v1251_v48  ;;  %v1188_v55 = vpop.f32.mrf.mxu1  ;;  %v9980_v48 = vld [vmem:[%s9340_s30 + $0x158] sm:$0xff]  ;;  %1804 = vmatpush.msrb.mxu3 %v689_v34 }
 0x1c3   : > { %1382 = vmatmul.f32.gmra.mxu0 %v9966_v54  ;;  %1512 = vmatmul.f32.gmra.mxu2 %v9970_v58  ;;  %v1189_v35 = vadd.f32 %v1188_v55, %v1124_v11  ;;  %v561_v16 = vld [vmem:[#allocation5 + $0x898] sm:$0xff] }
 0x1c4   : > { %v9973_v13 = vmul.f32 0.125, %v1316_v0  ;;  %1739 = vmatpush.msrb.mxu2 %v561_v16  ;;  %1805 = vmatpush.msrb.mxu3 %v681_v18 }
 0x1c5   : > { %1447 = vmatmul.f32.gmra.mxu1 %v9976_v5 }
 0x1c6   : > { %15253 = vst [vmem:[#allocation25_spill] sm:$0xff] %v9973_v13  ;;  %1577 = vmatmul.f32.gmra.mxu3 %v9980_v48  ;;  %4182 = vrot.lane.b32.xlu0 %v9973_v13, %s9215_s18  ;;  %v1253_v0 = vpop.f32.mrf.mxu2  ;;  %v9997_v13 = vld [vmem:[%s9340_s30 + $0x168] sm:$0xff] }
 0x1c7   : > { %v1254_v22 = vadd.f32 %v1253_v0, %v1189_v35  ;;  %v289_v35 = vld [vmem:[#allocation5 + $0x18] sm:$0xff] }
 0x1c8   : > { %v1126_v55 = vpop.f32.mrf.mxu0  ;;  %v433_v0 = vld [vmem:[#allocation5 + $0x498] sm:$0xff]  ;;  %1611 = vmatpush.msrb.mxu0 %v289_v35 }
 0x1c9   : > { %v1318_v11 = vpop.f32.mrf.mxu3  ;;  %v1127_v62 = vadd.f32 %v1126_v55, %v9749_v31  ;;  %1674 = vmatpush.msrb.mxu1 %v433_v0  ;;  %v410_v0 = vld [vmem:[#allocation5 + $0x3e0] sm:$0xff] }
 0x1ca   : > { %v1319_v46 = vadd.f32 %v1318_v11, %v1254_v22  ;;  %v1191_v29 = vpop.f32.mrf.mxu1  ;;  %v10001_v22 = vld [vmem:[%s9340_s30 + $0x178] sm:$0xff]  ;;  %1856 = vmatpush.msra.mxu0 %v410_v0  ;;  %v402_v0 = vld [vmem:[#allocation5 + $0x3a0] sm:$0xff] }
 0x1cb   : > { %1385 = vmatmul.f32.gmra.mxu0 %v9987_v38  ;;  %1515 = vmatmul.f32.gmra.mxu2 %v9991_v43  ;;  %v1192_v16 = vadd.f32 %v1191_v29, %v1127_v62  ;;  %15255 = vst [vmem:[#allocation39_spill] sm:$0xff] %v10001_v22  ;;  %v553_v11 = vld [vmem:[#allocation5 + $0x858] sm:$0xff] }
 0x1cc   : > { %v9994_v24 = vmul.f32 0.125, %v1319_v46  ;;  %1740 = vmatpush.msrb.mxu2 %v553_v11  ;;  %1675 = vmatpush.msrb.mxu1 %v425_v1  ;;  %v10018_v11 = vld [vmem:[%s9340_s30 + $0x188] sm:$0xff] }
 0x1cd   : > { %1450 = vmatmul.f32.gmra.mxu1 %v9997_v13  ;;  %15258 = vst [vmem:[#allocation42_spill] sm:$0xff] %v10018_v11  ;;  %1857 = vmatpush.msra.mxu0 %v402_v0  ;;  %v10050_v0 = vld [vmem:[%s9340_s30 + $0x1c0] sm:$0xff] }
 0x1ce   : > { %15254 = vst [vmem:[#allocation26_spill] sm:$0xff] %v9994_v24  ;;  %1580 = vmatmul.f32.gmra.mxu3 %v10001_v22  ;;  %4184 = vrot.lane.b32.xlu2 %v9994_v24, %s9215_s18  ;;  %v1256_v55 = vpop.f32.mrf.mxu2  ;;  %v10008_v22 = vld [vmem:[%s9340_s30 + $0x180] sm:$0xff] }
 0x1cf   : > { %v1257_v46 = vadd.f32 %v1256_v55, %v1192_v16  ;;  %v10012_v16 = vld [vmem:[%s9340_s30 + $0x190] sm:$0xff]  ;;  %v417_v55 = vld [vmem:[#allocation5 + $0x418] sm:$0xff]  ;;  %1741 = vmatpush.msrb.mxu2 %v545_v59  ;;  %15265 = vst [vmem:[#allocation49_spill] sm:$0xff] %v10050_v0 }
 0x1d0   : > { %v1129_v29 = vpop.f32.mrf.mxu0  ;;  %15256 = vst [vmem:[#allocation40_spill] sm:$0xff] %v10012_v16  ;;  %1676 = vmatpush.msrb.mxu1 %v417_v55 }
 0x1d1   : > { %v1321_v62 = vpop.f32.mrf.mxu3  ;;  %v1130_v30 = vadd.f32 %v1129_v29, %v9749_v31  ;;  %v673_v29 = vld [vmem:[#allocation5 + $0xc18] sm:$0xff] }
 0x1d2   : > { %v1322_v34 = vadd.f32 %v1321_v62, %v1257_v46  ;;  %v1194_v63 = vpop.f32.mrf.mxu1  ;;  %v10022_v62 = vld [vmem:[%s9340_s30 + $0x198] sm:$0xff]  ;;  %1806 = vmatpush.msrb.mxu3 %v673_v29  ;;  %v10039_v29 = vld [vmem:[%s9340_s30 + $0x1a8] sm:$0xff] }
 0x1d3   : > { %1388 = vmatmul.f32.gmra.mxu0 %v10008_v22  ;;  %1518 = vmatmul.f32.gmra.mxu2 %v10012_v16  ;;  %v1195_v46 = vadd.f32 %v1194_v63, %v1130_v30  ;;  %15259 = vst [vmem:[#allocation43_spill] sm:$0xff] %v10022_v62  ;;  %v522_v16 = vld [vmem:[#allocation5 + $0x760] sm:$0xff] }
 0x1d4   : > { %v10015_v35 = vmul.f32 0.125, %v1322_v34  ;;  %15263 = vst [vmem:[#allocation47_spill] sm:$0xff] %v10039_v29 }
 0x1d5   : > { %1453 = vmatmul.f32.gmra.mxu1 %v10018_v11  ;;  %v10029_v11 = vld [vmem:[%s9340_s30 + $0x1a0] sm:$0xff] }
 0x1d6   : > { %15257 = vst [vmem:[#allocation41_spill] sm:$0xff] %v10015_v35  ;;  %1583 = vmatmul.f32.gmra.mxu3 %v10022_v62  ;;  %4186 = vrot.lane.b32.xlu1 %v10015_v35, %s9215_s18  ;;  %v1259_v18 = vpop.f32.mrf.mxu2  ;;  %v10033_v62 = vld [vmem:[%s9340_s30 + $0x1b0] sm:$0xff] }
 0x1d7   : > { %v1260_v1 = vadd.f32 %v1259_v18, %v1195_v46  ;;  %15260 = vst [vmem:[#allocation44_spill] sm:$0xff] %v10029_v11  ;;  %v10043_v18 = vld [vmem:[%s9340_s30 + $0x1b8] sm:$0xff] }
 0x1d8   : > { %v1132_v30 = vpop.f32.mrf.mxu0  ;;  %15261 = vst [vmem:[#allocation45_spill] sm:$0xff] %v10033_v62 }
 0x1d9   : > { %v1324_v63 = vpop.f32.mrf.mxu3  ;;  %v1133_v59 = vadd.f32 %v1132_v30, %v9749_v31  ;;  %15264 = vst [vmem:[#allocation48_spill] sm:$0xff] %v10043_v18 }
 0x1da   : > { %v1325_v34 = vadd.f32 %v1324_v63, %v1260_v1  ;;  %v1197_v24 = vpop.f32.mrf.mxu1  ;;  %v666_v63 = vld [vmem:[#allocation5 + $0xbe0] sm:$0xff] }
 0x1db   : > { %1391 = vmatmul.f32.gmra.mxu0 %v10029_v11  ;;  %1521 = vmatmul.f32.gmra.mxu2 %v10033_v62  ;;  %v1198_v55 = vadd.f32 %v1197_v24, %v1133_v59  ;;  %v10060_v11 = vld [vmem:[%s9340_s30 + $0x1c8] sm:$0xff] }
 0x1dc   : > { %v10036_v46 = vmul.f32 0.125, %v1325_v34  ;;  %1986 = vmatpush.msra.mxu2 %v666_v63  ;;  %v538_v63 = vld [vmem:[#allocation5 + $0x7e0] sm:$0xff]  ;;  %15268 = vst [vmem:[#allocation52_spill] sm:$0xff] %v10060_v11 }
 0x1dd   : > { %1456 = vmatmul.f32.gmra.mxu1 %v10039_v29 }
 0x1de   : > { %15262 = vst [vmem:[#allocation46_spill] sm:$0xff] %v10036_v46  ;;  %1586 = vmatmul.f32.gmra.mxu3 %v10043_v18  ;;  %4188 = vrot.lane.b32.xlu0 %v10036_v46, %s9215_s18  ;;  %v1262_v1 = vpop.f32.mrf.mxu2  ;;  %v10054_v18 = vld [vmem:[%s9340_s30 + $0x1d0] sm:$0xff] }
 0x1df   : > { %v1263_v30 = vadd.f32 %v1262_v1, %v1198_v55  ;;  %15266 = vst [vmem:[#allocation50_spill] sm:$0xff] %v10054_v18  ;;  %v794_v55 = vld [vmem:[#allocation5 + $0xfe0] sm:$0xff]  ;;  %1921 = vmatpush.msra.mxu1 %v538_v63 }
 0x1e0   : > { %v1135_v24 = vpop.f32.mrf.mxu0  ;;  %v394_v1 = vld [vmem:[#allocation5 + $0x360] sm:$0xff]  ;;  %2051 = vmatpush.msra.mxu3 %v794_v55 }
 0x1e1   : > { %v1327_v59 = vpop.f32.mrf.mxu3  ;;  %v1136_v34 = vadd.f32 %v1135_v24, %v9749_v31  ;;  %1858 = vmatpush.msra.mxu0 %v394_v1  ;;  %v786_v1 = vld [vmem:[#allocation5 + $0xfa0] sm:$0xff] }
 0x1e2   : > { %v1328_v35 = vadd.f32 %v1327_v59, %v1263_v30  ;;  %v1200_v29 = vpop.f32.mrf.mxu1  ;;  %v10064_v30 = vld [vmem:[%s9340_s30 + $0x1d8] sm:$0xff]  ;;  %v658_v59 = vld [vmem:[#allocation5 + $0xba0] sm:$0xff]  ;;  %2052 = vmatpush.msra.mxu3 %v786_v1 }
 0x1e3   : > { %1394 = vmatmul.f32.gmra.mxu0 %v10050_v0  ;;  %1524 = vmatmul.f32.gmra.mxu2 %v10054_v18  ;;  %v1201_v62 = vadd.f32 %v1200_v29, %v1136_v34  ;;  %15269 = vst [vmem:[#allocation53_spill] sm:$0xff] %v10064_v30  ;;  %v10071_v0 = vld [vmem:[%s9340_s30 + $0x1e0] sm:$0xff] }
 0x1e4   : > { %v10057_v46 = vmul.f32 0.125, %v1328_v35  ;;  %1987 = vmatpush.msra.mxu2 %v658_v59  ;;  %15270 = vst [vmem:[#allocation54_spill] sm:$0xff] %v10071_v0  ;;  %v386_v63 = vld [vmem:[#allocation5 + $0x320] sm:$0xff] }
 0x1e5   : > { %1459 = vmatmul.f32.gmra.mxu1 %v10060_v11  ;;  %1859 = vmatpush.msra.mxu0 %v386_v63 }
 0x1e6   : > { %15267 = vst [vmem:[#allocation51_spill] sm:$0xff] %v10057_v46  ;;  %1589 = vmatmul.f32.gmra.mxu3 %v10064_v30  ;;  %4190 = vrot.lane.b32.xlu2 %v10057_v46, %s9215_s18  ;;  %v1265_v35 = vpop.f32.mrf.mxu2  ;;  %v10075_v30 = vld [vmem:[%s9340_s30 + $0x1f0] sm:$0xff]  ;;  %v10081_v46 = vld [vmem:[%s9340_s30 + $0x1e8] sm:$0xff] }
 0x1e7   : > { %v1266_v24 = vadd.f32 %v1265_v35, %v1201_v62  ;;  %15271 = vst [vmem:[#allocation55_spill] sm:$0xff] %v10075_v30  ;;  %v530_v35 = vld [vmem:[#allocation5 + $0x7a0] sm:$0xff] }
 0x1e8   : > { %v1138_v29 = vpop.f32.mrf.mxu0  ;;  %15273 = vst [vmem:[#allocation57_spill] sm:$0xff] %v10081_v46  ;;  %1922 = vmatpush.msra.mxu1 %v530_v35 }
 0x1e9   : > { %v1330_v34 = vpop.f32.mrf.mxu3  ;;  %v1139_v55 = vadd.f32 %v1138_v29, %v9749_v31  ;;  %v10085_v31 = vld [vmem:[%s9340_s30 + $0x1f8] sm:$0xff]  ;;  %v10090_v29 = vld [vmem:[#allocation7] sm:$0xff] }
 0x1ea   : > { %v1331_v11 = vadd.f32 %v1330_v34, %v1266_v24  ;;  %v1203_v18 = vpop.f32.mrf.mxu1  ;;  %15274 = vst [vmem:[#allocation58_spill] sm:$0xff] %v10085_v31  ;;  %1923 = vmatpush.msra.mxu1 %v522_v16 }
 0x1eb   : > { %1397 = vmatmul.f32.gmra.mxu0 %v10071_v0  ;;  %1527 = vmatmul.f32.gmra.mxu2 %v10075_v30  ;;  %v1204_v59 = vadd.f32 %v1203_v18, %v1139_v55  ;;  %15275 = vst [vmem:[#allocation59_spill] sm:$0xff] %v10090_v29  ;;  %v650_v18 = vld [vmem:[#allocation5 + $0xb60] sm:$0xff] }
 0x1ec   : > { %v10078_v62 = vmul.f32 0.125, %v1331_v11  ;;  %v10093_v11 = vperm.slane %v10090_v29, 2  ;;  %1988 = vmatpush.msra.mxu2 %v650_v18  ;;  %v778_v0 = vld [vmem:[#allocation5 + $0xf60] sm:$0xff] }
 0x1ed   : > { %1462 = vmatmul.f32.gmra.mxu1 %v10081_v46  ;;  %v378_v29 = vld [vmem:[#allocation5 + $0x2e0] sm:$0xff]  ;;  %2053 = vmatpush.msra.mxu3 %v778_v0 }
 0x1ee   : > { %15272 = vst [vmem:[#allocation56_spill] sm:$0xff] %v10078_v62  ;;  %1592 = vmatmul.f32.gmra.mxu3 %v10085_v31  ;;  %4192 = vrot.lane.b32.xlu1 %v10078_v62, %s9215_s18  ;;  %v1268_v24 = vpop.f32.mrf.mxu2  ;;  %v370_v0 = vld [vmem:[#allocation5 + $0x2a0] sm:$0xff] }
 0x1ef   : > { %v1269_v34 = vadd.f32 %v1268_v24, %v1204_v59  ;;  %1860 = vmatpush.msra.mxu0 %v378_v29 }
 0x1f0   : > { %v1353_v1 = vpop.f32.mrf.mxu0 }
 0x1f1   : > { %v1333_v55 = vpop.f32.mrf.mxu3  ;;  %v1354_v30 = vadd.f32 %v1353_v1, %v10093_v11  ;;  %1861 = vmatpush.msra.mxu0 %v370_v0 }
 0x1f2   : > { %v1334_v46 = vadd.f32 %v1333_v55, %v1269_v34  ;;  %v1418_v31 = vpop.f32.mrf.mxu1 }
 0x1f3   : > { %1612 = vmatmul.f32.vlgmr.msrb.gmra.mxu0 %v9756_v23  ;;  %1742 = vmatmul.f32.vlgmr.msrb.gmra.mxu2 %v9760_v25  ;;  %v1419_v59 = vadd.f32 %v1418_v31, %v1354_v30  ;;  %v642_v23 = vld [vmem:[#allocation5 + $0xb20] sm:$0xff] }
 0x1f4   : > { %v10098_v62 = vmul.f32 0.125, %v1334_v46  ;;  %1989 = vmatpush.msra.mxu2 %v642_v23  ;;  %v514_v31 = vld [vmem:[#allocation5 + $0x720] sm:$0xff] }
 0x1f5   : > { %1677 = vmatmul.f32.vlgmr.msrb.gmra.mxu1 %v9766_v37  ;;  %v506_v23 = vld [vmem:[#allocation5 + $0x6e0] sm:$0xff] }
 0x1f6   : > { %15276 = vst [vmem:[#allocation60_spill] sm:$0xff] %v10098_v62  ;;  %1807 = vmatmul.f32.vlgmr.msrb.gmra.mxu3 %v9770_v27  ;;  %4194 = vrot.lane.b32.xlu0 %v10098_v62, %s9215_s18  ;;  %v1483_v63 = vpop.f32.mrf.mxu2  ;;  %v770_v27 = vld [vmem:[#allocation5 + $0xf20] sm:$0xff]  ;;  %v547_v62 = vld [vmem:[#allocation5 + $0x828] sm:$0xff] }
 0x1f7   : > { %v1484_v35 = vadd.f32 %v1483_v63, %v1419_v59  ;;  %2054 = vmatpush.msra.mxu3 %v770_v27  ;;  %1924 = vmatpush.msra.mxu1 %v514_v31  ;;  %v354_v31 = vld [vmem:[#allocation5 + $0x220] sm:$0xff] }
 0x1f8   : > { %v1356_v25 = vpop.f32.mrf.mxu0 }
 0x1f9   : > { %v1548_v46 = vpop.f32.mrf.mxu3  ;;  %v1357_v24 = vadd.f32 %v1356_v25, %v10093_v11  ;;  %1925 = vmatpush.msra.mxu1 %v506_v23 }
 0x1fa   : > { %v1549_v34 = vadd.f32 %v1548_v46, %v1484_v35  ;;  %v1421_v30 = vpop.f32.mrf.mxu1  ;;  %v362_v35 = vld [vmem:[#allocation5 + $0x260] sm:$0xff] }
 0x1fb   : > { %1615 = vmatmul.f32.gmra.mxu0 %v9777_v49  ;;  %1745 = vmatmul.f32.gmra.mxu2 %v9781_v41  ;;  %v1422_v18 = vadd.f32 %v1421_v30, %v1357_v24  ;;  %v634_v49 = vld [vmem:[#allocation5 + $0xae0] sm:$0xff] }
 0x1fc   : > { %v10107_v37 = vmul.f32 0.125, %v1549_v34  ;;  %1990 = vmatpush.msra.mxu2 %v634_v49  ;;  %1862 = vmatpush.msra.mxu0 %v362_v35 }
 0x1fd   : > { %1680 = vmatmul.f32.gmra.mxu1 %v9787_v44 }
 0x1fe   : > { %15277 = vst [vmem:[#allocation61_spill] sm:$0xff] %v10107_v37  ;;  %1810 = vmatmul.f32.gmra.mxu3 %v9791_v45  ;;  %5430 = vrot.lane.b32.xlu1 %v10107_v37, %s9215_s18  ;;  %v1486_v16 = vpop.f32.mrf.mxu2  ;;  %v762_v45 = vld [vmem:[#allocation5 + $0xee0] sm:$0xff]  ;;  %v427_v37 = vld [vmem:[#allocation5 + $0x468] sm:$0xff] }
 0x1ff   : > { %v1487_v29 = vadd.f32 %v1486_v16, %v1422_v18  ;;  %2055 = vmatpush.msra.mxu3 %v762_v45  ;;  %v498_v18 = vld [vmem:[#allocation5 + $0x6a0] sm:$0xff]  ;;  %1863 = vmatpush.msra.mxu0 %v354_v31 }
 0x200   : > { %v1359_v41 = vpop.f32.mrf.mxu0  ;;  %1926 = vmatpush.msra.mxu1 %v498_v18  ;;  %v490_v45 = vld [vmem:[#allocation5 + $0x660] sm:$0xff] }
 0x201   : > { %v1551_v55 = vpop.f32.mrf.mxu3  ;;  %v1360_v1 = vadd.f32 %v1359_v41, %v10093_v11 }
 0x202   : > { %v1552_v59 = vadd.f32 %v1551_v55, %v1487_v29  ;;  %v1424_v63 = vpop.f32.mrf.mxu1  ;;  %1927 = vmatpush.msra.mxu1 %v490_v45  ;;  %v322_v45 = vld [vmem:[#allocation5 + $0x120] sm:$0xff] }
 0x203   : > { %1618 = vmatmul.f32.gmra.mxu0 %v9798_v6  ;;  %1748 = vmatmul.f32.gmra.mxu2 %v9802_v47  ;;  %v1425_v25 = vadd.f32 %v1424_v63, %v1360_v1  ;;  %v626_v6 = vld [vmem:[#allocation5 + $0xaa0] sm:$0xff] }
 0x204   : > { %v10116_v44 = vmul.f32 0.125, %v1552_v59  ;;  %1991 = vmatpush.msra.mxu2 %v626_v6  ;;  %v346_v63 = vld [vmem:[#allocation5 + $0x1e0] sm:$0xff] }
 0x205   : > { %1683 = vmatmul.f32.gmra.mxu1 %v9808_v21  ;;  %1864 = vmatpush.msra.mxu0 %v346_v63 }
 0x206   : > { %15278 = vst [vmem:[#allocation62_spill] sm:$0xff] %v10116_v44  ;;  %1813 = vmatmul.f32.gmra.mxu3 %v9812_v57  ;;  %5432 = vrot.lane.b32.xlu2 %v10116_v44, %s9215_s18  ;;  %v1489_v46 = vpop.f32.mrf.mxu2  ;;  %v754_v57 = vld [vmem:[#allocation5 + $0xea0] sm:$0xff] }
 0x207   : > { %v1490_v24 = vadd.f32 %v1489_v46, %v1425_v25  ;;  %2056 = vmatpush.msra.mxu3 %v754_v57 }
 0x208   : > { %v1362_v47 = vpop.f32.mrf.mxu0 }
 0x209   : > { %v1554_v34 = vpop.f32.mrf.mxu3  ;;  %v1363_v30 = vadd.f32 %v1362_v47, %v10093_v11 }
 0x20a   : > { %v1555_v27 = vadd.f32 %v1554_v34, %v1490_v24  ;;  %v1427_v0 = vpop.f32.mrf.mxu1  ;;  %v338_v34 = vld [vmem:[#allocation5 + $0x1a0] sm:$0xff] }
 0x20b   : > { %1621 = vmatmul.f32.gmra.mxu0 %v9819_v33  ;;  %1751 = vmatmul.f32.gmra.mxu2 %v9823_v26  ;;  %v1428_v16 = vadd.f32 %v1427_v0, %v1363_v30  ;;  %v618_v33 = vld [vmem:[#allocation5 + $0xa60] sm:$0xff] }
 0x20c   : > { %v10125_v21 = vmul.f32 0.125, %v1555_v27  ;;  %1992 = vmatpush.msra.mxu2 %v618_v33  ;;  %v482_v30 = vld [vmem:[#allocation5 + $0x620] sm:$0xff]  ;;  %1865 = vmatpush.msra.mxu0 %v338_v34 }
 0x20d   : > { %1686 = vmatmul.f32.gmra.mxu1 %v9829_v39  ;;  %v474_v33 = vld [vmem:[#allocation5 + $0x5e0] sm:$0xff] }
 0x20e   : > { %15279 = vst [vmem:[#allocation63_spill] sm:$0xff] %v10125_v21  ;;  %1816 = vmatmul.f32.gmra.mxu3 %v9833_v20  ;;  %5434 = vrot.lane.b32.xlu0 %v10125_v21, %s9215_s18  ;;  %v1492_v29 = vpop.f32.mrf.mxu2  ;;  %v746_v20 = vld [vmem:[#allocation5 + $0xe60] sm:$0xff]  ;;  %v10479_v21 = vld [vmem:[%s9340_s30 + $0x170] sm:$0xff] }
 0x20f   : > { %v1493_v49 = vadd.f32 %v1492_v29, %v1428_v16  ;;  %2057 = vmatpush.msra.mxu3 %v746_v20  ;;  %1928 = vmatpush.msra.mxu1 %v482_v30 }
 0x210   : > { %v1365_v26 = vpop.f32.mrf.mxu0 }
 0x211   : > { %v1557_v41 = vpop.f32.mrf.mxu3  ;;  %v1366_v55 = vadd.f32 %v1365_v26, %v10093_v11  ;;  %1929 = vmatpush.msra.mxu1 %v474_v33 }
 0x212   : > { %v1558_v1 = vadd.f32 %v1557_v41, %v1493_v49  ;;  %v1430_v59 = vpop.f32.mrf.mxu1  ;;  %v330_v49 = vld [vmem:[#allocation5 + $0x160] sm:$0xff] }
 0x213   : > { %1624 = vmatmul.f32.gmra.mxu0 %v9840_v40  ;;  %1754 = vmatmul.f32.gmra.mxu2 %v9844_v28  ;;  %v1431_v35 = vadd.f32 %v1430_v59, %v1366_v55  ;;  %v610_v40 = vld [vmem:[#allocation5 + $0xa20] sm:$0xff] }
 0x214   : > { %v10134_v39 = vmul.f32 0.125, %v1558_v1  ;;  %1993 = vmatpush.msra.mxu2 %v610_v40  ;;  %1866 = vmatpush.msra.mxu0 %v330_v49 }
 0x215   : > { %1689 = vmatmul.f32.gmra.mxu1 %v9850_v19 }
 0x216   : > { %15280 = vst [vmem:[#allocation64_spill] sm:$0xff] %v10134_v39  ;;  %1819 = vmatmul.f32.gmra.mxu3 %v9854_v17  ;;  %5436 = vrot.lane.b32.xlu1 %v10134_v39, %s9215_s18  ;;  %v1495_v23 = vpop.f32.mrf.mxu2  ;;  %v738_v17 = vld [vmem:[#allocation5 + $0xe20] sm:$0xff] }
 0x217   : > { %v1496_v25 = vadd.f32 %v1495_v23, %v1431_v35  ;;  %2058 = vmatpush.msra.mxu3 %v738_v17  ;;  %v466_v35 = vld [vmem:[#allocation5 + $0x5a0] sm:$0xff]  ;;  %1867 = vmatpush.msra.mxu0 %v322_v45 }
 0x218   : > { %v1368_v28 = vpop.f32.mrf.mxu0  ;;  %1930 = vmatpush.msra.mxu1 %v466_v35  ;;  %v458_v17 = vld [vmem:[#allocation5 + $0x560] sm:$0xff] }
 0x219   : > { %v1560_v46 = vpop.f32.mrf.mxu3  ;;  %v1369_v24 = vadd.f32 %v1368_v28, %v10093_v11  ;;  %v290_v35 = vld [vmem:[#allocation5 + $0x20] sm:$0xff] }
 0x21a   : > { %v1561_v6 = vadd.f32 %v1560_v46, %v1496_v25  ;;  %v1433_v47 = vpop.f32.mrf.mxu1  ;;  %1931 = vmatpush.msra.mxu1 %v458_v17  ;;  %v15289_v17 = vld [vmem:[#allocation40_spill] sm:$0xff] }
 0x21b   : > { %1627 = vmatmul.f32.gmra.mxu0 %v9861_v60  ;;  %1757 = vmatmul.f32.gmra.mxu2 %v9865_v61  ;;  %v1434_v27 = vadd.f32 %v1433_v47, %v1369_v24  ;;  %v602_v60 = vld [vmem:[#allocation5 + $0x9e0] sm:$0xff] }
 0x21c   : > { %v10143_v19 = vmul.f32 0.125, %v1561_v6  ;;  %1994 = vmatpush.msra.mxu2 %v602_v60  ;;  %v314_v47 = vld [vmem:[#allocation5 + $0xe0] sm:$0xff] }
 0x21d   : > { %1692 = vmatmul.f32.gmra.mxu1 %v9871_v8  ;;  %1868 = vmatpush.msra.mxu0 %v314_v47  ;;  %v546_v47 = vld [vmem:[#allocation5 + $0x820] sm:$0xff] }
 0x21e   : > { %15281 = vst [vmem:[#allocation65_spill] sm:$0xff] %v10143_v19  ;;  %1822 = vmatmul.f32.gmra.mxu3 %v9875_v9  ;;  %5438 = vrot.lane.b32.xlu0 %v10143_v19, %s9215_s18  ;;  %v1498_v0 = vpop.f32.mrf.mxu2  ;;  %v730_v9 = vld [vmem:[#allocation5 + $0xde0] sm:$0xff]  ;;  %v10458_v19 = vld [vmem:[%s9340_s30 + $0x150] sm:$0xff] }
 0x21f   : > { %v1499_v57 = vadd.f32 %v1498_v0, %v1434_v27  ;;  %2059 = vmatpush.msra.mxu3 %v730_v9 }
 0x220   : > { %v1371_v61 = vpop.f32.mrf.mxu0 }
 0x221   : > { %v1563_v31 = vpop.f32.mrf.mxu3  ;;  %v1372_v18 = vadd.f32 %v1371_v61, %v10093_v11 }
 0x222   : > { %v1564_v16 = vadd.f32 %v1563_v31, %v1499_v57  ;;  %v1436_v29 = vpop.f32.mrf.mxu1  ;;  %v306_v31 = vld [vmem:[#allocation5 + $0xa0] sm:$0xff] }
 0x223   : > { %1630 = vmatmul.f32.gmra.mxu0 %v9882_v53  ;;  %1760 = vmatmul.f32.gmra.mxu2 %v9886_v12  ;;  %v1437_v26 = vadd.f32 %v1436_v29, %v1372_v18  ;;  %v594_v53 = vld [vmem:[#allocation5 + $0x9a0] sm:$0xff] }
 0x224   : > { %v10152_v8 = vmul.f32 0.125, %v1564_v16  ;;  %1995 = vmatpush.msra.mxu2 %v594_v53  ;;  %v450_v18 = vld [vmem:[#allocation5 + $0x520] sm:$0xff]  ;;  %1869 = vmatpush.msra.mxu0 %v306_v31 }
 0x225   : > { %1695 = vmatmul.f32.gmra.mxu1 %v9892_v56  ;;  %v442_v53 = vld [vmem:[#allocation5 + $0x4e0] sm:$0xff] }
 0x226   : > { %15282 = vst [vmem:[#allocation66_spill] sm:$0xff] %v10152_v8  ;;  %1825 = vmatmul.f32.gmra.mxu3 %v9896_v51  ;;  %5440 = vrot.lane.b32.xlu1 %v10152_v8, %s9215_s18  ;;  %v1501_v41 = vpop.f32.mrf.mxu2  ;;  %v722_v51 = vld [vmem:[#allocation5 + $0xda0] sm:$0xff] }
 0x227   : > { %v1502_v55 = vadd.f32 %v1501_v41, %v1437_v26  ;;  %2060 = vmatpush.msra.mxu3 %v722_v51  ;;  %1932 = vmatpush.msra.mxu1 %v450_v18 }
 0x228   : > { %v1374_v12 = vpop.f32.mrf.mxu0 }
 0x229   : > { %v1566_v1 = vpop.f32.mrf.mxu3  ;;  %v1375_v59 = vadd.f32 %v1374_v12, %v10093_v11  ;;  %1933 = vmatpush.msra.mxu1 %v442_v53 }
 0x22a   : > { %v1567_v20 = vadd.f32 %v1566_v1, %v1502_v55  ;;  %v1439_v63 = vpop.f32.mrf.mxu1  ;;  %v298_v55 = vld [vmem:[#allocation5 + $0x60] sm:$0xff] }
 0x22b   : > { %1633 = vmatmul.f32.gmra.mxu0 %v9903_v52  ;;  %1763 = vmatmul.f32.gmra.mxu2 %v9907_v36  ;;  %v1440_v23 = vadd.f32 %v1439_v63, %v1375_v59  ;;  %v586_v52 = vld [vmem:[#allocation5 + $0x960] sm:$0xff] }
 0x22c   : > { %v10161_v56 = vmul.f32 0.125, %v1567_v20  ;;  %1996 = vmatpush.msra.mxu2 %v586_v52  ;;  %1870 = vmatpush.msra.mxu0 %v298_v55  ;;  %v667_v55 = vld [vmem:[#allocation5 + $0xbe8] sm:$0xff] }
 0x22d   : > { %1698 = vmatmul.f32.gmra.mxu1 %v9913_v14 }
 0x22e   : > { %15283 = vst [vmem:[#allocation67_spill] sm:$0xff] %v10161_v56  ;;  %1828 = vmatmul.f32.gmra.mxu3 %v9917_v2  ;;  %5442 = vrot.lane.b32.xlu2 %v10161_v56, %s9215_s18  ;;  %v1504_v25 = vpop.f32.mrf.mxu2  ;;  %v714_v2 = vld [vmem:[#allocation5 + $0xd60] sm:$0xff]  ;;  %v10437_v56 = vld [vmem:[%s9340_s30 + $0x130] sm:$0xff] }
 0x22f   : > { %v1505_v40 = vadd.f32 %v1504_v25, %v1440_v23  ;;  %2061 = vmatpush.msra.mxu3 %v714_v2  ;;  %v434_v23 = vld [vmem:[#allocation5 + $0x4a0] sm:$0xff]  ;;  %1871 = vmatpush.msra.mxu0 %v290_v35 }
 0x230   : > { %v1377_v36 = vpop.f32.mrf.mxu0  ;;  %1934 = vmatpush.msra.mxu1 %v434_v23  ;;  %v682_v2 = vld [vmem:[#allocation5 + $0xc60] sm:$0xff]  ;;  %v15301_v23 = vld [vmem:[#allocation52_spill] sm:$0xff] }
 0x231   : > { %v1569_v28 = vpop.f32.mrf.mxu3  ;;  %v1378_v46 = vadd.f32 %v1377_v36, %v10093_v11 }
 0x232   : > { %v1570_v24 = vadd.f32 %v1569_v28, %v1505_v40  ;;  %v1442_v6 = vpop.f32.mrf.mxu1  ;;  %v15288_v40 = vld [vmem:[#allocation39_spill] sm:$0xff] }
 0x233   : > { %1636 = vmatmul.f32.gmra.mxu0 %v9924_v15  ;;  %1766 = vmatmul.f32.gmra.mxu2 %v9928_v7  ;;  %v1443_v34 = vadd.f32 %v1442_v6, %v1378_v46  ;;  %v578_v15 = vld [vmem:[#allocation5 + $0x920] sm:$0xff] }
 0x234   : > { %v10170_v14 = vmul.f32 0.125, %v1570_v24  ;;  %1997 = vmatpush.msra.mxu2 %v578_v15 }
 0x235   : > { %1701 = vmatmul.f32.gmra.mxu1 %v9934_v50 }
 0x236   : > { %15284 = vst [vmem:[#allocation68_spill] sm:$0xff] %v10170_v14  ;;  %1831 = vmatmul.f32.gmra.mxu3 %v9938_v3  ;;  %5444 = vrot.lane.b32.xlu0 %v10170_v14, %s9215_s18  ;;  %v1507_v30 = vpop.f32.mrf.mxu2  ;;  %v706_v3 = vld [vmem:[#allocation5 + $0xd20] sm:$0xff] }
 0x237   : > { %v1508_v27 = vadd.f32 %v1507_v30, %v1443_v34  ;;  %2062 = vmatpush.msra.mxu3 %v706_v3  ;;  %v411_v30 = vld [vmem:[#allocation5 + $0x3e8] sm:$0xff] }
 0x238   : > { %v1380_v7 = vpop.f32.mrf.mxu0  ;;  %2116 = vmatpush.msrb.mxu0 %v411_v30  ;;  %v531_v30 = vld [vmem:[#allocation5 + $0x7a8] sm:$0xff] }
 0x239   : > { %v1572_v0 = vpop.f32.mrf.mxu3  ;;  %v1381_v57 = vadd.f32 %v1380_v7, %v10093_v11  ;;  %v15291_v7 = vld [vmem:[#allocation42_spill] sm:$0xff] }
 0x23a   : > { %v1573_v60 = vadd.f32 %v1572_v0, %v1508_v27  ;;  %v1445_v61 = vpop.f32.mrf.mxu1  ;;  %v418_v27 = vld [vmem:[#allocation5 + $0x420] sm:$0xff] }
 0x23b   : > { %1639 = vmatmul.f32.gmra.mxu0 %v9945_v10  ;;  %1769 = vmatmul.f32.gmra.mxu2 %v9949_v32  ;;  %v1446_v16 = vadd.f32 %v1445_v61, %v1381_v57  ;;  %v570_v10 = vld [vmem:[#allocation5 + $0x8e0] sm:$0xff] }
 0x23c   : > { %v10179_v50 = vmul.f32 0.125, %v1573_v60  ;;  %1998 = vmatpush.msra.mxu2 %v570_v10  ;;  %v674_v0 = vld [vmem:[#allocation5 + $0xc20] sm:$0xff] }
 0x23d   : > { %1704 = vmatmul.f32.gmra.mxu1 %v9955_v42  ;;  %v15292_v57 = vld [vmem:[#allocation43_spill] sm:$0xff] }
 0x23e   : > { %15285 = vst [vmem:[#allocation69_spill] sm:$0xff] %v10179_v50  ;;  %1834 = vmatmul.f32.gmra.mxu3 %v9959_v4  ;;  %5446 = vrot.lane.b32.xlu1 %v10179_v50, %s9215_s18  ;;  %v1510_v29 = vpop.f32.mrf.mxu2  ;;  %v698_v4 = vld [vmem:[#allocation5 + $0xce0] sm:$0xff] }
 0x23f   : > { %v1511_v9 = vadd.f32 %v1510_v29, %v1446_v16  ;;  %2063 = vmatpush.msra.mxu3 %v698_v4  ;;  %v15293_v29 = vld [vmem:[#allocation44_spill] sm:$0xff] }
 0x240   : > { %v1383_v32 = vpop.f32.mrf.mxu0 }
 0x241   : > { %v1575_v49 = vpop.f32.mrf.mxu3  ;;  %v1384_v33 = vadd.f32 %v1383_v32, %v10093_v11  ;;  %v403_v32 = vld [vmem:[#allocation5 + $0x3a8] sm:$0xff] }
 0x242   : > { %v1576_v26 = vadd.f32 %v1575_v49, %v1511_v9  ;;  %v1448_v41 = vpop.f32.mrf.mxu1  ;;  %v15294_v9 = vld [vmem:[#allocation45_spill] sm:$0xff]  ;;  %2117 = vmatpush.msrb.mxu0 %v403_v32 }
 0x243   : > { %1642 = vmatmul.f32.gmra.mxu0 %v9966_v54  ;;  %1772 = vmatmul.f32.gmra.mxu2 %v9970_v58  ;;  %v1449_v12 = vadd.f32 %v1448_v41, %v1384_v33  ;;  %v562_v54 = vld [vmem:[#allocation5 + $0x8a0] sm:$0xff] }
 0x244   : > { %v10188_v42 = vmul.f32 0.125, %v1576_v26  ;;  %1999 = vmatpush.msra.mxu2 %v562_v54  ;;  %v15296_v33 = vld [vmem:[#allocation47_spill] sm:$0xff]  ;;  %v15297_v26 = vld [vmem:[#allocation48_spill] sm:$0xff] }
 0x245   : > { %1707 = vmatmul.f32.gmra.mxu1 %v9976_v5 }
 0x246   : > { %15286 = vst [vmem:[#allocation70_spill] sm:$0xff] %v10188_v42  ;;  %1837 = vmatmul.f32.gmra.mxu3 %v9980_v48  ;;  %5448 = vrot.lane.b32.xlu2 %v10188_v42, %s9215_s18  ;;  %v1513_v1 = vpop.f32.mrf.mxu2  ;;  %v690_v48 = vld [vmem:[#allocation5 + $0xca0] sm:$0xff]  ;;  %v10422_v42 = vld [vmem:[%s9340_s30 + $0x108] sm:$0xff] }
 0x247   : > { %v1514_v59 = vadd.f32 %v1513_v1, %v1449_v12  ;;  %2064 = vmatpush.msra.mxu3 %v690_v48  ;;  %v539_v48 = vld [vmem:[#allocation5 + $0x7e8] sm:$0xff] }
 0x248   : > { %v1386_v58 = vpop.f32.mrf.mxu0 }
 0x249   : > { %v1578_v20 = vpop.f32.mrf.mxu3  ;;  %v1387_v63 = vadd.f32 %v1386_v58, %v10093_v11  ;;  %2065 = vmatpush.msra.mxu3 %v682_v2  ;;  %v15298_v58 = vld [vmem:[#allocation49_spill] sm:$0xff]  ;;  %v15304_v2 = vld [vmem:[#allocation55_spill] sm:$0xff] }
 0x24a   : > { %v1579_v51 = vadd.f32 %v1578_v20, %v1514_v59  ;;  %v1451_v45 = vpop.f32.mrf.mxu1  ;;  %v15299_v20 = vld [vmem:[#allocation50_spill] sm:$0xff] }
 0x24b   : > { %1645 = vmatmul.f32.gmra.mxu0 %v9987_v38  ;;  %1775 = vmatmul.f32.gmra.mxu2 %v9991_v43  ;;  %v1452_v25 = vadd.f32 %v1451_v45, %v1387_v63  ;;  %v554_v38 = vld [vmem:[#allocation5 + $0x860] sm:$0xff]  ;;  %v395_v45 = vld [vmem:[#allocation5 + $0x368] sm:$0xff] }
 0x24c   : > { %v10197_v5 = vmul.f32 0.125, %v1579_v51  ;;  %2000 = vmatpush.msra.mxu2 %v554_v38  ;;  %2066 = vmatpush.msra.mxu3 %v674_v0  ;;  %v795_v51 = vld [vmem:[#allocation5 + $0xfe8] sm:$0xff]  ;;  %v15308_v0 = vld [vmem:[#allocation59_spill] sm:$0xff] }
 0x24d   : > { %1710 = vmatmul.f32.gmra.mxu1 %v9997_v13  ;;  %v426_v13 = vld [vmem:[#allocation5 + $0x460] sm:$0xff]  ;;  %2118 = vmatpush.msrb.mxu0 %v395_v45 }
 0x24e   : > { %15287 = vst [vmem:[#allocation71_spill] sm:$0xff] %v10197_v5  ;;  %1840 = vmatmul.f32.gmra.mxu3 %v15288_v40  ;;  %5450 = vrot.lane.b32.xlu0 %v10197_v5, %s9215_s18  ;;  %v1516_v52 = vpop.f32.mrf.mxu2  ;;  %v10265_v45 = vld [vmem:[%s9340_s30 + $0x20] sm:$0xff]  ;;  %v10416_v5 = vld [vmem:[%s9340_s30 + $0x110] sm:$0xff] }
 0x24f   : > { %v1517_v36 = vadd.f32 %v1516_v52, %v1452_v25  ;;  %1935 = vmatpush.msra.mxu1 %v426_v13  ;;  %2001 = vmatpush.msra.mxu2 %v546_v47  ;;  %v15302_v25 = vld [vmem:[#allocation53_spill] sm:$0xff]  ;;  %v787_v47 = vld [vmem:[#allocation5 + $0xfa8] sm:$0xff] }
 0x250   : > { %v1389_v43 = vpop.f32.mrf.mxu0  ;;  %2311 = vmatpush.msrb.mxu3 %v795_v51 }
 0x251   : > { %v1581_v28 = vpop.f32.mrf.mxu3  ;;  %v1390_v46 = vadd.f32 %v1389_v43, %v10093_v11  ;;  %1936 = vmatpush.msra.mxu1 %v418_v27  ;;  %2246 = vmatpush.msrb.mxu2 %v667_v55  ;;  %v10258_v55 = vld [vmem:[%s9340_s30 + $0x18] sm:$0xff] }
 0x252   : > { %v1582_v24 = vadd.f32 %v1581_v28, %v1517_v36  ;;  %v1454_v6 = vpop.f32.mrf.mxu1  ;;  %v659_v36 = vld [vmem:[#allocation5 + $0xba8] sm:$0xff]  ;;  %2312 = vmatpush.msrb.mxu3 %v787_v47 }
 0x253   : > { %1648 = vmatmul.f32.gmra.mxu0 %v10008_v22  ;;  %1778 = vmatmul.f32.gmra.mxu2 %v15289_v17  ;;  %v1455_v15 = vadd.f32 %v1454_v6, %v1390_v46  ;;  %v15303_v6 = vld [vmem:[#allocation54_spill] sm:$0xff]  ;;  %v387_v17 = vld [vmem:[#allocation5 + $0x328] sm:$0xff] }
 0x254   : > { %v10206_v34 = vmul.f32 0.125, %v1582_v24  ;;  %2181 = vmatpush.msrb.mxu1 %v539_v48  ;;  %2247 = vmatpush.msrb.mxu2 %v659_v36  ;;  %v10269_v48 = vld [vmem:[%s9340_s30 + $0x30] sm:$0xff]  ;;  %v10275_v36 = vld [vmem:[%s9340_s30 + $0x28] sm:$0xff] }
 0x255   : > { %1713 = vmatmul.f32.gmra.mxu1 %v15291_v7  ;;  %v15307_v7 = vld [vmem:[#allocation58_spill] sm:$0xff]  ;;  %2119 = vmatpush.msrb.mxu0 %v387_v17 }
 0x256   : > { %15290 = vst [vmem:[#allocation39_spill] sm:$0xff] %v10206_v34  ;;  %1843 = vmatmul.f32.gmra.mxu3 %v15292_v57  ;;  %5452 = vrot.lane.b32.xlu1 %v10206_v34, %s9215_s18  ;;  %v1519_v60 = vpop.f32.mrf.mxu2  ;;  %v10240_v57 = vperm.slane %v15308_v0, 3  ;;  %v507_v0 = vld [vmem:[#allocation5 + $0x6e8] sm:$0xff]  ;;  %v10412_v34 = vld [vmem:[%s9340_s30 + $0x100] sm:$0xff] }
 0x257   : > { %v1520_v22 = vadd.f32 %v1519_v60, %v1455_v15  ;;  %v15306_v15 = vld [vmem:[#allocation57_spill] sm:$0xff]  ;;  %2182 = vmatpush.msrb.mxu1 %v531_v30  ;;  %v10286_v30 = vld [vmem:[%s9340_s30 + $0x40] sm:$0xff] }
 0x258   : > { %v1392_v61 = vpop.f32.mrf.mxu0 }
 0x259   : > { %v1584_v3 = vpop.f32.mrf.mxu3  ;;  %v1393_v31 = vadd.f32 %v1392_v61, %v10093_v11 }
 0x25a   : > { %v1585_v18 = vadd.f32 %v1584_v3, %v1520_v22  ;;  %v1457_v16 = vpop.f32.mrf.mxu1  ;;  %v651_v22 = vld [vmem:[#allocation5 + $0xb68] sm:$0xff] }
 0x25b   : > { %1651 = vmatmul.f32.gmra.mxu0 %v15293_v29  ;;  %1781 = vmatmul.f32.gmra.mxu2 %v15294_v9  ;;  %v1458_v49 = vadd.f32 %v1457_v16, %v1393_v31  ;;  %v10244_v29 = vld [vmem:[%s9340_s30] sm:$0xff]  ;;  %v10248_v9 = vld [vmem:[%s9340_s30 + $0x10] sm:$0xff] }
 0x25c   : > { %v10215_v10 = vmul.f32 0.125, %v1585_v18  ;;  %2248 = vmatpush.msrb.mxu2 %v651_v22  ;;  %v10296_v22 = vld [vmem:[%s9340_s30 + $0x48] sm:$0xff] }
 0x25d   : > { %1716 = vmatmul.f32.gmra.mxu1 %v15296_v33  ;;  %v379_v33 = vld [vmem:[#allocation5 + $0x2e8] sm:$0xff] }
 0x25e   : > { %15295 = vst [vmem:[#allocation40_spill] sm:$0xff] %v10215_v10  ;;  %1846 = vmatmul.f32.gmra.mxu3 %v15297_v26  ;;  %5454 = vrot.lane.b32.xlu2 %v10215_v10, %s9215_s18  ;;  %v1522_v41 = vpop.f32.mrf.mxu2  ;;  %v523_v26 = vld [vmem:[#allocation5 + $0x768] sm:$0xff] }
 0x25f   : > { %v1523_v4 = vadd.f32 %v1522_v41, %v1458_v49  ;;  %v779_v49 = vld [vmem:[#allocation5 + $0xf68] sm:$0xff]  ;;  %2120 = vmatpush.msrb.mxu0 %v379_v33  ;;  %2183 = vmatpush.msrb.mxu1 %v523_v26 }
 0x260   : > { %v1395_v53 = vpop.f32.mrf.mxu0  ;;  %2313 = vmatpush.msrb.mxu3 %v779_v49 }
 0x261   : > { %v1587_v12 = vpop.f32.mrf.mxu3  ;;  %v1396_v1 = vadd.f32 %v1395_v53, %v10093_v11 }
 0x262   : > { %v1588_v59 = vadd.f32 %v1587_v12, %v1523_v4  ;;  %v1460_v54 = vpop.f32.mrf.mxu1  ;;  %v10254_v4 = vld [vmem:[%s9340_s30 + $0x8] sm:$0xff] }
 0x263   : > { %1654 = vmatmul.f32.gmra.mxu0 %v15298_v58  ;;  %1784 = vmatmul.f32.gmra.mxu2 %v15299_v20  ;;  %v1461_v35 = vadd.f32 %v1460_v54, %v1396_v1  ;;  %v643_v1 = vld [vmem:[#allocation5 + $0xb28] sm:$0xff] }
 0x264   : > { %v10224_v63 = vmul.f32 0.125, %v1588_v59  ;;  %2249 = vmatpush.msrb.mxu2 %v643_v1 }
 0x265   : > { %1719 = vmatmul.f32.gmra.mxu1 %v15301_v23  ;;  %v771_v23 = vld [vmem:[#allocation5 + $0xf28] sm:$0xff] }
 0x266   : > { %15300 = vst [vmem:[#allocation42_spill] sm:$0xff] %v10224_v63  ;;  %1849 = vmatmul.f32.gmra.mxu3 %v15302_v25  ;;  %5456 = vrot.lane.b32.xlu0 %v10224_v63, %s9215_s18  ;;  %v1525_v40 = vpop.f32.mrf.mxu2  ;;  %v371_v25 = vld [vmem:[#allocation5 + $0x2a8] sm:$0xff] }
 0x267   : > { %v1526_v52 = vadd.f32 %v1525_v40, %v1461_v35  ;;  %v515_v40 = vld [vmem:[#allocation5 + $0x728] sm:$0xff]  ;;  %2314 = vmatpush.msrb.mxu3 %v771_v23  ;;  %2121 = vmatpush.msrb.mxu0 %v371_v25  ;;  %v10321_v23 = vld [vmem:[%s9340_s30 + $0x78] sm:$0xff] }
 0x268   : > { %v1398_v38 = vpop.f32.mrf.mxu0  ;;  %2184 = vmatpush.msrb.mxu1 %v515_v40 }
 0x269   : > { %v1590_v43 = vpop.f32.mrf.mxu3  ;;  %v1399_v28 = vadd.f32 %v1398_v38, %v10093_v11  ;;  %v10279_v38 = vld [vmem:[%s9340_s30 + $0x38] sm:$0xff] }
 0x26a   : > { %v1591_v46 = vadd.f32 %v1590_v43, %v1526_v52  ;;  %v1463_v24 = vpop.f32.mrf.mxu1  ;;  %2185 = vmatpush.msrb.mxu1 %v507_v0  ;;  %v491_v0 = vld [vmem:[#allocation5 + $0x668] sm:$0xff] }
 0x26b   : > { %1657 = vmatmul.f32.gmra.mxu0 %v15303_v6  ;;  %1787 = vmatmul.f32.gmra.mxu2 %v15304_v2  ;;  %v1464_v27 = vadd.f32 %v1463_v24, %v1399_v28 }
 0x26c   : > { %v10233_v13 = vmul.f32 0.125, %v1591_v46  ;;  %v635_v46 = vld [vmem:[#allocation5 + $0xae8] sm:$0xff] }
 0x26d   : > { %1722 = vmatmul.f32.gmra.mxu1 %v15306_v15  ;;  %2250 = vmatpush.msrb.mxu2 %v635_v46 }
 0x26e   : > { %15305 = vst [vmem:[#allocation43_spill] sm:$0xff] %v10233_v13  ;;  %1852 = vmatmul.f32.gmra.mxu3 %v15307_v7  ;;  %5458 = vrot.lane.b32.xlu1 %v10233_v13, %s9215_s18  ;;  %v1528_v11 = vpop.f32.mrf.mxu2  ;;  %v763_v7 = vld [vmem:[#allocation5 + $0xee8] sm:$0xff] }
 0x26f   : > { %v1529_v60 = vadd.f32 %v1528_v11, %v1464_v27  ;;  %v10290_v27 = vld [vmem:[%s9340_s30 + $0x50] sm:$0xff]  ;;  %v363_v11 = vld [vmem:[#allocation5 + $0x268] sm:$0xff]  ;;  %2315 = vmatpush.msrb.mxu3 %v763_v7 }
 0x270   : > { %v1613_v3 = vpop.f32.mrf.mxu0  ;;  %2122 = vmatpush.msrb.mxu0 %v363_v11  ;;  %v747_v7 = vld [vmem:[#allocation5 + $0xe68] sm:$0xff] }
 0x271   : > { %v1593_v61 = vpop.f32.mrf.mxu3  ;;  %v1614_v18 = vadd.f32 %v1613_v3, %v10240_v57  ;;  %v347_v11 = vld [vmem:[#allocation5 + $0x1e8] sm:$0xff] }
 0x272   : > { %v1594_v31 = vadd.f32 %v1593_v61, %v1529_v60  ;;  %v1678_v16 = vpop.f32.mrf.mxu1  ;;  %v10300_v61 = vld [vmem:[%s9340_s30 + $0x58] sm:$0xff]  ;;  %v10401_v13 = vld [vmem:[%s9340_s30 + $0xe8] sm:$0xff] }
 0x273   : > { %1872 = vmatmul.f32.vlgmr.msra.gmra.mxu0 %v10244_v29  ;;  %2002 = vmatmul.f32.vlgmr.msra.gmra.mxu2 %v10248_v9  ;;  %v1679_v41 = vadd.f32 %v1678_v16, %v1614_v18  ;;  %v627_v18 = vld [vmem:[#allocation5 + $0xaa8] sm:$0xff] }
 0x274   : > { %v10251_v32 = vmul.f32 0.125, %v1594_v31  ;;  %2251 = vmatpush.msrb.mxu2 %v627_v18 }
 0x275   : > { %1937 = vmatmul.f32.vlgmr.msra.gmra.mxu1 %v10254_v4 }
 0x276   : > { %15309 = vst [vmem:[#allocation44_spill] sm:$0xff] %v10251_v32  ;;  %2067 = vmatmul.f32.vlgmr.msra.gmra.mxu3 %v10258_v55  ;;  %5460 = vrot.lane.b32.xlu2 %v10251_v32, %s9215_s18  ;;  %v1743_v53 = vpop.f32.mrf.mxu2  ;;  %v10395_v32 = vld [vmem:[%s9340_s30 + $0xf0] sm:$0xff] }
 0x277   : > { %v1744_v12 = vadd.f32 %v1743_v53, %v1679_v41  ;;  %v10307_v53 = vld [vmem:[%s9340_s30 + $0x60] sm:$0xff] }
 0x278   : > { %v1616_v59 = vpop.f32.mrf.mxu0 }
 0x279   : > { %v1808_v54 = vpop.f32.mrf.mxu3  ;;  %v1617_v58 = vadd.f32 %v1616_v59, %v10240_v57  ;;  %v755_v59 = vld [vmem:[#allocation5 + $0xea8] sm:$0xff] }
 0x27a   : > { %v1809_v20 = vadd.f32 %v1808_v54, %v1744_v12  ;;  %v1681_v51 = vpop.f32.mrf.mxu1  ;;  %v10311_v12 = vld [vmem:[%s9340_s30 + $0x70] sm:$0xff]  ;;  %v355_v54 = vld [vmem:[#allocation5 + $0x228] sm:$0xff]  ;;  %2316 = vmatpush.msrb.mxu3 %v755_v59 }
 0x27b   : > { %1875 = vmatmul.f32.gmra.mxu0 %v10265_v45  ;;  %2005 = vmatmul.f32.gmra.mxu2 %v10269_v48  ;;  %v1682_v52 = vadd.f32 %v1681_v51, %v1617_v58  ;;  %v499_v58 = vld [vmem:[#allocation5 + $0x6a8] sm:$0xff] }
 0x27c   : > { %v10272_v35 = vmul.f32 0.125, %v1809_v20  ;;  %v10317_v51 = vld [vmem:[%s9340_s30 + $0x68] sm:$0xff]  ;;  %2123 = vmatpush.msrb.mxu0 %v355_v54  ;;  %2186 = vmatpush.msrb.mxu1 %v499_v58  ;;  %v10349_v58 = vld [vmem:[%s9340_s30 + $0xa0] sm:$0xff] }
 0x27d   : > { %1940 = vmatmul.f32.gmra.mxu1 %v10275_v36  ;;  %2317 = vmatpush.msrb.mxu3 %v747_v7 }
 0x27e   : > { %15310 = vst [vmem:[#allocation45_spill] sm:$0xff] %v10272_v35  ;;  %2070 = vmatmul.f32.gmra.mxu3 %v10279_v38  ;;  %6616 = vrot.lane.b32.xlu0 %v10272_v35, %s9215_s18  ;;  %v1746_v43 = vpop.f32.mrf.mxu2  ;;  %v683_v35 = vld [vmem:[#allocation5 + $0xc68] sm:$0xff] }
 0x27f   : > { %v1747_v28 = vadd.f32 %v1746_v43, %v1682_v52  ;;  %v619_v52 = vld [vmem:[#allocation5 + $0xa68] sm:$0xff]  ;;  %2124 = vmatpush.msrb.mxu0 %v347_v11  ;;  %2187 = vmatpush.msrb.mxu1 %v491_v0 }
 0x280   : > { %v1619_v24 = vpop.f32.mrf.mxu0  ;;  %2252 = vmatpush.msrb.mxu2 %v619_v52  ;;  %v339_v52 = vld [vmem:[#allocation5 + $0x1a8] sm:$0xff] }
 0x281   : > { %v1811_v6 = vpop.f32.mrf.mxu3  ;;  %v1620_v2 = vadd.f32 %v1619_v24, %v10240_v57  ;;  %2125 = vmatpush.msrb.mxu0 %v339_v52  ;;  %v603_v11 = vld [vmem:[#allocation5 + $0x9e8] sm:$0xff] }
 0x282   : > { %v1812_v47 = vadd.f32 %v1811_v6, %v1747_v28  ;;  %v1684_v17 = vpop.f32.mrf.mxu1 }
 0x283   : > { %1878 = vmatmul.f32.gmra.mxu0 %v10286_v30  ;;  %2008 = vmatmul.f32.gmra.mxu2 %v10290_v27  ;;  %v1685_v60 = vadd.f32 %v1684_v17, %v1620_v2  ;;  %v10328_v2 = vld [vmem:[%s9340_s30 + $0x80] sm:$0xff] }
 0x284   : > { %v10293_v15 = vmul.f32 0.125, %v1812_v47  ;;  %v10332_v47 = vld [vmem:[%s9340_s30 + $0x90] sm:$0xff] }
 0x285   : > { %1943 = vmatmul.f32.gmra.mxu1 %v10296_v22 }
 0x286   : > { %15311 = vst [vmem:[#allocation47_spill] sm:$0xff] %v10293_v15  ;;  %2073 = vmatmul.f32.gmra.mxu3 %v10300_v61  ;;  %6618 = vrot.lane.b32.xlu1 %v10293_v15, %s9215_s18  ;;  %v1749_v3 = vpop.f32.mrf.mxu2 }
 0x287   : > { %v1750_v31 = vadd.f32 %v1749_v3, %v1685_v60  ;;  %v10338_v3 = vld [vmem:[%s9340_s30 + $0x88] sm:$0xff] }
 0x288   : > { %v1622_v16 = vpop.f32.mrf.mxu0 }
 0x289   : > { %v1814_v49 = vpop.f32.mrf.mxu3  ;;  %v1623_v33 = vadd.f32 %v1622_v16, %v10240_v57 }
 0x28a   : > { %v1815_v26 = vadd.f32 %v1814_v49, %v1750_v31  ;;  %v1687_v41 = vpop.f32.mrf.mxu1  ;;  %v10342_v31 = vld [vmem:[%s9340_s30 + $0x98] sm:$0xff]  ;;  %v611_v49 = vld [vmem:[#allocation5 + $0xa28] sm:$0xff] }
 0x28b   : > { %1881 = vmatmul.f32.gmra.mxu0 %v10307_v53  ;;  %2011 = vmatmul.f32.gmra.mxu2 %v10311_v12  ;;  %v1688_v20 = vadd.f32 %v1687_v41, %v1623_v33 }
 0x28c   : > { %v10314_v1 = vmul.f32 0.125, %v1815_v26  ;;  %2253 = vmatpush.msrb.mxu2 %v611_v49 }
 0x28d   : > { %1946 = vmatmul.f32.gmra.mxu1 %v10317_v51 }
 0x28e   : > { %15312 = vst [vmem:[#allocation48_spill] sm:$0xff] %v10314_v1  ;;  %2076 = vmatmul.f32.gmra.mxu3 %v10321_v23  ;;  %6620 = vrot.lane.b32.xlu2 %v10314_v1, %s9215_s18  ;;  %v1752_v25 = vpop.f32.mrf.mxu2  ;;  %v10475_v1 = vld [vmem:[%s9340_s30 + $0x160] sm:$0xff] }
 0x28f   : > { %v1753_v40 = vadd.f32 %v1752_v25, %v1688_v20  ;;  %v10353_v20 = vld [vmem:[%s9340_s30 + $0xb0] sm:$0xff]  ;;  %2254 = vmatpush.msrb.mxu2 %v603_v11  ;;  %v595_v11 = vld [vmem:[#allocation5 + $0x9a8] sm:$0xff] }
 0x290   : > { %v1625_v43 = vpop.f32.mrf.mxu0 }
 0x291   : > { %v1817_v28 = vpop.f32.mrf.mxu3  ;;  %v1626_v46 = vadd.f32 %v1625_v43, %v10240_v57  ;;  %v483_v43 = vld [vmem:[#allocation5 + $0x628] sm:$0xff]  ;;  %2255 = vmatpush.msrb.mxu2 %v595_v11 }
 0x292   : > { %v1818_v24 = vadd.f32 %v1817_v28, %v1753_v40  ;;  %v1690_v6 = vpop.f32.mrf.mxu1  ;;  %v739_v40 = vld [vmem:[#allocation5 + $0xe28] sm:$0xff]  ;;  %2188 = vmatpush.msrb.mxu1 %v483_v43 }
 0x293   : > { %1884 = vmatmul.f32.gmra.mxu0 %v10328_v2  ;;  %2014 = vmatmul.f32.gmra.mxu2 %v10332_v47  ;;  %v1691_v60 = vadd.f32 %v1690_v6, %v1626_v46  ;;  %v10359_v46 = vld [vmem:[%s9340_s30 + $0xa8] sm:$0xff] }
 0x294   : > { %v10335_v17 = vmul.f32 0.125, %v1818_v24  ;;  %2318 = vmatpush.msrb.mxu3 %v739_v40  ;;  %v10363_v24 = vld [vmem:[%s9340_s30 + $0xb8] sm:$0xff]  ;;  %v475_v40 = vld [vmem:[#allocation5 + $0x5e8] sm:$0xff] }
 0x295   : > { %1949 = vmatmul.f32.gmra.mxu1 %v10338_v3  ;;  %v10380_v43 = vld [vmem:[%s9340_s30 + $0xc8] sm:$0xff] }
 0x296   : > { %15313 = vst [vmem:[#allocation49_spill] sm:$0xff] %v10335_v17  ;;  %2079 = vmatmul.f32.gmra.mxu3 %v10342_v31  ;;  %6622 = vrot.lane.b32.xlu0 %v10335_v17, %s9215_s18  ;;  %v1755_v18 = vpop.f32.mrf.mxu2 }
 0x297   : > { %v1756_v16 = vadd.f32 %v1755_v18, %v1691_v60  ;;  %2189 = vmatpush.msrb.mxu1 %v475_v40  ;;  %v723_v40 = vld [vmem:[#allocation5 + $0xda8] sm:$0xff] }
 0x298   : > { %v1628_v33 = vpop.f32.mrf.mxu0 }
 0x299   : > { %v1820_v26 = vpop.f32.mrf.mxu3  ;;  %v1629_v41 = vadd.f32 %v1628_v33, %v10240_v57  ;;  %v10370_v33 = vld [vmem:[%s9340_s30 + $0xc0] sm:$0xff] }
 0x29a   : > { %v1821_v59 = vadd.f32 %v1820_v26, %v1756_v16  ;;  %v1693_v54 = vpop.f32.mrf.mxu1  ;;  %v10374_v26 = vld [vmem:[%s9340_s30 + $0xd0] sm:$0xff] }
 0x29b   : > { %1887 = vmatmul.f32.gmra.mxu0 %v10349_v58  ;;  %2017 = vmatmul.f32.gmra.mxu2 %v10353_v20  ;;  %v1694_v28 = vadd.f32 %v1693_v54, %v1629_v41  ;;  %v331_v54 = vld [vmem:[#allocation5 + $0x168] sm:$0xff] }
 0x29c   : > { %v10356_v25 = vmul.f32 0.125, %v1821_v59  ;;  %v731_v59 = vld [vmem:[#allocation5 + $0xde8] sm:$0xff]  ;;  %2126 = vmatpush.msrb.mxu0 %v331_v54 }
 0x29d   : > { %1952 = vmatmul.f32.gmra.mxu1 %v10359_v46  ;;  %2319 = vmatpush.msrb.mxu3 %v731_v59  ;;  %v10391_v59 = vld [vmem:[%s9340_s30 + $0xe0] sm:$0xff] }
 0x29e   : > { %15314 = vst [vmem:[#allocation50_spill] sm:$0xff] %v10356_v25  ;;  %2082 = vmatmul.f32.gmra.mxu3 %v10363_v24  ;;  %6624 = vrot.lane.b32.xlu1 %v10356_v25, %s9215_s18  ;;  %v1758_v6 = vpop.f32.mrf.mxu2  ;;  %v10454_v25 = vld [vmem:[%s9340_s30 + $0x140] sm:$0xff] }
 0x29f   : > { %v1759_v7 = vadd.f32 %v1758_v6, %v1694_v28  ;;  %v10384_v28 = vld [vmem:[%s9340_s30 + $0xd8] sm:$0xff]  ;;  %2320 = vmatpush.msrb.mxu3 %v723_v40 }
 0x2a0   : > { %v1631_v0 = vpop.f32.mrf.mxu0 }
 0x2a1   : > { %v1823_v60 = vpop.f32.mrf.mxu3  ;;  %v1632_v18 = vadd.f32 %v1631_v0, %v10240_v57 }
 0x2a2   : > { %v1824_v16 = vadd.f32 %v1823_v60, %v1759_v7  ;;  %v1696_v49 = vpop.f32.mrf.mxu1 }
 0x2a3   : > { %1890 = vmatmul.f32.gmra.mxu0 %v10370_v33  ;;  %2020 = vmatmul.f32.gmra.mxu2 %v10374_v26  ;;  %v1697_v52 = vadd.f32 %v1696_v49, %v1632_v18 }
 0x2a4   : > { %v10377_v41 = vmul.f32 0.125, %v1824_v16 }
 0x2a5   : > { %1955 = vmatmul.f32.gmra.mxu1 %v10380_v43 }
 0x2a6   : > { %15315 = vst [vmem:[#allocation52_spill] sm:$0xff] %v10377_v41  ;;  %2085 = vmatmul.f32.gmra.mxu3 %v10384_v28  ;;  %6626 = vrot.lane.b32.xlu1 %v10377_v41, %s9215_s18  ;;  %v1761_v6 = vpop.f32.mrf.mxu2 }
 0x2a7   : > { %v1762_v7 = vadd.f32 %v1761_v6, %v1697_v52  ;;  %v323_v52 = vld [vmem:[#allocation5 + $0x128] sm:$0xff] }
 0x2a8   : > { %v1634_v0 = vpop.f32.mrf.mxu0  ;;  %v467_v6 = vld [vmem:[#allocation5 + $0x5a8] sm:$0xff]  ;;  %2127 = vmatpush.msrb.mxu0 %v323_v52 }
 0x2a9   : > { %v1826_v60 = vpop.f32.mrf.mxu3  ;;  %v1635_v18 = vadd.f32 %v1634_v0, %v10240_v57  ;;  %2190 = vmatpush.msrb.mxu1 %v467_v6  ;;  %v715_v6 = vld [vmem:[#allocation5 + $0xd68] sm:$0xff] }
 0x2aa   : > { %v1827_v16 = vadd.f32 %v1826_v60, %v1762_v7  ;;  %v1699_v49 = vpop.f32.mrf.mxu1  ;;  %v10405_v7 = vld [vmem:[%s9340_s30 + $0xf8] sm:$0xff]  ;;  %2321 = vmatpush.msrb.mxu3 %v715_v6 }
 0x2ab   : > { %1893 = vmatmul.f32.gmra.mxu0 %v10391_v59  ;;  %2023 = vmatmul.f32.gmra.mxu2 %v10395_v32  ;;  %v1700_v11 = vadd.f32 %v1699_v49, %v1635_v18 }
 0x2ac   : > { %v10398_v54 = vmul.f32 0.125, %v1827_v16  ;;  %v587_v16 = vld [vmem:[#allocation5 + $0x968] sm:$0xff] }
 0x2ad   : > { %1958 = vmatmul.f32.gmra.mxu1 %v10401_v13  ;;  %2256 = vmatpush.msrb.mxu2 %v587_v16 }
 0x2ae   : > { %15316 = vst [vmem:[#allocation53_spill] sm:$0xff] %v10398_v54  ;;  %2088 = vmatmul.f32.gmra.mxu3 %v10405_v7  ;;  %6628 = vrot.lane.b32.xlu0 %v10398_v54, %s9215_s18  ;;  %v1764_v0 = vpop.f32.mrf.mxu2  ;;  %v10433_v54 = vld [vmem:[%s9340_s30 + $0x120] sm:$0xff] }
 0x2af   : > { %v1765_v60 = vadd.f32 %v1764_v0, %v1700_v11  ;;  %v315_v11 = vld [vmem:[#allocation5 + $0xe8] sm:$0xff] }
 0x2b0   : > { %v1637_v18 = vpop.f32.mrf.mxu0  ;;  %v459_v0 = vld [vmem:[#allocation5 + $0x568] sm:$0xff]  ;;  %2128 = vmatpush.msrb.mxu0 %v315_v11 }
 0x2b1   : > { %v1829_v49 = vpop.f32.mrf.mxu3  ;;  %v1638_v40 = vadd.f32 %v1637_v18, %v10240_v57  ;;  %2191 = vmatpush.msrb.mxu1 %v459_v0  ;;  %v707_v0 = vld [vmem:[#allocation5 + $0xd28] sm:$0xff] }
 0x2b2   : > { %v1830_v63 = vadd.f32 %v1829_v49, %v1765_v60  ;;  %v1702_v10 = vpop.f32.mrf.mxu1  ;;  %v10426_v60 = vld [vmem:[%s9340_s30 + $0x118] sm:$0xff]  ;;  %v579_v49 = vld [vmem:[#allocation5 + $0x928] sm:$0xff]  ;;  %2322 = vmatpush.msrb.mxu3 %v707_v0 }
 0x2b3   : > { %1896 = vmatmul.f32.gmra.mxu0 %v10412_v34  ;;  %2026 = vmatmul.f32.gmra.mxu2 %v10416_v5  ;;  %v1703_v16 = vadd.f32 %v1702_v10, %v1638_v40 }
 0x2b4   : > { %v10419_v52 = vmul.f32 0.125, %v1830_v63  ;;  %2257 = vmatpush.msrb.mxu2 %v579_v49 }
 0x2b5   : > { %1961 = vmatmul.f32.gmra.mxu1 %v10422_v42 }
 0x2b6   : > { %15317 = vst [vmem:[#allocation54_spill] sm:$0xff] %v10419_v52  ;;  %2091 = vmatmul.f32.gmra.mxu3 %v10426_v60  ;;  %6630 = vrot.lane.b32.xlu1 %v10419_v52, %s9215_s18  ;;  %v1767_v63 = vpop.f32.mrf.mxu2  ;;  %v10443_v52 = vld [vmem:[%s9340_s30 + $0x128] sm:$0xff] }
 0x2b7   : > { %v1768_v18 = vadd.f32 %v1767_v63, %v1703_v16  ;;  %v307_v16 = vld [vmem:[#allocation5 + $0xa8] sm:$0xff] }
 0x2b8   : > { %v1640_v10 = vpop.f32.mrf.mxu0  ;;  %v451_v63 = vld [vmem:[#allocation5 + $0x528] sm:$0xff]  ;;  %2129 = vmatpush.msrb.mxu0 %v307_v16 }
 0x2b9   : > { %v1832_v40 = vpop.f32.mrf.mxu3  ;;  %v1641_v6 = vadd.f32 %v1640_v10, %v10240_v57  ;;  %2192 = vmatpush.msrb.mxu1 %v451_v63  ;;  %v699_v63 = vld [vmem:[#allocation5 + $0xce8] sm:$0xff] }
 0x2ba   : > { %v1833_v50 = vadd.f32 %v1832_v40, %v1768_v18  ;;  %v1705_v14 = vpop.f32.mrf.mxu1  ;;  %v10447_v18 = vld [vmem:[%s9340_s30 + $0x138] sm:$0xff]  ;;  %v571_v40 = vld [vmem:[#allocation5 + $0x8e8] sm:$0xff]  ;;  %2323 = vmatpush.msrb.mxu3 %v699_v63 }
 0x2bb   : > { %1899 = vmatmul.f32.gmra.mxu0 %v10433_v54  ;;  %2029 = vmatmul.f32.gmra.mxu2 %v10437_v56  ;;  %v1706_v49 = vadd.f32 %v1705_v14, %v1641_v6 }
 0x2bc   : > { %v10440_v11 = vmul.f32 0.125, %v1833_v50  ;;  %2258 = vmatpush.msrb.mxu2 %v571_v40 }
 0x2bd   : > { %1964 = vmatmul.f32.gmra.mxu1 %v10443_v52 }
 0x2be   : > { %15318 = vst [vmem:[#allocation55_spill] sm:$0xff] %v10440_v11  ;;  %2094 = vmatmul.f32.gmra.mxu3 %v10447_v18  ;;  %6632 = vrot.lane.b32.xlu2 %v10440_v11, %s9215_s18  ;;  %v1770_v50 = vpop.f32.mrf.mxu2  ;;  %v10464_v11 = vld [vmem:[%s9340_s30 + $0x148] sm:$0xff] }
 0x2bf   : > { %v1771_v10 = vadd.f32 %v1770_v50, %v1706_v49  ;;  %v299_v49 = vld [vmem:[#allocation5 + $0x68] sm:$0xff] }
 0x2c0   : > { %v1643_v14 = vpop.f32.mrf.mxu0  ;;  %v443_v50 = vld [vmem:[#allocation5 + $0x4e8] sm:$0xff]  ;;  %2130 = vmatpush.msrb.mxu0 %v299_v49 }
 0x2c1   : > { %v1835_v6 = vpop.f32.mrf.mxu3  ;;  %v1644_v0 = vadd.f32 %v1643_v14, %v10240_v57  ;;  %2193 = vmatpush.msrb.mxu1 %v443_v50  ;;  %v691_v50 = vld [vmem:[#allocation5 + $0xca8] sm:$0xff] }
 0x2c2   : > { %v1836_v41 = vadd.f32 %v1835_v6, %v1771_v10  ;;  %v1708_v8 = vpop.f32.mrf.mxu1  ;;  %v10468_v10 = vld [vmem:[%s9340_s30 + $0x158] sm:$0xff]  ;;  %v563_v6 = vld [vmem:[#allocation5 + $0x8a8] sm:$0xff]  ;;  %2324 = vmatpush.msrb.mxu3 %v691_v50 }
 0x2c3   : > { %1902 = vmatmul.f32.gmra.mxu0 %v10454_v25  ;;  %2032 = vmatmul.f32.gmra.mxu2 %v10458_v19  ;;  %v1709_v40 = vadd.f32 %v1708_v8, %v1644_v0 }
 0x2c4   : > { %v10461_v16 = vmul.f32 0.125, %v1836_v41  ;;  %2259 = vmatpush.msrb.mxu2 %v563_v6  ;;  %2325 = vmatpush.msrb.mxu3 %v683_v35 }
 0x2c5   : > { %1967 = vmatmul.f32.gmra.mxu1 %v10464_v11 }
 0x2c6   : > { %15319 = vst [vmem:[#allocation57_spill] sm:$0xff] %v10461_v16  ;;  %2097 = vmatmul.f32.gmra.mxu3 %v10468_v10  ;;  %6634 = vrot.lane.b32.xlu0 %v10461_v16, %s9215_s18  ;;  %v1773_v41 = vpop.f32.mrf.mxu2  ;;  %v10485_v16 = vld [vmem:[%s9340_s30 + $0x168] sm:$0xff] }
 0x2c7   : > { %v1774_v14 = vadd.f32 %v1773_v41, %v1709_v40  ;;  %v291_v40 = vld [vmem:[#allocation5 + $0x28] sm:$0xff] }
 0x2c8   : > { %v1646_v8 = vpop.f32.mrf.mxu0  ;;  %v435_v41 = vld [vmem:[#allocation5 + $0x4a8] sm:$0xff]  ;;  %2131 = vmatpush.msrb.mxu0 %v291_v40 }
 0x2c9   : > { %v1838_v0 = vpop.f32.mrf.mxu3  ;;  %v1647_v63 = vadd.f32 %v1646_v8, %v10240_v57  ;;  %2194 = vmatpush.msrb.mxu1 %v435_v41  ;;  %v412_v41 = vld [vmem:[#allocation5 + $0x3f0] sm:$0xff] }
 0x2ca   : > { %v1839_v17 = vadd.f32 %v1838_v0, %v1774_v14  ;;  %v1711_v39 = vpop.f32.mrf.mxu1  ;;  %v10489_v14 = vld [vmem:[%s9340_s30 + $0x178] sm:$0xff]  ;;  %v555_v0 = vld [vmem:[#allocation5 + $0x868] sm:$0xff]  ;;  %2376 = vmatpush.msra.mxu0 %v412_v41  ;;  %v404_v41 = vld [vmem:[#allocation5 + $0x3b0] sm:$0xff] }
 0x2cb   : > { %1905 = vmatmul.f32.gmra.mxu0 %v10475_v1  ;;  %2035 = vmatmul.f32.gmra.mxu2 %v10479_v21  ;;  %v1712_v6 = vadd.f32 %v1711_v39, %v1647_v63  ;;  %15321 = vst [vmem:[#allocation59_spill] sm:$0xff] %v10489_v14 }
 0x2cc   : > { %v10482_v49 = vmul.f32 0.125, %v1839_v17  ;;  %2260 = vmatpush.msrb.mxu2 %v555_v0  ;;  %2195 = vmatpush.msrb.mxu1 %v427_v37  ;;  %v10506_v0 = vld [vmem:[%s9340_s30 + $0x188] sm:$0xff] }
 0x2cd   : > { %1970 = vmatmul.f32.gmra.mxu1 %v10485_v16  ;;  %15323 = vst [vmem:[#allocation73_spill] sm:$0xff] %v10506_v0  ;;  %2377 = vmatpush.msra.mxu0 %v404_v41 }
 0x2ce   : > { %15320 = vst [vmem:[#allocation58_spill] sm:$0xff] %v10482_v49  ;;  %2100 = vmatmul.f32.gmra.mxu3 %v10489_v14  ;;  %6636 = vrot.lane.b32.xlu1 %v10482_v49, %s9215_s18  ;;  %v1776_v8 = vpop.f32.mrf.mxu2  ;;  %v10496_v14 = vld [vmem:[%s9340_s30 + $0x180] sm:$0xff] }
 0x2cf   : > { %v1777_v17 = vadd.f32 %v1776_v8, %v1712_v6  ;;  %v10500_v6 = vld [vmem:[%s9340_s30 + $0x190] sm:$0xff]  ;;  %v419_v8 = vld [vmem:[#allocation5 + $0x428] sm:$0xff]  ;;  %2261 = vmatpush.msrb.mxu2 %v547_v62 }
 0x2d0   : > { %v1649_v39 = vpop.f32.mrf.mxu0  ;;  %2196 = vmatpush.msrb.mxu1 %v419_v8 }
 0x2d1   : > { %v1841_v63 = vpop.f32.mrf.mxu3  ;;  %v1650_v15 = vadd.f32 %v1649_v39, %v10240_v57  ;;  %v675_v39 = vld [vmem:[#allocation5 + $0xc28] sm:$0xff] }
 0x2d2   : > { %v1842_v50 = vadd.f32 %v1841_v63, %v1777_v17  ;;  %v1714_v44 = vpop.f32.mrf.mxu1  ;;  %v10510_v63 = vld [vmem:[%s9340_s30 + $0x198] sm:$0xff]  ;;  %2326 = vmatpush.msrb.mxu3 %v675_v39  ;;  %v10527_v39 = vld [vmem:[%s9340_s30 + $0x1a8] sm:$0xff] }
 0x2d3   : > { %1908 = vmatmul.f32.gmra.mxu0 %v10496_v14  ;;  %2038 = vmatmul.f32.gmra.mxu2 %v10500_v6  ;;  %v1715_v17 = vadd.f32 %v1714_v44, %v1650_v15  ;;  %15324 = vst [vmem:[#allocation74_spill] sm:$0xff] %v10510_v63 }
 0x2d4   : > { %v10503_v40 = vmul.f32 0.125, %v1842_v50  ;;  %15328 = vst [vmem:[#allocation78_spill] sm:$0xff] %v10527_v39 }
 0x2d5   : > { %1973 = vmatmul.f32.gmra.mxu1 %v10506_v0  ;;  %v10517_v0 = vld [vmem:[%s9340_s30 + $0x1a0] sm:$0xff] }
 0x2d6   : > { %15322 = vst [vmem:[#allocation72_spill] sm:$0xff] %v10503_v40  ;;  %2103 = vmatmul.f32.gmra.mxu3 %v10510_v63  ;;  %6638 = vrot.lane.b32.xlu1 %v10503_v40, %s9215_s18  ;;  %v1779_v35 = vpop.f32.mrf.mxu2  ;;  %v10521_v63 = vld [vmem:[%s9340_s30 + $0x1b0] sm:$0xff] }
 0x2d7   : > { %v1780_v37 = vadd.f32 %v1779_v35, %v1715_v17  ;;  %15325 = vst [vmem:[#allocation75_spill] sm:$0xff] %v10517_v0  ;;  %v10531_v35 = vld [vmem:[%s9340_s30 + $0x1b8] sm:$0xff] }
 0x2d8   : > { %v1652_v44 = vpop.f32.mrf.mxu0  ;;  %15326 = vst [vmem:[#allocation76_spill] sm:$0xff] %v10521_v63 }
 0x2d9   : > { %v1844_v15 = vpop.f32.mrf.mxu3  ;;  %v1653_v62 = vadd.f32 %v1652_v44, %v10240_v57  ;;  %15329 = vst [vmem:[#allocation79_spill] sm:$0xff] %v10531_v35 }
 0x2da   : > { %v1845_v50 = vadd.f32 %v1844_v15, %v1780_v37  ;;  %v1717_v49 = vpop.f32.mrf.mxu1  ;;  %v668_v15 = vld [vmem:[#allocation5 + $0xbf0] sm:$0xff] }
 0x2db   : > { %1911 = vmatmul.f32.gmra.mxu0 %v10517_v0  ;;  %2041 = vmatmul.f32.gmra.mxu2 %v10521_v63  ;;  %v1718_v8 = vadd.f32 %v1717_v49, %v1653_v62  ;;  %v10538_v63 = vld [vmem:[%s9340_s30 + $0x1c0] sm:$0xff]  ;;  %v10548_v0 = vld [vmem:[%s9340_s30 + $0x1c8] sm:$0xff] }
 0x2dc   : > { %v10524_v17 = vmul.f32 0.125, %v1845_v50  ;;  %2506 = vmatpush.msra.mxu2 %v668_v15  ;;  %15330 = vst [vmem:[#allocation80_spill] sm:$0xff] %v10538_v63  ;;  %v540_v15 = vld [vmem:[#allocation5 + $0x7f0] sm:$0xff] }
 0x2dd   : > { %1976 = vmatmul.f32.gmra.mxu1 %v10527_v39  ;;  %v796_v39 = vld [vmem:[#allocation5 + $0xff0] sm:$0xff]  ;;  %15333 = vst [vmem:[#allocation83_spill] sm:$0xff] %v10548_v0 }
 0x2de   : > { %15327 = vst [vmem:[#allocation77_spill] sm:$0xff] %v10524_v17  ;;  %2106 = vmatmul.f32.gmra.mxu3 %v10531_v35  ;;  %6640 = vrot.lane.b32.xlu1 %v10524_v17, %s9215_s18  ;;  %v1782_v37 = vpop.f32.mrf.mxu2  ;;  %v10542_v35 = vld [vmem:[%s9340_s30 + $0x1d0] sm:$0xff] }
 0x2df   : > { %v1783_v44 = vadd.f32 %v1782_v37, %v1718_v8  ;;  %15331 = vst [vmem:[#allocation81_spill] sm:$0xff] %v10542_v35  ;;  %2571 = vmatpush.msra.mxu3 %v796_v39  ;;  %v396_v37 = vld [vmem:[#allocation5 + $0x370] sm:$0xff]  ;;  %2441 = vmatpush.msra.mxu1 %v540_v15 }
 0x2e0   : > { %v1655_v49 = vpop.f32.mrf.mxu0  ;;  %2378 = vmatpush.msra.mxu0 %v396_v37  ;;  %v660_v39 = vld [vmem:[#allocation5 + $0xbb0] sm:$0xff] }
 0x2e1   : > { %v1847_v62 = vpop.f32.mrf.mxu3  ;;  %v1656_v50 = vadd.f32 %v1655_v49, %v10240_v57  ;;  %2507 = vmatpush.msra.mxu2 %v660_v39  ;;  %v388_v15 = vld [vmem:[#allocation5 + $0x330] sm:$0xff] }
 0x2e2   : > { %v1848_v40 = vadd.f32 %v1847_v62, %v1783_v44  ;;  %v1720_v41 = vpop.f32.mrf.mxu1  ;;  %v10552_v44 = vld [vmem:[%s9340_s30 + $0x1d8] sm:$0xff]  ;;  %2379 = vmatpush.msra.mxu0 %v388_v15 }
 0x2e3   : > { %1914 = vmatmul.f32.gmra.mxu0 %v10538_v63  ;;  %2044 = vmatmul.f32.gmra.mxu2 %v10542_v35  ;;  %v1721_v17 = vadd.f32 %v1720_v41, %v1656_v50  ;;  %15334 = vst [vmem:[#allocation84_spill] sm:$0xff] %v10552_v44  ;;  %v788_v35 = vld [vmem:[#allocation5 + $0xfb0] sm:$0xff]  ;;  %v10559_v63 = vld [vmem:[%s9340_s30 + $0x1e0] sm:$0xff] }
 0x2e4   : > { %v10545_v8 = vmul.f32 0.125, %v1848_v40  ;;  %15335 = vst [vmem:[#allocation85_spill] sm:$0xff] %v10559_v63  ;;  %2572 = vmatpush.msra.mxu3 %v788_v35 }
 0x2e5   : > { %1979 = vmatmul.f32.gmra.mxu1 %v10548_v0 }
 0x2e6   : > { %15332 = vst [vmem:[#allocation82_spill] sm:$0xff] %v10545_v8  ;;  %2109 = vmatmul.f32.gmra.mxu3 %v10552_v44  ;;  %6642 = vrot.lane.b32.xlu1 %v10545_v8, %s9215_s18  ;;  %v1785_v40 = vpop.f32.mrf.mxu2  ;;  %v10563_v44 = vld [vmem:[%s9340_s30 + $0x1f0] sm:$0xff]  ;;  %v10569_v8 = vld [vmem:[%s9340_s30 + $0x1e8] sm:$0xff] }
 0x2e7   : > { %v1786_v49 = vadd.f32 %v1785_v40, %v1721_v17  ;;  %15336 = vst [vmem:[#allocation86_spill] sm:$0xff] %v10563_v44  ;;  %v532_v40 = vld [vmem:[#allocation5 + $0x7b0] sm:$0xff] }
 0x2e8   : > { %v1658_v62 = vpop.f32.mrf.mxu0  ;;  %15338 = vst [vmem:[#allocation88_spill] sm:$0xff] %v10569_v8  ;;  %2442 = vmatpush.msra.mxu1 %v532_v40  ;;  %v10589_v40 = vpop.permute.xlu1 %2980 }
 0x2e9   : > { %v1850_v50 = vpop.f32.mrf.mxu3  ;;  %v1659_v41 = vadd.f32 %v1658_v62, %v10240_v57  ;;  %v10573_v57 = vld [vmem:[%s9340_s30 + $0x1f8] sm:$0xff]  ;;  %v10578_v62 = vld [vmem:[#allocation7] sm:$0xff]  ;;  %15342 = vst [vmem:[#allocation92_spill] sm:$0xff] %v10589_v40 }
 0x2ea   : > { %v1851_v37 = vadd.f32 %v1850_v50, %v1786_v49  ;;  %v1723_v0 = vpop.f32.mrf.mxu1  ;;  %15339 = vst [vmem:[#allocation89_spill] sm:$0xff] %v10573_v57  ;;  %v10581_v35 = vperm.slane %v10578_v62, 4  ;;  %v11081_v40 = vld [vmem:[%s9340_s30 + $0x120] sm:$0xff] }
 0x2eb   : > { %1917 = vmatmul.f32.gmra.mxu0 %v10559_v63  ;;  %2047 = vmatmul.f32.gmra.mxu2 %v10563_v44  ;;  %v1724_v39 = vadd.f32 %v1723_v0, %v1659_v41  ;;  %15340 = vst [vmem:[#allocation90_spill] sm:$0xff] %v10578_v62  ;;  %v652_v0 = vld [vmem:[#allocation5 + $0xb70] sm:$0xff] }
 0x2ec   : > { %v10566_v17 = vmul.f32 0.125, %v1851_v37  ;;  %2508 = vmatpush.msra.mxu2 %v652_v0  ;;  %v380_v62 = vld [vmem:[#allocation5 + $0x2f0] sm:$0xff]  ;;  %15434 = vst [vmem:[#allocation152_spill] sm:$0xff] %v11081_v40 }
 0x2ed   : > { %1982 = vmatmul.f32.gmra.mxu1 %v10569_v8  ;;  %v524_v63 = vld [vmem:[#allocation5 + $0x770] sm:$0xff]  ;;  %2380 = vmatpush.msra.mxu0 %v380_v62 }
 0x2ee   : > { %15337 = vst [vmem:[#allocation87_spill] sm:$0xff] %v10566_v17  ;;  %2112 = vmatmul.f32.gmra.mxu3 %v10573_v57  ;;  %6644 = vrot.lane.b32.xlu0 %v10566_v17, %s9215_s18  ;;  %v1788_v49 = vpop.f32.mrf.mxu2  ;;  %v780_v57 = vld [vmem:[#allocation5 + $0xf70] sm:$0xff] }
 0x2ef   : > { %v1789_v50 = vadd.f32 %v1788_v49, %v1724_v39  ;;  %2573 = vmatpush.msra.mxu3 %v780_v57  ;;  %2443 = vmatpush.msra.mxu1 %v524_v63 }
 0x2f0   : > { %v1873_v37 = vpop.f32.mrf.mxu0 }
 0x2f1   : > { %v1853_v41 = vpop.f32.mrf.mxu3  ;;  %v1874_v8 = vadd.f32 %v1873_v37, %v10581_v35 }
 0x2f2   : > { %v1854_v15 = vadd.f32 %v1853_v41, %v1789_v50  ;;  %v1938_v44 = vpop.f32.mrf.mxu1 }
 0x2f3   : > { %2132 = vmatmul.f32.vlgmr.msrb.gmra.mxu0 %v10244_v29  ;;  %2262 = vmatmul.f32.vlgmr.msrb.gmra.mxu2 %v10248_v9  ;;  %v1939_v39 = vadd.f32 %v1938_v44, %v1874_v8  ;;  %v644_v29 = vld [vmem:[#allocation5 + $0xb30] sm:$0xff] }
 0x2f4   : > { %v10586_v17 = vmul.f32 0.125, %v1854_v15  ;;  %2509 = vmatpush.msra.mxu2 %v644_v29  ;;  %v516_v44 = vld [vmem:[#allocation5 + $0x730] sm:$0xff]  ;;  %v10603_v15 = vpop.permute.xlu1 %2982 }
 0x2f5   : > { %2197 = vmatmul.f32.vlgmr.msrb.gmra.mxu1 %v10254_v4  ;;  %v772_v4 = vld [vmem:[#allocation5 + $0xf30] sm:$0xff]  ;;  %15343 = vst [vmem:[#allocation93_spill] sm:$0xff] %v10603_v15 }
 0x2f6   : > { %15341 = vst [vmem:[#allocation91_spill] sm:$0xff] %v10586_v17  ;;  %2327 = vmatmul.f32.vlgmr.msrb.gmra.mxu3 %v10258_v55  ;;  %6646 = vrot.lane.b32.xlu2 %v10586_v17, %s9215_s18  ;;  %v2003_v49 = vpop.f32.mrf.mxu2  ;;  %v372_v55 = vld [vmem:[#allocation5 + $0x2b0] sm:$0xff] }
 0x2f7   : > { %v2004_v9 = vadd.f32 %v2003_v49, %v1939_v39  ;;  %2574 = vmatpush.msra.mxu3 %v772_v4  ;;  %2381 = vmatpush.msra.mxu0 %v372_v55  ;;  %v628_v4 = vld [vmem:[#allocation5 + $0xab0] sm:$0xff]  ;;  %v10614_v55 = vpop.permute.xlu0 %2976 }
 0x2f8   : > { %v1876_v50 = vpop.f32.mrf.mxu0  ;;  %2444 = vmatpush.msra.mxu1 %v516_v44  ;;  %15344 = vst [vmem:[#allocation94_spill] sm:$0xff] %v10614_v55  ;;  %v15391_v17 = vld [vmem:[#allocation85_spill] sm:$0xff] }
 0x2f9   : > { %v2068_v57 = vpop.f32.mrf.mxu3  ;;  %v1877_v0 = vadd.f32 %v1876_v50, %v10581_v35  ;;  %v508_v50 = vld [vmem:[#allocation5 + $0x6f0] sm:$0xff] }
 0x2fa   : > { %v1941_v41 = vpop.f32.mrf.mxu1  ;;  %v10597_v8 = vadd.f32 %v2068_v57, %v2004_v9  ;;  %v764_v9 = vld [vmem:[#allocation5 + $0xef0] sm:$0xff]  ;;  %2445 = vmatpush.msra.mxu1 %v508_v50 }
 0x2fb   : > { %2135 = vmatmul.f32.gmra.mxu0 %v10265_v45  ;;  %2265 = vmatmul.f32.gmra.mxu2 %v10269_v48  ;;  %v1942_v62 = vadd.f32 %v1941_v41, %v1877_v0  ;;  %v636_v45 = vld [vmem:[#allocation5 + $0xaf0] sm:$0xff] }
 0x2fc   : > { %2510 = vmatpush.msra.mxu2 %v636_v45  ;;  %2575 = vmatpush.msra.mxu3 %v764_v9  ;;  %v500_v45 = vld [vmem:[#allocation5 + $0x6b0] sm:$0xff] }
 0x2fd   : > { %2200 = vmatmul.f32.gmra.mxu1 %v10275_v36 }
 0x2fe   : > { %2330 = vmatmul.f32.gmra.mxu3 %v10279_v38  ;;  %4196 = vrot.lane.b32.xlu2 %v10597_v8, %s9215_s18  ;;  %v2006_v63 = vpop.f32.mrf.mxu2  ;;  %v364_v38 = vld [vmem:[#allocation5 + $0x270] sm:$0xff] }
 0x2ff   : > { %v2007_v37 = vadd.f32 %v2006_v63, %v1942_v62  ;;  %2382 = vmatpush.msra.mxu0 %v364_v38  ;;  %2511 = vmatpush.msra.mxu2 %v628_v4  ;;  %v10629_v38 = vpop.permute.xlu2 %2984  ;;  %v492_v4 = vld [vmem:[#allocation5 + $0x670] sm:$0xff] }
 0x300   : > { %v1879_v48 = vpop.f32.mrf.mxu0  ;;  %2446 = vmatpush.msra.mxu1 %v500_v45  ;;  %15347 = vst [vmem:[#allocation97_spill] sm:$0xff] %v10629_v38 }
 0x301   : > { %v2071_v39 = vpop.f32.mrf.mxu3  ;;  %v1880_v49 = vadd.f32 %v1879_v48, %v10581_v35 }
 0x302   : > { %v10606_v29 = vadd.f32 %v2071_v39, %v2007_v37  ;;  %v1944_v36 = vpop.f32.mrf.mxu1  ;;  %2447 = vmatpush.msra.mxu1 %v492_v4 }
 0x303   : > { %2138 = vmatmul.f32.gmra.mxu0 %v10286_v30  ;;  %2268 = vmatmul.f32.gmra.mxu2 %v10290_v27  ;;  %v1945_v57 = vadd.f32 %v1944_v36, %v1880_v49  ;;  %v10616_v30 = vpop.permute.xlu1 %2990  ;;  %v620_v36 = vld [vmem:[#allocation5 + $0xa70] sm:$0xff] }
 0x304   : > { %4198 = vrot.lane.b32.xlu1 %v10606_v29, %s9215_s18  ;;  %15345 = vst [vmem:[#allocation95_spill] sm:$0xff] %v10616_v30  ;;  %2512 = vmatpush.msra.mxu2 %v620_v36  ;;  %v484_v36 = vld [vmem:[#allocation5 + $0x630] sm:$0xff] }
 0x305   : > { %2203 = vmatmul.f32.gmra.mxu1 %v10296_v22  ;;  %v756_v22 = vld [vmem:[#allocation5 + $0xeb0] sm:$0xff] }
 0x306   : > { %2333 = vmatmul.f32.gmra.mxu3 %v10300_v61  ;;  %v2009_v0 = vpop.f32.mrf.mxu2  ;;  %v356_v61 = vld [vmem:[#allocation5 + $0x230] sm:$0xff]  ;;  %2448 = vmatpush.msra.mxu1 %v484_v36 }
 0x307   : > { %v2010_v41 = vadd.f32 %v2009_v0, %v1945_v57  ;;  %2576 = vmatpush.msra.mxu3 %v756_v22  ;;  %2383 = vmatpush.msra.mxu0 %v356_v61 }
 0x308   : > { %v1882_v27 = vpop.f32.mrf.mxu0 }
 0x309   : > { %v2074_v44 = vpop.f32.mrf.mxu3  ;;  %v1883_v62 = vadd.f32 %v1882_v27, %v10581_v35 }
 0x30a   : > { %v10619_v63 = vadd.f32 %v2074_v44, %v2010_v41  ;;  %v1947_v37 = vpop.f32.mrf.mxu1  ;;  %v10634_v41 = vpop.permute.xlu0 %2978 }
 0x30b   : > { %2141 = vmatmul.f32.gmra.mxu0 %v10307_v53  ;;  %2271 = vmatmul.f32.gmra.mxu2 %v10311_v12  ;;  %v1948_v48 = vadd.f32 %v1947_v37, %v1883_v62  ;;  %v10627_v9 = vpop.permute.xlu1 %2996  ;;  %15348 = vst [vmem:[#allocation98_spill] sm:$0xff] %v10634_v41  ;;  %v612_v37 = vld [vmem:[#allocation5 + $0xa30] sm:$0xff] }
 0x30c   : > { %4200 = vrot.lane.b32.xlu0 %v10619_v63, %s9215_s18  ;;  %15346 = vst [vmem:[#allocation96_spill] sm:$0xff] %v10627_v9  ;;  %2513 = vmatpush.msra.mxu2 %v612_v37  ;;  %v476_v37 = vld [vmem:[#allocation5 + $0x5f0] sm:$0xff] }
 0x30d   : > { %2206 = vmatmul.f32.gmra.mxu1 %v10317_v51  ;;  %v748_v51 = vld [vmem:[#allocation5 + $0xe70] sm:$0xff] }
 0x30e   : > { %2336 = vmatmul.f32.gmra.mxu3 %v10321_v23  ;;  %v2012_v39 = vpop.f32.mrf.mxu2  ;;  %v348_v23 = vld [vmem:[#allocation5 + $0x1f0] sm:$0xff]  ;;  %2449 = vmatpush.msra.mxu1 %v476_v37 }
 0x30f   : > { %v2013_v49 = vadd.f32 %v2012_v39, %v1948_v48  ;;  %2577 = vmatpush.msra.mxu3 %v748_v51  ;;  %2384 = vmatpush.msra.mxu0 %v348_v23  ;;  %v740_v39 = vld [vmem:[#allocation5 + $0xe30] sm:$0xff] }
 0x310   : > { %v1885_v53 = vpop.f32.mrf.mxu0 }
 0x311   : > { %v2077_v12 = vpop.f32.mrf.mxu3  ;;  %v1886_v50 = vadd.f32 %v1885_v53, %v10581_v35  ;;  %2578 = vmatpush.msra.mxu3 %v740_v39 }
 0x312   : > { %v10632_v57 = vadd.f32 %v2077_v12, %v2013_v49  ;;  %v1950_v0 = vpop.f32.mrf.mxu1  ;;  %v10647_v49 = vpop.permute.xlu0 %2988 }
 0x313   : > { %2144 = vmatmul.f32.gmra.mxu0 %v10328_v2  ;;  %2274 = vmatmul.f32.gmra.mxu2 %v10332_v47  ;;  %v1951_v27 = vadd.f32 %v1950_v0, %v1886_v50  ;;  %v10642_v22 = vpop.permute.xlu1 %3002  ;;  %15350 = vst [vmem:[#allocation100_spill] sm:$0xff] %v10647_v49  ;;  %v11023_v49 = vld [vmem:[%s9340_s30 + $0xe0] sm:$0xff] }
 0x314   : > { %4202 = vrot.lane.b32.xlu2 %v10632_v57, %s9215_s18  ;;  %15349 = vst [vmem:[#allocation99_spill] sm:$0xff] %v10642_v22 }
 0x315   : > { %2209 = vmatmul.f32.gmra.mxu1 %v10338_v3  ;;  %v10651_v3 = vpop.permute.xlu2 %2986  ;;  %15422 = vst [vmem:[#allocation140_spill] sm:$0xff] %v11023_v49 }
 0x316   : > { %2339 = vmatmul.f32.gmra.mxu3 %v10342_v31  ;;  %v2015_v44 = vpop.f32.mrf.mxu2  ;;  %15351 = vst [vmem:[#allocation101_spill] sm:$0xff] %v10651_v3  ;;  %v340_v31 = vld [vmem:[#allocation5 + $0x1b0] sm:$0xff] }
 0x317   : > { %v2016_v62 = vadd.f32 %v2015_v44, %v1951_v27  ;;  %2385 = vmatpush.msra.mxu0 %v340_v31  ;;  %v732_v44 = vld [vmem:[#allocation5 + $0xdf0] sm:$0xff] }
 0x318   : > { %v1888_v2 = vpop.f32.mrf.mxu0  ;;  %2579 = vmatpush.msra.mxu3 %v732_v44 }
 0x319   : > { %v2080_v47 = vpop.f32.mrf.mxu3  ;;  %v1889_v61 = vadd.f32 %v1888_v2, %v10581_v35 }
 0x31a   : > { %v10645_v45 = vadd.f32 %v2080_v47, %v2016_v62  ;;  %v1953_v48 = vpop.f32.mrf.mxu1  ;;  %v10662_v62 = vpop.permute.xlu0 %2994 }
 0x31b   : > { %2147 = vmatmul.f32.gmra.mxu0 %v10349_v58  ;;  %2277 = vmatmul.f32.gmra.mxu2 %v10353_v20  ;;  %v1954_v53 = vadd.f32 %v1953_v48, %v1889_v61  ;;  %v604_v58 = vld [vmem:[#allocation5 + $0x9f0] sm:$0xff]  ;;  %v10657_v0 = vpop.permute.xlu1 %4168  ;;  %15353 = vst [vmem:[#allocation103_spill] sm:$0xff] %v10662_v62 }
 0x31c   : > { %4204 = vrot.lane.b32.xlu1 %v10645_v45, %s9215_s18  ;;  %15352 = vst [vmem:[#allocation102_spill] sm:$0xff] %v10657_v0  ;;  %2514 = vmatpush.msra.mxu2 %v604_v58  ;;  %v468_v58 = vld [vmem:[#allocation5 + $0x5b0] sm:$0xff]  ;;  %v709_v0 = vld [vmem:[#allocation5 + $0xd38] sm:$0xff] }
 0x31d   : > { %2212 = vmatmul.f32.gmra.mxu1 %v10359_v46  ;;  %v10666_v46 = vpop.permute.xlu2 %2992 }
 0x31e   : > { %2342 = vmatmul.f32.gmra.mxu3 %v10363_v24  ;;  %v2018_v12 = vpop.f32.mrf.mxu2  ;;  %15354 = vst [vmem:[#allocation104_spill] sm:$0xff] %v10666_v46  ;;  %v332_v24 = vld [vmem:[#allocation5 + $0x170] sm:$0xff]  ;;  %2450 = vmatpush.msra.mxu1 %v468_v58  ;;  %v10992_v46 = vld [vmem:[%s9340_s30 + $0xc0] sm:$0xff] }
 0x31f   : > { %v2019_v50 = vadd.f32 %v2018_v12, %v1954_v53  ;;  %2386 = vmatpush.msra.mxu0 %v332_v24  ;;  %v724_v12 = vld [vmem:[#allocation5 + $0xdb0] sm:$0xff] }
 0x320   : > { %v1891_v20 = vpop.f32.mrf.mxu0  ;;  %2580 = vmatpush.msra.mxu3 %v724_v12 }
 0x321   : > { %v2083_v51 = vpop.f32.mrf.mxu3  ;;  %v1892_v23 = vadd.f32 %v1891_v20, %v10581_v35 }
 0x322   : > { %v10660_v4 = vadd.f32 %v2083_v51, %v2019_v50  ;;  %v1956_v27 = vpop.f32.mrf.mxu1  ;;  %v10677_v50 = vpop.permute.xlu0 %3000  ;;  %v316_v51 = vld [vmem:[#allocation5 + $0xf0] sm:$0xff] }
 0x323   : > { %2150 = vmatmul.f32.gmra.mxu0 %v10370_v33  ;;  %2280 = vmatmul.f32.gmra.mxu2 %v10374_v26  ;;  %v1957_v2 = vadd.f32 %v1956_v27, %v1892_v23  ;;  %v596_v33 = vld [vmem:[#allocation5 + $0x9b0] sm:$0xff]  ;;  %v10672_v48 = vpop.permute.xlu1 %4174  ;;  %15356 = vst [vmem:[#allocation106_spill] sm:$0xff] %v10677_v50  ;;  %v749_v50 = vld [vmem:[#allocation5 + $0xe78] sm:$0xff] }
 0x324   : > { %4206 = vrot.lane.b32.xlu0 %v10660_v4, %s9215_s18  ;;  %15355 = vst [vmem:[#allocation105_spill] sm:$0xff] %v10672_v48  ;;  %2515 = vmatpush.msra.mxu2 %v596_v33  ;;  %v588_v27 = vld [vmem:[#allocation5 + $0x970] sm:$0xff]  ;;  %v557_v48 = vld [vmem:[#allocation5 + $0x878] sm:$0xff] }
 0x325   : > { %2215 = vmatmul.f32.gmra.mxu1 %v10380_v43  ;;  %v324_v43 = vld [vmem:[#allocation5 + $0x130] sm:$0xff] }
 0x326   : > { %2345 = vmatmul.f32.gmra.mxu3 %v10384_v28  ;;  %v2021_v47 = vpop.f32.mrf.mxu2  ;;  %v10681_v28 = vpop.permute.xlu2 %2998  ;;  %2387 = vmatpush.msra.mxu0 %v324_v43  ;;  %v716_v33 = vld [vmem:[#allocation5 + $0xd70] sm:$0xff] }
 0x327   : > { %v2022_v61 = vadd.f32 %v2021_v47, %v1957_v2  ;;  %15357 = vst [vmem:[#allocation107_spill] sm:$0xff] %v10681_v28  ;;  %2516 = vmatpush.msra.mxu2 %v588_v27  ;;  %v300_v2 = vld [vmem:[#allocation5 + $0x70] sm:$0xff]  ;;  %2581 = vmatpush.msra.mxu3 %v716_v33  ;;  %v381_v33 = vld [vmem:[#allocation5 + $0x2f8] sm:$0xff]  ;;  %v10932_v28 = vld [vmem:[%s9340_s30 + $0x80] sm:$0xff] }
 0x328   : > { %v1894_v26 = vpop.f32.mrf.mxu0  ;;  %2388 = vmatpush.msra.mxu0 %v316_v51 }
 0x329   : > { %v2086_v39 = vpop.f32.mrf.mxu3  ;;  %v1895_v31 = vadd.f32 %v1894_v26, %v10581_v35  ;;  %v292_v26 = vld [vmem:[#allocation5 + $0x30] sm:$0xff] }
 0x32a   : > { %v10675_v36 = vadd.f32 %v2086_v39, %v2022_v61  ;;  %v1959_v53 = vpop.f32.mrf.mxu1 }
 0x32b   : > { %2153 = vmatmul.f32.gmra.mxu0 %v10391_v59  ;;  %2283 = vmatmul.f32.gmra.mxu2 %v10395_v32  ;;  %v1960_v20 = vadd.f32 %v1959_v53, %v1895_v31  ;;  %v308_v32 = vld [vmem:[#allocation5 + $0xb0] sm:$0xff]  ;;  %v10687_v44 = vpop.permute.xlu1 %4180  ;;  %v413_v53 = vld [vmem:[#allocation5 + $0x3f8] sm:$0xff] }
 0x32c   : > { %4208 = vrot.lane.b32.xlu2 %v10675_v36, %s9215_s18  ;;  %15358 = vst [vmem:[#allocation108_spill] sm:$0xff] %v10687_v44  ;;  %2389 = vmatpush.msra.mxu0 %v308_v32  ;;  %v460_v31 = vld [vmem:[#allocation5 + $0x570] sm:$0xff]  ;;  %v733_v44 = vld [vmem:[#allocation5 + $0xdf8] sm:$0xff] }
 0x32d   : > { %2218 = vmatmul.f32.gmra.mxu1 %v10401_v13 }
 0x32e   : > { %2348 = vmatmul.f32.gmra.mxu3 %v10405_v7  ;;  %v2024_v23 = vpop.f32.mrf.mxu2  ;;  %v10692_v7 = vpop.permute.xlu0 %3006  ;;  %2390 = vmatpush.msra.mxu0 %v300_v2  ;;  %v452_v2 = vld [vmem:[#allocation5 + $0x530] sm:$0xff] }
 0x32f   : > { %v2025_v59 = vadd.f32 %v2024_v23, %v1960_v20  ;;  %15359 = vst [vmem:[#allocation109_spill] sm:$0xff] %v10692_v7  ;;  %v10696_v39 = vpop.permute.xlu2 %3004  ;;  %2451 = vmatpush.msra.mxu1 %v460_v31  ;;  %v572_v31 = vld [vmem:[#allocation5 + $0x8f0] sm:$0xff] }
 0x330   : > { %v1897_v24 = vpop.f32.mrf.mxu0  ;;  %15360 = vst [vmem:[#allocation110_spill] sm:$0xff] %v10696_v39  ;;  %2391 = vmatpush.msra.mxu0 %v292_v26  ;;  %v373_v26 = vld [vmem:[#allocation5 + $0x2b8] sm:$0xff]  ;;  %v10870_v39 = vld [vmem:[%s9340_s30 + $0x40] sm:$0xff] }
 0x331   : > { %v2089_v37 = vpop.f32.mrf.mxu3  ;;  %v1898_v47 = vadd.f32 %v1897_v24, %v10581_v35  ;;  %v389_v24 = vld [vmem:[#allocation5 + $0x338] sm:$0xff]  ;;  %2452 = vmatpush.msra.mxu1 %v452_v2  ;;  %v564_v2 = vld [vmem:[#allocation5 + $0x8b0] sm:$0xff] }
 0x332   : > { %v10690_v13 = vadd.f32 %v2089_v37, %v2025_v59  ;;  %v1962_v61 = vpop.f32.mrf.mxu1  ;;  %2636 = vmatpush.msrb.mxu0 %v413_v53  ;;  %v397_v59 = vld [vmem:[#allocation5 + $0x378] sm:$0xff] }
 0x333   : > { %2156 = vmatmul.f32.gmra.mxu0 %v10412_v34  ;;  %2286 = vmatmul.f32.gmra.mxu2 %v10416_v5  ;;  %v1963_v12 = vadd.f32 %v1962_v61, %v1898_v47  ;;  %v405_v34 = vld [vmem:[#allocation5 + $0x3b8] sm:$0xff]  ;;  %v580_v5 = vld [vmem:[#allocation5 + $0x930] sm:$0xff]  ;;  %v10702_v20 = vpop.permute.xlu1 %4186 }
 0x334   : > { %4210 = vrot.lane.b32.xlu1 %v10690_v13, %s9215_s18  ;;  %15361 = vst [vmem:[#allocation111_spill] sm:$0xff] %v10702_v20  ;;  %2517 = vmatpush.msra.mxu2 %v580_v5 }
 0x335   : > { %2221 = vmatmul.f32.gmra.mxu1 %v10422_v42  ;;  %2637 = vmatpush.msrb.mxu0 %v405_v34  ;;  %v365_v34 = vld [vmem:[#allocation5 + $0x278] sm:$0xff] }
 0x336   : > { %2351 = vmatmul.f32.gmra.mxu3 %v10426_v60  ;;  %v2027_v43 = vpop.f32.mrf.mxu2  ;;  %v708_v60 = vld [vmem:[#allocation5 + $0xd30] sm:$0xff]  ;;  %v10713_v47 = vpop.permute.xlu0 %4164  ;;  %2518 = vmatpush.msra.mxu2 %v572_v31 }
 0x337   : > { %v2028_v58 = vadd.f32 %v2027_v43, %v1963_v12  ;;  %v10709_v37 = vpop.permute.xlu2 %4166  ;;  %2638 = vmatpush.msrb.mxu0 %v397_v59  ;;  %15363 = vst [vmem:[#allocation113_spill] sm:$0xff] %v10713_v47  ;;  %2582 = vmatpush.msra.mxu3 %v708_v60  ;;  %v444_v59 = vld [vmem:[#allocation5 + $0x4f0] sm:$0xff]  ;;  %v349_v60 = vld [vmem:[#allocation5 + $0x1f8] sm:$0xff] }
 0x338   : > { %v1900_v51 = vpop.f32.mrf.mxu0  ;;  %15362 = vst [vmem:[#allocation112_spill] sm:$0xff] %v10709_v37  ;;  %2453 = vmatpush.msra.mxu1 %v444_v59  ;;  %2519 = vmatpush.msra.mxu2 %v564_v2  ;;  %v309_v59 = vld [vmem:[#allocation5 + $0xb8] sm:$0xff]  ;;  %v11085_v37 = vld [vmem:[%s9340_s30 + $0x130] sm:$0xff] }
 0x339   : > { %v2092_v23 = vpop.f32.mrf.mxu3  ;;  %v1901_v32 = vadd.f32 %v1900_v51, %v10581_v35  ;;  %2639 = vmatpush.msrb.mxu0 %v389_v24  ;;  %v357_v51 = vld [vmem:[#allocation5 + $0x238] sm:$0xff]  ;;  %15435 = vst [vmem:[#allocation153_spill] sm:$0xff] %v11085_v37 }
 0x33a   : > { %v10705_v42 = vadd.f32 %v2092_v23, %v2028_v58  ;;  %v1965_v27 = vpop.f32.mrf.mxu1  ;;  %v341_v24 = vld [vmem:[#allocation5 + $0x1b8] sm:$0xff] }
 0x33b   : > { %2159 = vmatmul.f32.gmra.mxu0 %v10433_v54  ;;  %2289 = vmatmul.f32.gmra.mxu2 %v10437_v56  ;;  %v1966_v61 = vadd.f32 %v1965_v27, %v1901_v32  ;;  %v10717_v53 = vpop.permute.xlu1 %4192 }
 0x33c   : > { %4212 = vrot.lane.b32.xlu0 %v10705_v42, %s9215_s18  ;;  %15364 = vst [vmem:[#allocation114_spill] sm:$0xff] %v10717_v53  ;;  %2640 = vmatpush.msrb.mxu0 %v381_v33  ;;  %v765_v53 = vld [vmem:[#allocation5 + $0xef8] sm:$0xff] }
 0x33d   : > { %2224 = vmatmul.f32.gmra.mxu1 %v10443_v52 }
 0x33e   : > { %2354 = vmatmul.f32.gmra.mxu3 %v10447_v18  ;;  %v2030_v54 = vpop.f32.mrf.mxu2  ;;  %2641 = vmatpush.msrb.mxu0 %v373_v26  ;;  %v700_v18 = vld [vmem:[#allocation5 + $0xcf0] sm:$0xff]  ;;  %v10728_v32 = vpop.permute.xlu0 %4170 }
 0x33f   : > { %v2031_v56 = vadd.f32 %v2030_v54, %v1966_v61  ;;  %v10724_v23 = vpop.permute.xlu2 %4172  ;;  %15366 = vst [vmem:[#allocation116_spill] sm:$0xff] %v10728_v32  ;;  %2583 = vmatpush.msra.mxu3 %v700_v18  ;;  %v317_v18 = vld [vmem:[#allocation5 + $0xf8] sm:$0xff] }
 0x340   : > { %v1903_v12 = vpop.f32.mrf.mxu0  ;;  %15365 = vst [vmem:[#allocation115_spill] sm:$0xff] %v10724_v23  ;;  %2642 = vmatpush.msrb.mxu0 %v365_v34  ;;  %v436_v34 = vld [vmem:[#allocation5 + $0x4b0] sm:$0xff]  ;;  %v717_v32 = vld [vmem:[#allocation5 + $0xd78] sm:$0xff] }
 0x341   : > { %v2095_v43 = vpop.f32.mrf.mxu3  ;;  %v1904_v58 = vadd.f32 %v1903_v12, %v10581_v35  ;;  %v325_v12 = vld [vmem:[#allocation5 + $0x138] sm:$0xff]  ;;  %2454 = vmatpush.msra.mxu1 %v436_v34 }
 0x342   : > { %v10720_v52 = vadd.f32 %v2095_v43, %v2031_v56  ;;  %v1968_v5 = vpop.f32.mrf.mxu1  ;;  %2643 = vmatpush.msrb.mxu0 %v357_v51  ;;  %v333_v56 = vld [vmem:[#allocation5 + $0x178] sm:$0xff]  ;;  %v15370_v51 = vld [vmem:[#allocation59_spill] sm:$0xff] }
 0x343   : > { %2162 = vmatmul.f32.gmra.mxu0 %v10454_v25  ;;  %2292 = vmatmul.f32.gmra.mxu2 %v10458_v19  ;;  %v1969_v27 = vadd.f32 %v1968_v5, %v1904_v58  ;;  %v10732_v61 = vpop.permute.xlu1 %5430 }
 0x344   : > { %4214 = vrot.lane.b32.xlu2 %v10720_v52, %s9215_s18  ;;  %15367 = vst [vmem:[#allocation117_spill] sm:$0xff] %v10732_v61  ;;  %2644 = vmatpush.msrb.mxu0 %v349_v60  ;;  %v789_v61 = vld [vmem:[#allocation5 + $0xfb8] sm:$0xff] }
 0x345   : > { %2227 = vmatmul.f32.gmra.mxu1 %v10464_v11 }
 0x346   : > { %2357 = vmatmul.f32.gmra.mxu3 %v10468_v10  ;;  %v2033_v25 = vpop.f32.mrf.mxu2  ;;  %2645 = vmatpush.msrb.mxu0 %v341_v24  ;;  %v692_v10 = vld [vmem:[#allocation5 + $0xcb0] sm:$0xff]  ;;  %v10743_v58 = vpop.permute.xlu0 %4176  ;;  %v301_v24 = vld [vmem:[#allocation5 + $0x78] sm:$0xff] }
 0x347   : > { %v2034_v19 = vadd.f32 %v2033_v25, %v1969_v27  ;;  %v10739_v43 = vpop.permute.xlu2 %4178  ;;  %15369 = vst [vmem:[#allocation119_spill] sm:$0xff] %v10743_v58  ;;  %2584 = vmatpush.msra.mxu3 %v692_v10  ;;  %v556_v27 = vld [vmem:[#allocation5 + $0x870] sm:$0xff]  ;;  %v293_v10 = vld [vmem:[#allocation5 + $0x38] sm:$0xff] }
 0x348   : > { %v1906_v33 = vpop.f32.mrf.mxu0  ;;  %15368 = vst [vmem:[#allocation118_spill] sm:$0xff] %v10739_v43  ;;  %2646 = vmatpush.msrb.mxu0 %v333_v56  ;;  %2520 = vmatpush.msra.mxu2 %v556_v27  ;;  %v428_v56 = vld [vmem:[#allocation5 + $0x470] sm:$0xff]  ;;  %v581_v43 = vld [vmem:[#allocation5 + $0x938] sm:$0xff] }
 0x349   : > { %v2098_v54 = vpop.f32.mrf.mxu3  ;;  %v1907_v26 = vadd.f32 %v1906_v33, %v10581_v35  ;;  %2455 = vmatpush.msra.mxu1 %v428_v56  ;;  %v573_v58 = vld [vmem:[#allocation5 + $0x8f8] sm:$0xff] }
 0x34a   : > { %v10735_v11 = vadd.f32 %v2098_v54, %v2034_v19  ;;  %v1971_v31 = vpop.f32.mrf.mxu1  ;;  %2647 = vmatpush.msrb.mxu0 %v325_v12  ;;  %v684_v54 = vld [vmem:[#allocation5 + $0xc70] sm:$0xff] }
 0x34b   : > { %2165 = vmatmul.f32.gmra.mxu0 %v10475_v1  ;;  %2295 = vmatmul.f32.gmra.mxu2 %v10479_v21  ;;  %v1972_v5 = vadd.f32 %v1971_v31, %v1907_v26  ;;  %v10747_v60 = vpop.permute.xlu1 %5436  ;;  %v548_v31 = vld [vmem:[#allocation5 + $0x830] sm:$0xff] }
 0x34c   : > { %4216 = vrot.lane.b32.xlu1 %v10735_v11, %s9215_s18  ;;  %15371 = vst [vmem:[#allocation59_spill] sm:$0xff] %v10747_v60  ;;  %2648 = vmatpush.msrb.mxu0 %v317_v18  ;;  %v420_v18 = vld [vmem:[#allocation5 + $0x430] sm:$0xff] }
 0x34d   : > { %2230 = vmatmul.f32.gmra.mxu1 %v10485_v16  ;;  %2585 = vmatpush.msra.mxu3 %v684_v54 }
 0x34e   : > { %2360 = vmatmul.f32.gmra.mxu3 %v15370_v51  ;;  %v2036_v1 = vpop.f32.mrf.mxu2  ;;  %2649 = vmatpush.msrb.mxu0 %v309_v59  ;;  %v10758_v12 = vpop.permute.xlu0 %4182  ;;  %v676_v51 = vld [vmem:[#allocation5 + $0xc30] sm:$0xff] }
 0x34f   : > { %v2037_v21 = vadd.f32 %v2036_v1, %v1972_v5  ;;  %v10754_v26 = vpop.permute.xlu2 %4184  ;;  %15373 = vst [vmem:[#allocation121_spill] sm:$0xff] %v10758_v12  ;;  %v15374_v5 = vld [vmem:[#allocation73_spill] sm:$0xff]  ;;  %2521 = vmatpush.msra.mxu2 %v548_v31  ;;  %2456 = vmatpush.msra.mxu1 %v420_v18  ;;  %v10963_v12 = vld [vmem:[%s9340_s30 + $0xa0] sm:$0xff] }
 0x350   : > { %v1909_v25 = vpop.f32.mrf.mxu0  ;;  %15372 = vst [vmem:[#allocation120_spill] sm:$0xff] %v10754_v26  ;;  %2650 = vmatpush.msrb.mxu0 %v301_v24  ;;  %2586 = vmatpush.msra.mxu3 %v676_v51  ;;  %v669_v51 = vld [vmem:[#allocation5 + $0xbf8] sm:$0xff] }
 0x351   : > { %v2101_v19 = vpop.f32.mrf.mxu3  ;;  %v1910_v2 = vadd.f32 %v1909_v25, %v10581_v35  ;;  %2766 = vmatpush.msrb.mxu2 %v669_v51  ;;  %v741_v26 = vld [vmem:[#allocation5 + $0xe38] sm:$0xff] }
 0x352   : > { %v10750_v16 = vadd.f32 %v2101_v19, %v2037_v21  ;;  %v1974_v33 = vpop.f32.mrf.mxu1  ;;  %2651 = vmatpush.msrb.mxu0 %v293_v10  ;;  %v15381_v10 = vld [vmem:[#allocation78_spill] sm:$0xff] }
 0x353   : > { %2168 = vmatmul.f32.gmra.mxu0 %v10496_v14  ;;  %2298 = vmatmul.f32.gmra.mxu2 %v10500_v6  ;;  %v1975_v34 = vadd.f32 %v1974_v33, %v1910_v2  ;;  %v15375_v14 = vld [vmem:[#allocation74_spill] sm:$0xff]  ;;  %v10762_v21 = vpop.permute.xlu1 %5440  ;;  %v15377_v2 = vld [vmem:[#allocation75_spill] sm:$0xff]  ;;  %v15378_v33 = vld [vmem:[#allocation76_spill] sm:$0xff] }
 0x354   : > { %4218 = vrot.lane.b32.xlu0 %v10750_v16, %s9215_s18  ;;  %15376 = vst [vmem:[#allocation73_spill] sm:$0xff] %v10762_v21  ;;  %v15384_v21 = vld [vmem:[#allocation80_spill] sm:$0xff] }
 0x355   : > { %2233 = vmatmul.f32.gmra.mxu1 %v15374_v5 }
 0x356   : > { %2363 = vmatmul.f32.gmra.mxu3 %v15375_v14  ;;  %v2039_v6 = vpop.f32.mrf.mxu2  ;;  %v10773_v56 = vpop.permute.xlu0 %4188 }
 0x357   : > { %v2040_v1 = vadd.f32 %v2039_v6, %v1975_v34  ;;  %v10769_v54 = vpop.permute.xlu2 %4190  ;;  %15380 = vst [vmem:[#allocation75_spill] sm:$0xff] %v10773_v56  ;;  %v15382_v34 = vld [vmem:[#allocation79_spill] sm:$0xff] }
 0x358   : > { %v1912_v59 = vpop.f32.mrf.mxu0  ;;  %15379 = vst [vmem:[#allocation74_spill] sm:$0xff] %v10769_v54  ;;  %v757_v54 = vld [vmem:[#allocation5 + $0xeb8] sm:$0xff]  ;;  %v10901_v56 = vld [vmem:[%s9340_s30 + $0x60] sm:$0xff] }
 0x359   : > { %v2104_v27 = vpop.f32.mrf.mxu3  ;;  %v1913_v25 = vadd.f32 %v1912_v59, %v10581_v35 }
 0x35a   : > { %v10765_v19 = vadd.f32 %v2104_v27, %v2040_v1  ;;  %v1977_v24 = vpop.f32.mrf.mxu1 }
 0x35b   : > { %2171 = vmatmul.f32.gmra.mxu0 %v15377_v2  ;;  %2301 = vmatmul.f32.gmra.mxu2 %v15378_v33  ;;  %v1978_v31 = vadd.f32 %v1977_v24, %v1913_v25  ;;  %v10777_v14 = vpop.permute.xlu1 %5446  ;;  %v797_v33 = vld [vmem:[#allocation5 + $0xff8] sm:$0xff]  ;;  %v15385_v25 = vld [vmem:[#allocation81_spill] sm:$0xff] }
 0x35c   : > { %4220 = vrot.lane.b32.xlu2 %v10765_v19, %s9215_s18  ;;  %15383 = vst [vmem:[#allocation76_spill] sm:$0xff] %v10777_v14  ;;  %2831 = vmatpush.msrb.mxu3 %v797_v33 }
 0x35d   : > { %2236 = vmatmul.f32.gmra.mxu1 %v15381_v10 }
 0x35e   : > { %2366 = vmatmul.f32.gmra.mxu3 %v15382_v34  ;;  %v2042_v5 = vpop.f32.mrf.mxu2  ;;  %v10788_v10 = vpop.permute.xlu0 %4194 }
 0x35f   : > { %v2043_v18 = vadd.f32 %v2042_v5, %v1978_v31  ;;  %v10784_v24 = vpop.permute.xlu2 %5432  ;;  %v541_v31 = vld [vmem:[#allocation5 + $0x7f8] sm:$0xff]  ;;  %15387 = vst [vmem:[#allocation79_spill] sm:$0xff] %v10788_v10  ;;  %v15388_v5 = vld [vmem:[#allocation83_spill] sm:$0xff]  ;;  %2832 = vmatpush.msrb.mxu3 %v789_v61 }
 0x360   : > { %v1915_v6 = vpop.f32.mrf.mxu0  ;;  %15386 = vst [vmem:[#allocation78_spill] sm:$0xff] %v10784_v24  ;;  %2701 = vmatpush.msrb.mxu1 %v541_v31  ;;  %v533_v31 = vld [vmem:[#allocation5 + $0x7b8] sm:$0xff]  ;;  %v10839_v10 = vld [vmem:[%s9340_s30 + $0x20] sm:$0xff] }
 0x361   : > { %v2107_v1 = vpop.f32.mrf.mxu3  ;;  %v1916_v59 = vadd.f32 %v1915_v6, %v10581_v35 }
 0x362   : > { %v10780_v27 = vadd.f32 %v2107_v1, %v2043_v18  ;;  %v1980_v2 = vpop.f32.mrf.mxu1  ;;  %v15389_v18 = vld [vmem:[#allocation84_spill] sm:$0xff]  ;;  %2702 = vmatpush.msrb.mxu1 %v533_v31  ;;  %v10815_v31 = vld [vmem:[%s9340_s30 + $0x10] sm:$0xff] }
 0x363   : > { %2174 = vmatmul.f32.gmra.mxu0 %v15384_v21  ;;  %2304 = vmatmul.f32.gmra.mxu2 %v15385_v25  ;;  %v1981_v34 = vadd.f32 %v1980_v2, %v1916_v59  ;;  %v661_v21 = vld [vmem:[#allocation5 + $0xbb8] sm:$0xff]  ;;  %v10792_v1 = vpop.permute.xlu1 %5452 }
 0x364   : > { %4222 = vrot.lane.b32.xlu1 %v10780_v27, %s9215_s18  ;;  %15390 = vst [vmem:[#allocation80_spill] sm:$0xff] %v10792_v1  ;;  %2767 = vmatpush.msrb.mxu2 %v661_v21  ;;  %v15392_v59 = vld [vmem:[#allocation86_spill] sm:$0xff]  ;;  %v10811_v1 = vld [vmem:[%s9340_s30] sm:$0xff] }
 0x365   : > { %2239 = vmatmul.f32.gmra.mxu1 %v15388_v5  ;;  %v653_v21 = vld [vmem:[#allocation5 + $0xb78] sm:$0xff] }
 0x366   : > { %2369 = vmatmul.f32.gmra.mxu3 %v15389_v18  ;;  %v2045_v51 = vpop.f32.mrf.mxu2  ;;  %v15395_v18 = vld [vmem:[#allocation88_spill] sm:$0xff]  ;;  %2768 = vmatpush.msrb.mxu2 %v653_v21 }
 0x367   : > { %v2046_v6 = vadd.f32 %v2045_v51, %v1981_v34  ;;  %v10797_v2 = vpop.permute.xlu2 %5442  ;;  %v10800_v34 = vpop.permute.xlu0 %5434  ;;  %v15396_v51 = vld [vmem:[#allocation89_spill] sm:$0xff]  ;;  %v10825_v21 = vld [vmem:[%s9340_s30 + $0x8] sm:$0xff] }
 0x368   : > { %v1918_v25 = vpop.f32.mrf.mxu0  ;;  %15393 = vst [vmem:[#allocation81_spill] sm:$0xff] %v10797_v2 }
 0x369   : > { %v2110_v14 = vpop.f32.mrf.mxu3  ;;  %v1919_v60 = vadd.f32 %v1918_v25, %v10581_v35  ;;  %15394 = vst [vmem:[#allocation83_spill] sm:$0xff] %v10800_v34  ;;  %v773_v34 = vld [vmem:[#allocation5 + $0xf38] sm:$0xff] }
 0x36a   : > { %v2111_v33 = vadd.f32 %v2110_v14, %v2046_v6  ;;  %v1983_v24 = vpop.f32.mrf.mxu1  ;;  %v15397_v14 = vld [vmem:[#allocation90_spill] sm:$0xff] }
 0x36b   : > { %2177 = vmatmul.f32.gmra.mxu0 %v15391_v17  ;;  %2307 = vmatmul.f32.gmra.mxu2 %v15392_v59  ;;  %v1984_v5 = vadd.f32 %v1983_v24, %v1919_v60  ;;  %v10805_v17 = vperm.slane %v15397_v14, 5  ;;  %v10807_v25 = vpop.permute.xlu1 %5458 }
 0x36c   : > { %4224 = vrot.lane.b32.xlu0 %v2111_v33, %s9215_s18  ;;  %15398 = vst [vmem:[#allocation84_spill] sm:$0xff] %v10807_v25 }
 0x36d   : > { %2242 = vmatmul.f32.gmra.mxu1 %v15395_v18 }
 0x36e   : > { %2372 = vmatmul.f32.gmra.mxu3 %v15396_v51  ;;  %v2048_v35 = vpop.f32.mrf.mxu2  ;;  %v781_v51 = vld [vmem:[#allocation5 + $0xf78] sm:$0xff] }
 0x36f   : > { %v2049_v6 = vadd.f32 %v2048_v35, %v1984_v5  ;;  %v10818_v5 = vpop.permute.xlu2 %5448  ;;  %v525_v35 = vld [vmem:[#allocation5 + $0x778] sm:$0xff]  ;;  %v10822_v14 = vpop.permute.xlu0 %5438  ;;  %2833 = vmatpush.msrb.mxu3 %v781_v51 }
 0x370   : > { %v2133_v59 = vpop.f32.mrf.mxu0  ;;  %15399 = vst [vmem:[#allocation85_spill] sm:$0xff] %v10818_v5  ;;  %2703 = vmatpush.msrb.mxu1 %v525_v35  ;;  %v645_v5 = vld [vmem:[#allocation5 + $0xb38] sm:$0xff]  ;;  %v10843_v35 = vld [vmem:[%s9340_s30 + $0x30] sm:$0xff] }
 0x371   : > { %v2113_v61 = vpop.f32.mrf.mxu3  ;;  %v2134_v24 = vadd.f32 %v2133_v59, %v10805_v17  ;;  %15400 = vst [vmem:[#allocation86_spill] sm:$0xff] %v10822_v14  ;;  %2769 = vmatpush.msrb.mxu2 %v645_v5  ;;  %2834 = vmatpush.msrb.mxu3 %v773_v34 }
 0x372   : > { %v2114_v60 = vadd.f32 %v2113_v61, %v2049_v6  ;;  %v2198_v18 = vpop.f32.mrf.mxu1  ;;  %v10829_v61 = vld [vmem:[%s9340_s30 + $0x18] sm:$0xff] }
 0x373   : > { %2392 = vmatmul.f32.vlgmr.msra.gmra.mxu0 %v10811_v1  ;;  %2522 = vmatmul.f32.vlgmr.msra.gmra.mxu2 %v10815_v31  ;;  %v2199_v6 = vadd.f32 %v2198_v18, %v2134_v24 }
 0x374   : > { %7987 = vmatpush.xpose.msk.msra.mxu0 %vm3008_vm0, %v2114_v60  ;;  %4226 = vrot.lane.b32.xlu2 %v2114_v60, %s9215_s18  ;;  %v10832_v60 = vpop.permute.xlu1 %6618 }
 0x375   : > { %2457 = vmatmul.f32.vlgmr.msra.gmra.mxu1 %v10825_v21  ;;  %15401 = vst [vmem:[#allocation88_spill] sm:$0xff] %v10832_v60  ;;  %2835 = vmatpush.msrb.mxu3 %v765_v53 }
 0x376   : > { %2587 = vmatmul.f32.vlgmr.msra.gmra.mxu3 %v10829_v61  ;;  %v2263_v59 = vpop.f32.mrf.mxu2 }
 0x377   : > { %v2264_v25 = vadd.f32 %v2263_v59, %v2199_v6  ;;  %v10852_v5 = vpop.permute.xlu0 %5444  ;;  %v10855_v59 = vld [vmem:[%s9340_s30 + $0x28] sm:$0xff]  ;;  %2836 = vmatpush.msrb.mxu3 %v757_v54 }
 0x378   : > { %7988 = vmatpush.xpose.msk.msra.mxu0 %vm3008_vm0, %v2111_v33  ;;  %v2136_v24 = vpop.f32.mrf.mxu0  ;;  %v10846_v33 = vpop.permute.xlu2 %5454  ;;  %15404 = vst [vmem:[#allocation122_spill] sm:$0xff] %v10852_v5 }
 0x379   : > { %v2328_v18 = vpop.f32.mrf.mxu3  ;;  %v2137_v51 = vadd.f32 %v2136_v24, %v10805_v17  ;;  %15403 = vst [vmem:[#allocation90_spill] sm:$0xff] %v10846_v33  ;;  %v10859_v24 = vld [vmem:[%s9340_s30 + $0x38] sm:$0xff]  ;;  %2837 = vmatpush.msrb.mxu3 %v749_v50 }
 0x37a   : > { %v10836_v2 = vadd.f32 %v2328_v18, %v2264_v25  ;;  %v2201_v14 = vpop.f32.mrf.mxu1  ;;  %v517_v25 = vld [vmem:[#allocation5 + $0x738] sm:$0xff] }
 0x37b   : > { %2395 = vmatmul.f32.gmra.mxu0 %v10839_v10  ;;  %2525 = vmatmul.f32.gmra.mxu2 %v10843_v35  ;;  %v2202_v6 = vadd.f32 %v2201_v14, %v2137_v51  ;;  %v637_v33 = vld [vmem:[#allocation5 + $0xaf8] sm:$0xff] }
 0x37c   : > { %15402 = vst [vmem:[#allocation89_spill] sm:$0xff] %v10836_v2  ;;  %7989 = vmatpush.xpose.msk.msra.mxu0 %vm3008_vm0, %v10780_v27  ;;  %6648 = vrot.lane.b32.xlu2 %v10836_v2, %s9215_s18  ;;  %v10862_v60 = vpop.permute.xlu1 %6624 }
 0x37d   : > { %2460 = vmatmul.f32.gmra.mxu1 %v10855_v59  ;;  %15405 = vst [vmem:[#allocation123_spill] sm:$0xff] %v10862_v60  ;;  %2770 = vmatpush.msrb.mxu2 %v637_v33  ;;  %v509_v33 = vld [vmem:[#allocation5 + $0x6f8] sm:$0xff] }
 0x37e   : > { %2590 = vmatmul.f32.gmra.mxu3 %v10859_v24  ;;  %v2266_v18 = vpop.f32.mrf.mxu2  ;;  %2704 = vmatpush.msrb.mxu1 %v517_v25  ;;  %v10874_v25 = vld [vmem:[%s9340_s30 + $0x50] sm:$0xff] }
 0x37f   : > { %v2267_v27 = vadd.f32 %v2266_v18, %v2202_v6  ;;  %v10883_v6 = vpop.permute.xlu0 %5450  ;;  %2838 = vmatpush.msrb.mxu3 %v741_v26 }
 0x380   : > { %7990 = vmatpush.xpose.msk.msra.mxu0 %vm3008_vm0, %v10765_v19  ;;  %v2139_v14 = vpop.f32.mrf.mxu0  ;;  %v10877_v19 = vpop.permute.xlu2 %5460  ;;  %15408 = vst [vmem:[#allocation126_spill] sm:$0xff] %v10883_v6  ;;  %2705 = vmatpush.msrb.mxu1 %v509_v33  ;;  %v10905_v33 = vld [vmem:[%s9340_s30 + $0x70] sm:$0xff] }
 0x381   : > { %v2331_v51 = vpop.f32.mrf.mxu3  ;;  %v2140_v34 = vadd.f32 %v2139_v14, %v10805_v17  ;;  %15407 = vst [vmem:[#allocation125_spill] sm:$0xff] %v10877_v19  ;;  %v10890_v14 = vld [vmem:[%s9340_s30 + $0x58] sm:$0xff]  ;;  %2839 = vmatpush.msrb.mxu3 %v733_v44 }
 0x382   : > { %v10867_v5 = vadd.f32 %v2331_v51, %v2267_v27  ;;  %v2204_v7 = vpop.f32.mrf.mxu1  ;;  %v10886_v27 = vld [vmem:[%s9340_s30 + $0x48] sm:$0xff]  ;;  %v629_v19 = vld [vmem:[#allocation5 + $0xab8] sm:$0xff] }
 0x383   : > { %2398 = vmatmul.f32.gmra.mxu0 %v10870_v39  ;;  %2528 = vmatmul.f32.gmra.mxu2 %v10874_v25  ;;  %v2205_v18 = vadd.f32 %v2204_v7, %v2140_v34 }
 0x384   : > { %15406 = vst [vmem:[#allocation124_spill] sm:$0xff] %v10867_v5  ;;  %7991 = vmatpush.xpose.msk.msra.mxu0 %vm3008_vm0, %v10750_v16  ;;  %6650 = vrot.lane.b32.xlu0 %v10867_v5, %s9215_s18  ;;  %v10898_v22 = vpop.permute.xlu1 %6626  ;;  %v11161_v5 = vld [vmem:[%s9340_s30 + $0x180] sm:$0xff] }
 0x385   : > { %2463 = vmatmul.f32.gmra.mxu1 %v10886_v27  ;;  %2771 = vmatpush.msrb.mxu2 %v629_v19  ;;  %15410 = vst [vmem:[#allocation128_spill] sm:$0xff] %v10898_v22  ;;  %v501_v19 = vld [vmem:[#allocation5 + $0x6b8] sm:$0xff] }
 0x386   : > { %2593 = vmatmul.f32.gmra.mxu3 %v10890_v14  ;;  %v2269_v51 = vpop.f32.mrf.mxu2  ;;  %2706 = vmatpush.msrb.mxu1 %v501_v19  ;;  %v621_v22 = vld [vmem:[#allocation5 + $0xa78] sm:$0xff]  ;;  %v10936_v19 = vld [vmem:[%s9340_s30 + $0x90] sm:$0xff]  ;;  %15446 = vst [vmem:[#allocation164_spill] sm:$0xff] %v11161_v5 }
 0x387   : > { %v2270_v16 = vadd.f32 %v2269_v51, %v2205_v18  ;;  %v10914_v18 = vpop.permute.xlu0 %5456  ;;  %2772 = vmatpush.msrb.mxu2 %v621_v22 }
 0x388   : > { %7992 = vmatpush.xpose.msk.msra.mxu0 %vm3008_vm0, %v10735_v11  ;;  %v2142_v7 = vpop.f32.mrf.mxu0  ;;  %v10908_v11 = vpop.permute.xlu2 %6620  ;;  %15412 = vst [vmem:[#allocation130_spill] sm:$0xff] %v10914_v18 }
 0x389   : > { %v2334_v34 = vpop.f32.mrf.mxu3  ;;  %v2143_v6 = vadd.f32 %v2142_v7, %v10805_v17  ;;  %15411 = vst [vmem:[#allocation129_spill] sm:$0xff] %v10908_v11  ;;  %v10921_v7 = vld [vmem:[%s9340_s30 + $0x78] sm:$0xff] }
 0x38a   : > { %v10896_v53 = vadd.f32 %v2334_v34, %v2270_v16  ;;  %v2207_v60 = vpop.f32.mrf.mxu1  ;;  %v10917_v16 = vld [vmem:[%s9340_s30 + $0x68] sm:$0xff] }
 0x38b   : > { %2401 = vmatmul.f32.gmra.mxu0 %v10901_v56  ;;  %2531 = vmatmul.f32.gmra.mxu2 %v10905_v33  ;;  %v2208_v51 = vadd.f32 %v2207_v60, %v2143_v6 }
 0x38c   : > { %15409 = vst [vmem:[#allocation127_spill] sm:$0xff] %v10896_v53  ;;  %7993 = vmatpush.xpose.msk.msra.mxu0 %vm3008_vm0, %v10720_v52  ;;  %6652 = vrot.lane.b32.xlu2 %v10896_v53, %s9215_s18  ;;  %v10929_v20 = vpop.permute.xlu1 %6630 }
 0x38d   : > { %2466 = vmatmul.f32.gmra.mxu1 %v10917_v16  ;;  %15413 = vst [vmem:[#allocation131_spill] sm:$0xff] %v10929_v20 }
 0x38e   : > { %2596 = vmatmul.f32.gmra.mxu3 %v10921_v7  ;;  %v2272_v34 = vpop.f32.mrf.mxu2 }
 0x38f   : > { %v2273_v52 = vadd.f32 %v2272_v34, %v2208_v51  ;;  %v10945_v51 = vpop.permute.xlu0 %6616 }
 0x390   : > { %7994 = vmatpush.xpose.msk.msra.mxu0 %vm3008_vm0, %v10705_v42  ;;  %v2145_v60 = vpop.f32.mrf.mxu0  ;;  %v10939_v22 = vpop.permute.xlu2 %6632  ;;  %v493_v42 = vld [vmem:[#allocation5 + $0x678] sm:$0xff]  ;;  %15415 = vst [vmem:[#allocation133_spill] sm:$0xff] %v10945_v51 }
 0x391   : > { %v2337_v6 = vpop.f32.mrf.mxu3  ;;  %v2146_v18 = vadd.f32 %v2145_v60, %v10805_v17  ;;  %15414 = vst [vmem:[#allocation132_spill] sm:$0xff] %v10939_v22  ;;  %v10952_v60 = vld [vmem:[%s9340_s30 + $0x98] sm:$0xff]  ;;  %2707 = vmatpush.msrb.mxu1 %v493_v42  ;;  %v10967_v42 = vld [vmem:[%s9340_s30 + $0xb0] sm:$0xff] }
 0x392   : > { %v10927_v54 = vadd.f32 %v2337_v6, %v2273_v52  ;;  %v2210_v11 = vpop.f32.mrf.mxu1  ;;  %v10948_v52 = vld [vmem:[%s9340_s30 + $0x88] sm:$0xff]  ;;  %v613_v22 = vld [vmem:[#allocation5 + $0xa38] sm:$0xff] }
 0x393   : > { %2404 = vmatmul.f32.gmra.mxu0 %v10932_v28  ;;  %2534 = vmatmul.f32.gmra.mxu2 %v10936_v19  ;;  %v2211_v34 = vadd.f32 %v2210_v11, %v2146_v18 }
 0x394   : > { %7995 = vmatpush.xpose.msk.msra.mxu0 %vm3008_vm0, %v10690_v13  ;;  %6654 = vrot.lane.b32.xlu1 %v10927_v54, %s9215_s18  ;;  %v10960_v9 = vpop.permute.xlu1 %6636 }
 0x395   : > { %2469 = vmatmul.f32.gmra.mxu1 %v10948_v52  ;;  %2773 = vmatpush.msrb.mxu2 %v613_v22  ;;  %15416 = vst [vmem:[#allocation134_spill] sm:$0xff] %v10960_v9  ;;  %v485_v22 = vld [vmem:[#allocation5 + $0x638] sm:$0xff] }
 0x396   : > { %2599 = vmatmul.f32.gmra.mxu3 %v10952_v60  ;;  %v2275_v6 = vpop.f32.mrf.mxu2  ;;  %2708 = vmatpush.msrb.mxu1 %v485_v22  ;;  %v597_v9 = vld [vmem:[#allocation5 + $0x9b8] sm:$0xff]  ;;  %v10996_v22 = vld [vmem:[%s9340_s30 + $0xd0] sm:$0xff] }
 0x397   : > { %v2276_v13 = vadd.f32 %v2275_v6, %v2211_v34  ;;  %v10976_v34 = vpop.permute.xlu0 %6622 }
 0x398   : > { %7996 = vmatpush.xpose.msk.msra.mxu0 %vm3008_vm0, %v10675_v36  ;;  %v2148_v11 = vpop.f32.mrf.mxu0  ;;  %v10970_v36 = vpop.permute.xlu2 %6646  ;;  %15418 = vst [vmem:[#allocation136_spill] sm:$0xff] %v10976_v34 }
 0x399   : > { %v2340_v18 = vpop.f32.mrf.mxu3  ;;  %v2149_v20 = vadd.f32 %v2148_v11, %v10805_v17  ;;  %15417 = vst [vmem:[#allocation135_spill] sm:$0xff] %v10970_v36  ;;  %v10983_v11 = vld [vmem:[%s9340_s30 + $0xb8] sm:$0xff] }
 0x39a   : > { %v10958_v50 = vadd.f32 %v2340_v18, %v2276_v13  ;;  %v2213_v51 = vpop.f32.mrf.mxu1  ;;  %v10979_v13 = vld [vmem:[%s9340_s30 + $0xa8] sm:$0xff]  ;;  %v605_v36 = vld [vmem:[#allocation5 + $0x9f8] sm:$0xff] }
 0x39b   : > { %2407 = vmatmul.f32.gmra.mxu0 %v10963_v12  ;;  %2537 = vmatmul.f32.gmra.mxu2 %v10967_v42  ;;  %v2214_v6 = vadd.f32 %v2213_v51, %v2149_v20 }
 0x39c   : > { %7997 = vmatpush.xpose.msk.msra.mxu0 %vm3008_vm0, %v10660_v4  ;;  %6656 = vrot.lane.b32.xlu2 %v10958_v50, %s9215_s18 }
 0x39d   : > { %2472 = vmatmul.f32.gmra.mxu1 %v10979_v13  ;;  %2774 = vmatpush.msrb.mxu2 %v605_v36  ;;  %v589_v36 = vld [vmem:[#allocation5 + $0x978] sm:$0xff] }
 0x39e   : > { %2602 = vmatmul.f32.gmra.mxu3 %v10983_v11  ;;  %v2278_v18 = vpop.f32.mrf.mxu2 }
 0x39f   : > { %v2279_v4 = vadd.f32 %v2278_v18, %v2214_v6  ;;  %2775 = vmatpush.msrb.mxu2 %v597_v9  ;;  %v11003_v6 = vpop.permute.xlu0 %6628  ;;  %v11005_v9 = vpop.permute.xlu1 %6638 }
 0x3a0   : > { %7998 = vmatpush.xpose.msk.msra.mxu0 %vm3008_vm0, %v10645_v45  ;;  %v2151_v20 = vpop.f32.mrf.mxu0  ;;  %v477_v45 = vld [vmem:[#allocation5 + $0x5f8] sm:$0xff]  ;;  %15419 = vst [vmem:[#allocation137_spill] sm:$0xff] %v11003_v6 }
 0x3a1   : > { %v2343_v51 = vpop.f32.mrf.mxu3  ;;  %v2152_v34 = vadd.f32 %v2151_v20, %v10805_v17  ;;  %15420 = vst [vmem:[#allocation138_spill] sm:$0xff] %v11005_v9  ;;  %v11011_v20 = vpop.permute.xlu2 %4196  ;;  %2709 = vmatpush.msrb.mxu1 %v477_v45  ;;  %2776 = vmatpush.msrb.mxu2 %v589_v36  ;;  %v11027_v45 = vld [vmem:[%s9340_s30 + $0xf0] sm:$0xff]  ;;  %v469_v36 = vld [vmem:[#allocation5 + $0x5b8] sm:$0xff] }
 0x3a2   : > { %v10989_v26 = vadd.f32 %v2343_v51, %v2279_v4  ;;  %v2216_v62 = vpop.f32.mrf.mxu1  ;;  %v11008_v4 = vld [vmem:[%s9340_s30 + $0xc8] sm:$0xff]  ;;  %v11014_v51 = vld [vmem:[%s9340_s30 + $0xd8] sm:$0xff]  ;;  %15423 = vst [vmem:[#allocation141_spill] sm:$0xff] %v11027_v45 }
 0x3a3   : > { %2410 = vmatmul.f32.gmra.mxu0 %v10992_v46  ;;  %2540 = vmatmul.f32.gmra.mxu2 %v10996_v22  ;;  %v2217_v18 = vadd.f32 %v2216_v62, %v2152_v34  ;;  %15421 = vst [vmem:[#allocation139_spill] sm:$0xff] %v11014_v51 }
 0x3a4   : > { %7999 = vmatpush.xpose.msk.msra.mxu0 %vm3008_vm0, %v10632_v57  ;;  %6658 = vrot.lane.b32.xlu1 %v10989_v26, %s9215_s18 }
 0x3a5   : > { %2475 = vmatmul.f32.gmra.mxu1 %v11008_v4  ;;  %2777 = vmatpush.msrb.mxu2 %v581_v43  ;;  %v725_v43 = vld [vmem:[#allocation5 + $0xdb8] sm:$0xff] }
 0x3a6   : > { %2605 = vmatmul.f32.gmra.mxu3 %v11014_v51  ;;  %v2281_v57 = vpop.f32.mrf.mxu2  ;;  %2710 = vmatpush.msrb.mxu1 %v469_v36 }
 0x3a7   : > { %v2282_v6 = vadd.f32 %v2281_v57, %v2217_v18  ;;  %v11037_v57 = vld [vmem:[%s9340_s30 + $0xe8] sm:$0xff]  ;;  %2778 = vmatpush.msrb.mxu2 %v573_v58  ;;  %2840 = vmatpush.msrb.mxu3 %v725_v43 }
 0x3a8   : > { %8000 = vmatpush.xpose.msk.msra.mxu0 %vm3008_vm0, %v10619_v63  ;;  %v2154_v62 = vpop.f32.mrf.mxu0  ;;  %v565_v63 = vld [vmem:[#allocation5 + $0x8b8] sm:$0xff]  ;;  %15425 = vst [vmem:[#allocation143_spill] sm:$0xff] %v11037_v57  ;;  %v11066_v43 = vld [vmem:[%s9340_s30 + $0x108] sm:$0xff] }
 0x3a9   : > { %v2346_v34 = vpop.f32.mrf.mxu3  ;;  %v2155_v44 = vadd.f32 %v2154_v62, %v10805_v17  ;;  %v11040_v62 = vpop.permute.xlu2 %4202  ;;  %2779 = vmatpush.msrb.mxu2 %v565_v63  ;;  %v11058_v63 = vld [vmem:[%s9340_s30 + $0x110] sm:$0xff]  ;;  %15431 = vst [vmem:[#allocation149_spill] sm:$0xff] %v11066_v43  ;;  %2841 = vmatpush.msrb.mxu3 %v717_v32 }
 0x3aa   : > { %v11020_v9 = vadd.f32 %v2346_v34, %v2282_v6  ;;  %v2219_v30 = vpop.f32.mrf.mxu1  ;;  %v11034_v6 = vpop.permute.xlu0 %6634  ;;  %v11043_v34 = vld [vmem:[%s9340_s30 + $0xf8] sm:$0xff]  ;;  %15429 = vst [vmem:[#allocation147_spill] sm:$0xff] %v11058_v63 }
 0x3ab   : > { %2413 = vmatmul.f32.gmra.mxu0 %v11023_v49  ;;  %2543 = vmatmul.f32.gmra.mxu2 %v11027_v45  ;;  %15424 = vst [vmem:[#allocation142_spill] sm:$0xff] %v11034_v6  ;;  %v2220_v18 = vadd.f32 %v2219_v30, %v2155_v44  ;;  %v11046_v30 = vpop.permute.xlu1 %6640  ;;  %v549_v6 = vld [vmem:[#allocation5 + $0x838] sm:$0xff] }
 0x3ac   : > { %8001 = vmatpush.xpose.msk.msra.mxu0 %vm3008_vm0, %v10606_v29  ;;  %6660 = vrot.lane.b32.xlu0 %v11020_v9, %s9215_s18  ;;  %15426 = vst [vmem:[#allocation144_spill] sm:$0xff] %v11043_v34 }
 0x3ad   : > { %2478 = vmatmul.f32.gmra.mxu1 %v11037_v57  ;;  %15427 = vst [vmem:[#allocation145_spill] sm:$0xff] %v11046_v30  ;;  %2780 = vmatpush.msrb.mxu2 %v557_v48  ;;  %v685_v57 = vld [vmem:[#allocation5 + $0xc78] sm:$0xff] }
 0x3ae   : > { %2608 = vmatmul.f32.gmra.mxu3 %v11043_v34  ;;  %v2284_v29 = vpop.f32.mrf.mxu2 }
 0x3af   : > { %v2285_v3 = vadd.f32 %v2284_v29, %v2220_v18  ;;  %v11054_v18 = vld [vmem:[%s9340_s30 + $0x100] sm:$0xff]  ;;  %2781 = vmatpush.msrb.mxu2 %v549_v6  ;;  %2842 = vmatpush.msrb.mxu3 %v709_v0 }
 0x3b0   : > { %8002 = vmatpush.xpose.msk.msra.mxu0 %vm3008_vm0, %v10597_v8  ;;  %v2157_v58 = vpop.f32.mrf.mxu0  ;;  %15428 = vst [vmem:[#allocation146_spill] sm:$0xff] %v11054_v18  ;;  %v461_v8 = vld [vmem:[#allocation5 + $0x578] sm:$0xff] }
 0x3b1   : > { %v2349_v44 = vpop.f32.mrf.mxu3  ;;  %v2158_v23 = vadd.f32 %v2157_v58, %v10805_v17  ;;  %v11069_v29 = vpop.permute.xlu2 %4208  ;;  %v11072_v58 = vld [vmem:[%s9340_s30 + $0x118] sm:$0xff]  ;;  %2711 = vmatpush.msrb.mxu1 %v461_v8 }
 0x3b2   : > { %v11051_v38 = vadd.f32 %v2349_v44, %v2285_v3  ;;  %v2222_v36 = vpop.f32.mrf.mxu1  ;;  %v11063_v48 = vpop.permute.xlu0 %6644  ;;  %15432 = vst [vmem:[#allocation150_spill] sm:$0xff] %v11072_v58  ;;  %v453_v8 = vld [vmem:[#allocation5 + $0x538] sm:$0xff] }
 0x3b3   : > { %2416 = vmatmul.f32.gmra.mxu0 %v11054_v18  ;;  %2546 = vmatmul.f32.gmra.mxu2 %v11058_v63  ;;  %15430 = vst [vmem:[#allocation148_spill] sm:$0xff] %v11063_v48  ;;  %v2223_v3 = vadd.f32 %v2222_v36, %v2158_v23  ;;  %v11075_v23 = vpop.permute.xlu1 %6642  ;;  %v693_v63 = vld [vmem:[#allocation5 + $0xcb8] sm:$0xff]  ;;  %v11135_v18 = vld [vmem:[%s9340_s30 + $0x160] sm:$0xff] }
 0x3b4   : > { %6662 = vrot.lane.b32.xlu1 %v11051_v38, %s9215_s18  ;;  %15433 = vst [vmem:[#allocation151_spill] sm:$0xff] %v11075_v23  ;;  %2712 = vmatpush.msrb.mxu1 %v453_v8 }
 0x3b5   : > { %2481 = vmatmul.f32.gmra.mxu1 %v11066_v43  ;;  %15442 = vst [vmem:[#allocation160_spill] sm:$0xff] %v11135_v18 }
 0x3b6   : > { %2611 = vmatmul.f32.gmra.mxu3 %v11072_v58  ;;  %v2287_v44 = vpop.f32.mrf.mxu2 }
 0x3b7   : > { %v2288_v6 = vadd.f32 %v2287_v44, %v2223_v3 }
 0x3b8   : > { %v2160_v30 = vpop.f32.mrf.mxu0 }
 0x3b9   : > { %v2352_v48 = vpop.f32.mrf.mxu3  ;;  %v2161_v36 = vadd.f32 %v2160_v30, %v10805_v17  ;;  %v11096_v44 = vpop.permute.xlu2 %4214 }
 0x3ba   : > { %v11078_v15 = vadd.f32 %v2352_v48, %v2288_v6  ;;  %v2225_v32 = vpop.f32.mrf.mxu1  ;;  %v11090_v3 = vpop.permute.xlu0 %4200  ;;  %v11093_v48 = vld [vmem:[%s9340_s30 + $0x128] sm:$0xff]  ;;  %v11099_v6 = vld [vmem:[%s9340_s30 + $0x138] sm:$0xff] }
 0x3bb   : > { %2419 = vmatmul.f32.gmra.mxu0 %v11081_v40  ;;  %2549 = vmatmul.f32.gmra.mxu2 %v11085_v37  ;;  %v2226_v30 = vadd.f32 %v2225_v32, %v2161_v36  ;;  %15436 = vst [vmem:[#allocation154_spill] sm:$0xff] %v11093_v48  ;;  %v11102_v55 = vpop.permute.xlu1 %4198  ;;  %v701_v37 = vld [vmem:[#allocation5 + $0xcf8] sm:$0xff]  ;;  %v11108_v40 = vld [vmem:[%s9340_s30 + $0x140] sm:$0xff] }
 0x3bc   : > { %6664 = vrot.lane.b32.xlu0 %v11078_v15, %s9215_s18  ;;  %15437 = vst [vmem:[#allocation155_spill] sm:$0xff] %v11099_v6  ;;  %2843 = vmatpush.msrb.mxu3 %v701_v37 }
 0x3bd   : > { %2484 = vmatmul.f32.gmra.mxu1 %v11093_v48  ;;  %15438 = vst [vmem:[#allocation156_spill] sm:$0xff] %v11108_v40 }
 0x3be   : > { %2614 = vmatmul.f32.gmra.mxu3 %v11099_v6  ;;  %v2290_v23 = vpop.f32.mrf.mxu2  ;;  %v11112_v6 = vld [vmem:[%s9340_s30 + $0x150] sm:$0xff] }
 0x3bf   : > { %v2291_v41 = vadd.f32 %v2290_v23, %v2226_v30  ;;  %15439 = vst [vmem:[#allocation157_spill] sm:$0xff] %v11112_v6  ;;  %v445_v23 = vld [vmem:[#allocation5 + $0x4f8] sm:$0xff]  ;;  %2844 = vmatpush.msrb.mxu3 %v693_v63 }
 0x3c0   : > { %v2163_v0 = vpop.f32.mrf.mxu0  ;;  %2713 = vmatpush.msrb.mxu1 %v445_v23 }
 0x3c1   : > { %v2355_v47 = vpop.f32.mrf.mxu3  ;;  %v2164_v36 = vadd.f32 %v2163_v0, %v10805_v17  ;;  %v11126_v0 = vld [vmem:[%s9340_s30 + $0x158] sm:$0xff]  ;;  %2845 = vmatpush.msrb.mxu3 %v685_v57 }
 0x3c2   : > { %v11105_v32 = vadd.f32 %v2355_v47, %v2291_v41  ;;  %v2228_v48 = vpop.f32.mrf.mxu1  ;;  %v11117_v8 = vpop.permute.xlu0 %4206  ;;  %v11120_v41 = vld [vmem:[%s9340_s30 + $0x148] sm:$0xff]  ;;  %15441 = vst [vmem:[#allocation159_spill] sm:$0xff] %v11126_v0 }
 0x3c3   : > { %2422 = vmatmul.f32.gmra.mxu0 %v11108_v40  ;;  %2552 = vmatmul.f32.gmra.mxu2 %v11112_v6  ;;  %v2229_v30 = vadd.f32 %v2228_v48, %v2164_v36  ;;  %15440 = vst [vmem:[#allocation158_spill] sm:$0xff] %v11120_v41  ;;  %v11123_v47 = vpop.permute.xlu2 %4220  ;;  %v11129_v43 = vpop.permute.xlu1 %4204 }
 0x3c4   : > { %6666 = vrot.lane.b32.xlu2 %v11105_v32, %s9215_s18 }
 0x3c5   : > { %2487 = vmatmul.f32.gmra.mxu1 %v11120_v41 }
 0x3c6   : > { %2617 = vmatmul.f32.gmra.mxu3 %v11126_v0  ;;  %v2293_v6 = vpop.f32.mrf.mxu2  ;;  %v11139_v0 = vld [vmem:[%s9340_s30 + $0x170] sm:$0xff] }
 0x3c7   : > { %v2294_v40 = vadd.f32 %v2293_v6, %v2229_v30  ;;  %15443 = vst [vmem:[#allocation161_spill] sm:$0xff] %v11139_v0  ;;  %v437_v6 = vld [vmem:[#allocation5 + $0x4b8] sm:$0xff] }
 0x3c8   : > { %v2166_v37 = vpop.f32.mrf.mxu0  ;;  %2714 = vmatpush.msrb.mxu1 %v437_v6  ;;  %v11165_v6 = vld [vmem:[%s9340_s30 + $0x190] sm:$0xff] }
 0x3c9   : > { %v2358_v58 = vpop.f32.mrf.mxu3  ;;  %v2167_v48 = vadd.f32 %v2166_v37, %v10805_v17  ;;  %15447 = vst [vmem:[#allocation165_spill] sm:$0xff] %v11165_v6 }
 0x3ca   : > { %v11132_v36 = vadd.f32 %v2358_v58, %v2294_v40  ;;  %v2231_v41 = vpop.f32.mrf.mxu1  ;;  %v11144_v23 = vpop.permute.xlu0 %4212  ;;  %v11147_v40 = vld [vmem:[%s9340_s30 + $0x168] sm:$0xff]  ;;  %v11151_v58 = vld [vmem:[%s9340_s30 + $0x178] sm:$0xff] }
 0x3cb   : > { %2425 = vmatmul.f32.gmra.mxu0 %v11135_v18  ;;  %2555 = vmatmul.f32.gmra.mxu2 %v11139_v0  ;;  %v2232_v30 = vadd.f32 %v2231_v41, %v2167_v48  ;;  %15444 = vst [vmem:[#allocation162_spill] sm:$0xff] %v11147_v40  ;;  %v11155_v41 = vpop.permute.xlu1 %4210 }
 0x3cc   : > { %6668 = vrot.lane.b32.xlu0 %v11132_v36, %s9215_s18  ;;  %15445 = vst [vmem:[#allocation163_spill] sm:$0xff] %v11151_v58 }
 0x3cd   : > { %2490 = vmatmul.f32.gmra.mxu1 %v11147_v40 }
 0x3ce   : > { %2620 = vmatmul.f32.gmra.mxu3 %v11151_v58  ;;  %v4227_v37 = vpop.permute.xlu2 %4226  ;;  %v2296_v0 = vpop.f32.mrf.mxu2 }
 0x3cf   : > { %v2297_v18 = vadd.f32 %v2296_v0, %v2232_v30  ;;  %8035 = vmatpush.xpose.msk.msra.mxu2 %vm3008_vm0, %v4227_v37  ;;  %v429_v0 = vld [vmem:[#allocation5 + $0x478] sm:$0xff]  ;;  %v11171_v30 = vld [vmem:[%s9340_s30 + $0x188] sm:$0xff] }
 0x3d0   : > { %v2169_v63 = vpop.f32.mrf.mxu0  ;;  %15448 = vst [vmem:[#allocation166_spill] sm:$0xff] %v11171_v30  ;;  %2715 = vmatpush.msrb.mxu1 %v429_v0 }
 0x3d1   : > { %v2361_v2 = vpop.f32.mrf.mxu3  ;;  %v2170_v48 = vadd.f32 %v2169_v63, %v10805_v17 }
 0x3d2   : > { %v11158_v34 = vadd.f32 %v2361_v2, %v2297_v18  ;;  %v2234_v40 = vpop.f32.mrf.mxu1  ;;  %v421_v2 = vld [vmem:[#allocation5 + $0x438] sm:$0xff]  ;;  %v4219_v37 = vpop.permute.xlu0 %4218 }
 0x3d3   : > { %2428 = vmatmul.f32.gmra.mxu0 %v11161_v5  ;;  %2558 = vmatmul.f32.gmra.mxu2 %v11165_v6  ;;  %v677_v18 = vld [vmem:[#allocation5 + $0xc38] sm:$0xff]  ;;  %v2235_v63 = vadd.f32 %v2234_v40, %v2170_v48  ;;  %v11182_v48 = vld [vmem:[%s9340_s30 + $0x1a0] sm:$0xff] }
 0x3d4   : > { %6670 = vrot.lane.b32.xlu2 %v11158_v34, %s9215_s18  ;;  %v11175_v5 = vld [vmem:[%s9340_s30 + $0x198] sm:$0xff]  ;;  %2846 = vmatpush.msrb.mxu3 %v677_v18  ;;  %15450 = vst [vmem:[#allocation168_spill] sm:$0xff] %v11182_v48 }
 0x3d5   : > { %2493 = vmatmul.f32.gmra.mxu1 %v11171_v30  ;;  %15449 = vst [vmem:[#allocation167_spill] sm:$0xff] %v11175_v5  ;;  %v4217_v30 = vpop.permute.xlu1 %4216 }
 0x3d6   : > { %2623 = vmatmul.f32.gmra.mxu3 %v11175_v5  ;;  %v2299_v6 = vpop.f32.mrf.mxu2  ;;  %2716 = vmatpush.msrb.mxu1 %v421_v2  ;;  %v11186_v5 = vld [vmem:[%s9340_s30 + $0x1b0] sm:$0xff] }
 0x3d7   : > { %v2300_v58 = vadd.f32 %v2299_v6, %v2235_v63  ;;  %15451 = vst [vmem:[#allocation169_spill] sm:$0xff] %v11186_v5  ;;  %v11192_v6 = vld [vmem:[%s9340_s30 + $0x1a8] sm:$0xff] }
 0x3d8   : > { %v2172_v57 = vpop.f32.mrf.mxu0  ;;  %15452 = vst [vmem:[#allocation170_spill] sm:$0xff] %v11192_v6 }
 0x3d9   : > { %v2364_v45 = vpop.f32.mrf.mxu3  ;;  %v2173_v49 = vadd.f32 %v2172_v57, %v10805_v17 }
 0x3da   : > { %v11179_v53 = vadd.f32 %v2364_v45, %v2300_v58  ;;  %v2237_v40 = vpop.f32.mrf.mxu1  ;;  %v11196_v45 = vld [vmem:[%s9340_s30 + $0x1b8] sm:$0xff] }
 0x3db   : > { %2431 = vmatmul.f32.gmra.mxu0 %v11182_v48  ;;  %2561 = vmatmul.f32.gmra.mxu2 %v11186_v5  ;;  %v2238_v0 = vadd.f32 %v2237_v40, %v2173_v49  ;;  %15453 = vst [vmem:[#allocation171_spill] sm:$0xff] %v11196_v45  ;;  %v11203_v49 = vld [vmem:[%s9340_s30 + $0x1c0] sm:$0xff]  ;;  %v11207_v40 = vld [vmem:[%s9340_s30 + $0x1d0] sm:$0xff] }
 0x3dc   : > { %6672 = vrot.lane.b32.xlu1 %v11179_v53, %s9215_s18  ;;  %15454 = vst [vmem:[#allocation172_spill] sm:$0xff] %v11203_v49 }
 0x3dd   : > { %2496 = vmatmul.f32.gmra.mxu1 %v11192_v6  ;;  %v4223_v5 = vpop.permute.xlu1 %4222  ;;  %15455 = vst [vmem:[#allocation173_spill] sm:$0xff] %v11207_v40 }
 0x3de   : > { %2626 = vmatmul.f32.gmra.mxu3 %v11196_v45  ;;  %v4225_v58 = vpop.permute.xlu0 %4224  ;;  %v2302_v2 = vpop.f32.mrf.mxu2 }
 0x3df   : > { %8036 = vmatpush.xpose.msk.msra.mxu2 %vm3008_vm0, %v4225_v58  ;;  %v2303_v18 = vadd.f32 %v2302_v2, %v2238_v0  ;;  %v11212_v0 = vld [vmem:[%s9340_s30 + $0x1c8] sm:$0xff]  ;;  %v11216_v2 = vld [vmem:[%s9340_s30 + $0x1d8] sm:$0xff] }
 0x3e0   : > { %v2175_v63 = vpop.f32.mrf.mxu0 }
 0x3e1   : > { %v2367_v57 = vpop.f32.mrf.mxu3  ;;  %v2176_v48 = vadd.f32 %v2175_v63, %v10805_v17 }
 0x3e2   : > { %v2368_v51 = vadd.f32 %v2367_v57, %v2303_v18  ;;  %v2240_v6 = vpop.f32.mrf.mxu1 }
 0x3e3   : > { %8037 = vmatpush.xpose.msk.msra.mxu2 %vm3008_vm0, %v4223_v5  ;;  %2434 = vmatmul.f32.gmra.mxu0 %v11203_v49  ;;  %v2241_v58 = vadd.f32 %v2240_v6, %v2176_v48  ;;  %v11224_v48 = vld [vmem:[%s9340_s30 + $0x1e0] sm:$0xff]  ;;  %v11228_v6 = vld [vmem:[%s9340_s30 + $0x1f0] sm:$0xff] }
 0x3e4   : > { %2564 = vmatmul.f32.gmra.mxu2 %v11207_v40  ;;  %6674 = vrot.lane.b32.xlu2 %v2368_v51, %s9215_s18  ;;  %15456 = vst [vmem:[#allocation174_spill] sm:$0xff] %v11224_v48 }
 0x3e5   : > { %2499 = vmatmul.f32.gmra.mxu1 %v11212_v0  ;;  %15457 = vst [vmem:[#allocation175_spill] sm:$0xff] %v11228_v6 }
 0x3e6   : > { %2629 = vmatmul.f32.gmra.mxu3 %v11216_v2  ;;  %v2305_v5 = vpop.f32.mrf.mxu2 }
 0x3e7   : > { %8038 = vmatpush.xpose.msk.msra.mxu2 %vm3008_vm0, %v11123_v47  ;;  %v2306_v18 = vadd.f32 %v2305_v5, %v2241_v58  ;;  %v11233_v47 = vld [vmem:[%s9340_s30 + $0x1e8] sm:$0xff] }
 0x3e8   : > { %v2178_v63 = vpop.f32.mrf.mxu0 }
 0x3e9   : > { %v2370_v57 = vpop.f32.mrf.mxu3  ;;  %v2179_v40 = vadd.f32 %v2178_v63, %v10805_v17  ;;  %v11237_v17 = vld [vmem:[%s9340_s30 + $0x1f8] sm:$0xff] }
 0x3ea   : > { %v2371_v49 = vadd.f32 %v2370_v57, %v2306_v18  ;;  %v2243_v45 = vpop.f32.mrf.mxu1 }
 0x3eb   : > { %8039 = vmatpush.xpose.msk.msra.mxu2 %vm3008_vm0, %v4219_v37  ;;  %2437 = vmatmul.f32.gmra.mxu0 %v11224_v48  ;;  %v2244_v58 = vadd.f32 %v2243_v45, %v2179_v40 }
 0x3ec   : > { %2567 = vmatmul.f32.gmra.mxu2 %v11228_v6  ;;  %6676 = vrot.lane.b32.xlu1 %v2371_v49, %s9215_s18  ;;  %v11244_v6 = vld [vmem:[#allocation7] sm:$0xff] }
 0x3ed   : > { %2502 = vmatmul.f32.gmra.mxu1 %v11233_v47  ;;  %v11247_v45 = vperm.slane %v11244_v6, 6 }
 0x3ee   : > { %2632 = vmatmul.f32.gmra.mxu3 %v11237_v17  ;;  %v2308_v37 = vpop.f32.mrf.mxu2 }
 0x3ef   : > { %8040 = vmatpush.xpose.msk.msra.mxu2 %vm3008_vm0, %v4217_v30  ;;  %v2309_v5 = vadd.f32 %v2308_v37, %v2244_v58 }
 0x3f0   : > { %v2393_v63 = vpop.f32.mrf.mxu0 }
 0x3f1   : > { %v2373_v18 = vpop.f32.mrf.mxu3 }
 0x3f2   : > { %v2374_v57 = vadd.f32 %v2373_v18, %v2309_v5  ;;  %v2458_v48 = vpop.f32.mrf.mxu1 }
 0x3f3   : > { %8041 = vmatpush.xpose.msk.msra.mxu2 %vm3008_vm0, %v11096_v44  ;;  %2652 = vmatmul.f32.vlgmr.msrb.gmra.mxu0 %v10811_v1  ;;  %v2394_v1 = vadd.f32 %v2393_v63, %v11247_v45 }
 0x3f4   : > { %2782 = vmatmul.f32.vlgmr.msrb.gmra.mxu2 %v10815_v31  ;;  %8083 = vmatpush.xpose.msk.msrb.mxu0 %vm3008_vm0, %v2374_v57 }
 0x3f5   : > { %6678 = vrot.lane.b32.xlu0 %v2374_v57, %s9215_s18  ;;  %2717 = vmatmul.f32.vlgmr.msrb.gmra.mxu1 %v10825_v21  ;;  %v2459_v21 = vadd.f32 %v2458_v48, %v2394_v1 }
 0x3f6   : > { %2847 = vmatmul.f32.vlgmr.msrb.gmra.mxu3 %v10829_v61  ;;  %v2523_v30 = vpop.f32.mrf.mxu2 }
 0x3f7   : > { %8042 = vmatpush.xpose.msk.msra.mxu2 %vm3008_vm0, %v11144_v23  ;;  %v2524_v61 = vadd.f32 %v2523_v30, %v2459_v21  ;;  %v15459_v30 = vld [vmem:[#allocation127_spill] sm:$0xff] }
 0x3f8   : > { %8084 = vmatpush.xpose.msk.msrb.mxu0 %vm3008_vm0, %v2371_v49  ;;  %v2396_v44 = vpop.f32.mrf.mxu0 }
 0x3f9   : > { %v2588_v40 = vpop.f32.mrf.mxu3  ;;  %v2397_v31 = vadd.f32 %v2396_v44, %v11247_v45 }
 0x3fa   : > { %v2461_v58 = vpop.f32.mrf.mxu1  ;;  %v11270_v48 = vadd.f32 %v2588_v40, %v2524_v61  ;;  %v15460_v40 = vld [vmem:[#allocation140_spill] sm:$0xff] }
 0x3fb   : > { %8043 = vmatpush.xpose.msk.msra.mxu2 %vm3008_vm0, %v11155_v41  ;;  %2655 = vmatmul.f32.gmra.mxu0 %v10839_v10  ;;  %v2462_v23 = vadd.f32 %v2461_v58, %v2397_v31  ;;  %v15461_v31 = vld [vmem:[#allocation141_spill] sm:$0xff]  ;;  %v15463_v58 = vld [vmem:[#allocation143_spill] sm:$0xff] }
 0x3fc   : > { %2785 = vmatmul.f32.gmra.mxu2 %v10843_v35  ;;  %8085 = vmatpush.xpose.msk.msrb.mxu0 %vm3008_vm0, %v2368_v51 }
 0x3fd   : > { %2720 = vmatmul.f32.gmra.mxu1 %v10855_v59 }
 0x3fe   : > { %2850 = vmatmul.f32.gmra.mxu3 %v10859_v24  ;;  %v2526_v49 = vpop.f32.mrf.mxu2 }
 0x3ff   : > { %8044 = vmatpush.xpose.msk.msra.mxu2 %vm3008_vm0, %v11069_v29  ;;  %v2527_v37 = vadd.f32 %v2526_v49, %v2462_v23  ;;  %v15464_v23 = vld [vmem:[#allocation144_spill] sm:$0xff] }
 0x400   : > { %8086 = vmatpush.xpose.msk.msrb.mxu0 %vm3008_vm0, %v11179_v53  ;;  %v2399_v10 = vpop.f32.mrf.mxu0 }
 0x401   : > { %v2591_v41 = vpop.f32.mrf.mxu3 }
 0x402   : > { %v11272_v35 = vadd.f32 %v2591_v41, %v2527_v37  ;;  %v2464_v51 = vpop.f32.mrf.mxu1 }
 0x403   : > { %8045 = vmatpush.xpose.msk.msra.mxu2 %vm3008_vm0, %v11117_v8  ;;  %2658 = vmatmul.f32.gmra.mxu0 %v10870_v39  ;;  %v2400_v39 = vadd.f32 %v2399_v10, %v11247_v45  ;;  %v15465_v10 = vld [vmem:[#allocation89_spill] sm:$0xff] }
 0x404   : > { %v8260_v59 = vpack.i.bf16 %v11272_v35, %v11270_v48  ;;  %2788 = vmatmul.f32.gmra.mxu2 %v10874_v25  ;;  %8087 = vmatpush.xpose.msk.msrb.mxu0 %vm3008_vm0, %v11158_v34 }
 0x405   : > { %2723 = vmatmul.f32.gmra.mxu1 %v10886_v27  ;;  %v2465_v27 = vadd.f32 %v2464_v51, %v2400_v39 }
 0x406   : > { %2853 = vmatmul.f32.gmra.mxu3 %v10890_v14  ;;  %8261 = vrot.lane.b32.xlu0 %v8260_v59, %s9215_s18  ;;  %v2529_v24 = vpop.f32.mrf.mxu2 }
 0x407   : > { %8046 = vmatpush.xpose.msk.msra.mxu2 %vm3008_vm0, %v11129_v43  ;;  %v2530_v14 = vadd.f32 %v2529_v24, %v2465_v27  ;;  %v15469_v27 = vld [vmem:[#allocation150_spill] sm:$0xff] }
 0x408   : > { %8088 = vmatpush.xpose.msk.msrb.mxu0 %vm3008_vm0, %v11132_v36  ;;  %v2402_v53 = vpop.f32.mrf.mxu0 }
 0x409   : > { %v2594_v25 = vpop.f32.mrf.mxu3  ;;  %v2403_v29 = vadd.f32 %v2402_v53, %v11247_v45  ;;  %v15466_v53 = vld [vmem:[#allocation146_spill] sm:$0xff] }
 0x40a   : > { %v2467_v34 = vpop.f32.mrf.mxu1 }
 0x40b   : > { %8047 = vmatpush.xpose.msk.msra.mxu2 %vm3008_vm0, %v11040_v62  ;;  %2661 = vmatmul.f32.gmra.mxu0 %v10901_v56  ;;  %v2468_v43 = vadd.f32 %v2467_v34, %v2403_v29  ;;  %v15467_v29 = vld [vmem:[#allocation147_spill] sm:$0xff]  ;;  %v15468_v34 = vld [vmem:[#allocation149_spill] sm:$0xff] }
 0x40c   : > { %2791 = vmatmul.f32.gmra.mxu2 %v10905_v33  ;;  %8089 = vmatpush.xpose.msk.msrb.mxu0 %vm3008_vm0, %v11105_v32  ;;  %v11303_v33 = vadd.f32 %v2594_v25, %v2530_v14 }
 0x40d   : > { %2726 = vmatmul.f32.gmra.mxu1 %v10917_v16 }
 0x40e   : > { %2856 = vmatmul.f32.gmra.mxu3 %v10921_v7  ;;  %v2532_v8 = vpop.f32.mrf.mxu2 }
 0x40f   : > { %8048 = vmatpush.xpose.msk.msra.mxu2 %vm3008_vm0, %v11090_v3  ;;  %v2533_v36 = vadd.f32 %v2532_v8, %v2468_v43 }
 0x410   : > { %8090 = vmatpush.xpose.msk.msrb.mxu0 %vm3008_vm0, %v11078_v15  ;;  %v2405_v56 = vpop.f32.mrf.mxu0 }
 0x411   : > { %v2597_v62 = vpop.f32.mrf.mxu3 }
 0x412   : > { %v11305_v5 = vadd.f32 %v2597_v62, %v2533_v36  ;;  %v2470_v32 = vpop.f32.mrf.mxu1 }
 0x413   : > { %8049 = vmatpush.xpose.msk.msra.mxu2 %vm3008_vm0, %v11102_v55  ;;  %2664 = vmatmul.f32.gmra.mxu0 %v10932_v28  ;;  %v2406_v55 = vadd.f32 %v2405_v56, %v11247_v45 }
 0x414   : > { %v8265_v16 = vpack.i.bf16 %v11305_v5, %v11303_v33  ;;  %2794 = vmatmul.f32.gmra.mxu2 %v10936_v19  ;;  %8091 = vmatpush.xpose.msk.msrb.mxu0 %vm3008_vm0, %v11051_v38 }
 0x415   : > { %2729 = vmatmul.f32.gmra.mxu1 %v10948_v52  ;;  %v2471_v52 = vadd.f32 %v2470_v32, %v2406_v55  ;;  %v15470_v32 = vld [vmem:[#allocation152_spill] sm:$0xff]  ;;  %v15472_v55 = vld [vmem:[#allocation154_spill] sm:$0xff] }
 0x416   : > { %2859 = vmatmul.f32.gmra.mxu3 %v10952_v60  ;;  %8266 = vrot.lane.b32.xlu2 %v8265_v16, %s9215_s18  ;;  %v2535_v15 = vpop.f32.mrf.mxu2 }
 0x417   : > { %8050 = vmatpush.xpose.msk.msra.mxu2 %vm3008_vm0, %v11011_v20  ;;  %v2536_v60 = vadd.f32 %v2535_v15, %v2471_v52  ;;  %v15471_v15 = vld [vmem:[#allocation153_spill] sm:$0xff] }
 0x418   : > { %8092 = vmatpush.xpose.msk.msrb.mxu0 %vm3008_vm0, %v11020_v9  ;;  %v2408_v28 = vpop.f32.mrf.mxu0 }
 0x419   : > { %v2600_v7 = vpop.f32.mrf.mxu3  ;;  %v2409_v19 = vadd.f32 %v2408_v28, %v11247_v45 }
 0x41a   : > { %v2473_v38 = vpop.f32.mrf.mxu1 }
 0x41b   : > { %2667 = vmatmul.f32.gmra.mxu0 %v10963_v12  ;;  %v2474_v20 = vadd.f32 %v2473_v38, %v2409_v19  ;;  %v11332_v12 = vadd.f32 %v2600_v7, %v2536_v60  ;;  %v15473_v19 = vld [vmem:[#allocation155_spill] sm:$0xff] }
 0x41c   : > { %2797 = vmatmul.f32.gmra.mxu2 %v10967_v42  ;;  %8093 = vmatpush.xpose.msk.msrb.mxu0 %vm3008_vm0, %v10989_v26 }
 0x41d   : > { %2732 = vmatmul.f32.gmra.mxu1 %v10979_v13 }
 0x41e   : > { %2862 = vmatmul.f32.gmra.mxu3 %v10983_v11  ;;  %v2538_v9 = vpop.f32.mrf.mxu2 }
 0x41f   : > { %v2539_v3 = vadd.f32 %v2538_v9, %v2474_v20 }
 0x420   : > { %8094 = vmatpush.xpose.msk.msrb.mxu0 %vm3008_vm0, %v10958_v50  ;;  %v2411_v18 = vpop.f32.mrf.mxu0  ;;  %v15458_v50 = vld [vmem:[#allocation139_spill] sm:$0xff] }
 0x421   : > { %v2603_v63 = vpop.f32.mrf.mxu3  ;;  %v2412_v26 = vadd.f32 %v2411_v18, %v11247_v45 }
 0x422   : > { %v11334_v57 = vadd.f32 %v2603_v63, %v2539_v3  ;;  %v2476_v42 = vpop.f32.mrf.mxu1  ;;  %v15474_v63 = vld [vmem:[#allocation156_spill] sm:$0xff] }
 0x423   : > { %2670 = vmatmul.f32.gmra.mxu0 %v10992_v46 }
 0x424   : > { %v8270_v13 = vpack.i.bf16 %v11334_v57, %v11332_v12  ;;  %2800 = vmatmul.f32.gmra.mxu2 %v10996_v22  ;;  %8095 = vmatpush.xpose.msk.msrb.mxu0 %vm3008_vm0, %v10927_v54  ;;  %v2477_v54 = vadd.f32 %v2476_v42, %v2412_v26  ;;  %v15477_v26 = vld [vmem:[#allocation159_spill] sm:$0xff] }
 0x425   : > { %2735 = vmatmul.f32.gmra.mxu1 %v11008_v4  ;;  %v15462_v4 = vld [vmem:[#allocation124_spill] sm:$0xff] }
 0x426   : > { %2865 = vmatmul.f32.gmra.mxu3 %v15458_v50  ;;  %8271 = vrot.lane.b32.xlu1 %v8270_v13, %s9215_s18  ;;  %v2541_v11 = vpop.f32.mrf.mxu2  ;;  %v15475_v13 = vld [vmem:[#allocation157_spill] sm:$0xff]  ;;  %v15476_v50 = vld [vmem:[#allocation158_spill] sm:$0xff] }
 0x427   : > { %v2542_v21 = vadd.f32 %v2541_v11, %v2477_v54  ;;  %v11383_v11 = vpop.permute.xlu2 %6648 }
 0x428   : > { %8096 = vmatpush.xpose.msk.msrb.mxu0 %vm3008_vm0, %v15459_v30  ;;  %v2414_v46 = vpop.f32.mrf.mxu0  ;;  %v11387_v30 = vpop.permute.xlu0 %6650 }
 0x429   : > { %v2606_v1 = vpop.f32.mrf.mxu3  ;;  %v2415_v44 = vadd.f32 %v2414_v46, %v11247_v45 }
 0x42a   : > { %v2479_v22 = vpop.f32.mrf.mxu1  ;;  %v11357_v59 = vadd.f32 %v2606_v1, %v2542_v21  ;;  %v15479_v21 = vld [vmem:[#allocation161_spill] sm:$0xff] }
 0x42b   : > { %2673 = vmatmul.f32.gmra.mxu0 %v15460_v40  ;;  %v2480_v61 = vadd.f32 %v2479_v22, %v2415_v44 }
 0x42c   : > { %2803 = vmatmul.f32.gmra.mxu2 %v15461_v31  ;;  %8097 = vmatpush.xpose.msk.msrb.mxu0 %vm3008_vm0, %v15462_v4  ;;  %v11391_v31 = vpop.permute.xlu1 %6654  ;;  %v15478_v4 = vld [vmem:[#allocation160_spill] sm:$0xff] }
 0x42d   : > { %2738 = vmatmul.f32.gmra.mxu1 %v15463_v58 }
 0x42e   : > { %2868 = vmatmul.f32.gmra.mxu3 %v15464_v23  ;;  %v2544_v49 = vpop.f32.mrf.mxu2 }
 0x42f   : > { %v2545_v37 = vadd.f32 %v2544_v49, %v2480_v61  ;;  %v15480_v61 = vld [vmem:[#allocation162_spill] sm:$0xff]  ;;  %v11396_v23 = vpop.permute.xlu2 %6652 }
 0x430   : > { %8098 = vmatpush.xpose.msk.msrb.mxu0 %vm3008_vm0, %v15465_v10  ;;  %v2417_v41 = vpop.f32.mrf.mxu0  ;;  %v15481_v10 = vld [vmem:[#allocation163_spill] sm:$0xff] }
 0x431   : > { %v2609_v51 = vpop.f32.mrf.mxu3  ;;  %v2418_v43 = vadd.f32 %v2417_v41, %v11247_v45  ;;  %v11399_v41 = vpop.permute.xlu0 %6660 }
 0x432   : > { %v11359_v24 = vadd.f32 %v2609_v51, %v2545_v37  ;;  %v2482_v39 = vpop.f32.mrf.mxu1 }
 0x433   : > { %2676 = vmatmul.f32.gmra.mxu0 %v15466_v53  ;;  %v2483_v16 = vadd.f32 %v2482_v39, %v2418_v43  ;;  %v15482_v43 = vld [vmem:[#allocation164_spill] sm:$0xff] }
 0x434   : > { %v8275_v25 = vpack.i.bf16 %v11359_v24, %v11357_v59  ;;  %2806 = vmatmul.f32.gmra.mxu2 %v15467_v29 }
 0x435   : > { %2741 = vmatmul.f32.gmra.mxu1 %v15468_v34 }
 0x436   : > { %2871 = vmatmul.f32.gmra.mxu3 %v15469_v27  ;;  %8276 = vrot.lane.b32.xlu0 %v8275_v25, %s9215_s18  ;;  %v2547_v14 = vpop.f32.mrf.mxu2 }
 0x437   : > { %v2548_v28 = vadd.f32 %v2547_v14, %v2483_v16  ;;  %v11405_v14 = vpop.permute.xlu1 %6658 }
 0x438   : > { %v2420_v8 = vpop.f32.mrf.mxu0 }
 0x439   : > { %v2612_v36 = vpop.f32.mrf.mxu3  ;;  %v2421_v56 = vadd.f32 %v2420_v8, %v11247_v45  ;;  %v11416_v16 = vpop.permute.xlu0 %6664 }
 0x43a   : > { %v2485_v62 = vpop.f32.mrf.mxu1  ;;  %v11374_v9 = vadd.f32 %v2612_v36, %v2548_v28  ;;  %v15483_v36 = vld [vmem:[#allocation165_spill] sm:$0xff] }
 0x43b   : > { %2679 = vmatmul.f32.gmra.mxu0 %v15470_v32  ;;  %v2486_v7 = vadd.f32 %v2485_v62, %v2421_v56  ;;  %v15484_v56 = vld [vmem:[#allocation166_spill] sm:$0xff]  ;;  %v11412_v62 = vpop.permute.xlu2 %6656  ;;  %v15485_v32 = vld [vmem:[#allocation167_spill] sm:$0xff] }
 0x43c   : > { %2809 = vmatmul.f32.gmra.mxu2 %v15471_v15 }
 0x43d   : > { %2744 = vmatmul.f32.gmra.mxu1 %v15472_v55 }
 0x43e   : > { %2874 = vmatmul.f32.gmra.mxu3 %v15473_v19  ;;  %v2550_v38 = vpop.f32.mrf.mxu2 }
 0x43f   : > { %v2551_v52 = vadd.f32 %v2550_v38, %v2486_v7 }
 0x440   : > { %v2423_v60 = vpop.f32.mrf.mxu0 }
 0x441   : > { %v2615_v20 = vpop.f32.mrf.mxu3  ;;  %v2424_v1 = vadd.f32 %v2423_v60, %v11247_v45  ;;  %v15486_v60 = vld [vmem:[#allocation168_spill] sm:$0xff] }
 0x442   : > { %v11376_v3 = vadd.f32 %v2615_v20, %v2551_v52  ;;  %v2488_v18 = vpop.f32.mrf.mxu1  ;;  %v11420_v52 = vpop.permute.xlu1 %6662 }
 0x443   : > { %2682 = vmatmul.f32.gmra.mxu0 %v15474_v63  ;;  %v2489_v58 = vadd.f32 %v2488_v18, %v2424_v1  ;;  %v15487_v18 = vld [vmem:[#allocation169_spill] sm:$0xff]  ;;  %v15488_v63 = vld [vmem:[#allocation170_spill] sm:$0xff] }
 0x444   : > { %v8280_v42 = vpack.i.bf16 %v11376_v3, %v11374_v9  ;;  %2812 = vmatmul.f32.gmra.mxu2 %v15475_v13 }
 0x445   : > { %2747 = vmatmul.f32.gmra.mxu1 %v15476_v50 }
 0x446   : > { %2877 = vmatmul.f32.gmra.mxu3 %v15477_v26  ;;  %8281 = vrot.lane.b32.xlu2 %v8280_v42, %s9215_s18  ;;  %v2553_v46 = vpop.f32.mrf.mxu2  ;;  %v11425_v42 = vpop.permute.xlu2 %6666  ;;  %v15489_v26 = vld [vmem:[#allocation171_spill] sm:$0xff] }
 0x447   : > { %v2554_v49 = vadd.f32 %v2553_v46, %v2489_v58  ;;  %v6669_v46 = vpop.permute.xlu0 %6668 }
 0x448   : > { %v2426_v44 = vpop.f32.mrf.mxu0 }
 0x449   : > { %v2618_v22 = vpop.f32.mrf.mxu3  ;;  %v2427_v40 = vadd.f32 %v2426_v44, %v11247_v45 }
 0x44a   : > { %v2491_v54 = vpop.f32.mrf.mxu1  ;;  %v11401_v29 = vadd.f32 %v2618_v22, %v2554_v49 }
 0x44b   : > { %2685 = vmatmul.f32.gmra.mxu0 %v15478_v4  ;;  %v2492_v37 = vadd.f32 %v2491_v54, %v2427_v40 }
 0x44c   : > { %2815 = vmatmul.f32.gmra.mxu2 %v15479_v21 }
 0x44d   : > { %2750 = vmatmul.f32.gmra.mxu1 %v15480_v61  ;;  %v15490_v61 = vld [vmem:[#allocation172_spill] sm:$0xff] }
 0x44e   : > { %2880 = vmatmul.f32.gmra.mxu3 %v15481_v10  ;;  %v2556_v51 = vpop.f32.mrf.mxu2  ;;  %v6673_v21 = vpop.permute.xlu1 %6672 }
 0x44f   : > { %v2557_v39 = vadd.f32 %v2556_v51, %v2492_v37  ;;  %v15491_v37 = vld [vmem:[#allocation173_spill] sm:$0xff]  ;;  %v6671_v10 = vpop.permute.xlu2 %6670 }
 0x450   : > { %v2429_v53 = vpop.f32.mrf.mxu0 }
 0x451   : > { %v2621_v25 = vpop.f32.mrf.mxu3  ;;  %v2430_v55 = vadd.f32 %v2429_v53, %v11247_v45 }
 0x452   : > { %v11403_v34 = vadd.f32 %v2621_v25, %v2557_v39  ;;  %v2494_v27 = vpop.f32.mrf.mxu1 }
 0x453   : > { %2688 = vmatmul.f32.gmra.mxu0 %v15482_v43  ;;  %v2495_v20 = vadd.f32 %v2494_v27, %v2430_v55 }
 0x454   : > { %v8285_v8 = vpack.i.bf16 %v11403_v34, %v11401_v29  ;;  %2818 = vmatmul.f32.gmra.mxu2 %v15483_v36 }
 0x455   : > { %2753 = vmatmul.f32.gmra.mxu1 %v15484_v56  ;;  %v15492_v56 = vld [vmem:[#allocation174_spill] sm:$0xff] }
 0x456   : > { %2883 = vmatmul.f32.gmra.mxu3 %v15485_v32  ;;  %8286 = vrot.lane.b32.xlu0 %v8285_v8, %s9215_s18  ;;  %v2559_v15 = vpop.f32.mrf.mxu2 }
 0x457   : > { %v2560_v13 = vadd.f32 %v2559_v15, %v2495_v20  ;;  %v6675_v55 = vpop.permute.xlu2 %6674 }
 0x458   : > { %v2432_v28 = vpop.f32.mrf.mxu0 }
 0x459   : > { %v2624_v7 = vpop.f32.mrf.mxu3  ;;  %v2433_v19 = vadd.f32 %v2432_v28, %v11247_v45 }
 0x45a   : > { %v2497_v38 = vpop.f32.mrf.mxu1  ;;  %v2625_v54 = vadd.f32 %v2624_v7, %v2560_v13 }
 0x45b   : > { %2691 = vmatmul.f32.gmra.mxu0 %v15486_v60  ;;  %v2498_v50 = vadd.f32 %v2497_v38, %v2433_v19 }
 0x45c   : > { %2821 = vmatmul.f32.gmra.mxu2 %v15487_v18  ;;  %v15494_v18 = vld [vmem:[#allocation27_spill] sm:$0xff] }
 0x45d   : > { %2756 = vmatmul.f32.gmra.mxu1 %v15488_v63 }
 0x45e   : > { %2886 = vmatmul.f32.gmra.mxu3 %v15489_v26  ;;  %v2562_v1 = vpop.f32.mrf.mxu2  ;;  %v6677_v36 = vpop.permute.xlu1 %6676 }
 0x45f   : > { %v2563_v44 = vadd.f32 %v2562_v1, %v2498_v50 }
 0x460   : > { %v2435_v22 = vpop.f32.mrf.mxu0 }
 0x461   : > { %v2627_v40 = vpop.f32.mrf.mxu3  ;;  %v2436_v53 = vadd.f32 %v2435_v22, %v11247_v45  ;;  %v15496_v22 = vld [vmem:[#allocation28_spill] sm:$0xff] }
 0x462   : > { %v2628_v4 = vadd.f32 %v2627_v40, %v2563_v44  ;;  %v2500_v58 = vpop.f32.mrf.mxu1 }
 0x463   : > { %2694 = vmatmul.f32.gmra.mxu0 %v15490_v61 }
 0x464   : > { %v8290_v49 = vpack.i.bf16 %v2628_v4, %v2625_v54  ;;  %2824 = vmatmul.f32.gmra.mxu2 %v15491_v37 }
 0x465   : > { %2759 = vmatmul.f32.gmra.mxu1 %v11212_v0  ;;  %v2501_v0 = vadd.f32 %v2500_v58, %v2436_v53  ;;  %v15497_v58 = vld [vmem:[#allocation17_spill] sm:$0xff] }
 0x466   : > { %2889 = vmatmul.f32.gmra.mxu3 %v11216_v2  ;;  %8291 = vrot.lane.b32.xlu1 %v8290_v49, %s9215_s18  ;;  %v15493_v2 = vld [vmem:[#allocation175_spill] sm:$0xff] }
 0x467   : > { %v6679_v51 = vpop.permute.xlu0 %6678  ;;  %v2565_v39 = vpop.f32.mrf.mxu2 }
 0x468   : > { %8131 = vmatpush.xpose.msk.msrb.mxu2 %vm3008_vm0, %v6679_v51  ;;  %v2438_v25 = vpop.f32.mrf.mxu0  ;;  %v2566_v32 = vadd.f32 %v2565_v39, %v2501_v0  ;;  %v15498_v51 = vld [vmem:[#allocation29_spill] sm:$0xff]  ;;  %v15502_v0 = vld [vmem:[#allocation31_spill] sm:$0xff] }
 0x469   : > { %v2630_v27 = vpop.f32.mrf.mxu3  ;;  %v2439_v43 = vadd.f32 %v2438_v25, %v11247_v45  ;;  %v15500_v25 = vld [vmem:[#allocation30_spill] sm:$0xff] }
 0x46a   : > { %v2503_v8 = vpop.f32.mrf.mxu1  ;;  %v2631_v38 = vadd.f32 %v2630_v27, %v2566_v32  ;;  %v15501_v27 = vld [vmem:[#allocation19_spill] sm:$0xff] }
 0x46b   : > { %2697 = vmatmul.f32.gmra.mxu0 %v15492_v56  ;;  %v2504_v15 = vadd.f32 %v2503_v8, %v2439_v43 }
 0x46c   : > { %8132 = vmatpush.xpose.msk.msrb.mxu2 %vm3008_vm0, %v6677_v36 }
 0x46d   : > { %2827 = vmatmul.f32.gmra.mxu2 %v15493_v2  ;;  %2762 = vmatmul.f32.gmra.mxu1 %v11233_v47  ;;  %v11445_v47 = vperm.slane %v11244_v6, 7 }
 0x46e   : > { %2892 = vmatmul.f32.gmra.mxu3 %v11237_v17  ;;  %v15495_v17 = vld [vmem:[#allocation16_spill] sm:$0xff] }
 0x46f   : > { %v2568_v28 = vpop.f32.mrf.mxu2 }
 0x470   : > { %v2569_v7 = vadd.f32 %v2568_v28, %v2504_v15  ;;  %8133 = vmatpush.xpose.msk.msrb.mxu2 %vm3008_vm0, %v6675_v55  ;;  %v2653_v19 = vpop.f32.mrf.mxu0  ;;  %v15504_v28 = vld [vmem:[#allocation32_spill] sm:$0xff] }
 0x471   : > { %v2633_v45 = vpop.f32.mrf.mxu3  ;;  %v2654_v50 = vadd.f32 %v2653_v19, %v11445_v47 }
 0x472   : > { %v2634_v60 = vadd.f32 %v2633_v45, %v2569_v7  ;;  %v2718_v20 = vpop.f32.mrf.mxu1  ;;  %v15505_v7 = vld [vmem:[#allocation21_spill] sm:$0xff] }
 0x473   : > { %8003 = vmatmul.msk.f32.vlgmr.msra.gmra.mxu0 %vm3008_vm0, %v15494_v18  ;;  %v2719_v40 = vadd.f32 %v2718_v20, %v2654_v50  ;;  %v15507_v50 = vld [vmem:[#allocation22_spill] sm:$0xff] }
 0x474   : > { %v8295_v63 = vpack.i.bf16 %v2634_v60, %v2631_v38  ;;  %8134 = vmatpush.xpose.msk.msrb.mxu2 %vm3008_vm0, %v6673_v21  ;;  %3906 = vmatpush.msra.mxu1 %v2634_v60 }
 0x475   : > { %8051 = vmatmul.msk.f32.vlgmr.msra.gmra.mxu2 %vm3008_vm0, %v15495_v17 }
 0x476   : > { %3907 = vmatpush.msra.mxu1 %v2631_v38  ;;  %8296 = vrot.lane.b32.xlu2 %v8295_v63, %s9215_s18 }
 0x477   : > { %v2783_v13 = vpop.f32.mrf.mxu2 }
 0x478   : > { %8135 = vmatpush.xpose.msk.msrb.mxu2 %vm3008_vm0, %v6671_v10  ;;  %3908 = vmatpush.msra.mxu1 %v2628_v4  ;;  %v2656_v26 = vpop.f32.mrf.mxu0  ;;  %v2784_v21 = vadd.f32 %v2783_v13, %v2719_v40  ;;  %v15506_v13 = vld [vmem:[#allocation33_spill] sm:$0xff]  ;;  %v15508_v40 = vld [vmem:[#allocation34_spill] sm:$0xff] }
 0x479   : > { %v2848_v1 = vpop.f32.mrf.mxu3  ;;  %v2657_v6 = vadd.f32 %v2656_v26, %v11445_v47 }
 0x47a   : > { %3909 = vmatpush.msra.mxu1 %v2625_v54  ;;  %v2721_v44 = vpop.f32.mrf.mxu1  ;;  %v11464_v10 = vadd.f32 %v2848_v1, %v2784_v21  ;;  %v15509_v21 = vld [vmem:[#allocation23_spill] sm:$0xff] }
 0x47b   : > { %8004 = vmatmul.msk.f32.gmra.mxu0 %vm3008_vm0, %v15496_v22  ;;  %v2722_v61 = vadd.f32 %v2721_v44, %v2657_v6 }
 0x47c   : > { %8136 = vmatpush.xpose.msk.msrb.mxu2 %vm3008_vm0, %v6669_v46  ;;  %3910 = vmatpush.msra.mxu1 %v11403_v34 }
 0x47d   : > { %8052 = vmatmul.msk.f32.gmra.mxu2 %vm3008_vm0, %v15497_v58 }
 0x47e   : > { %3911 = vmatpush.msra.mxu1 %v11401_v29 }
 0x47f   : > { %v2786_v4 = vpop.f32.mrf.mxu2 }
 0x480   : > { %v2787_v49 = vadd.f32 %v2786_v4, %v2722_v61  ;;  %8137 = vmatpush.xpose.msk.msrb.mxu2 %vm3008_vm0, %v11425_v42  ;;  %3912 = vmatpush.msra.mxu1 %v11376_v3  ;;  %v2659_v54 = vpop.f32.mrf.mxu0  ;;  %v15499_v3 = vld [vmem:[#allocation18_spill] sm:$0xff] }
 0x481   : > { %v2851_v37 = vpop.f32.mrf.mxu3  ;;  %v2660_v42 = vadd.f32 %v2659_v54, %v11445_v47 }
 0x482   : > { %v11466_v46 = vadd.f32 %v2851_v37, %v2787_v49  ;;  %3913 = vmatpush.msra.mxu1 %v11374_v9  ;;  %v2724_v34 = vpop.f32.mrf.mxu1 }
 0x483   : > { %8005 = vmatmul.msk.f32.gmra.mxu0 %vm3008_vm0, %v15498_v51 }
 0x484   : > { %v8300_v29 = vpack.i.bf16 %v11464_v10, %v11466_v46  ;;  %8138 = vmatpush.xpose.msk.msrb.mxu2 %vm3008_vm0, %v11416_v16  ;;  %3914 = vmatpush.msra.mxu1 %v11359_v24 }
 0x485   : > { %8053 = vmatmul.msk.f32.gmra.mxu2 %vm3008_vm0, %v15499_v3  ;;  %v15510_v3 = vld [vmem:[#allocation35_spill] sm:$0xff] }
 0x486   : > { %3915 = vmatpush.msra.mxu1 %v11357_v59  ;;  %8301 = vrot.lane.b32.xlu1 %v8300_v29, %s9215_s18  ;;  %v2725_v59 = vadd.f32 %v2724_v34, %v2660_v42  ;;  %v15511_v42 = vld [vmem:[#allocation24_spill] sm:$0xff] }
 0x487   : > { %v2789_v9 = vpop.f32.mrf.mxu2 }
 0x488   : > { %8139 = vmatpush.xpose.msk.msrb.mxu2 %vm3008_vm0, %v11420_v52  ;;  %3916 = vmatpush.msra.mxu1 %v11334_v57  ;;  %v2662_v39 = vpop.f32.mrf.mxu0  ;;  %v2790_v57 = vadd.f32 %v2789_v9, %v2725_v59 }
 0x489   : > { %v2854_v53 = vpop.f32.mrf.mxu3  ;;  %v2663_v16 = vadd.f32 %v2662_v39, %v11445_v47 }
 0x48a   : > { %3917 = vmatpush.msra.mxu1 %v11332_v12  ;;  %v2727_v24 = vpop.f32.mrf.mxu1  ;;  %v11497_v56 = vadd.f32 %v2854_v53, %v2790_v57 }
 0x48b   : > { %8006 = vmatmul.msk.f32.gmra.mxu0 %vm3008_vm0, %v15500_v25  ;;  %v2728_v52 = vadd.f32 %v2727_v24, %v2663_v16 }
 0x48c   : > { %8140 = vmatpush.xpose.msk.msrb.mxu2 %vm3008_vm0, %v11399_v41  ;;  %3918 = vmatpush.msra.mxu1 %v11305_v5 }
 0x48d   : > { %8054 = vmatmul.msk.f32.gmra.mxu2 %vm3008_vm0, %v15501_v27  ;;  %v15512_v27 = vld [vmem:[#allocation36_spill] sm:$0xff] }
 0x48e   : > { %3919 = vmatpush.msra.mxu1 %v11303_v33 }
 0x48f   : > { %v2792_v43 = vpop.f32.mrf.mxu2 }
 0x490   : > { %v2793_v8 = vadd.f32 %v2792_v43, %v2728_v52  ;;  %8141 = vmatpush.xpose.msk.msrb.mxu2 %vm3008_vm0, %v11405_v14  ;;  %3920 = vmatpush.msra.mxu1 %v11272_v35  ;;  %v2665_v12 = vpop.f32.mrf.mxu0  ;;  %v15503_v14 = vld [vmem:[#allocation20_spill] sm:$0xff]  ;;  %v15513_v52 = vld [vmem:[#allocation25_spill] sm:$0xff] }
 0x491   : > { %v2857_v36 = vpop.f32.mrf.mxu3  ;;  %v2666_v2 = vadd.f32 %v2665_v12, %v11445_v47 }
 0x492   : > { %v11499_v41 = vadd.f32 %v2857_v36, %v2793_v8  ;;  %3921 = vmatpush.msra.mxu1 %v11270_v48  ;;  %v2730_v5 = vpop.f32.mrf.mxu1  ;;  %v11559_v36 = vpop.permute.xlu2 %8266 }
 0x493   : > { %8007 = vmatmul.msk.f32.gmra.mxu0 %vm3008_vm0, %v15502_v0 }
 0x494   : > { %v8305_v33 = vpack.i.bf16 %v11497_v56, %v11499_v41  ;;  %8142 = vmatpush.xpose.msk.msrb.mxu2 %vm3008_vm0, %v11412_v62  ;;  %v2731_v62 = vadd.f32 %v2730_v5, %v2666_v2 }
 0x495   : > { %8055 = vmatmul.msk.f32.gmra.mxu2 %vm3008_vm0, %v15503_v14 }
 0x496   : > { %8306 = vrot.lane.b32.xlu1 %v8305_v33, %s9215_s18 }
 0x497   : > { %v2795_v35 = vpop.f32.mrf.mxu2 }
 0x498   : > { %8143 = vmatpush.xpose.msk.msrb.mxu2 %vm3008_vm0, %v11391_v31  ;;  %v2668_v48 = vpop.f32.mrf.mxu0  ;;  %v2796_v45 = vadd.f32 %v2795_v35, %v2731_v62 }
 0x499   : > { %v2860_v32 = vpop.f32.mrf.mxu3  ;;  %v2669_v15 = vadd.f32 %v2668_v48, %v11445_v47  ;;  %v15514_v48 = vld [vmem:[#allocation37_spill] sm:$0xff] }
 0x49a   : > { %v2733_v55 = vpop.f32.mrf.mxu1  ;;  %v11523_v18 = vadd.f32 %v2860_v32, %v2796_v45 }
 0x49b   : > { %8008 = vmatmul.msk.f32.gmra.mxu0 %vm3008_vm0, %v15504_v28  ;;  %v2734_v19 = vadd.f32 %v2733_v55, %v2669_v15  ;;  %v15515_v15 = vld [vmem:[#allocation26_spill] sm:$0xff] }
 0x49c   : > { %8144 = vmatpush.xpose.msk.msrb.mxu2 %vm3008_vm0, %v11396_v23 }
 0x49d   : > { %8056 = vmatmul.msk.f32.gmra.mxu2 %vm3008_vm0, %v15505_v7 }
 0x49f   : > { %v2798_v38 = vpop.f32.mrf.mxu2 }
 0x4a0   : > { %v2799_v60 = vadd.f32 %v2798_v38, %v2734_v19  ;;  %8145 = vmatpush.xpose.msk.msrb.mxu2 %vm3008_vm0, %v11387_v30  ;;  %v2671_v31 = vpop.f32.mrf.mxu0  ;;  %v11572_v28 = vpop.permute.xlu2 %8281 }
 0x4a1   : > { %v2863_v20 = vpop.f32.mrf.mxu3  ;;  %v2672_v26 = vadd.f32 %v2671_v31, %v11445_v47  ;;  %v11575_v19 = vpop.permute.xlu0 %8261  ;;  %v15516_v31 = vld [vmem:[#allocation38_spill] sm:$0xff] }
 0x4a2   : > { %v11525_v63 = vadd.f32 %v2863_v20, %v2799_v60  ;;  %v2736_v17 = vpop.f32.mrf.mxu1 }
 0x4a3   : > { %8009 = vmatmul.msk.f32.gmra.mxu0 %vm3008_vm0, %v15506_v13  ;;  %v2737_v58 = vadd.f32 %v2736_v17, %v2672_v26  ;;  %v15517_v17 = vld [vmem:[#allocation41_spill] sm:$0xff] }
 0x4a4   : > { %v8310_v23 = vpack.i.bf16 %v11523_v18, %v11525_v63  ;;  %8146 = vmatpush.xpose.msk.msrb.mxu2 %vm3008_vm0, %v11383_v11 }
 0x4a5   : > { %8057 = vmatmul.msk.f32.gmra.mxu2 %vm3008_vm0, %v15507_v50 }
 0x4a6   : > { %8311 = vrot.lane.b32.xlu1 %v8310_v23, %s9215_s18 }
 0x4a7   : > { %v2801_v30 = vpop.f32.mrf.mxu2 }
 0x4a8   : > { %v2674_v1 = vpop.f32.mrf.mxu0  ;;  %v2802_v11 = vadd.f32 %v2801_v30, %v2737_v58  ;;  %v11582_v30 = vpop.permute.xlu1 %8271 }
 0x4a9   : > { %v2866_v6 = vpop.f32.mrf.mxu3  ;;  %v2675_v44 = vadd.f32 %v2674_v1, %v11445_v47 }
 0x4aa   : > { %v2739_v22 = vpop.f32.mrf.mxu1  ;;  %v11542_v34 = vadd.f32 %v2866_v6, %v2802_v11 }
 0x4ab   : > { %8010 = vmatmul.msk.f32.gmra.mxu0 %vm3008_vm0, %v15508_v40  ;;  %v2740_v61 = vadd.f32 %v2739_v22, %v2675_v44  ;;  %v8277_v40 = vpop.permute.xlu0 %8276 }
 0x4ad   : > { %8058 = vmatmul.msk.f32.gmra.mxu2 %vm3008_vm0, %v15509_v21 }
 0x4af   : > { %v2804_v4 = vpop.f32.mrf.mxu2 }
 0x4b0   : > { %v2805_v49 = vadd.f32 %v2804_v4, %v2740_v61  ;;  %v2677_v54 = vpop.f32.mrf.mxu0  ;;  %v15518_v4 = vld [vmem:[#allocation12_spill] sm:$0xff] }
 0x4b1   : > { %v2869_v37 = vpop.f32.mrf.mxu3  ;;  %v2678_v53 = vadd.f32 %v2677_v54, %v11445_v47  ;;  %v15519_v54 = vld [vmem:[#allocation46_spill] sm:$0xff] }
 0x4b2   : > { %v11544_v51 = vadd.f32 %v2869_v37, %v2805_v49  ;;  %v2742_v29 = vpop.f32.mrf.mxu1 }
 0x4b3   : > { %8011 = vmatmul.msk.f32.gmra.mxu0 %vm3008_vm0, %v15510_v3  ;;  %v2743_v57 = vadd.f32 %v2742_v29, %v2678_v53 }
 0x4b4   : > { %v8315_v9 = vpack.i.bf16 %v11542_v34, %v11544_v51 }
 0x4b5   : > { %8059 = vmatmul.msk.f32.gmra.mxu2 %vm3008_vm0, %v15511_v42 }
 0x4b6   : > { %8316 = vrot.lane.b32.xlu0 %v8315_v9, %s9215_s18 }
 0x4b7   : > { %v2807_v39 = vpop.f32.mrf.mxu2 }
 0x4b8   : > { %v2680_v16 = vpop.f32.mrf.mxu0  ;;  %v2808_v43 = vadd.f32 %v2807_v39, %v2743_v57 }
 0x4b9   : > { %v2872_v24 = vpop.f32.mrf.mxu3  ;;  %v2681_v25 = vadd.f32 %v2680_v16, %v11445_v47 }
 0x4ba   : > { %v2745_v59 = vpop.f32.mrf.mxu1  ;;  %v11561_v14 = vadd.f32 %v2872_v24, %v2808_v43 }
 0x4bb   : > { %8012 = vmatmul.msk.f32.gmra.mxu0 %vm3008_vm0, %v15512_v27  ;;  %v2746_v8 = vadd.f32 %v2745_v59, %v2681_v25  ;;  %v15520_v59 = vld [vmem:[#allocation13_spill] sm:$0xff] }
 0x4bd   : > { %8060 = vmatmul.msk.f32.gmra.mxu2 %vm3008_vm0, %v15513_v52  ;;  %v15521_v52 = vld [vmem:[#allocation51_spill] sm:$0xff] }
 0x4bf   : > { %v2810_v12 = vpop.f32.mrf.mxu2 }
 0x4c0   : > { %v2811_v5 = vadd.f32 %v2810_v12, %v2746_v8  ;;  %v2683_v0 = vpop.f32.mrf.mxu0 }
 0x4c1   : > { %v2875_v33 = vpop.f32.mrf.mxu3  ;;  %v2684_v62 = vadd.f32 %v2683_v0, %v11445_v47 }
 0x4c2   : > { %v11563_v35 = vadd.f32 %v2875_v33, %v2811_v5  ;;  %v2748_v2 = vpop.f32.mrf.mxu1  ;;  %v8284_v33 = vunpack.i.h.bf16 %v11572_v28 }
 0x4c3   : > { %8013 = vmatmul.msk.f32.gmra.mxu0 %vm3008_vm0, %v15514_v48  ;;  %v2749_v20 = vadd.f32 %v2748_v2, %v2684_v62  ;;  %v8283_v62 = vunpack.i.l.bf16 %v11572_v28  ;;  %v8273_v28 = vunpack.i.l.bf16 %v11582_v30 }
 0x4c4   : > { %v8320_v32 = vpack.i.bf16 %v11561_v14, %v11563_v35 }
 0x4c5   : > { %8061 = vmatmul.msk.f32.gmra.mxu2 %vm3008_vm0, %v15515_v15 }
 0x4c6   : > { %8321 = vrot.lane.b32.xlu2 %v8320_v32, %s9215_s18 }
 0x4c7   : > { %v2813_v55 = vpop.f32.mrf.mxu2 }
 0x4c8   : > { %v2686_v7 = vpop.f32.mrf.mxu0  ;;  %v2814_v13 = vadd.f32 %v2813_v55, %v2749_v20  ;;  %v8287_v53 = vpop.permute.xlu0 %8286 }
 0x4c9   : > { %v2878_v45 = vpop.f32.mrf.mxu3  ;;  %v2687_v38 = vadd.f32 %v2686_v7, %v11445_v47  ;;  %v8289_v57 = vunpack.i.h.bf16 %v8287_v53  ;;  %v8288_v12 = vunpack.i.l.bf16 %v8287_v53  ;;  %v15522_v7 = vld [vmem:[#allocation14_spill] sm:$0xff] }
 0x4ca   : > { %v2751_v60 = vpop.f32.mrf.mxu1  ;;  %v11584_v58 = vadd.f32 %v2878_v45, %v2814_v13 }
 0x4cb   : > { %8014 = vmatmul.msk.f32.gmra.mxu0 %vm3008_vm0, %v15516_v31  ;;  %v2752_v23 = vadd.f32 %v2751_v60, %v2687_v38  ;;  %v8279_v38 = vunpack.i.h.bf16 %v8277_v40  ;;  %v15523_v60 = vld [vmem:[#allocation56_spill] sm:$0xff]  ;;  %v8278_v31 = vunpack.i.l.bf16 %v8277_v40  ;;  %v8268_v40 = vunpack.i.l.bf16 %v11559_v36 }
 0x4cd   : > { %8062 = vmatmul.msk.f32.gmra.mxu2 %vm3008_vm0, %v15517_v17  ;;  %v8274_v17 = vunpack.i.h.bf16 %v11582_v30 }
 0x4cf   : > { %v2816_v50 = vpop.f32.mrf.mxu2 }
 0x4d0   : > { %v2817_v26 = vadd.f32 %v2816_v50, %v2752_v23  ;;  %v8297_v1 = vpop.permute.xlu2 %8296  ;;  %v2689_v44 = vpop.f32.mrf.mxu0 }
 0x4d1   : > { %v8299_v6 = vunpack.i.h.bf16 %v8297_v1  ;;  %v2881_v22 = vpop.f32.mrf.mxu3  ;;  %v8298_v61 = vunpack.i.l.bf16 %v8297_v1  ;;  %v2690_v29 = vadd.f32 %v2689_v44, %v11445_v47  ;;  %v15524_v1 = vld [vmem:[#allocation15_spill] sm:$0xff]  ;;  %v8269_v44 = vunpack.i.h.bf16 %v11559_v36 }
 0x4d2   : > { %v11586_v21 = vadd.f32 %v2881_v22, %v2817_v26  ;;  %v2754_v11 = vpop.f32.mrf.mxu1  ;;  %v15525_v22 = vld [vmem:[#allocation60_spill] sm:$0xff]  ;;  %v8263_v36 = vunpack.i.l.bf16 %v11575_v19 }
 0x4d3   : > { %5173 = vmatpush.msra.mxu3 %v8299_v6  ;;  %8015 = vmatmul.msk.f32.gmra.mxu0 %vm3008_vm0, %v15518_v4  ;;  %v2755_v27 = vadd.f32 %v2754_v11, %v2690_v29  ;;  %v8264_v4 = vunpack.i.h.bf16 %v11575_v19 }
 0x4d4   : > { %v8325_v49 = vpack.i.bf16 %v11584_v58, %v11586_v21 }
 0x4d5   : > { %8063 = vmatmul.msk.f32.gmra.mxu2 %vm3008_vm0, %v15519_v54  ;;  %5174 = vmatpush.msra.mxu3 %v8298_v61 }
 0x4d6   : > { %8326 = vrot.lane.b32.xlu0 %v8325_v49, %s9215_s18 }
 0x4d7   : > { %v2819_v37 = vpop.f32.mrf.mxu2 }
 0x4d8   : > { %v8292_v3 = vpop.permute.xlu1 %8291  ;;  %v2692_v42 = vpop.f32.mrf.mxu0  ;;  %v2820_v43 = vadd.f32 %v2819_v37, %v2755_v27  ;;  %v15531_v27 = vld [vmem:[#allocation102_spill] sm:$0xff] }
 0x4d9   : > { %v8294_v9 = vunpack.i.h.bf16 %v8292_v3  ;;  %v2884_v39 = vpop.f32.mrf.mxu3  ;;  %v2693_v16 = vadd.f32 %v2692_v42, %v11445_v47  ;;  %v8293_v25 = vunpack.i.l.bf16 %v8292_v3  ;;  %v15526_v3 = vld [vmem:[#allocation94_spill] sm:$0xff]  ;;  %v15527_v42 = vld [vmem:[#allocation113_spill] sm:$0xff] }
 0x4da   : > { %v2757_v24 = vpop.f32.mrf.mxu1  ;;  %v2885_v32 = vadd.f32 %v2884_v39, %v2820_v43 }
 0x4db   : > { %5175 = vmatpush.msra.mxu3 %v8294_v9  ;;  %8016 = vmatmul.msk.f32.gmra.mxu0 %vm3008_vm0, %v15520_v59  ;;  %v2758_v8 = vadd.f32 %v2757_v24, %v2693_v16  ;;  %v15528_v16 = vld [vmem:[#allocation98_spill] sm:$0xff]  ;;  %v15529_v24 = vld [vmem:[#allocation112_spill] sm:$0xff] }
 0x4dc   : > { %v15530_v59 = vld [vmem:[#allocation92_spill] sm:$0xff] }
 0x4dd   : > { %8064 = vmatmul.msk.f32.gmra.mxu2 %vm3008_vm0, %v15521_v52  ;;  %5176 = vmatpush.msra.mxu3 %v8293_v25  ;;  %v15537_v52 = vld [vmem:[#allocation105_spill] sm:$0xff] }
 0x4df   : > { %v2822_v5 = vpop.f32.mrf.mxu2  ;;  %5177 = vmatpush.msra.mxu3 %v8289_v57  ;;  %v15533_v57 = vld [vmem:[#allocation116_spill] sm:$0xff] }
 0x4e0   : > { %v2823_v0 = vadd.f32 %v2822_v5, %v2758_v8  ;;  %v2695_v2 = vpop.f32.mrf.mxu0  ;;  %v15538_v8 = vld [vmem:[#allocation100_spill] sm:$0xff] }
 0x4e1   : > { %v2887_v48 = vpop.f32.mrf.mxu3  ;;  %5178 = vmatpush.msra.mxu3 %v8288_v12  ;;  %v2696_v50 = vadd.f32 %v2695_v2, %v11445_v47  ;;  %v15539_v12 = vld [vmem:[#allocation119_spill] sm:$0xff]  ;;  %v15541_v2 = vld [vmem:[#allocation118_spill] sm:$0xff] }
 0x4e2   : > { %v2888_v15 = vadd.f32 %v2887_v48, %v2823_v0  ;;  %v2760_v55 = vpop.f32.mrf.mxu1 }
 0x4e3   : > { %5179 = vmatpush.msra.mxu3 %v8284_v33  ;;  %8017 = vmatmul.msk.f32.gmra.mxu0 %vm3008_vm0, %v15522_v7  ;;  %v2761_v11 = vadd.f32 %v2760_v55, %v2696_v50  ;;  %v15540_v33 = vld [vmem:[#allocation95_spill] sm:$0xff]  ;;  %v15543_v55 = vld [vmem:[#allocation108_spill] sm:$0xff] }
 0x4e4   : > { %v8330_v45 = vpack.i.bf16 %v2885_v32, %v2888_v15 }
 0x4e5   : > { %8065 = vmatmul.msk.f32.gmra.mxu2 %vm3008_vm0, %v15523_v60  ;;  %5180 = vmatpush.msra.mxu3 %v8283_v62 }
 0x4e6   : > { %8331 = vrot.lane.b32.xlu0 %v8330_v45, %s9215_s18  ;;  %v15544_v45 = vld [vmem:[#allocation103_spill] sm:$0xff] }
 0x4e7   : > { %v2825_v20 = vpop.f32.mrf.mxu2  ;;  %5181 = vmatpush.msra.mxu3 %v8279_v38  ;;  %v15545_v38 = vld [vmem:[#allocation121_spill] sm:$0xff] }
 0x4e8   : > { %v2698_v13 = vpop.f32.mrf.mxu0 }
 0x4e9   : > { %v2890_v23 = vpop.f32.mrf.mxu3  ;;  %5182 = vmatpush.msra.mxu3 %v8278_v31  ;;  %v2699_v26 = vadd.f32 %v2698_v13, %v11445_v47  ;;  %v2826_v47 = vadd.f32 %v2825_v20, %v2761_v11  ;;  %v15546_v20 = vld [vmem:[#allocation96_spill] sm:$0xff] }
 0x4ea   : > { %v2763_v6 = vpop.f32.mrf.mxu1 }
 0x4eb   : > { %5183 = vmatpush.msra.mxu3 %v8274_v17  ;;  %8018 = vmatmul.msk.f32.gmra.mxu0 %vm3008_vm0, %v15524_v1  ;;  %v2764_v61 = vadd.f32 %v2763_v6, %v2699_v26  ;;  %v2891_v9 = vadd.f32 %v2890_v23, %v2826_v47  ;;  %v15547_v17 = vld [vmem:[#allocation120_spill] sm:$0xff]  ;;  %v15549_v26 = vld [vmem:[#allocation111_spill] sm:$0xff]  ;;  %v15553_v47 = vld [vmem:[#allocation74_spill] sm:$0xff] }
 0x4ed   : > { %8066 = vmatmul.msk.f32.gmra.mxu2 %vm3008_vm0, %v15525_v22  ;;  %5184 = vmatpush.msra.mxu3 %v8273_v28  ;;  %v15548_v28 = vld [vmem:[#allocation107_spill] sm:$0xff] }
 0x4ef   : > { %5185 = vmatpush.msra.mxu3 %v8269_v44  ;;  %v15550_v44 = vld [vmem:[#allocation106_spill] sm:$0xff] }
 0x4f0   : > { %v2828_v30 = vpop.f32.mrf.mxu2  ;;  %v11619_v37 = vpop.f32.mrf.mxu0 }
 0x4f1   : > { %v2829_v49 = vadd.f32 %v2828_v30, %v2764_v61  ;;  %v2893_v54 = vpop.f32.mrf.mxu3  ;;  %5186 = vmatpush.msra.mxu3 %v8268_v40  ;;  %3234 = vmax.xlane.f32.xlu1 %v11619_v37  ;;  %v15551_v40 = vld [vmem:[#allocation75_spill] sm:$0xff] }
 0x4f2   : > { %v15552_v30 = vld [vmem:[#allocation99_spill] sm:$0xff] }
 0x4f3   : > { %v2894_v29 = vadd.f32 %v2893_v54, %v2829_v49  ;;  %5187 = vmatpush.msra.mxu3 %v8264_v4  ;;  %8019 = vmatmul.msk.f32.gmra.mxu0 %vm3008_vm0, %v15526_v3 }
 0x4f5   : > { %8067 = vmatmul.msk.f32.gmra.mxu2 %vm3008_vm0, %v15527_v42  ;;  %6359 = vmatpush.msrb.mxu1 %v2894_v29 }
 0x4f6   : > { %5188 = vmatpush.msra.mxu3 %v8263_v36  ;;  %v15555_v36 = vld [vmem:[#allocation114_spill] sm:$0xff] }
 0x4f7   : > { %6360 = vmatpush.msrb.mxu1 %v2891_v9 }
 0x4f8   : > { %v11627_v39 = vpop.f32.mrf.mxu2  ;;  %v11629_v53 = vpop.f32.mrf.mxu0 }
 0x4f9   : > { %6361 = vmatpush.msrb.mxu1 %v2888_v15  ;;  %3236 = vmax.xlane.f32.xlu2 %v11629_v53  ;;  %v15542_v15 = vld [vmem:[#allocation104_spill] sm:$0xff]  ;;  %v11744_v50 = vpop.permute.xlu1 %8301 }
 0x4fb   : > { %6362 = vmatpush.msrb.mxu1 %v2885_v32  ;;  %8020 = vmatmul.msk.f32.gmra.mxu0 %vm3008_vm0, %v15528_v16 }
 0x4fd   : > { %8068 = vmatmul.msk.f32.gmra.mxu2 %vm3008_vm0, %v15529_v24  ;;  %6363 = vmatpush.msrb.mxu1 %v11586_v21 }
 0x4ff   : > { %6364 = vmatpush.msrb.mxu1 %v11584_v58  ;;  %v8335_v58 = vpack.i.bf16 %v2891_v9, %v2894_v29  ;;  %v15554_v29 = vld [vmem:[#allocation110_spill] sm:$0xff] }
 0x500   : > { %v11638_v19 = vpop.f32.mrf.mxu2  ;;  %v11641_v25 = vpop.f32.mrf.mxu0 }
 0x501   : > { %6365 = vmatpush.msrb.mxu1 %v11563_v35 }
 0x503   : > { %6366 = vmatpush.msrb.mxu1 %v11561_v14  ;;  %8021 = vmatmul.msk.f32.gmra.mxu0 %vm3008_vm0, %v15530_v59  ;;  %v15532_v14 = vld [vmem:[#allocation93_spill] sm:$0xff] }
 0x505   : > { %8069 = vmatmul.msk.f32.gmra.mxu2 %vm3008_vm0, %v15531_v27  ;;  %6367 = vmatpush.msrb.mxu1 %v11544_v51  ;;  %v15535_v51 = vld [vmem:[#allocation115_spill] sm:$0xff] }
 0x507   : > { %6368 = vmatpush.msrb.mxu1 %v11542_v34 }
 0x508   : > { %v11650_v21 = vpop.f32.mrf.mxu2  ;;  %v11654_v35 = vpop.f32.mrf.mxu0 }
 0x509   : > { %6369 = vmatpush.msrb.mxu1 %v11525_v63  ;;  %4441 = vmax.xlane.f32.xlu2 %v11650_v21  ;;  %v15534_v63 = vld [vmem:[#allocation97_spill] sm:$0xff]  ;;  %v11757_v22 = vpop.permute.xlu1 %8306 }
 0x50a   : > { %8336 = vrot.lane.b32.xlu1 %v8335_v58, %s9215_s18  ;;  %v15556_v58 = vld [vmem:[#allocation109_spill] sm:$0xff] }
 0x50b   : > { %6370 = vmatpush.msrb.mxu1 %v11523_v18  ;;  %8022 = vmatmul.msk.f32.gmra.mxu0 %vm3008_vm0, %v15532_v14  ;;  %v15557_v14 = vld [vmem:[#allocation79_spill] sm:$0xff] }
 0x50d   : > { %8070 = vmatmul.msk.f32.gmra.mxu2 %vm3008_vm0, %v15533_v57  ;;  %6371 = vmatpush.msrb.mxu1 %v11499_v41 }
 0x50f   : > { %6372 = vmatpush.msrb.mxu1 %v11497_v56 }
 0x510   : > { %v11664_v34 = vpop.f32.mrf.mxu2  ;;  %4439 = vmax.xlane.f32.xlu0 %v11638_v19  ;;  %v11669_v18 = vpop.f32.mrf.mxu0 }
 0x511   : > { %6373 = vmatpush.msrb.mxu1 %v11466_v46  ;;  %3240 = vmax.xlane.f32.xlu2 %v11654_v35  ;;  %v15536_v46 = vld [vmem:[#allocation101_spill] sm:$0xff] }
 0x513   : > { %6374 = vmatpush.msrb.mxu1 %v11464_v10  ;;  %8023 = vmatmul.msk.f32.gmra.mxu0 %vm3008_vm0, %v15534_v63 }
 0x515   : > { %8071 = vmatmul.msk.f32.gmra.mxu2 %vm3008_vm0, %v15535_v51 }
 0x518   : > { %v11676_v41 = vpop.f32.mrf.mxu2  ;;  %3238 = vmax.xlane.f32.xlu0 %v11641_v25  ;;  %v11679_v56 = vpop.f32.mrf.mxu0 }
 0x519   : > { %3244 = vmax.xlane.f32.xlu2 %v11679_v56  ;;  %v11768_v4 = vpop.permute.xlu1 %8311 }
 0x51b   : > { %8024 = vmatmul.msk.f32.gmra.mxu0 %vm3008_vm0, %v15536_v46 }
 0x51d   : > { %8072 = vmatmul.msk.f32.gmra.mxu2 %vm3008_vm0, %v15537_v52 }
 0x520   : > { %v11686_v10 = vpop.f32.mrf.mxu2  ;;  %4445 = vmax.xlane.f32.xlu0 %v11676_v41  ;;  %v11689_v43 = vpop.f32.mrf.mxu0 }
 0x521   : > { %4447 = vmax.xlane.f32.xlu2 %v11686_v10  ;;  %v11781_v3 = vpop.permute.xlu2 %8321 }
 0x523   : > { %8025 = vmatmul.msk.f32.gmra.mxu0 %vm3008_vm0, %v15538_v8 }
 0x525   : > { %8073 = vmatmul.msk.f32.gmra.mxu2 %vm3008_vm0, %v15539_v12  ;;  %v15558_v12 = vld [vmem:[#allocation61_spill] sm:$0xff] }
 0x528   : > { %v11696_v5 = vpop.f32.mrf.mxu2  ;;  %3246 = vmax.xlane.f32.xlu0 %v11689_v43  ;;  %v11699_v0 = vpop.f32.mrf.mxu0 }
 0x529   : > { %v11793_v27 = vpop.permute.xlu0 %8316 }
 0x52b   : > { %8026 = vmatmul.msk.f32.gmra.mxu0 %vm3008_vm0, %v15540_v33  ;;  %v15559_v33 = vld [vmem:[#allocation45_spill] sm:$0xff] }
 0x52d   : > { %8074 = vmatmul.msk.f32.gmra.mxu2 %vm3008_vm0, %v15541_v2 }
 0x530   : > { %v11705_v48 = vpop.f32.mrf.mxu2  ;;  %v11708_v32 = vpop.f32.mrf.mxu0 }
 0x531   : > { %4451 = vmax.xlane.f32.xlu0 %v11705_v48  ;;  %3250 = vmax.xlane.f32.xlu2 %v11708_v32 }
 0x533   : > { %8027 = vmatmul.msk.f32.gmra.mxu0 %vm3008_vm0, %v15542_v15 }
 0x534   : > { %4437 = vmax.xlane.f32.xlu1 %v11627_v39 }
 0x535   : > { %8075 = vmatmul.msk.f32.gmra.mxu2 %vm3008_vm0, %v15543_v55  ;;  %v15560_v55 = vld [vmem:[#allocation62_spill] sm:$0xff] }
 0x538   : > { %v11716_v62 = vpop.f32.mrf.mxu2  ;;  %v11718_v7 = vpop.f32.mrf.mxu0 }
 0x539   : > { %4453 = vmax.xlane.f32.xlu2 %v11716_v62  ;;  %3252 = vmax.xlane.f32.xlu0 %v11718_v7 }
 0x53b   : > { %8028 = vmatmul.msk.f32.gmra.mxu0 %vm3008_vm0, %v15544_v45  ;;  %v15561_v45 = vld [vmem:[#allocation47_spill] sm:$0xff] }
 0x53c   : > { %4443 = vmax.xlane.f32.xlu1 %v11664_v34 }
 0x53d   : > { %8076 = vmatmul.msk.f32.gmra.mxu2 %vm3008_vm0, %v15545_v38 }
 0x540   : > { %v11727_v60 = vpop.f32.mrf.mxu2  ;;  %v11729_v31 = vpop.f32.mrf.mxu0 }
 0x543   : > { %8029 = vmatmul.msk.f32.gmra.mxu0 %vm3008_vm0, %v15546_v20 }
 0x544   : > { %3242 = vmax.xlane.f32.xlu1 %v11669_v18 }
 0x545   : > { %8077 = vmatmul.msk.f32.gmra.mxu2 %vm3008_vm0, %v15547_v17 }
 0x548   : > { %v11736_v13 = vpop.f32.mrf.mxu2  ;;  %v11739_v23 = vpop.f32.mrf.mxu0 }
 0x549   : > { %4457 = vmax.xlane.f32.xlu0 %v11736_v13  ;;  %3256 = vmax.xlane.f32.xlu2 %v11739_v23  ;;  %v8327_v52 = vpop.permute.xlu0 %8326 }
 0x54b   : > { %8030 = vmatmul.msk.f32.gmra.mxu0 %vm3008_vm0, %v15548_v28 }
 0x54c   : > { %4449 = vmax.xlane.f32.xlu1 %v11696_v5 }
 0x54d   : > { %8078 = vmatmul.msk.f32.gmra.mxu2 %vm3008_vm0, %v15549_v26 }
 0x550   : > { %v11749_v1 = vpop.f32.mrf.mxu2  ;;  %v11751_v6 = vpop.f32.mrf.mxu0 }
 0x551   : > { %4459 = vmax.xlane.f32.xlu2 %v11749_v1  ;;  %3258 = vmax.xlane.f32.xlu0 %v11751_v6 }
 0x553   : > { %8031 = vmatmul.msk.f32.gmra.mxu0 %vm3008_vm0, %v15550_v44 }
 0x554   : > { %3248 = vmax.xlane.f32.xlu1 %v11699_v0 }
 0x555   : > { %8079 = vmatmul.msk.f32.gmra.mxu2 %vm3008_vm0, %v15551_v40 }
 0x558   : > { %v11762_v11 = vpop.f32.mrf.mxu2  ;;  %v11764_v61 = vpop.f32.mrf.mxu0 }
 0x559   : > { %v8332_v15 = vpop.permute.xlu0 %8331 }
 0x55a   : > { %v8333_v44 = vunpack.i.l.bf16 %v8332_v15 }
 0x55b   : > { %8032 = vmatmul.msk.f32.gmra.mxu0 %vm3008_vm0, %v15552_v30 }
 0x55c   : > { %4455 = vmax.xlane.f32.xlu1 %v11727_v60 }
 0x55d   : > { %8080 = vmatmul.msk.f32.gmra.mxu2 %vm3008_vm0, %v15553_v47  ;;  %v8334_v47 = vunpack.i.h.bf16 %v8332_v15  ;;  %v8318_v15 = vunpack.i.l.bf16 %v11793_v27 }
 0x560   : > { %v11773_v49 = vpop.f32.mrf.mxu2  ;;  %v11776_v54 = vpop.f32.mrf.mxu0 }
 0x561   : > { %4463 = vmax.xlane.f32.xlu0 %v11773_v49  ;;  %3262 = vmax.xlane.f32.xlu2 %v11776_v54 }
 0x563   : > { %8033 = vmatmul.msk.f32.gmra.mxu0 %vm3008_vm0, %v15554_v29 }
 0x564   : > { %v3235_v9 = vpop.xlane.xlu1 %3234  ;;  %3254 = vmax.xlane.f32.xlu1 %v11729_v31 }
 0x565   : > { %8081 = vmatmul.msk.f32.gmra.mxu2 %vm3008_vm0, %v15555_v36  ;;  %v3298_v42 = vsub.f32 %v11619_v37, %v3235_v9  ;;  %v15562_v9 = vld [vmem:[#allocation63_spill] sm:$0xff] }
 0x567   : > { %v3330_v16 = vmul.f32 1.442695, %v3298_v42  ;;  %v15563_v42 = vld [vmem:[#allocation48_spill] sm:$0xff] }
 0x568   : > { %v11787_v24 = vpop.f32.mrf.mxu2  ;;  %v11789_v59 = vpop.f32.mrf.mxu0 }
 0x569   : > { %8340 = vpow2.f32 %v3330_v16  ;;  %4465 = vmax.xlane.f32.xlu2 %v11787_v24  ;;  %3264 = vmax.xlane.f32.xlu0 %v11789_v59  ;;  %v8328_v16 = vunpack.i.l.bf16 %v8327_v52 }
 0x56b   : > { %8034 = vmatmul.msk.f32.gmra.mxu0 %vm3008_vm0, %v15556_v58 }
 0x56c   : > { %v3237_v57 = vpop.xlane.xlu2 %3236  ;;  %4461 = vmax.xlane.f32.xlu1 %v11762_v11 }
 0x56d   : > { %8082 = vmatmul.msk.f32.gmra.mxu2 %vm3008_vm0, %v15557_v14  ;;  %v3299_v37 = vsub.f32 %v11629_v53, %v3237_v57 }
 0x56f   : > { %v8341_v63 = vpop.eup %8340  ;;  %v3332_v51 = vmul.f32 1.442695, %v3299_v37 }
 0x570   : > { %v11801_v46 = vpop.f32.mrf.mxu2  ;;  %3922 = vmatmul.f32.vlgmr.msra.gmra.mxu1 %v8341_v63  ;;  %v11803_v8 = vpop.f32.mrf.mxu0 }
 0x571   : > { %8342 = vpow2.f32 %v3332_v51  ;;  %3394 = vadd.xlane.f32.xlu2 %v8341_v63  ;;  %v8324_v63 = vunpack.i.h.bf16 %v11781_v3 }
 0x573   : > { %8099 = vmatmul.msk.f32.vlgmr.msrb.gmra.mxu0 %vm3008_vm0, %v15558_v12  ;;  %v15564_v12 = vld [vmem:[#allocation64_spill] sm:$0xff] }
 0x574   : > { %3260 = vmax.xlane.f32.xlu1 %v11764_v61 }
 0x575   : > { %8147 = vmatmul.msk.f32.vlgmr.msrb.gmra.mxu2 %vm3008_vm0, %v15559_v33  ;;  %v15565_v33 = vld [vmem:[#allocation49_spill] sm:$0xff] }
 0x577   : > { %v8343_v2 = vpop.eup %8342 }
 0x578   : > { %v11810_v53 = vpop.f32.mrf.mxu2  ;;  %3925 = vmatmul.f32.gmra.mxu1 %v8343_v2  ;;  %v11818_v20 = vpop.f32.mrf.mxu0 }
 0x579   : > { %4469 = vmax.xlane.f32.xlu0 %v11810_v53 }
 0x57b   : > { %8100 = vmatmul.msk.f32.gmra.mxu0 %vm3008_vm0, %v15560_v55 }
 0x57c   : > { %v8337_v38 = vpop.permute.xlu1 %8336  ;;  %4467 = vmax.xlane.f32.xlu1 %v11801_v46  ;;  %v4442_v28 = vpop.xlane.xlu2 %4441 }
 0x57d   : > { %8148 = vmatmul.msk.f32.gmra.mxu2 %vm3008_vm0, %v15561_v45  ;;  %v8338_v17 = vunpack.i.l.bf16 %v8337_v38  ;;  %v8339_v26 = vunpack.i.h.bf16 %v8337_v38  ;;  %v4503_v40 = vsub.f32 %v11650_v21, %v4442_v28  ;;  %v8329_v21 = vunpack.i.h.bf16 %v8327_v52 }
 0x57e   : > { %v8314_v28 = vunpack.i.h.bf16 %v11768_v4 }
 0x57f   : > { %7625 = vmatpush.msrb.mxu3 %v8338_v17  ;;  %v4537_v58 = vmul.f32 1.442695, %v4503_v40  ;;  %v8313_v17 = vunpack.i.l.bf16 %v11768_v4  ;;  %v15567_v40 = vld [vmem:[#allocation50_spill] sm:$0xff]  ;;  %v8303_v4 = vunpack.i.l.bf16 %v11744_v50 }
 0x580   : > { %v11821_v29 = vpop.f32.mrf.mxu2  ;;  %v11829_v57 = vpop.f32.mrf.mxu0 }
 0x581   : > { %3396 = vadd.xlane.f32.xlu0 %v8343_v2  ;;  %7626 = vmatpush.msrb.mxu3 %v8339_v26 }
 0x583   : > { %v4440_v30 = vpop.xlane.xlu0 %4439  ;;  %8101 = vmatmul.msk.f32.gmra.mxu0 %vm3008_vm0, %v15562_v9  ;;  %7627 = vmatpush.msrb.mxu3 %v8333_v44  ;;  %v15566_v44 = vld [vmem:[#allocation65_spill] sm:$0xff]  ;;  %v15568_v9 = vld [vmem:[#allocation66_spill] sm:$0xff] }
 0x584   : > { %v4502_v36 = vsub.f32 %v11638_v19, %v4440_v30  ;;  %3266 = vmax.xlane.f32.xlu1 %v11803_v8  ;;  %v8323_v19 = vunpack.i.l.bf16 %v11781_v3  ;;  %v3241_v52 = vpop.xlane.xlu2 %3240  ;;  %v8309_v30 = vunpack.i.h.bf16 %v11757_v22 }
 0x585   : > { %8149 = vmatmul.msk.f32.gmra.mxu2 %vm3008_vm0, %v15563_v42  ;;  %7628 = vmatpush.msrb.mxu3 %v8334_v47  ;;  %v3301_v38 = vsub.f32 %v11654_v35, %v3241_v52  ;;  %v8308_v35 = vunpack.i.l.bf16 %v11757_v22 }
 0x586   : > { %v4535_v14 = vmul.f32 1.442695, %v4502_v36  ;;  %v8304_v36 = vunpack.i.h.bf16 %v11744_v50  ;;  %v15570_v50 = vld [vmem:[#allocation67_spill] sm:$0xff] }
 0x587   : > { %7629 = vmatpush.msrb.mxu3 %v8328_v16  ;;  %v3336_v26 = vmul.f32 1.442695, %v3301_v38  ;;  %v15569_v16 = vld [vmem:[#allocation52_spill] sm:$0xff] }
 0x588   : > { %8344 = vpow2.f32 %v4535_v14  ;;  %v11842_v55 = vpop.f32.mrf.mxu2 }
 0x589   : > { %3270 = vmax.xlane.f32.xlu0 %v11829_v57  ;;  %8346 = vpow2.f32 %v4537_v58  ;;  %7630 = vmatpush.msrb.mxu3 %v8329_v21 }
 0x58b   : > { %v3239_v37 = vpop.xlane.xlu0 %3238  ;;  %8102 = vmatmul.msk.f32.gmra.mxu0 %vm3008_vm0, %v15564_v12  ;;  %7631 = vmatpush.msrb.mxu3 %v8323_v19  ;;  %v15571_v19 = vld [vmem:[#allocation53_spill] sm:$0xff] }
 0x58c   : > { %v3300_v51 = vsub.f32 %v11641_v25, %v3239_v37  ;;  %v8319_v25 = vunpack.i.h.bf16 %v11793_v27  ;;  %v3245_v58 = vpop.xlane.xlu2 %3244  ;;  %v11876_v37 = vpop.f32.mrf.mxu0 }
 0x58d   : > { %8150 = vmatmul.msk.f32.gmra.mxu2 %vm3008_vm0, %v15565_v33  ;;  %7632 = vmatpush.msrb.mxu3 %v8324_v63  ;;  %v3303_v63 = vsub.f32 %v11679_v56, %v3245_v58 }
 0x58e   : > { %v11839_v2 = vpop.eup %8344  ;;  %v3334_v45 = vmul.f32 1.442695, %v3300_v51 }
 0x58f   : > { %4599 = vadd.xlane.f32.xlu1 %v11839_v2  ;;  %v11845_v3 = vpop.eup %8346  ;;  %7633 = vmatpush.msrb.mxu3 %v8318_v15  ;;  %v15572_v15 = vld [vmem:[#allocation68_spill] sm:$0xff] }
 0x590   : > { %8348 = vpow2.f32 %v3334_v45  ;;  %v11858_v47 = vpop.f32.mrf.mxu2  ;;  %v15573_v45 = vld [vmem:[#allocation54_spill] sm:$0xff] }
 0x591   : > { %4601 = vadd.xlane.f32.xlu0 %v11845_v3  ;;  %7634 = vmatpush.msrb.mxu3 %v8319_v25  ;;  %8350 = vpow2.f32 %v3336_v26 }
 0x593   : > { %8103 = vmatmul.msk.f32.gmra.mxu0 %vm3008_vm0, %v15566_v44  ;;  %7635 = vmatpush.msrb.mxu3 %v8313_v17  ;;  %v4446_v42 = vpop.xlane.xlu0 %4445  ;;  %v15574_v44 = vld [vmem:[#allocation55_spill] sm:$0xff] }
 0x594   : > { %v4505_v14 = vsub.f32 %v11676_v41, %v4446_v42  ;;  %v4448_v12 = vpop.xlane.xlu2 %4447  ;;  %v3340_v41 = vmul.f32 1.442695, %v3303_v63  ;;  %v11890_v56 = vpop.f32.mrf.mxu0 }
 0x595   : > { %8151 = vmatmul.msk.f32.gmra.mxu2 %vm3008_vm0, %v15567_v40  ;;  %7636 = vmatpush.msrb.mxu3 %v8314_v28  ;;  %v15575_v40 = vld [vmem:[#allocation69_spill] sm:$0xff] }
 0x596   : > { %v8349_v27 = vpop.eup %8348  ;;  %v4541_v21 = vmul.f32 1.442695, %v4505_v14  ;;  %v15576_v14 = vld [vmem:[#allocation57_spill] sm:$0xff] }
 0x597   : > { %3928 = vmatmul.f32.gmra.mxu1 %v8349_v27  ;;  %3398 = vadd.xlane.f32.xlu1 %v8349_v27  ;;  %v11867_v22 = vpop.eup %8350 }
 0x598   : > { %7637 = vmatpush.msrb.mxu3 %v8308_v35  ;;  %8352 = vpow2.f32 %v4541_v21  ;;  %v11887_v38 = vpop.f32.mrf.mxu2  ;;  %v15577_v21 = vld [vmem:[#allocation70_spill] sm:$0xff] }
 0x599   : > { %4475 = vmax.xlane.f32.xlu0 %v11858_v47 }
 0x59a   : > { %7638 = vmatpush.msrb.mxu3 %v8309_v30 }
 0x59b   : > { %8104 = vmatmul.msk.f32.gmra.mxu0 %vm3008_vm0, %v15568_v9  ;;  %v3247_v28 = vpop.xlane.xlu0 %3246 }
 0x59c   : > { %7639 = vmatpush.msrb.mxu3 %v8303_v4 }
 0x59d   : > { %8152 = vmatmul.msk.f32.gmra.mxu2 %vm3008_vm0, %v15569_v16 }
 0x59e   : > { %7640 = vmatpush.msrb.mxu3 %v8304_v36  ;;  %v11885_v25 = vpop.eup %8352  ;;  %v11899_v36 = vpop.f32.mrf.mxu0 }
 0x59f   : > { %3931 = vmatmul.f32.gmra.mxu1 %v11867_v22  ;;  %4473 = vmax.xlane.f32.xlu1 %v11842_v55 }
 0x5a0   : > { %v11896_v35 = vpop.f32.mrf.mxu2 }
 0x5a3   : > { %8105 = vmatmul.msk.f32.gmra.mxu0 %vm3008_vm0, %v15570_v50 }
 0x5a4   : > { %v4452_v16 = vpop.xlane.xlu0 %4451 }
 0x5a5   : > { %8153 = vmatmul.msk.f32.gmra.mxu2 %vm3008_vm0, %v15571_v19 }
 0x5a7   : > { %3272 = vmax.xlane.f32.xlu1 %v11876_v37  ;;  %v4438_v51 = vpop.xlane.xlu1 %4437 }
 0x5a8   : > { %v4501_v52 = vsub.f32 %v11627_v39, %v4438_v51  ;;  %v3251_v39 = vpop.xlane.xlu2 %3250  ;;  %v11912_v63 = vpop.f32.mrf.mxu2 }
 0x5aa   : > { %v4533_v33 = vmul.f32 1.442695, %v4501_v52  ;;  %v11916_v52 = vpop.f32.mrf.mxu0 }
 0x5ab   : > { %8106 = vmatmul.msk.f32.gmra.mxu0 %vm3008_vm0, %v15572_v15  ;;  %v15578_v15 = vld [vmem:[#allocation58_spill] sm:$0xff] }
 0x5ac   : > { %8354 = vpow2.f32 %v4533_v33  ;;  %v11918_v33 = vpop.xlane.xlu0 %3252 }
 0x5ad   : > { %8154 = vmatmul.msk.f32.gmra.mxu2 %vm3008_vm0, %v15573_v45  ;;  %8356 = vpow2.f32 %v3340_v41  ;;  %v3304_v41 = vsub.f32 %v11689_v43, %v3247_v28  ;;  %v4506_v45 = vsub.f32 %v11686_v10, %v4448_v12  ;;  %v15580_v12 = vld [vmem:[#allocation72_spill] sm:$0xff] }
 0x5af   : > { %4605 = vadd.xlane.f32.xlu1 %v11885_v25  ;;  %v4444_v17 = vpop.xlane.xlu1 %4443  ;;  %v4543_v28 = vmul.f32 1.442695, %v4506_v45  ;;  %v15584_v45 = vld [vmem:[#allocation82_spill] sm:$0xff] }
 0x5b0   : > { %v11901_v9 = vpop.xlane.xlu2 %4453  ;;  %v4504_v58 = vsub.f32 %v11664_v34, %v4444_v17  ;;  %v3306_v17 = vsub.f32 %v11708_v32, %v3251_v39 }
 0x5b2   : > { %v8355_v26 = vpop.eup %8354  ;;  %v4539_v19 = vmul.f32 1.442695, %v4504_v58  ;;  %v11940_v39 = vpop.f32.mrf.mxu0 }
 0x5b3   : > { %5189 = vmatmul.f32.vlgmr.msra.gmra.mxu3 %v8355_v26  ;;  %4597 = vadd.xlane.f32.xlu2 %v8355_v26  ;;  %v8357_v27 = vpop.eup %8356  ;;  %v3342_v26 = vmul.f32 1.442695, %v3304_v41 }
 0x5b4   : > { %8107 = vmatmul.msk.f32.gmra.mxu0 %vm3008_vm0, %v15575_v40  ;;  %v11930_v40 = vpop.f32.mrf.mxu2 }
 0x5b5   : > { %8155 = vmatmul.msk.f32.gmra.mxu2 %vm3008_vm0, %v15574_v44  ;;  %v3346_v44 = vmul.f32 1.442695, %v3306_v17 }
 0x5b7   : > { %3404 = vadd.xlane.f32.xlu1 %v8357_v27  ;;  %v3243_v30 = vpop.xlane.xlu1 %3242 }
 0x5b8   : > { %v3302_v4 = vsub.f32 %v11669_v18, %v3243_v30  ;;  %v4508_v18 = vsub.f32 %v11705_v48, %v4452_v16  ;;  %v15579_v48 = vld [vmem:[#allocation71_spill] sm:$0xff] }
 0x5ba   : > { %v3338_v42 = vmul.f32 1.442695, %v3302_v4  ;;  %v4547_v34 = vmul.f32 1.442695, %v4508_v18  ;;  %v11963_v41 = vpop.f32.mrf.mxu0 }
 0x5bb   : > { %5192 = vmatmul.f32.gmra.mxu3 %v11839_v2  ;;  %3268 = vmax.xlane.f32.xlu2 %v11818_v20 }
 0x5bc   : > { %8358 = vpow2.f32 %v3338_v42  ;;  %8108 = vmatmul.msk.f32.gmra.mxu0 %vm3008_vm0, %v15577_v21  ;;  %v11914_v51 = vpop.xlane.xlu2 %3256  ;;  %v4458_v30 = vpop.xlane.xlu0 %4457  ;;  %v15581_v42 = vld [vmem:[#allocation39_spill] sm:$0xff]  ;;  %v15582_v21 = vld [vmem:[#allocation77_spill] sm:$0xff] }
 0x5bd   : > { %8156 = vmatmul.msk.f32.gmra.mxu2 %vm3008_vm0, %v15576_v14  ;;  %8360 = vpow2.f32 %v4539_v19 }
 0x5be   : > { %8362 = vpow2.f32 %v4547_v34  ;;  %v15583_v34 = vld [vmem:[#allocation40_spill] sm:$0xff] }
 0x5bf   : > { %4479 = vmax.xlane.f32.xlu1 %v11896_v35  ;;  %v4450_v50 = vpop.xlane.xlu1 %4449  ;;  %8364 = vpow2.f32 %v3342_v26  ;;  %v4511_v26 = vsub.f32 %v11736_v13, %v4458_v30  ;;  %v15586_v13 = vld [vmem:[#allocation87_spill] sm:$0xff] }
 0x5c0   : > { %8366 = vpow2.f32 %v4543_v28  ;;  %v4507_v14 = vsub.f32 %v11696_v5, %v4450_v50 }
 0x5c1   : > { %8368 = vpow2.f32 %v3346_v44 }
 0x5c2   : > { %v8359_v2 = vpop.eup %8358  ;;  %v11983_v28 = vpop.f32.mrf.mxu0 }
 0x5c3   : > { %3934 = vmatmul.f32.gmra.mxu1 %v8359_v2  ;;  %5195 = vmatmul.f32.gmra.mxu3 %v11845_v3  ;;  %v8361_v43 = vpop.eup %8360 }
 0x5c4   : > { %4471 = vmax.xlane.f32.xlu2 %v11821_v29  ;;  %3402 = vadd.xlane.f32.xlu0 %v8359_v2  ;;  %v11932_v4 = vpop.xlane.xlu2 %4459  ;;  %v11938_v32 = vpop.eup %8362 }
 0x5c5   : > { %8157 = vmatmul.msk.f32.gmra.mxu2 %vm3008_vm0, %v15578_v15  ;;  %8109 = vmatmul.msk.f32.gmra.mxu0 %vm3008_vm0, %v15579_v48  ;;  %v11948_v16 = vpop.eup %8364  ;;  %v11950_v58 = vpop.xlane.xlu0 %3258  ;;  %v4545_v15 = vmul.f32 1.442695, %v4507_v14  ;;  %v3307_v48 = vsub.f32 %v11718_v7, %v11918_v33 }
 0x5c6   : > { %v11959_v2 = vpop.f32.mrf.mxu2 }
 0x5c7   : > { %3278 = vmax.xlane.f32.xlu1 %v11916_v52  ;;  %v3249_v3 = vpop.xlane.xlu1 %3248  ;;  %v3348_v33 = vmul.f32 1.442695, %v3307_v48  ;;  %v15588_v48 = vld [vmem:[#allocation91_spill] sm:$0xff] }
 0x5c8   : > { %v3305_v10 = vsub.f32 %v11699_v0, %v3249_v3  ;;  %v15585_v3 = vld [vmem:[#allocation42_spill] sm:$0xff] }
 0x5ca   : > { %v3344_v0 = vmul.f32 1.442695, %v3305_v10  ;;  %v4509_v10 = vsub.f32 %v11716_v62, %v11901_v9  ;;  %v3309_v9 = vsub.f32 %v11739_v23, %v11914_v51 }
 0x5cb   : > { %3937 = vmatmul.f32.gmra.mxu1 %v8357_v27  ;;  %5198 = vmatmul.f32.gmra.mxu3 %v8361_v43 }
 0x5cc   : > { %3400 = vadd.xlane.f32.xlu2 %v11867_v22  ;;  %3276 = vmax.xlane.f32.xlu0 %v11899_v36  ;;  %v8367_v22 = vpop.eup %8366  ;;  %8370 = vpow2.f32 %v3344_v0  ;;  %v4549_v62 = vmul.f32 1.442695, %v4509_v10 }
 0x5cd   : > { %8158 = vmatmul.msk.f32.gmra.mxu2 %vm3008_vm0, %v15580_v12  ;;  %8110 = vmatmul.msk.f32.gmra.mxu0 %vm3008_vm0, %v15581_v42  ;;  %v8369_v19 = vpop.eup %8368  ;;  %8372 = vpow2.f32 %v4545_v15  ;;  %v4553_v12 = vmul.f32 1.442695, %v4511_v26  ;;  %v12004_v15 = vpop.f32.mrf.mxu0 }
 0x5ce   : > { %8374 = vpow2.f32 %v3348_v33 }
 0x5cf   : > { %4611 = vadd.xlane.f32.xlu1 %v11938_v32  ;;  %v11946_v27 = vpop.xlane.xlu1 %4455 }
 0x5d0   : > { %v4510_v23 = vsub.f32 %v11727_v60, %v11946_v27 }
 0x5d2   : > { %v8371_v5 = vpop.eup %8370  ;;  %v4551_v27 = vmul.f32 1.442695, %v4510_v23 }
 0x5d3   : > { %3940 = vmatmul.f32.gmra.mxu1 %v11948_v16  ;;  %5201 = vmatmul.f32.gmra.mxu3 %v11885_v25  ;;  %v8373_v44 = vpop.eup %8372 }
 0x5d4   : > { %4603 = vadd.xlane.f32.xlu2 %v8361_v43  ;;  %v11957_v18 = vpop.xlane.xlu2 %3262  ;;  %4607 = vadd.xlane.f32.xlu0 %v8367_v22  ;;  %v11965_v50 = vpop.xlane.xlu0 %4463 }
 0x5d5   : > { %8159 = vmatmul.msk.f32.gmra.mxu2 %vm3008_vm0, %v15582_v21  ;;  %8111 = vmatmul.msk.f32.gmra.mxu0 %vm3008_vm0, %v15583_v34  ;;  %v11979_v43 = vpop.f32.mrf.mxu2  ;;  %v12032_v23 = vpop.f32.mrf.mxu0 }
 0x5d7   : > { %3410 = vadd.xlane.f32.xlu1 %v8369_v19  ;;  %v3255_v25 = vpop.xlane.xlu1 %3254 }
 0x5d8   : > { %v3308_v0 = vsub.f32 %v11729_v31, %v3255_v25  ;;  %v3352_v25 = vmul.f32 1.442695, %v3309_v9  ;;  %v3310_v9 = vsub.f32 %v11751_v6, %v11950_v58 }
 0x5da   : > { %v3350_v31 = vmul.f32 1.442695, %v3308_v0  ;;  %v3354_v6 = vmul.f32 1.442695, %v3310_v9 }
 0x5db   : > { %3943 = vmatmul.f32.gmra.mxu1 %v8371_v5  ;;  %5204 = vmatmul.f32.gmra.mxu3 %v8367_v22  ;;  %v15587_v22 = vld [vmem:[#allocation43_spill] sm:$0xff] }
 0x5dc   : > { %3274 = vmax.xlane.f32.xlu2 %v11890_v56  ;;  %v11972_v17 = vpop.xlane.xlu2 %4465  ;;  %4481 = vmax.xlane.f32.xlu0 %v11912_v63  ;;  %v11987_v42 = vpop.xlane.xlu0 %3264 }
 0x5dd   : > { %8160 = vmatmul.msk.f32.gmra.mxu2 %vm3008_vm0, %v15584_v45  ;;  %8112 = vmatmul.msk.f32.gmra.mxu0 %vm3008_vm0, %v15585_v3  ;;  %v12000_v21 = vpop.f32.mrf.mxu2  ;;  %v15589_v3 = vld [vmem:[#allocation44_spill] sm:$0xff] }
 0x5df   : > { %4485 = vmax.xlane.f32.xlu1 %v11959_v2  ;;  %v11981_v7 = vpop.xlane.xlu1 %4461 }
 0x5e3   : > { %3946 = vmatmul.f32.gmra.mxu1 %v8369_v19  ;;  %5207 = vmatmul.f32.gmra.mxu3 %v8373_v44  ;;  %v12002_v19 = vpop.eup %8374 }
 0x5e4   : > { %4477 = vmax.xlane.f32.xlu2 %v11887_v38  ;;  %v3395_v30 = vpop.xlane.xlu2 %3394  ;;  %3408 = vadd.xlane.f32.xlu0 %v8371_v5 }
 0x5e5   : > { %8161 = vmatmul.msk.f32.gmra.mxu2 %vm3008_vm0, %v15586_v13  ;;  %8113 = vmatmul.msk.f32.gmra.mxu0 %vm3008_vm0, %v15587_v22  ;;  %8376 = vrcp.f32 %v3395_v30  ;;  %v3467_v10 = vand.u32 2147483647, %v3395_v30  ;;  %vm3463_vm2 = vweird.f32 %v3395_v30  ;;  %v12025_v13 = vpop.f32.mrf.mxu2 }
 0x5e6   : > { %8378 = vpow2.f32 %v4553_v12 }
 0x5e7   : > { %3284 = vmax.xlane.f32.xlu1 %v11983_v28  ;;  %v11998_v14 = vpop.xlane.xlu1 %3260  ;;  %8380 = vpow2.f32 %v4549_v62  ;;  %vm3468_vm4 = vcmp.eq.f32.partialorder %v3467_v10, 8.507059e+37  ;;  %v15592_v10 = vld [vmem:[#allocation88_spill] sm:$0xff] }
 0x5e8   : > { %8382 = vpow2.f32 %v3350_v31 }
 0x5e9   : > { %8384 = vpow2.f32 %v3352_v25  ;;  %v15590_v25 = vld [vmem:[#allocation133_spill] sm:$0xff] }
 0x5ea   : > { %8386 = vpow2.f32 %v4551_v27  ;;  %v3311_v27 = vsub.f32 %v11764_v61, %v11998_v14  ;;  %v4514_v61 = vsub.f32 %v11773_v49, %v11965_v50  ;;  %v4513_v49 = vsub.f32 %v11762_v11, %v11981_v7 }
 0x5eb   : > { %v8377_v34 = vpop.eup %8376  ;;  %3949 = vmatmul.f32.gmra.mxu1 %v12002_v19  ;;  %5210 = vmatmul.f32.gmra.mxu3 %v11938_v32  ;;  %v3469_v32 = vand.u32 2147483648, %v3395_v30 }
 0x5ec   : > { %v12006_v5 = vpop.xlane.xlu0 %4469  ;;  %v3459_v51 = vmul.f32 %v8377_v34, %v3395_v30  ;;  %3406 = vadd.xlane.f32.xlu2 %v11948_v16  ;;  %v12015_v45 = vpop.eup %8378  ;;  %3282 = vmax.xlane.f32.xlu0 %v11963_v41  ;;  %vm3464_vm1 = vweird.f32 %v8377_v34  ;;  %v3356_v9 = vmul.f32 1.442695, %v3311_v27 }
 0x5ed   : > { %8162 = vmatmul.msk.f32.gmra.mxu2 %vm3008_vm0, %v15588_v48  ;;  %8114 = vmatmul.msk.f32.gmra.mxu0 %vm3008_vm0, %v15589_v3  ;;  %v8381_v12 = vpop.eup %8380  ;;  %vm3465_vm3 = vmor %vm3463_vm2, %vm3464_vm1  ;;  %v3470_v22 = vor.u32 1.1754944e-38, %v3469_v32  ;;  %v3923_v48 = vpop.f32.mrf.mxu1  ;;  %v15591_v3 = vld [vmem:[#allocation117_spill] sm:$0xff]  ;;  %v4512_v32 = vsub.f32 %v11749_v1, %v11932_v4 }
 0x5ee   : > { %v3460_v26 = vsub.f32 1.0, %v3459_v51  ;;  %v12023_v16 = vpop.eup %8382 }
 0x5ef   : > { %4617 = vadd.xlane.f32.xlu1 %v12015_v45  ;;  %v12021_v60 = vpop.xlane.xlu1 %4467  ;;  %v8385_v30 = vpop.eup %8384  ;;  %v4555_v4 = vmul.f32 1.442695, %v4512_v32  ;;  %v15594_v32 = vld [vmem:[#allocation129_spill] sm:$0xff] }
 0x5f0   : > { %v3461_v33 = vmul.f32 %v8377_v34, %v3460_v26 }
 0x5f2   : > { %v3462_v0 = vadd.f32 %v8377_v34, %v3461_v33 }
 0x5f3   : > { %3952 = vmatmul.f32.gmra.mxu1 %v12023_v16  ;;  %5213 = vmatmul.f32.gmra.mxu3 %v8381_v12 }
 0x5f4   : > { %v3397_v62 = vpop.xlane.xlu0 %3396  ;;  %v3466_v31 = vsel %vm3465_vm3, %v8377_v34, %v3462_v0  ;;  %4609 = vadd.xlane.f32.xlu2 %v8373_v44  ;;  %4613 = vadd.xlane.f32.xlu0 %v8381_v12  ;;  %v12044_v44 = vpop.eup %8386  ;;  %v15593_v0 = vld [vmem:[#allocation78_spill] sm:$0xff] }
 0x5f5   : > { %8163 = vmatmul.msk.f32.gmra.mxu2 %vm3008_vm0, %v15590_v25  ;;  %v3471_v51 = vsel %vm3468_vm4, %v3470_v22, %v3466_v31  ;;  %8388 = vrcp.f32 %v3397_v62  ;;  %8115 = vmatmul.msk.f32.gmra.mxu0 %vm3008_vm0, %v15591_v3  ;;  %v12054_v12 = vpop.f32.mrf.mxu2  ;;  %v12060_v22 = vpop.f32.mrf.mxu0  ;;  %v3483_v14 = vand.u32 2147483648, %v3397_v62  ;;  %v3481_v25 = vand.u32 2147483647, %v3397_v62 }
 0x5f6   : > { %v4019_v26 = vmul.f32 %v3923_v48, %v3471_v51  ;;  %8390 = vpow2.f32 %v3354_v6  ;;  %vm3477_vm6 = vweird.f32 %v3397_v62  ;;  %v4559_v3 = vmul.f32 1.442695, %v4514_v61  ;;  %v15597_v61 = vld [vmem:[#allocation59_spill] sm:$0xff] }
 0x5f7   : > { %3416 = vadd.xlane.f32.xlu1 %v8385_v30  ;;  %v12042_v58 = vpop.xlane.xlu1 %3266  ;;  %8392 = vpow2.f32 %v4555_v4  ;;  %v3484_v6 = vor.u32 1.1754944e-38, %v3483_v14  ;;  %vm3482_vm8 = vcmp.eq.f32.partialorder %v3481_v25, 8.507059e+37 }
 0x5f8   : > { %4051 = vst.msk [vmem:[%s12038_s23] sm:$0xff] %vm3008_vm0, %v4019_v26  ;;  %v3312_v26 = vsub.f32 %v11776_v54, %v11957_v18  ;;  %8394 = vpow2.f32 %v3356_v9  ;;  %v3926_v54 = vpop.f32.mrf.mxu1  ;;  %v15595_v18 = vld [vmem:[#allocation83_spill] sm:$0xff] }
 0x5f9   : > { %8396 = vpow2.f32 %v4559_v3 }
 0x5fa   : > { %v3358_v11 = vmul.f32 1.442695, %v3312_v26 }
 0x5fb   : > { %v8389_v34 = vpop.eup %8388  ;;  %3955 = vmatmul.f32.gmra.mxu1 %v8385_v30  ;;  %5216 = vmatmul.f32.gmra.mxu3 %v12044_v44 }
 0x5fc   : > { %v3473_v33 = vmul.f32 %v8389_v34, %v3397_v62  ;;  %3280 = vmax.xlane.f32.xlu2 %v11940_v39  ;;  %4487 = vmax.xlane.f32.xlu0 %v11979_v43  ;;  %vm3478_vm5 = vweird.f32 %v8389_v34  ;;  %v12066_v51 = vpop.eup %8390 }
 0x5fd   : > { %8164 = vmatmul.msk.f32.gmra.mxu2 %vm3008_vm0, %v15592_v10  ;;  %8116 = vmatmul.msk.f32.gmra.mxu0 %vm3008_vm0, %v15593_v0  ;;  %vm3479_vm7 = vmor %vm3477_vm6, %vm3478_vm5  ;;  %v12081_v7 = vpop.f32.mrf.mxu2  ;;  %v8393_v27 = vpop.eup %8392 }
 0x5fe   : > { %v3474_v1 = vsub.f32 1.0, %v3473_v33  ;;  %v12085_v33 = vpop.f32.mrf.mxu0  ;;  %v12087_v0 = vpop.eup %8394 }
 0x5ff   : > { %4491 = vmax.xlane.f32.xlu1 %v12025_v13  ;;  %v8397_v4 = vpop.eup %8396 }
 0x600   : > { %v3475_v31 = vmul.f32 %v8389_v34, %v3474_v1  ;;  %v15596_v1 = vld [vmem:[#allocation136_spill] sm:$0xff] }
 0x602   : > { %v12064_v30 = vpop.xlane.xlu1 %4599  ;;  %v3476_v48 = vadd.f32 %v8389_v34, %v3475_v31 }
 0x603   : > { %3958 = vmatmul.f32.gmra.mxu1 %v12066_v51  ;;  %5219 = vmatmul.f32.gmra.mxu3 %v12015_v45  ;;  %vm4680_vm3 = vweird.f32 %v12064_v30 }
 0x604   : > { %v3480_v50 = vsel %vm3479_vm7, %v8389_v34, %v3476_v48  ;;  %4483 = vmax.xlane.f32.xlu2 %v11930_v40  ;;  %3414 = vadd.xlane.f32.xlu0 %v12023_v16  ;;  %v4557_v34 = vmul.f32 1.442695, %v4513_v49  ;;  %v3313_v16 = vsub.f32 %v11789_v59, %v11987_v42 }
 0x605   : > { %8165 = vmatmul.msk.f32.gmra.mxu2 %vm3008_vm0, %v15594_v32  ;;  %v3485_v62 = vsel %vm3482_vm8, %v3484_v6, %v3480_v50  ;;  %8117 = vmatmul.msk.f32.gmra.mxu0 %vm3008_vm0, %v15595_v18  ;;  %v12098_v25 = vpop.f32.mrf.mxu2  ;;  %v3314_v6 = vsub.f32 %v11803_v8, %v12042_v58  ;;  %v15599_v50 = vld [vmem:[#allocation123_spill] sm:$0xff] }
 0x606   : > { %v4020_v45 = vmul.f32 %v3926_v54, %v3485_v62  ;;  %v3360_v9 = vmul.f32 1.442695, %v3313_v16  ;;  %15598 = vst [vmem:[#allocation139_spill] sm:$0xff] %v12098_v25  ;;  %v12106_v3 = vpop.f32.mrf.mxu0  ;;  %v12122_v16 = vpop.xlane.xlu0 %3270 }
 0x607   : > { %3290 = vmax.xlane.f32.xlu1 %v12060_v22  ;;  %v3362_v18 = vmul.f32 1.442695, %v3314_v6  ;;  %v15606_v6 = vld [vmem:[#allocation81_spill] sm:$0xff] }
 0x608   : > { %4052 = vst.msk [vmem:[%s12038_s23 + $0x20] sm:$0xff] %vm3008_vm0, %v4020_v45 }
 0x60a   : > { %v3399_v10 = vpop.xlane.xlu1 %3398 }
 0x60b   : > { %8398 = vrcp.f32 %v3399_v10  ;;  %3961 = vmatmul.f32.gmra.mxu1 %v12087_v0  ;;  %5222 = vmatmul.f32.gmra.mxu3 %v8393_v27  ;;  %v3497_v49 = vand.u32 2147483648, %v3399_v10  ;;  %v3495_v62 = vand.u32 2147483647, %v3399_v10  ;;  %vm3491_vm10 = vweird.f32 %v3399_v10 }
 0x60c   : > { %8400 = vpow2.f32 %v3358_v11  ;;  %3412 = vadd.xlane.f32.xlu2 %v12002_v19  ;;  %3288 = vmax.xlane.f32.xlu0 %v12032_v23  ;;  %v4515_v19 = vsub.f32 %v11787_v24, %v11972_v17  ;;  %v15600_v24 = vld [vmem:[#allocation86_spill] sm:$0xff] }
 0x60d   : > { %8402 = vpow2.f32 %v4557_v34  ;;  %8166 = vmatmul.msk.f32.gmra.mxu2 %vm3008_vm0, %v15596_v1  ;;  %8118 = vmatmul.msk.f32.gmra.mxu0 %vm3008_vm0, %v15597_v61  ;;  %v3498_v8 = vor.u32 1.1754944e-38, %v3497_v49  ;;  %vm3496_vm12 = vcmp.eq.f32.partialorder %v3495_v62, 8.507059e+37  ;;  %v15602_v61 = vld [vmem:[#allocation128_spill] sm:$0xff] }
 0x60e   : > { %8404 = vpow2.f32 %v3360_v9  ;;  %v4561_v17 = vmul.f32 1.442695, %v4515_v19  ;;  %v15604_v9 = vld [vmem:[#allocation73_spill] sm:$0xff] }
 0x60f   : > { %4623 = vadd.xlane.f32.xlu1 %v8397_v4 }
 0x610   : > { %8406 = vpow2.f32 %v4561_v17 }
 0x611   : > { %v8399_v14 = vpop.eup %8398  ;;  %8408 = vpow2.f32 %v3362_v18 }
 0x612   : > { %v8401_v31 = vpop.eup %8400  ;;  %v3487_v48 = vmul.f32 %v8399_v14, %v3399_v10  ;;  %v12100_v59 = vpop.xlane.xlu1 %4473  ;;  %vm3492_vm9 = vweird.f32 %v8399_v14  ;;  %v4516_v10 = vsub.f32 %v11801_v46, %v12021_v60  ;;  %8410 = vrcp.f32 %v12064_v30 }
 0x613   : > { %v12102_v42 = vpop.eup %8402  ;;  %3964 = vmatmul.f32.gmra.mxu1 %v8401_v31  ;;  %vm3493_vm11 = vmor %vm3491_vm10, %vm3492_vm9 }
 0x614   : > { %v3488_v26 = vsub.f32 1.0, %v3487_v48  ;;  %5225 = vmatmul.f32.gmra.mxu3 %v12102_v42  ;;  %4615 = vadd.xlane.f32.xlu2 %v12044_v44  ;;  %v12118_v44 = vpop.eup %8404  ;;  %v3929_v34 = vpop.f32.mrf.mxu1  ;;  %v4563_v46 = vmul.f32 1.442695, %v4516_v10 }
 0x615   : > { %8167 = vmatmul.msk.f32.gmra.mxu2 %vm3008_vm0, %v15599_v50  ;;  %4619 = vadd.xlane.f32.xlu0 %v8393_v27  ;;  %v12120_v27 = vpop.f32.mrf.mxu2 }
 0x616   : > { %v3489_v32 = vmul.f32 %v8399_v14, %v3488_v26  ;;  %8119 = vmatmul.msk.f32.gmra.mxu0 %vm3008_vm0, %v15600_v24  ;;  %15601 = vst [vmem:[#allocation127_spill] sm:$0xff] %v12120_v27  ;;  %v8407_v60 = vpop.eup %8406  ;;  %8412 = vpow2.f32 %v4563_v46  ;;  %v15605_v26 = vld [vmem:[#allocation137_spill] sm:$0xff]  ;;  %v3316_v46 = vsub.f32 %v11829_v57, %v12122_v16 }
 0x617   : > { %3422 = vadd.xlane.f32.xlu1 %v8401_v31  ;;  %v12142_v48 = vpop.eup %8408 }
 0x618   : > { %v3490_v54 = vadd.f32 %v8399_v14, %v3489_v32  ;;  %v12159_v32 = vpop.eup %8410  ;;  %v3366_v16 = vmul.f32 1.442695, %v3316_v46 }
 0x619   : > { %vm4681_vm2 = vweird.f32 %v12159_v32 }
 0x61a   : > { %v3494_v58 = vsel %vm3493_vm11, %v8399_v14, %v3490_v54  ;;  %v12116_v45 = vpop.xlane.xlu1 %3272  ;;  %v12130_v14 = vpop.f32.mrf.mxu0  ;;  %v15607_v54 = vld [vmem:[#allocation131_spill] sm:$0xff]  ;;  %vm12224_vm4 = vmor %vm4680_vm3, %vm4681_vm2 }
 0x61b   : > { %v3499_v11 = vsel %vm3496_vm12, %v3498_v8, %v3494_v58  ;;  %3967 = vmatmul.f32.gmra.mxu1 %v12118_v44  ;;  %15603 = vst [vmem:[#allocation140_spill] sm:$0xff] %v12130_v14  ;;  %v15608_v8 = vld [vmem:[#allocation122_spill] sm:$0xff] }
 0x61c   : > { %v4021_v1 = vmul.f32 %v3929_v34, %v3499_v11  ;;  %5228 = vmatmul.f32.gmra.mxu3 %v8397_v4  ;;  %3286 = vmax.xlane.f32.xlu2 %v12004_v15  ;;  %v4517_v4 = vsub.f32 %v11810_v53, %v12006_v5  ;;  %v12151_v5 = vpop.xlane.xlu0 %4601  ;;  %v12164_v24 = vpop.eup %8412 }
 0x61d   : > { %8168 = vmatmul.msk.f32.gmra.mxu2 %vm3008_vm0, %v15602_v61  ;;  %4493 = vmax.xlane.f32.xlu0 %v12054_v12  ;;  %v12149_v53 = vpop.f32.mrf.mxu2  ;;  %v12205_v46 = vpop.f32.mrf.mxu1  ;;  %vm4694_vm7 = vweird.f32 %v12151_v5 }
 0x61e   : > { %4053 = vst.msk [vmem:[%s12038_s23 + $0x40] sm:$0xff] %vm3008_vm0, %v4021_v1  ;;  %8120 = vmatmul.msk.f32.gmra.mxu0 %vm3008_vm0, %v15604_v9  ;;  %v4565_v19 = vmul.f32 1.442695, %v4517_v4 }
 0x61f   : > { %4497 = vmax.xlane.f32.xlu1 %v12098_v25 }
 0x620   : > { %8414 = vpow2.f32 %v4565_v19 }
 0x622   : > { %v12140_v31 = vpop.xlane.xlu1 %4605  ;;  %v12157_v50 = vpop.f32.mrf.mxu0 }
 0x623   : > { %3970 = vmatmul.f32.gmra.mxu1 %v12142_v48 }
 0x624   : > { %5231 = vmatmul.f32.gmra.mxu3 %v8407_v60  ;;  %4489 = vmax.xlane.f32.xlu2 %v12000_v21  ;;  %v12181_v9 = vpop.xlane.xlu0 %4475 }
 0x625   : > { %8169 = vmatmul.msk.f32.gmra.mxu2 %vm3008_vm0, %v15605_v26  ;;  %3420 = vadd.xlane.f32.xlu0 %v12087_v0  ;;  %v4676_v0 = vmul.f32 %v12159_v32, %v12064_v30  ;;  %v12178_v1 = vpop.f32.mrf.mxu2 }
 0x626   : > { %8121 = vmatmul.msk.f32.gmra.mxu0 %vm3008_vm0, %v15606_v6  ;;  %v4598_v49 = vpop.xlane.xlu2 %4597  ;;  %v8415_v17 = vpop.eup %8414 }
 0x627   : > { %3296 = vmax.xlane.f32.xlu1 %v12130_v14  ;;  %8416 = vrcp.f32 %v4598_v49  ;;  %v4677_v10 = vsub.f32 1.0, %v4676_v0  ;;  %v4670_v0 = vand.u32 2147483647, %v4598_v49  ;;  %vm4666_vm14 = vweird.f32 %v4598_v49 }
 0x628   : > { %8418 = vrcp.f32 %v12151_v5 }
 0x629   : > { %vm4671_vm1 = vcmp.eq.f32.partialorder %v4670_v0, 8.507059e+37 }
 0x62a   : > { %v12162_v62 = vpop.xlane.xlu1 %3404  ;;  %v12183_v4 = vpop.f32.mrf.mxu0 }
 0x62b   : > { %8420 = vrcp.f32 %v12162_v62  ;;  %15609 = vst [vmem:[#allocation141_spill] sm:$0xff] %v12183_v4  ;;  %vm3533_vm11 = vweird.f32 %v12162_v62 }
 0x62c   : > { %5234 = vmatmul.f32.gmra.mxu3 %v12164_v24  ;;  %3418 = vadd.xlane.f32.xlu2 %v12066_v51 }
 0x62d   : > { %8170 = vmatmul.msk.f32.gmra.mxu2 %vm3008_vm0, %v15607_v54  ;;  %v8417_v18 = vpop.eup %8416  ;;  %3294 = vmax.xlane.f32.xlu0 %v12106_v3  ;;  %v4672_v54 = vand.u32 2147483648, %v4598_v49 }
 0x62e   : > { %8122 = vmatmul.msk.f32.gmra.mxu0 %vm3008_vm0, %v15608_v8  ;;  %v12176_v58 = vpop.eup %8418  ;;  %v4662_v11 = vmul.f32 %v8417_v18, %v4598_v49  ;;  %v3269_v34 = vpop.xlane.xlu2 %3268  ;;  %vm4667_vm13 = vweird.f32 %v8417_v18 }
 0x62f   : > { %4629 = vadd.xlane.f32.xlu1 %v8415_v17  ;;  %v3315_v61 = vsub.f32 %v11818_v20, %v3269_v34  ;;  %v4690_v19 = vmul.f32 %v12176_v58, %v12151_v5  ;;  %v4678_v20 = vmul.f32 %v12159_v32, %v4677_v10  ;;  %vm4668_vm15 = vmor %vm4666_vm14, %vm4667_vm13  ;;  %vm4695_vm6 = vweird.f32 %v12176_v58 }
 0x630   : > { %v4663_v51 = vsub.f32 1.0, %v4662_v11  ;;  %v15610_v11 = vld [vmem:[#allocation132_spill] sm:$0xff]  ;;  %vm12264_vm8 = vmor %vm4694_vm7, %vm4695_vm6 }
 0x631   : > { %v3364_v26 = vmul.f32 1.442695, %v3315_v61  ;;  %v12191_v14 = vpop.eup %8420  ;;  %v4691_v34 = vsub.f32 1.0, %v4690_v19  ;;  %v15611_v61 = vld [vmem:[#allocation76_spill] sm:$0xff]  ;;  %v4679_v49 = vadd.f32 %v12159_v32, %v4678_v20  ;;  %v4519_v20 = vsub.f32 %v11842_v55, %v12100_v59 }
 0x632   : > { %v12189_v6 = vpop.xlane.xlu1 %4479  ;;  %v4664_v8 = vmul.f32 %v8417_v18, %v4663_v51  ;;  %v4673_v51 = vor.u32 1.1754944e-38, %v4672_v54  ;;  %v12228_v55 = vpop.f32.mrf.mxu0  ;;  %vm3534_vm10 = vweird.f32 %v12191_v14 }
 0x633   : > { %8422 = vpow2.f32 %v3364_v26  ;;  %v4683_v59 = vsel %vm12224_vm4, %v12159_v32, %v4679_v49  ;;  %v15616_v32 = vld [vmem:[#allocation85_spill] sm:$0xff]  ;;  %vm12309_vm13 = vmor %vm3533_vm11, %vm3534_vm10 }
 0x634   : > { %5237 = vmatmul.f32.gmra.mxu3 %v8415_v17  ;;  %4621 = vadd.xlane.f32.xlu2 %v12102_v42  ;;  %v4665_v57 = vadd.f32 %v8417_v18, %v4664_v8  ;;  %8424 = vrcp.f32 %v12140_v31  ;;  %v3529_v17 = vmul.f32 %v12191_v14, %v12162_v62 }
 0x635   : > { %8171 = vmatmul.msk.f32.gmra.mxu2 %vm3008_vm0, %v15610_v11  ;;  %4625 = vadd.xlane.f32.xlu0 %v8407_v60  ;;  %v4684_v60 = vand.u32 2147483647, %v12064_v30 }
 0x636   : > { %8123 = vmatmul.msk.f32.gmra.mxu0 %vm3008_vm0, %v15611_v61  ;;  %v4669_v10 = vsel %vm4668_vm15, %v8417_v18, %v4665_v57  ;;  %v5190_v26 = vpop.f32.mrf.mxu3  ;;  %v4686_v18 = vand.u32 2147483648, %v12064_v30  ;;  %v12211_v57 = vpop.f32.mrf.mxu2  ;;  %v3317_v30 = vsub.f32 %v11876_v37, %v12116_v45  ;;  %v4520_v37 = vsub.f32 %v11858_v47, %v12181_v9 }
 0x637   : > { %v4674_v11 = vsel %vm4671_vm1, %v4673_v51, %v4669_v10  ;;  %v4472_v42 = vpop.xlane.xlu2 %4471  ;;  %v12208_v8 = vpop.xlane.xlu0 %3402  ;;  %15612 = vst [vmem:[#allocation124_spill] sm:$0xff] %v12211_v57  ;;  %v4692_v51 = vmul.f32 %v12176_v58, %v4691_v34  ;;  %v3530_v10 = vsub.f32 1.0, %v3529_v17  ;;  %vm4685_vm5 = vcmp.eq.f32.partialorder %v4684_v60, 8.507059e+37  ;;  %v15615_v17 = vld [vmem:[#allocation142_spill] sm:$0xff] }
 0x638   : > { %v5286_v19 = vmul.f32 %v5190_v26, %v4674_v11  ;;  %v4518_v54 = vsub.f32 %v11821_v29, %v4472_v42  ;;  %8426 = vrcp.f32 %v12208_v8  ;;  %v4687_v11 = vor.u32 1.1754944e-38, %v4686_v18 }
 0x639   : > { %v8423_v0 = vpop.eup %8422  ;;  %8428 = vpow2.f32 %v3366_v16  ;;  %v4698_v16 = vand.u32 2147483647, %v12151_v5  ;;  %v4700_v42 = vand.u32 2147483648, %v12151_v5  ;;  %v4569_v45 = vmul.f32 1.442695, %v4519_v20 }
 0x63a   : > { %v12216_v61 = vpop.xlane.xlu1 %3278  ;;  %5318 = vst.msk [vmem:[%s12038_s23 + $0x8] sm:$0xff] %vm3008_vm0, %v5286_v19  ;;  %v4567_v29 = vmul.f32 1.442695, %v4518_v54  ;;  %3973 = vmatmul.f32.gmra.mxu1 %v8423_v0  ;;  %3428 = vadd.xlane.f32.xlu1 %v8423_v0  ;;  %v12235_v34 = vpop.eup %8424  ;;  %v4693_v49 = vadd.f32 %v12176_v58, %v4692_v51  ;;  %v4688_v60 = vsel %vm4685_vm5, %v4687_v11, %v4683_v59  ;;  %v3368_v0 = vmul.f32 1.442695, %v3317_v30 }
 0x63b   : > { %v3531_v54 = vmul.f32 %v12191_v14, %v3530_v10  ;;  %v4718_v47 = vmul.f32 %v12235_v34, %v12140_v31  ;;  %vm12268_vm9 = vcmp.eq.f32.partialorder %v4698_v16, 8.507059e+37  ;;  %v4571_v5 = vmul.f32 1.442695, %v4520_v37 }
 0x63c   : > { %8430 = vpow2.f32 %v4567_v29  ;;  %3292 = vmax.xlane.f32.xlu2 %v12085_v33  ;;  %v4697_v11 = vsel %vm12264_vm8, %v12176_v58, %v4693_v49  ;;  %v3539_v37 = vand.u32 2147483648, %v12162_v62  ;;  %v3525_v58 = vand.u32 2147483648, %v12208_v8 }
 0x63d   : > { %8172 = vmatmul.msk.f32.gmra.mxu2 %vm3008_vm0, %v15615_v17  ;;  %4499 = vmax.xlane.f32.xlu0 %v12120_v27  ;;  %v3532_v16 = vadd.f32 %v12191_v14, %v3531_v54  ;;  %v3523_v49 = vand.u32 2147483647, %v12208_v8  ;;  %v15621_v54 = vld [vmem:[#allocation134_spill] sm:$0xff]  ;;  %vm4723_vm14 = vweird.f32 %v12235_v34  ;;  %vm3519_vm15 = vweird.f32 %v12208_v8 }
 0x63e   : > { %8124 = vmatmul.msk.f32.gmra.mxu0 %vm3008_vm0, %v15616_v32  ;;  %v5193_v19 = vpop.f32.mrf.mxu3  ;;  %v12250_v18 = vpop.eup %8426  ;;  %v4701_v32 = vor.u32 1.1754944e-38, %v4700_v42  ;;  %vm4722_vm5 = vweird.f32 %v12140_v31 }
 0x63f   : > { %v5287_v9 = vmul.f32 %v5193_v19, %v4688_v60  ;;  %v12254_v20 = vpop.xlane.xlu2 %3400  ;;  %v3515_v51 = vmul.f32 %v12250_v18, %v12208_v8  ;;  %v12260_v29 = vpop.xlane.xlu0 %3276  ;;  %vm3520_vm12 = vweird.f32 %v12250_v18  ;;  %v3536_v30 = vsel %vm12309_vm13, %v12191_v14, %v3532_v16  ;;  %vm12368_vm7 = vmor %vm4722_vm5, %vm4723_vm14 }
 0x640   : > { %8432 = vrcp.f32 %v12254_v20  ;;  %v12262_v10 = vpop.f32.mrf.mxu1  ;;  %v12272_v59 = vpop.eup %8428  ;;  %v4702_v26 = vsel %vm12268_vm9, %v4701_v32, %v4697_v11  ;;  %v3540_v11 = vor.u32 1.1754944e-38, %v3539_v37  ;;  %vm3521_vm1 = vmor %vm3519_vm15, %vm3520_vm12  ;;  %vm3524_vm2 = vcmp.eq.f32.partialorder %v3523_v49, 8.507059e+37 }
 0x641   : > { %8434 = vpow2.f32 %v4569_v45  ;;  %5319 = vst.msk [vmem:[%s12038_s23 + $0x28] sm:$0xff] %vm3008_vm0, %v5287_v9  ;;  %v3516_v19 = vsub.f32 1.0, %v3515_v51  ;;  %v12288_v45 = vpop.f32.mrf.mxu2  ;;  %v4719_v9 = vsub.f32 1.0, %v4718_v47  ;;  %v12300_v47 = vpop.f32.mrf.mxu0  ;;  %v15622_v51 = vld [vmem:[#allocation126_spill] sm:$0xff]  ;;  %vm3505_vm6 = vweird.f32 %v12254_v20 }
 0x642   : > { %v12276_v17 = vpop.xlane.xlu1 %4611  ;;  %v12281_v60 = vpop.eup %8430  ;;  %3976 = vmatmul.f32.gmra.mxu1 %v12272_v59  ;;  %5689 = vmax.xlane.f32.xlu1 %v12183_v4  ;;  %8436 = vpow2.f32 %v3368_v0  ;;  %v3537_v0 = vand.u32 2147483647, %v12162_v62 }
 0x643   : > { %5240 = vmatmul.f32.gmra.mxu3 %v12281_v60  ;;  %v3517_v42 = vmul.f32 %v12250_v18, %v3516_v19  ;;  %8438 = vpow2.f32 %v4571_v5  ;;  %v4720_v8 = vmul.f32 %v12235_v34, %v4719_v9 }
 0x644   : > { %4495 = vmax.xlane.f32.xlu2 %v12081_v7  ;;  %vm3538_vm3 = vcmp.eq.f32.partialorder %v3537_v0, 8.507059e+37  ;;  %v3509_v0 = vand.u32 2147483647, %v12254_v20 }
 0x645   : > { %8173 = vmatmul.msk.f32.gmra.mxu2 %vm3008_vm0, %v15621_v54  ;;  %3426 = vadd.xlane.f32.xlu0 %v12142_v48  ;;  %v3518_v5 = vadd.f32 %v12250_v18, %v3517_v42 }
 0x646   : > { %8125 = vmatmul.msk.f32.gmra.mxu0 %vm3008_vm0, %v15622_v51  ;;  %v12314_v62 = vpop.eup %8432  ;;  %v5196_v48 = vpop.f32.mrf.mxu3  ;;  %v3526_v51 = vor.u32 1.1754944e-38, %v3525_v58  ;;  %v3541_v58 = vsel %vm3538_vm3, %v3540_v11, %v3536_v30  ;;  %v15626_v30 = vld [vmem:[#allocation80_spill] sm:$0xff]  ;;  %vm3510_vm9 = vcmp.eq.f32.partialorder %v3509_v0, 8.507059e+37 }
 0x647   : > { %v12321_v32 = vpop.eup %8434  ;;  %v3501_v54 = vmul.f32 %v12314_v62, %v12254_v20  ;;  %v5288_v4 = vmul.f32 %v5196_v48, %v4702_v26  ;;  %v12327_v42 = vpop.xlane.xlu2 %4603  ;;  %v3522_v27 = vsel %vm3521_vm1, %v12250_v18, %v3518_v5  ;;  %v3511_v18 = vand.u32 2147483648, %v12254_v20 }
 0x648   : > { %8440 = vrcp.f32 %v12327_v42  ;;  %v12332_v14 = vpop.xlane.xlu0 %4607  ;;  %v3938_v16 = vpop.f32.mrf.mxu1  ;;  %v3527_v25 = vsel %vm3524_vm2, %v3526_v51, %v3522_v27  ;;  %vm3506_vm4 = vweird.f32 %v12314_v62  ;;  %v4721_v5 = vadd.f32 %v12235_v34, %v4720_v8 }
 0x649   : > { %v12334_v37 = vpop.eup %8436  ;;  %v3502_v19 = vsub.f32 1.0, %v3501_v54  ;;  %5320 = vst.msk [vmem:[%s12038_s23 + $0x48] sm:$0xff] %vm3008_vm0, %v5288_v4  ;;  %8442 = vrcp.f32 %v12332_v14  ;;  %v4023_v49 = vmul.f32 %v12262_v10, %v3527_v25  ;;  %v4024_v26 = vmul.f32 %v3938_v16, %v3541_v58  ;;  %v15625_v25 = vld [vmem:[#allocation138_spill] sm:$0xff]  ;;  %v12357_v10 = vpop.f32.mrf.mxu2  ;;  %vm3507_vm8 = vmor %vm3505_vm6, %vm3506_vm4 }
 0x64a   : > { %v12339_v9 = vpop.xlane.xlu1 %3410  ;;  %3979 = vmatmul.f32.gmra.mxu1 %v12334_v37  ;;  %6893 = vmax.xlane.f32.xlu1 %v12211_v57  ;;  %v8439_v27 = vpop.eup %8438  ;;  %v3512_v54 = vor.u32 1.1754944e-38, %v3511_v18  ;;  %v4726_v20 = vand.u32 2147483647, %v12140_v31  ;;  %v4728_v8 = vand.u32 2147483648, %v12140_v31  ;;  %v4725_v18 = vsel %vm12368_vm7, %v12235_v34, %v4721_v5 }
 0x64b   : > { %8444 = vrcp.f32 %v12339_v9  ;;  %v3503_v4 = vmul.f32 %v12314_v62, %v3502_v19  ;;  %5243 = vmatmul.f32.gmra.mxu3 %v12321_v32  ;;  %4055 = vst.msk [vmem:[%s12038_s23 + $0x80] sm:$0xff] %vm3008_vm0, %v4023_v49  ;;  %v12380_v19 = vpop.f32.mrf.mxu0  ;;  %v3319_v31 = vsub.f32 %v11899_v36, %v12260_v29  ;;  %v4712_v29 = vand.u32 2147483647, %v12327_v42 }
 0x64c   : > { %3424 = vadd.xlane.f32.xlu2 %v12118_v44  ;;  %4056 = vst.msk [vmem:[%s12038_s23 + $0xa0] sm:$0xff] %vm3008_vm0, %v4024_v26  ;;  %8446 = vrcp.f32 %v12276_v17  ;;  %vm4727_vm11 = vcmp.eq.f32.partialorder %v4726_v20, 8.507059e+37  ;;  %vm4708_vm12 = vweird.f32 %v12327_v42  ;;  %vm4736_vm15 = vweird.f32 %v12332_v14 }
 0x64d   : > { %8174 = vmatmul.msk.f32.gmra.mxu2 %vm3008_vm0, %v15625_v25  ;;  %v3504_v48 = vadd.f32 %v12314_v62, %v3503_v4  ;;  %5687 = vmax.xlane.f32.xlu0 %v12157_v50  ;;  %15629 = vst [vmem:[#allocation143_spill] sm:$0xff] %v12380_v19  ;;  %vm4713_vm14 = vcmp.eq.f32.partialorder %v4712_v29, 8.507059e+37  ;;  %vm3575_vm4 = vweird.f32 %v12339_v9 }
 0x64e   : > { %8126 = vmatmul.msk.f32.gmra.mxu0 %vm3008_vm0, %v15626_v30  ;;  %v8441_v44 = vpop.eup %8440  ;;  %v12374_v51 = vpop.f32.mrf.mxu3 }
 0x64f   : > { %v12378_v16 = vpop.eup %8442  ;;  %v3508_v58 = vsel %vm3507_vm8, %v12314_v62, %v3504_v48  ;;  %v4704_v49 = vmul.f32 %v8441_v44, %v12327_v42  ;;  %v3275_v26 = vpop.xlane.xlu2 %3274  ;;  %vm4709_vm10 = vweird.f32 %v8441_v44 }
 0x650   : > { %v3513_v25 = vsel %vm3510_vm9, %v3512_v54, %v3508_v58  ;;  %v4732_v30 = vmul.f32 %v12378_v16, %v12332_v14  ;;  %v3318_v62 = vsub.f32 %v11890_v56, %v3275_v26  ;;  %v12394_v0 = vpop.xlane.xlu0 %4481  ;;  %v12396_v48 = vpop.f32.mrf.mxu1  ;;  %v4714_v54 = vand.u32 2147483648, %v12327_v42  ;;  %vm4710_vm13 = vmor %vm4708_vm12, %vm4709_vm10 }
 0x651   : > { %v12387_v4 = vpop.eup %8444  ;;  %v4022_v57 = vmul.f32 %v12205_v46, %v3513_v25  ;;  %v4705_v34 = vsub.f32 1.0, %v4704_v49  ;;  %v4729_v46 = vor.u32 1.1754944e-38, %v4728_v8  ;;  %v15630_v49 = vld [vmem:[#allocation145_spill] sm:$0xff]  ;;  %v3372_v8 = vmul.f32 1.442695, %v3319_v31  ;;  %v12421_v42 = vpop.f32.mrf.mxu2 }
 0x652   : > { %v3571_v5 = vmul.f32 %v12387_v4, %v12339_v9  ;;  %v12402_v11 = vpop.xlane.xlu1 %4485  ;;  %v4733_v36 = vsub.f32 1.0, %v4732_v30  ;;  %v3370_v56 = vmul.f32 1.442695, %v3318_v62  ;;  %4635 = vadd.xlane.f32.xlu1 %v8439_v27  ;;  %v12419_v20 = vpop.eup %8446  ;;  %vm4737_vm1 = vweird.f32 %v12378_v16 }
 0x653   : > { %4054 = vst.msk [vmem:[%s12038_s23 + $0x60] sm:$0xff] %vm3008_vm0, %v4022_v57  ;;  %v4706_v26 = vmul.f32 %v8441_v44, %v4705_v34  ;;  %5246 = vmatmul.f32.gmra.mxu3 %v8439_v27  ;;  %v15631_v57 = vld [vmem:[#allocation90_spill] sm:$0xff]  ;;  %v4730_v62 = vsel %vm4727_vm11, %v4729_v46, %v4725_v18  ;;  %v4715_v34 = vor.u32 1.1754944e-38, %v4714_v54  ;;  %vm3576_vm2 = vweird.f32 %v12387_v4  ;;  %vm12450_vm3 = vmor %vm4736_vm15, %vm4737_vm1 }
 0x654   : > { %v3572_v58 = vsub.f32 1.0, %v3571_v5  ;;  %8448 = vpow2.f32 %v3370_v56  ;;  %4627 = vadd.xlane.f32.xlu2 %v12164_v24  ;;  %v4734_v25 = vmul.f32 %v12378_v16, %v4733_v36  ;;  %vm12469_vm5 = vmor %vm3575_vm4, %vm3576_vm2  ;;  %vm4765_vm10 = vweird.f32 %v12419_v20 }
 0x655   : > { %8175 = vmatmul.msk.f32.gmra.mxu2 %vm3008_vm0, %v15630_v49  ;;  %v4707_v30 = vadd.f32 %v8441_v44, %v4706_v26  ;;  %4631 = vadd.xlane.f32.xlu0 %v12281_v60  ;;  %v4742_v26 = vand.u32 2147483648, %v12332_v14  ;;  %vm4764_vm12 = vweird.f32 %v12276_v17 }
 0x656   : > { %8127 = vmatmul.msk.f32.gmra.mxu0 %vm3008_vm0, %v15631_v57  ;;  %v3573_v27 = vmul.f32 %v12387_v4, %v3572_v58  ;;  %v5202_v24 = vpop.f32.mrf.mxu3  ;;  %v4735_v18 = vadd.f32 %v12378_v16, %v4734_v25  ;;  %v4740_v58 = vand.u32 2147483647, %v12332_v14  ;;  %v12440_v25 = vpop.f32.mrf.mxu0  ;;  %v4760_v57 = vmul.f32 %v12419_v20, %v12276_v17 }
 0x657   : > { %v4711_v60 = vsel %vm4710_vm13, %v8441_v44, %v4707_v30  ;;  %v5290_v5 = vmul.f32 %v5202_v24, %v4730_v62  ;;  %v4478_v36 = vpop.xlane.xlu2 %4477  ;;  %v4522_v30 = vsub.f32 %v11896_v35, %v12189_v6  ;;  %v3579_v6 = vand.u32 2147483647, %v12339_v9  ;;  %v15638_v24 = vld [vmem:[#allocation148_spill] sm:$0xff] }
 0x658   : > { %v4716_v31 = vsel %vm4713_vm14, %v4715_v34, %v4711_v60  ;;  %v4521_v56 = vsub.f32 %v11887_v38, %v4478_v36  ;;  %v12426_v29 = vpop.xlane.xlu0 %3408  ;;  %v12428_v54 = vpop.f32.mrf.mxu1  ;;  %v3574_v49 = vadd.f32 %v12387_v4, %v3573_v27  ;;  %v3581_v27 = vand.u32 2147483648, %v12339_v9  ;;  %v15634_v34 = vld [vmem:[#allocation151_spill] sm:$0xff]  ;;  %v15637_v9 = vld [vmem:[#allocation130_spill] sm:$0xff]  ;;  %vm12538_vm14 = vmor %vm4764_vm12, %vm4765_vm10 }
 0x659   : > { %v5289_v44 = vmul.f32 %v12374_v51, %v4716_v31  ;;  %5322 = vst.msk [vmem:[%s12038_s23 + $0x88] sm:$0xff] %vm3008_vm0, %v5290_v5  ;;  %8450 = vrcp.f32 %v12426_v29  ;;  %v4739_v35 = vsel %vm12450_vm3, %v12378_v16, %v4735_v18  ;;  %v3320_v14 = vsub.f32 %v11916_v52, %v12216_v61  ;;  %v12495_v62 = vpop.f32.mrf.mxu2 }
 0x65a   : > { %v12436_v46 = vpop.xlane.xlu1 %3284  ;;  %v8449_v38 = vpop.eup %8448  ;;  %v4573_v51 = vmul.f32 1.442695, %v4521_v56  ;;  %8452 = vpow2.f32 %v3372_v8  ;;  %v4743_v8 = vor.u32 1.1754944e-38, %v4742_v26  ;;  %v4523_v16 = vsub.f32 %v11912_v63, %v12394_v0 }
 0x65b   : > { %5321 = vst.msk [vmem:[%s12038_s23 + $0x68] sm:$0xff] %vm3008_vm0, %v5289_v44  ;;  %3982 = vmatmul.f32.gmra.mxu1 %v8449_v38  ;;  %3434 = vadd.xlane.f32.xlu1 %v8449_v38  ;;  %vm4741_vm6 = vcmp.eq.f32.partialorder %v4740_v58, 8.507059e+37  ;;  %v3578_v52 = vsel %vm12469_vm5, %v12387_v4, %v3574_v49  ;;  %v4761_v61 = vsub.f32 1.0, %v4760_v57  ;;  %v3582_v36 = vor.u32 1.1754944e-38, %v3581_v27 }
 0x65c   : > { %8454 = vpow2.f32 %v4573_v51  ;;  %6889 = vmax.xlane.f32.xlu2 %v12149_v53  ;;  %v4744_v60 = vsel %vm4741_vm6, %v4743_v8, %v4739_v35  ;;  %v4575_v31 = vmul.f32 1.442695, %v4522_v30  ;;  %vm3580_vm7 = vcmp.eq.f32.partialorder %v3579_v6, 8.507059e+37 }
 0x65d   : > { %8176 = vmatmul.msk.f32.gmra.mxu2 %vm3008_vm0, %v15634_v34  ;;  %6891 = vmax.xlane.f32.xlu0 %v12178_v1  ;;  %v3374_v63 = vmul.f32 1.442695, %v3320_v14  ;;  %v3583_v4 = vsel %vm3580_vm7, %v3582_v36, %v3578_v52  ;;  %v4577_v38 = vmul.f32 1.442695, %v4523_v16  ;;  %v4762_v35 = vmul.f32 %v12419_v20, %v4761_v61  ;;  %v15639_v52 = vld [vmem:[#allocation84_spill] sm:$0xff] }
 0x65e   : > { %8128 = vmatmul.msk.f32.gmra.mxu0 %vm3008_vm0, %v15637_v9  ;;  %v5205_v5 = vpop.f32.mrf.mxu3  ;;  %v3567_v6 = vand.u32 2147483648, %v12426_v29  ;;  %v12503_v14 = vpop.f32.mrf.mxu0  ;;  %v3565_v8 = vand.u32 2147483647, %v12426_v29  ;;  %vm3561_vm9 = vweird.f32 %v12426_v29 }
 0x65f   : > { %v8451_v18 = vpop.eup %8450  ;;  %v5291_v56 = vmul.f32 %v5205_v5, %v4744_v60  ;;  %v12481_v26 = vpop.xlane.xlu2 %3406  ;;  %v4763_v60 = vadd.f32 %v12419_v20, %v4762_v35 }
 0x660   : > { %v3557_v0 = vmul.f32 %v8451_v18, %v12426_v29  ;;  %8456 = vrcp.f32 %v12481_v26  ;;  %v12485_v58 = vpop.xlane.xlu0 %3282  ;;  %v3947_v44 = vpop.f32.mrf.mxu1  ;;  %vm3562_vm8 = vweird.f32 %v8451_v18  ;;  %v3568_v5 = vor.u32 1.1754944e-38, %v3567_v6 }
 0x661   : > { %v12487_v49 = vpop.eup %8452  ;;  %5323 = vst.msk [vmem:[%s12038_s23 + $0xa8] sm:$0xff] %vm3008_vm0, %v5291_v56  ;;  %v4027_v30 = vmul.f32 %v3947_v44, %v3583_v4  ;;  %8458 = vpow2.f32 %v4575_v31  ;;  %vm3563_vm11 = vmor %vm3561_vm9, %vm3562_vm8  ;;  %vm3566_vm13 = vcmp.eq.f32.partialorder %v3565_v8, 8.507059e+37  ;;  %v4770_v56 = vand.u32 2147483648, %v12276_v17 }
 0x662   : > { %v12491_v57 = vpop.xlane.xlu1 %4617  ;;  %v12493_v51 = vpop.eup %8454  ;;  %v3558_v27 = vsub.f32 1.0, %v3557_v0  ;;  %8460 = vpow2.f32 %v3374_v63  ;;  %v3553_v35 = vand.u32 2147483648, %v12481_v26  ;;  %v4767_v6 = vsel %vm12538_vm14, %v12419_v20, %v4763_v60 }
 0x663   : > { %4059 = vst.msk [vmem:[%s12038_s23 + $0x100] sm:$0xff] %vm3008_vm0, %v4027_v30  ;;  %3985 = vmatmul.f32.gmra.mxu1 %v12487_v49  ;;  %5249 = vmatmul.f32.gmra.mxu3 %v12493_v51  ;;  %8462 = vpow2.f32 %v4577_v38  ;;  %v4768_v38 = vand.u32 2147483647, %v12276_v17  ;;  %v12557_v17 = vpop.f32.mrf.mxu2  ;;  %v3322_v20 = vsub.f32 %v11963_v41, %v12485_v58  ;;  %vm3547_vm1 = vweird.f32 %v12481_v26 }
 0x664   : > { %v3559_v34 = vmul.f32 %v8451_v18, %v3558_v27  ;;  %5695 = vmax.xlane.f32.xlu1 %v12380_v19  ;;  %3430 = vadd.xlane.f32.xlu2 %v12272_v59  ;;  %8464 = vrcp.f32 %v12491_v57 }
 0x665   : > { %8177 = vmatmul.msk.f32.gmra.mxu2 %vm3008_vm0, %v15638_v24  ;;  %3432 = vadd.xlane.f32.xlu0 %v12334_v37  ;;  %v3551_v24 = vand.u32 2147483647, %v12481_v26  ;;  %vm4769_vm2 = vcmp.eq.f32.partialorder %v4768_v38, 8.507059e+37  ;;  %v3378_v60 = vmul.f32 1.442695, %v3322_v20 }
 0x666   : > { %v12511_v16 = vpop.eup %8456  ;;  %v3560_v9 = vadd.f32 %v8451_v18, %v3559_v34  ;;  %8129 = vmatmul.msk.f32.gmra.mxu0 %vm3008_vm0, %v15639_v52  ;;  %v12516_v61 = vpop.f32.mrf.mxu3 }
 0x667   : > { %v3543_v59 = vmul.f32 %v12511_v16, %v12481_v26  ;;  %v12523_v37 = vpop.xlane.xlu2 %4609  ;;  %v12532_v63 = vpop.eup %8458  ;;  %vm3548_vm15 = vweird.f32 %v12511_v16  ;;  %vm3552_vm4 = vcmp.eq.f32.partialorder %v3551_v24, 8.507059e+37 }
 0x668   : > { %v3564_v29 = vsel %vm3563_vm11, %v8451_v18, %v3560_v9  ;;  %8466 = vrcp.f32 %v12523_v37  ;;  %v12527_v36 = vpop.xlane.xlu0 %4613  ;;  %v12529_v31 = vpop.f32.mrf.mxu1  ;;  %v4771_v9 = vor.u32 1.1754944e-38, %v4770_v56  ;;  %vm3549_vm3 = vmor %vm3547_vm1, %vm3548_vm15  ;;  %v4754_v56 = vand.u32 2147483647, %v12523_v37 }
 0x669   : > { %v3569_v0 = vsel %vm3566_vm13, %v3568_v5, %v3564_v29  ;;  %v3544_v4 = vsub.f32 1.0, %v3543_v59  ;;  %v12543_v30 = vpop.eup %8460  ;;  %8468 = vrcp.f32 %v12527_v36  ;;  %v12573_v58 = vpop.f32.mrf.mxu0  ;;  %v3554_v29 = vor.u32 1.1754944e-38, %v3553_v35 }
 0x66a   : > { %v12534_v44 = vpop.xlane.xlu1 %3416  ;;  %v4026_v27 = vmul.f32 %v12428_v54, %v3569_v0  ;;  %v8463_v34 = vpop.eup %8462  ;;  %v15642_v54 = vld [vmem:[#allocation135_spill] sm:$0xff]  ;;  %v15643_v0 = vld [vmem:[#allocation125_spill] sm:$0xff]  ;;  %v4772_v26 = vsel %vm4769_vm2, %v4771_v9, %v4767_v6  ;;  %vm4750_vm5 = vweird.f32 %v12523_v37  ;;  %vm12598_vm6 = vcmp.eq.f32.partialorder %v4754_v56, 8.507059e+37 }
 0x66b   : > { %v3545_v8 = vmul.f32 %v12511_v16, %v3544_v4  ;;  %8470 = vrcp.f32 %v12534_v44  ;;  %3988 = vmatmul.f32.gmra.mxu1 %v12543_v30  ;;  %5252 = vmatmul.f32.gmra.mxu3 %v12532_v63  ;;  %v12565_v52 = vpop.eup %8464  ;;  %vm4778_vm8 = vweird.f32 %v12527_v36  ;;  %vm3617_vm11 = vweird.f32 %v12534_v44 }
 0x66c   : > { %4058 = vst.msk [vmem:[%s12038_s23 + $0xe0] sm:$0xff] %vm3008_vm0, %v4026_v27  ;;  %4641 = vadd.xlane.f32.xlu1 %v8463_v34  ;;  %5691 = vmax.xlane.f32.xlu2 %v12228_v55  ;;  %v4802_v35 = vmul.f32 %v12565_v52, %v12491_v57  ;;  %vm4807_vm2 = vweird.f32 %v12565_v52 }
 0x66d   : > { %8178 = vmatmul.msk.f32.gmra.mxu2 %vm3008_vm0, %v15642_v54  ;;  %v3546_v5 = vadd.f32 %v12511_v16, %v3545_v8  ;;  %5693 = vmax.xlane.f32.xlu0 %v12300_v47 }
 0x66e   : > { %v8467_v41 = vpop.eup %8466  ;;  %8130 = vmatmul.msk.f32.gmra.mxu0 %vm3008_vm0, %v15643_v0  ;;  %v5211_v4 = vpop.f32.mrf.mxu3  ;;  %v4803_v56 = vsub.f32 1.0, %v4802_v35 }
 0x66f   : > { %v3550_v18 = vsel %vm3549_vm3, %v12511_v16, %v3546_v5  ;;  %v4746_v38 = vmul.f32 %v8467_v41, %v12523_v37  ;;  %v5293_v27 = vmul.f32 %v5211_v4, %v4772_v26  ;;  %v3281_v8 = vpop.xlane.xlu2 %3280  ;;  %v8469_v54 = vpop.eup %8468  ;;  %vm4751_vm7 = vweird.f32 %v8467_v41 }
 0x670   : > { %v3555_v59 = vsel %vm3552_vm4, %v3554_v29, %v3550_v18  ;;  %v3321_v19 = vsub.f32 %v11940_v39, %v3281_v8  ;;  %v12587_v0 = vpop.xlane.xlu0 %4487  ;;  %v4774_v9 = vmul.f32 %v8469_v54, %v12527_v36  ;;  %v4756_v39 = vand.u32 2147483648, %v12523_v37  ;;  %vm4752_vm10 = vmor %vm4750_vm5, %vm4751_vm7 }
 0x671   : > { %v12589_v6 = vpop.eup %8470  ;;  %v4025_v16 = vmul.f32 %v12396_v48, %v3555_v59  ;;  %v4747_v24 = vsub.f32 1.0, %v4746_v38  ;;  %5325 = vst.msk [vmem:[%s12038_s23 + $0xe8] sm:$0xff] %vm3008_vm0, %v5293_v27  ;;  %v12605_v48 = vpop.f32.mrf.mxu1  ;;  %v4784_v38 = vand.u32 2147483648, %v12527_v36  ;;  %vm4779_vm9 = vweird.f32 %v8469_v54 }
 0x672   : > { %v12596_v20 = vpop.xlane.xlu1 %4491  ;;  %v3613_v29 = vmul.f32 %v12589_v6, %v12534_v44  ;;  %v3376_v26 = vmul.f32 1.442695, %v3321_v19  ;;  %v4775_v4 = vsub.f32 1.0, %v4774_v9  ;;  %v4782_v8 = vand.u32 2147483647, %v12527_v36  ;;  %vm4780_vm13 = vmor %vm4778_vm8, %vm4779_vm9 }
 0x673   : > { %4057 = vst.msk [vmem:[%s12038_s23 + $0xc0] sm:$0xff] %vm3008_vm0, %v4025_v16  ;;  %v4748_v59 = vmul.f32 %v8467_v41, %v4747_v24  ;;  %5255 = vmatmul.f32.gmra.mxu3 %v8463_v34  ;;  %v4757_v34 = vor.u32 1.1754944e-38, %v4756_v39  ;;  %v3623_v24 = vand.u32 2147483648, %v12534_v44  ;;  %vm3618_vm12 = vweird.f32 %v12589_v6 }
 0x674   : > { %v3614_v18 = vsub.f32 1.0, %v3613_v29  ;;  %8472 = vpow2.f32 %v3376_v26  ;;  %4633 = vadd.xlane.f32.xlu2 %v12321_v32  ;;  %v4776_v19 = vmul.f32 %v8469_v54, %v4775_v4  ;;  %v3621_v26 = vand.u32 2147483647, %v12534_v44  ;;  %vm3619_vm15 = vmor %vm3617_vm11, %vm3618_vm12 }
 0x675   : > { %v4749_v27 = vadd.f32 %v8467_v41, %v4748_v59  ;;  %6895 = vmax.xlane.f32.xlu0 %v12288_v45  ;;  %v4785_v37 = vor.u32 1.1754944e-38, %v4784_v38  ;;  %vm4783_vm14 = vcmp.eq.f32.partialorder %v4782_v8, 8.507059e+37  ;;  %v4804_v38 = vmul.f32 %v12565_v52, %v4803_v56 }
 0x676   : > { %v5214_v16 = vpop.f32.mrf.mxu3  ;;  %v3615_v35 = vmul.f32 %v12589_v6, %v3614_v18  ;;  %v4777_v29 = vadd.f32 %v8469_v54, %v4776_v19  ;;  %vm3622_vm1 = vcmp.eq.f32.partialorder %v3621_v26, 8.507059e+37  ;;  %v15646_v44 = vsub.f32 %v11959_v2, %v12402_v11 }
 0x677   : > { %v4753_v9 = vsel %vm4752_vm10, %v8467_v41, %v4749_v27  ;;  %v4484_v32 = vpop.xlane.xlu2 %4483  ;;  %v4526_v56 = vsub.f32 %v11979_v43, %v12587_v0  ;;  %v4805_v43 = vadd.f32 %v12565_v52, %v4804_v38  ;;  %v4812_v0 = vand.u32 2147483648, %v12491_v57 }
 0x678   : > { %v4758_v59 = vsel %vm12598_vm6, %v4757_v34, %v4753_v9  ;;  %v4524_v39 = vsub.f32 %v11930_v40, %v4484_v32  ;;  %v12626_v4 = vpop.xlane.xlu0 %3414  ;;  %v3616_v41 = vadd.f32 %v12589_v6, %v3615_v35  ;;  %v4781_v27 = vsel %vm4780_vm13, %v8469_v54, %v4777_v29 }
 0x679   : > { %v5292_v18 = vmul.f32 %v12516_v61, %v4758_v59  ;;  %8474 = vrcp.f32 %v12626_v4  ;;  %v4786_v34 = vsel %vm4783_vm14, %v4785_v37, %v4781_v27  ;;  %v3624_v40 = vor.u32 1.1754944e-38, %v3623_v24  ;;  %v3956_v35 = vpop.f32.mrf.mxu1 }
 0x67a   : > { %v12631_v19 = vpop.xlane.xlu1 %3290  ;;  %v8473_v5 = vpop.eup %8472  ;;  %v4579_v36 = vmul.f32 1.442695, %v4524_v39  ;;  %8476 = vpow2.f32 %v3378_v60  ;;  %v5294_v61 = vmul.f32 %v5214_v16, %v4786_v34  ;;  %v3620_v54 = vsel %vm3619_vm15, %v12589_v6, %v3616_v41 }
 0x67b   : > { %5324 = vst.msk [vmem:[%s12038_s23 + $0xc8] sm:$0xff] %vm3008_vm0, %v5292_v18  ;;  %3991 = vmatmul.f32.gmra.mxu1 %v8473_v5  ;;  %3440 = vadd.xlane.f32.xlu1 %v8473_v5  ;;  %v3625_v8 = vsel %vm3622_vm1, %v3624_v40, %v3620_v54  ;;  %v4581_v9 = vmul.f32 1.442695, %v15646_v44  ;;  %v15647_v24 = vsub.f32 %v11983_v28, %v12436_v46  ;;  %v4583_v28 = vmul.f32 1.442695, %v4526_v56 }
 0x67c   : > { %8478 = vpow2.f32 %v4579_v36  ;;  %5326 = vst.msk [vmem:[%s12038_s23 + $0x108] sm:$0xff] %vm3008_vm0, %v5294_v61  ;;  %v4030_v60 = vmul.f32 %v3956_v35, %v3625_v8  ;;  %6897 = vmax.xlane.f32.xlu2 %v12357_v10  ;;  %vm4806_vm3 = vweird.f32 %v12491_v57  ;;  %v4810_v26 = vand.u32 2147483647, %v12491_v57 }
 0x67d   : > { %4637 = vadd.xlane.f32.xlu0 %v12493_v51  ;;  %v3380_v29 = vmul.f32 1.442695, %v15647_v24  ;;  %vm12675_vm4 = vmor %vm4806_vm3, %vm4807_vm2  ;;  %v3609_v41 = vand.u32 2147483648, %v12626_v4  ;;  %v3607_v27 = vand.u32 2147483647, %v12626_v4  ;;  %v4813_v5 = vor.u32 1.1754944e-38, %v4812_v0 }
 0x67e   : > { %v12650_v6 = vpop.f32.mrf.mxu3  ;;  %4062 = vst.msk [vmem:[%s12038_s23 + $0x160] sm:$0xff] %vm3008_vm0, %v4030_v60  ;;  %v4809_v57 = vsel %vm12675_vm4, %v12565_v52, %v4805_v43  ;;  %vm4811_vm6 = vcmp.eq.f32.partialorder %v4810_v26, 8.507059e+37  ;;  %vm3603_vm7 = vweird.f32 %v12626_v4  ;;  %v12704_v60 = vpop.f32.mrf.mxu2 }
 0x67f   : > { %v8475_v16 = vpop.eup %8474  ;;  %v12657_v2 = vpop.xlane.xlu2 %3412  ;;  %v4814_v40 = vsel %vm4811_vm6, %v4813_v5, %v4809_v57  ;;  %v3610_v61 = vor.u32 1.1754944e-38, %v3609_v41  ;;  %vm3608_vm9 = vcmp.eq.f32.partialorder %v3607_v27, 8.507059e+37 }
 0x680   : > { %v3599_v11 = vmul.f32 %v8475_v16, %v12626_v4  ;;  %8480 = vrcp.f32 %v12657_v2  ;;  %v12663_v51 = vpop.xlane.xlu0 %3288  ;;  %v12666_v32 = vpop.eup %8476  ;;  %vm3604_vm5 = vweird.f32 %v8475_v16  ;;  %v3593_v43 = vand.u32 2147483647, %v12657_v2 }
 0x681   : > { %8482 = vpow2.f32 %v4581_v9  ;;  %vm3605_vm8 = vmor %vm3603_vm7, %vm3604_vm5  ;;  %v12693_v8 = vpop.f32.mrf.mxu1  ;;  %v3595_v0 = vand.u32 2147483648, %v12657_v2  ;;  %vm3589_vm11 = vweird.f32 %v12657_v2 }
 0x682   : > { %v12668_v46 = vpop.xlane.xlu1 %4623  ;;  %v12672_v59 = vpop.eup %8478  ;;  %v3600_v37 = vsub.f32 1.0, %v3599_v11  ;;  %vm3594_vm13 = vcmp.eq.f32.partialorder %v3593_v43, 8.507059e+37 }
 0x683   : > { %8484 = vrcp.f32 %v12668_v46  ;;  %3994 = vmatmul.f32.gmra.mxu1 %v12666_v32  ;;  %5258 = vmatmul.f32.gmra.mxu3 %v12672_v59  ;;  %vm4848_vm2 = vweird.f32 %v12668_v46 }
 0x684   : > { %8486 = vpow2.f32 %v3380_v29  ;;  %v3601_v18 = vmul.f32 %v8475_v16, %v3600_v37  ;;  %5701 = vmax.xlane.f32.xlu1 %v12573_v58  ;;  %3436 = vadd.xlane.f32.xlu2 %v12487_v49 }
 0x685   : > { %8488 = vpow2.f32 %v4583_v28  ;;  %6899 = vmax.xlane.f32.xlu0 %v12421_v42  ;;  %v3325_v28 = vsub.f32 %v12032_v23, %v12663_v51 }
 0x686   : > { %v8481_v34 = vpop.eup %8480  ;;  %v3602_v36 = vadd.f32 %v8475_v16, %v3601_v18  ;;  %v5220_v38 = vpop.f32.mrf.mxu3  ;;  %v3596_v18 = vor.u32 1.1754944e-38, %v3595_v0 }
 0x687   : > { %v12690_v52 = vpop.eup %8482  ;;  %v3585_v54 = vmul.f32 %v8481_v34, %v12657_v2  ;;  %v5296_v35 = vmul.f32 %v5220_v38, %v4814_v40  ;;  %v12695_v49 = vpop.xlane.xlu2 %4615  ;;  %vm3590_vm10 = vweird.f32 %v8481_v34  ;;  %v12731_v27 = vmul.f32 1.442695, %v3325_v28 }
 0x688   : > { %v3606_v9 = vsel %vm3605_vm8, %v8475_v16, %v3602_v36  ;;  %8490 = vrcp.f32 %v12695_v49  ;;  %v12700_v4 = vpop.xlane.xlu0 %4619  ;;  %vm3591_vm12 = vmor %vm3589_vm11, %vm3590_vm10  ;;  %v4798_v5 = vand.u32 2147483648, %v12695_v49  ;;  %v12736_v40 = vpop.f32.mrf.mxu0  ;;  %vm4792_vm14 = vweird.f32 %v12695_v49 }
 0x689   : > { %v12697_v44 = vpop.eup %8484  ;;  %v3611_v24 = vsel %vm3608_vm9, %v3610_v61, %v3606_v9  ;;  %v3586_v29 = vsub.f32 1.0, %v3585_v54  ;;  %5328 = vst.msk [vmem:[%s12038_s23 + $0x148] sm:$0xff] %vm3008_vm0, %v5296_v35  ;;  %8492 = vrcp.f32 %v12700_v4  ;;  %v4854_v54 = vand.u32 2147483648, %v12668_v46 }
 0x68a   : > { %v12702_v56 = vpop.eup %8486  ;;  %v12709_v11 = vpop.xlane.xlu1 %3422  ;;  %v4029_v16 = vmul.f32 %v12605_v48, %v3611_v24  ;;  %v4844_v39 = vmul.f32 %v12697_v44, %v12668_v46  ;;  %v4796_v48 = vand.u32 2147483647, %v12695_v49  ;;  %vm4820_vm1 = vweird.f32 %v12700_v4 }
 0x68b   : > { %v8489_v26 = vpop.eup %8488  ;;  %v3587_v37 = vmul.f32 %v8481_v34, %v3586_v29  ;;  %8494 = vrcp.f32 %v12709_v11  ;;  %3997 = vmatmul.f32.gmra.mxu1 %v12702_v56  ;;  %5261 = vmatmul.f32.gmra.mxu3 %v12690_v52  ;;  %v4826_v23 = vand.u32 2147483648, %v12700_v4  ;;  %vm3659_vm4 = vweird.f32 %v12709_v11 }
 0x68c   : > { %4061 = vst.msk [vmem:[%s12038_s23 + $0x140] sm:$0xff] %vm3008_vm0, %v4029_v16  ;;  %4647 = vadd.xlane.f32.xlu1 %v8489_v26  ;;  %5697 = vmax.xlane.f32.xlu2 %v12440_v25  ;;  %v4845_v38 = vsub.f32 1.0, %v4844_v39  ;;  %vm12741_vm15 = vcmp.eq.f32.partialorder %v4796_v48, 8.507059e+37  ;;  %v4799_v48 = vor.u32 1.1754944e-38, %v4798_v5  ;;  %v3665_v41 = vand.u32 2147483648, %v12709_v11 }
 0x68d   : > { %v3588_v51 = vadd.f32 %v8481_v34, %v3587_v37  ;;  %3438 = vadd.xlane.f32.xlu0 %v12543_v30  ;;  %v12752_v37 = vpop.f32.mrf.mxu1  ;;  %vm4849_vm8 = vweird.f32 %v12697_v44 }
 0x68e   : > { %v8491_v57 = vpop.eup %8490  ;;  %v12734_v36 = vpop.f32.mrf.mxu3 }
 0x68f   : > { %v3592_v2 = vsel %vm3591_vm12, %v8481_v34, %v3588_v51  ;;  %v4788_v30 = vmul.f32 %v8491_v57, %v12695_v49  ;;  %v3287_v61 = vpop.xlane.xlu2 %3286  ;;  %v8493_v35 = vpop.eup %8492  ;;  %v4824_v51 = vand.u32 2147483647, %v12700_v4  ;;  %vm4793_vm3 = vweird.f32 %v8491_v57 }
 0x690   : > { %v3597_v9 = vsel %vm3594_vm13, %v3596_v18, %v3592_v2  ;;  %v3324_v29 = vsub.f32 %v12004_v15, %v3287_v61  ;;  %v12746_v43 = vpop.xlane.xlu0 %4493  ;;  %v4816_v28 = vmul.f32 %v8493_v35, %v12700_v4  ;;  %v12761_v2 = vpop.f32.mrf.mxu2  ;;  %v4846_v61 = vmul.f32 %v12697_v44, %v4845_v38  ;;  %vm4794_vm6 = vmor %vm4792_vm14, %vm4793_vm3 }
 0x691   : > { %v12748_v34 = vpop.eup %8494  ;;  %v4028_v16 = vmul.f32 %v12529_v31, %v3597_v9  ;;  %v4789_v0 = vsub.f32 1.0, %v4788_v30  ;;  %vm4821_vm5 = vweird.f32 %v8493_v35  ;;  %v3663_v38 = vand.u32 2147483647, %v12709_v11  ;;  %vm12810_vm13 = vmor %vm4848_vm2, %vm4849_vm8 }
 0x692   : > { %v12755_v39 = vpop.xlane.xlu1 %4497  ;;  %v3655_v15 = vmul.f32 %v12748_v34, %v12709_v11  ;;  %v3382_v18 = vmul.f32 1.442695, %v3324_v29  ;;  %v4817_v30 = vsub.f32 1.0, %v4816_v28  ;;  %vm3660_vm7 = vweird.f32 %v12748_v34  ;;  %vm4822_vm10 = vmor %vm4820_vm1, %vm4821_vm5 }
 0x693   : > { %4060 = vst.msk [vmem:[%s12038_s23 + $0x120] sm:$0xff] %vm3008_vm0, %v4028_v16  ;;  %v4790_v31 = vmul.f32 %v8491_v57, %v4789_v0  ;;  %5264 = vmatmul.f32.gmra.mxu3 %v8489_v26  ;;  %vm12781_vm9 = vcmp.eq.f32.partialorder %v4824_v51, 8.507059e+37  ;;  %v4847_v49 = vadd.f32 %v12697_v44, %v4846_v61  ;;  %vm3661_vm11 = vmor %vm3659_vm4, %vm3660_vm7  ;;  %v3666_v4 = vor.u32 1.1754944e-38, %v3665_v41 }
 0x694   : > { %v3656_v9 = vsub.f32 1.0, %v3655_v15  ;;  %8496 = vpow2.f32 %v3382_v18  ;;  %6907 = vmax.xlane.f32.xlu1 %v12761_v2  ;;  %v4818_v29 = vmul.f32 %v8493_v35, %v4817_v30  ;;  %4639 = vadd.xlane.f32.xlu2 %v12532_v63  ;;  %vm3664_vm12 = vcmp.eq.f32.partialorder %v3663_v38, 8.507059e+37 }
 0x695   : > { %v4791_v5 = vadd.f32 %v8491_v57, %v4790_v31  ;;  %5699 = vmax.xlane.f32.xlu0 %v12503_v14  ;;  %v4827_v31 = vor.u32 1.1754944e-38, %v4826_v23 }
 0x696   : > { %v3657_v26 = vmul.f32 %v12748_v34, %v3656_v9  ;;  %v4819_v28 = vadd.f32 %v8493_v35, %v4818_v29  ;;  %v12795_v9 = vpop.f32.mrf.mxu0  ;;  %v4851_v29 = vsel %vm12810_vm13, %v12697_v44, %v4847_v49  ;;  %v15656_v44 = vand.u32 2147483647, %v12668_v46 }
 0x697   : > { %v12778_v16 = vpop.f32.mrf.mxu3  ;;  %v4795_v0 = vsel %vm4794_vm6, %v8491_v57, %v4791_v5  ;;  %v4490_v15 = vpop.xlane.xlu2 %4489 }
 0x698   : > { %v4800_v18 = vsel %vm12741_vm15, %v4799_v48, %v4795_v0  ;;  %v3658_v30 = vadd.f32 %v12748_v34, %v3657_v26  ;;  %v4527_v57 = vsub.f32 %v12000_v21, %v4490_v15  ;;  %v12793_v51 = vpop.xlane.xlu0 %3420  ;;  %v4823_v61 = vsel %vm4822_vm10, %v8493_v35, %v4819_v28  ;;  %v3965_v35 = vpop.f32.mrf.mxu1 }
 0x699   : > { %v5295_v5 = vmul.f32 %v12650_v6, %v4800_v18  ;;  %8498 = vrcp.f32 %v12793_v51  ;;  %v4828_v24 = vsel %vm12781_vm9, %v4827_v31, %v4823_v61  ;;  %v3326_v26 = vsub.f32 %v12060_v22, %v12631_v19  ;;  %v12837_v28 = vpop.f32.mrf.mxu2 }
 0x69a   : > { %v8497_v23 = vpop.eup %8496  ;;  %v3662_v21 = vsel %vm3661_vm11, %v12748_v34, %v3658_v30  ;;  %v4585_v48 = vmul.f32 1.442695, %v4527_v57  ;;  %8500 = vpow2.f32 %v12731_v27  ;;  %v5297_v11 = vmul.f32 %v12734_v36, %v4828_v24  ;;  %v12818_v34 = vpop.xlane.xlu1 %3296 }
 0x69b   : > { %5327 = vst.msk [vmem:[%s12038_s23 + $0x128] sm:$0xff] %vm3008_vm0, %v5295_v5  ;;  %v3667_v41 = vsel %vm3664_vm12, %v3666_v4, %v3662_v21  ;;  %4000 = vmatmul.f32.gmra.mxu1 %v8497_v23  ;;  %v4855_v27 = vor.u32 1.1754944e-38, %v4854_v54  ;;  %v4529_v36 = vsub.f32 %v12054_v12, %v12746_v43  ;;  %vm4853_vm14 = vcmp.eq.f32.partialorder %v15656_v44, 8.507059e+37 }
 0x69c   : > { %v4033_v38 = vmul.f32 %v3965_v35, %v3667_v41  ;;  %8502 = vpow2.f32 %v4585_v48  ;;  %3446 = vadd.xlane.f32.xlu1 %v8497_v23  ;;  %5329 = vst.msk [vmem:[%s12038_s23 + $0x168] sm:$0xff] %vm3008_vm0, %v5297_v11  ;;  %6901 = vmax.xlane.f32.xlu2 %v12495_v62  ;;  %v15657_v54 = vsub.f32 %v12025_v13, %v12596_v20  ;;  %v3386_v15 = vmul.f32 1.442695, %v3326_v26 }
 0x69d   : > { %4643 = vadd.xlane.f32.xlu0 %v12672_v59  ;;  %v4856_v22 = vsel %vm4853_vm14, %v4855_v27, %v4851_v29  ;;  %v4589_v18 = vmul.f32 1.442695, %v4529_v36  ;;  %v3651_v13 = vand.u32 2147483648, %v12793_v51  ;;  %v3649_v5 = vand.u32 2147483647, %v12793_v51 }
 0x69e   : > { %4065 = vst.msk [vmem:[%s12038_s23 + $0x1c0] sm:$0xff] %vm3008_vm0, %v4033_v38  ;;  %v4587_v63 = vmul.f32 1.442695, %v15657_v54  ;;  %v12851_v57 = vpop.f32.mrf.mxu0  ;;  %vm3645_vm1 = vweird.f32 %v12793_v51 }
 0x69f   : > { %v5229_v19 = vpop.f32.mrf.mxu3  ;;  %v8499_v0 = vpop.eup %8498  ;;  %v3652_v24 = vor.u32 1.1754944e-38, %v3651_v13  ;;  %vm3650_vm3 = vcmp.eq.f32.partialorder %v3649_v5, 8.507059e+37 }
 0x6a0   : > { %v5299_v12 = vmul.f32 %v5229_v19, %v4856_v22  ;;  %v3419_v43 = vpop.xlane.xlu2 %3418  ;;  %v3641_v59 = vmul.f32 %v8499_v0, %v12793_v51  ;;  %v12843_v46 = vpop.xlane.xlu0 %3294  ;;  %vm3646_vm15 = vweird.f32 %v8499_v0 }
 0x6a1   : > { %8504 = vrcp.f32 %v3419_v43  ;;  %v12845_v49 = vpop.eup %8500  ;;  %vm3647_vm2 = vmor %vm3645_vm1, %vm3646_vm15  ;;  %v12870_v35 = vpop.f32.mrf.mxu2  ;;  %v3637_v38 = vand.u32 2147483648, %v3419_v43  ;;  %v3635_v44 = vand.u32 2147483647, %v3419_v43  ;;  %vm3631_vm5 = vweird.f32 %v3419_v43 }
 0x6a2   : > { %5331 = vst.msk [vmem:[%s12038_s23 + $0x1a8] sm:$0xff] %vm3008_vm0, %v5299_v12  ;;  %v12849_v31 = vpop.eup %8502  ;;  %v3642_v30 = vsub.f32 1.0, %v3641_v59  ;;  %8506 = vpow2.f32 %v4587_v63  ;;  %v12858_v61 = vpop.xlane.xlu1 %4629  ;;  %v3328_v5 = vsub.f32 %v12106_v3, %v12843_v46 }
 0x6a3   : > { %4003 = vmatmul.f32.gmra.mxu1 %v12845_v49  ;;  %5267 = vmatmul.f32.gmra.mxu3 %v12849_v31  ;;  %8508 = vpow2.f32 %v3386_v15  ;;  %vm3636_vm7 = vcmp.eq.f32.partialorder %v3635_v44, 8.507059e+37 }
 0x6a4   : > { %v3643_v20 = vmul.f32 %v8499_v0, %v3642_v30  ;;  %5707 = vmax.xlane.f32.xlu1 %v12851_v57  ;;  %8510 = vpow2.f32 %v4589_v18  ;;  %6903 = vmax.xlane.f32.xlu2 %v12557_v17 }
 0x6a5   : > { %3444 = vadd.xlane.f32.xlu0 %v12702_v56 }
 0x6a6   : > { %v3644_v23 = vadd.f32 %v8499_v0, %v3643_v20  ;;  %v12884_v54 = vpop.f32.mrf.mxu0 }
 0x6a7   : > { %v8505_v4 = vpop.eup %8504 }
 0x6a8   : > { %v3627_v21 = vmul.f32 %v8505_v4, %v3419_v43  ;;  %v12863_v48 = vpop.xlane.xlu2 %4621  ;;  %v3648_v6 = vsel %vm3647_vm2, %v8499_v0, %v3644_v23  ;;  %v12866_v11 = vpop.xlane.xlu0 %4625  ;;  %vm3632_vm4 = vweird.f32 %v8505_v4  ;;  %v3638_v0 = vor.u32 1.1754944e-38, %v3637_v38 }
 0x6a9   : > { %8512 = vrcp.f32 %v12863_v48  ;;  %v12868_v41 = vpop.eup %8506  ;;  %v3653_v56 = vsel %vm3650_vm3, %v3652_v24, %v3648_v6  ;;  %vm3633_vm6 = vmor %vm3631_vm5, %vm3632_vm4  ;;  %v12895_v24 = vpop.f32.mrf.mxu2  ;;  %vm4834_vm9 = vweird.f32 %v12863_v48  ;;  %vm4862_vm13 = vweird.f32 %v12866_v11 }
 0x6aa   : > { %v3628_v29 = vsub.f32 1.0, %v3627_v21  ;;  %v12872_v26 = vpop.eup %8508  ;;  %v4032_v51 = vmul.f32 %v12752_v37, %v3653_v56  ;;  %8514 = vrcp.f32 %v12866_v11  ;;  %v4866_v56 = vand.u32 2147483647, %v12866_v11 }
 0x6ab   : > { %v8511_v27 = vpop.eup %8510  ;;  %4006 = vmatmul.f32.gmra.mxu1 %v12872_v26  ;;  %5270 = vmatmul.f32.gmra.mxu3 %v12868_v41 }
 0x6ac   : > { %v3629_v36 = vmul.f32 %v8505_v4, %v3628_v29  ;;  %4064 = vst.msk [vmem:[%s12038_s23 + $0x1a0] sm:$0xff] %vm3008_vm0, %v4032_v51  ;;  %4653 = vadd.xlane.f32.xlu1 %v8511_v27  ;;  %3442 = vadd.xlane.f32.xlu2 %v12666_v32  ;;  %v3390_v51 = vmul.f32 1.442695, %v3328_v5  ;;  %vm4867_vm15 = vcmp.eq.f32.partialorder %v4866_v56, 8.507059e+37 }
 0x6ad   : > { %5705 = vmax.xlane.f32.xlu0 %v12795_v9  ;;  %v12882_v37 = vpop.xlane.xlu1 %3428 }
 0x6ae   : > { %v3630_v22 = vadd.f32 %v8505_v4, %v3629_v36 }
 0x6af   : > { %v8513_v19 = vpop.eup %8512 }
 0x6b0   : > { %v3634_v63 = vsel %vm3633_vm6, %v8505_v4, %v3630_v22  ;;  %v4830_v12 = vmul.f32 %v8513_v19, %v12863_v48  ;;  %v3293_v15 = vpop.xlane.xlu2 %3292  ;;  %v8515_v59 = vpop.eup %8514  ;;  %v4840_v4 = vand.u32 2147483648, %v12863_v48  ;;  %vm4835_vm8 = vweird.f32 %v8513_v19 }
 0x6b1   : > { %v3639_v18 = vsel %vm3636_vm7, %v3638_v0, %v3634_v63  ;;  %v3327_v43 = vsub.f32 %v12085_v33, %v3293_v15  ;;  %v12888_v32 = vpop.xlane.xlu0 %4499  ;;  %v4858_v20 = vmul.f32 %v8515_v59, %v12866_v11  ;;  %v4838_v33 = vand.u32 2147483647, %v12863_v48  ;;  %vm4836_vm11 = vmor %vm4834_vm9, %vm4835_vm8 }
 0x6b2   : > { %v4031_v30 = vmul.f32 %v12693_v8, %v3639_v18  ;;  %v4831_v13 = vsub.f32 1.0, %v4830_v12  ;;  %v4868_v8 = vand.u32 2147483648, %v12866_v11  ;;  %vm4863_vm10 = vweird.f32 %v8515_v59  ;;  %v5232_v18 = vpop.f32.mrf.mxu3 }
 0x6b3   : > { %v3388_v23 = vmul.f32 1.442695, %v3327_v43  ;;  %v4859_v6 = vsub.f32 1.0, %v4858_v20  ;;  %5273 = vmatmul.f32.gmra.mxu3 %v8511_v27  ;;  %v4841_v48 = vor.u32 1.1754944e-38, %v4840_v4  ;;  %vm4839_vm12 = vcmp.eq.f32.partialorder %v4838_v33, 8.507059e+37  ;;  %vm4864_vm14 = vmor %vm4862_vm13, %vm4863_vm10  ;;  %v15659_v20 = vld [vmem:[#allocation140_spill] sm:$0xff] }
 0x6b4   : > { %4063 = vst.msk [vmem:[%s12038_s23 + $0x180] sm:$0xff] %vm3008_vm0, %v4031_v30  ;;  %v4832_v21 = vmul.f32 %v8513_v19, %v4831_v13  ;;  %6913 = vmax.xlane.f32.xlu1 %v12895_v24  ;;  %5703 = vmax.xlane.f32.xlu2 %v12736_v40  ;;  %v4869_v22 = vor.u32 1.1754944e-38, %v4868_v8  ;;  %v15658_v30 = vld [vmem:[#allocation139_spill] sm:$0xff]  ;;  %v3329_v5 = vsub.f32 %v15659_v20, %v12818_v34 }
 0x6b5   : > { %8516 = vpow2.f32 %v3388_v23  ;;  %v4860_v46 = vmul.f32 %v8515_v59, %v4859_v6  ;;  %4649 = vadd.xlane.f32.xlu0 %v12849_v31  ;;  %v12906_v29 = vpop.xlane.xlu1 %5689  ;;  %v12913_v31 = vpop.f32.mrf.mxu0  ;;  %v4531_v13 = vsub.f32 %v15658_v30, %v12755_v39  ;;  %v15660_v6 = vld [vmem:[#allocation127_spill] sm:$0xff] }
 0x6b6   : > { %v4833_v3 = vadd.f32 %v8513_v19, %v4832_v21  ;;  %8518 = vpow2.f32 %v3390_v51  ;;  %v3392_v4 = vmul.f32 1.442695, %v3329_v5  ;;  %v4532_v8 = vsub.f32 %v15660_v6, %v12888_v32 }
 0x6b7   : > { %v4861_v27 = vadd.f32 %v8515_v59, %v4860_v46 }
 0x6b8   : > { %v4837_v38 = vsel %vm4836_vm11, %v8513_v19, %v4833_v3  ;;  %v4496_v36 = vpop.xlane.xlu2 %4495  ;;  %v4595_v46 = vmul.f32 1.442695, %v4532_v8 }
 0x6b9   : > { %v4842_v44 = vsel %vm4839_vm12, %v4841_v48, %v4837_v38  ;;  %v4530_v0 = vsub.f32 %v12081_v7, %v4496_v36  ;;  %v12911_v63 = vpop.xlane.xlu0 %3426  ;;  %v4865_v15 = vsel %vm4864_vm14, %v8515_v59, %v4861_v27  ;;  %v4593_v59 = vmul.f32 1.442695, %v4531_v13 }
 0x6ba   : > { %v5298_v12 = vmul.f32 %v12778_v16, %v4842_v44  ;;  %v4870_v43 = vsel %vm4867_vm15, %v4869_v22, %v4865_v15  ;;  %vm3687_vm10 = vweird.f32 %v12911_v63  ;;  %vm4890_vm14 = vweird.f32 %v12858_v61 }
 0x6bb   : > { %v8517_v19 = vpop.eup %8516  ;;  %v4591_v11 = vmul.f32 1.442695, %v4530_v0  ;;  %v5300_v7 = vmul.f32 %v5232_v18, %v4870_v43 }
 0x6bc   : > { %5330 = vst.msk [vmem:[%s12038_s23 + $0x188] sm:$0xff] %vm3008_vm0, %v5298_v12  ;;  %4009 = vmatmul.f32.gmra.mxu1 %v8517_v19  ;;  %3452 = vadd.xlane.f32.xlu1 %v8517_v19  ;;  %v12928_v21 = vpop.eup %8518 }
 0x6bd   : > { %8520 = vpow2.f32 %v4591_v11  ;;  %5332 = vst.msk [vmem:[%s12038_s23 + $0x1c8] sm:$0xff] %vm3008_vm0, %v5300_v7  ;;  %4645 = vadd.xlane.f32.xlu2 %v12690_v52  ;;  %6909 = vmax.xlane.f32.xlu0 %v12837_v28  ;;  %v12926_v16 = vpop.xlane.xlu1 %6893  ;;  %v12932_v34 = vpop.f32.mrf.mxu0 }
 0x6c0   : > { %v3425_v39 = vpop.xlane.xlu2 %3424 }
 0x6c1   : > { %v5688_v23 = vpop.xlane.xlu0 %5687  ;;  %8522 = vrcp.f32 %v3425_v39  ;;  %v3679_v0 = vand.u32 2147483648, %v3425_v39  ;;  %v3677_v15 = vand.u32 2147483647, %v3425_v39  ;;  %vm3673_vm2 = vweird.f32 %v3425_v39 }
 0x6c2   : > { %8524 = vpow2.f32 %v4593_v59  ;;  %v5751_v52 = vsub.f32 %v12157_v50, %v5688_v23  ;;  %v12951_v50 = vpop.f32.mrf.mxu2  ;;  %v3968_v59 = vpop.f32.mrf.mxu1 }
 0x6c3   : > { %v12930_v33 = vpop.eup %8520  ;;  %8526 = vpow2.f32 %v3392_v4  ;;  %vm3678_vm4 = vcmp.eq.f32.partialorder %v3677_v15, 8.507059e+37 }
 0x6c4   : > { %4012 = vmatmul.f32.gmra.mxu1 %v12928_v21  ;;  %5276 = vmatmul.f32.gmra.mxu3 %v12930_v33  ;;  %v5783_v48 = vmul.f32 1.442695, %v5751_v52 }
 0x6c5   : > { %5713 = vmax.xlane.f32.xlu1 %v12932_v34  ;;  %6905 = vmax.xlane.f32.xlu2 %v12704_v60  ;;  %v12944_v32 = vpop.xlane.xlu1 %4635  ;;  %v12962_v43 = vpop.f32.mrf.mxu0 }
 0x6c6   : > { %3450 = vadd.xlane.f32.xlu0 %v12872_v26  ;;  %v15661_v26 = vld [vmem:[#allocation141_spill] sm:$0xff] }
 0x6c7   : > { %v8523_v3 = vpop.eup %8522  ;;  %v5752_v22 = vsub.f32 %v15661_v26, %v12906_v29  ;;  %v3680_v29 = vor.u32 1.1754944e-38, %v3679_v0 }
 0x6c8   : > { %v12942_v56 = vpop.xlane.xlu2 %4627  ;;  %v3669_v51 = vmul.f32 %v8523_v3, %v3425_v39  ;;  %v12949_v27 = vpop.eup %8524  ;;  %vm3674_vm1 = vweird.f32 %v8523_v3 }
 0x6c9   : > { %8528 = vrcp.f32 %v12942_v56  ;;  %v12947_v38 = vpop.xlane.xlu0 %4631  ;;  %v12953_v36 = vpop.eup %8526  ;;  %vm3675_vm3 = vmor %vm3673_vm2, %vm3674_vm1  ;;  %v5785_v13 = vmul.f32 1.442695, %v5752_v22  ;;  %v4882_v8 = vand.u32 2147483648, %v12942_v56  ;;  %vm4876_vm6 = vweird.f32 %v12942_v56 }
 0x6ca   : > { %v3670_v44 = vsub.f32 1.0, %v3669_v51  ;;  %8530 = vpow2.f32 %v4595_v46  ;;  %v12971_v46 = vpop.f32.mrf.mxu2  ;;  %v5235_v22 = vpop.f32.mrf.mxu3 }
 0x6cb   : > { %8532 = vpow2.f32 %v5783_v48  ;;  %v4883_v26 = vor.u32 1.1754944e-38, %v4882_v8 }
 0x6cc   : > { %4015 = vmatmul.f32.gmra.mxu1 %v12953_v36  ;;  %5279 = vmatmul.f32.gmra.mxu3 %v12949_v27  ;;  %v3671_v12 = vmul.f32 %v8523_v3, %v3670_v44  ;;  %8534 = vpow2.f32 %v5785_v13 }
 0x6cd   : > { %6915 = vmax.xlane.f32.xlu1 %v12951_v50  ;;  %3448 = vadd.xlane.f32.xlu2 %v12845_v49 }
 0x6ce   : > { %5711 = vmax.xlane.f32.xlu0 %v12913_v31  ;;  %v3672_v18 = vadd.f32 %v8523_v3, %v3671_v12  ;;  %v12969_v52 = vpop.xlane.xlu1 %3434 }
 0x6cf   : > { %v8529_v19 = vpop.eup %8528 }
 0x6d0   : > { %v4872_v11 = vmul.f32 %v8529_v19, %v12942_v56  ;;  %v6890_v30 = vpop.xlane.xlu2 %6889  ;;  %v3676_v7 = vsel %vm3675_vm3, %v8523_v3, %v3672_v18  ;;  %v8531_v5 = vpop.eup %8530  ;;  %vm4877_vm5 = vweird.f32 %v8529_v19  ;;  %v4880_v3 = vand.u32 2147483647, %v12942_v56 }
 0x6d1   : > { %v6892_v20 = vpop.xlane.xlu0 %6891  ;;  %v3681_v49 = vsel %vm3678_vm4, %v3680_v29, %v3676_v7  ;;  %v6953_v23 = vsub.f32 %v12149_v53, %v6890_v30  ;;  %v12966_v6 = vpop.eup %8532  ;;  %vm4878_vm7 = vmor %vm4876_vm6, %vm4877_vm5  ;;  %vm3701_vm3 = vweird.f32 %v12882_v37 }
 0x6d2   : > { %v4873_v4 = vsub.f32 1.0, %v4872_v11  ;;  %v4034_v39 = vmul.f32 %v3968_v59, %v3681_v49  ;;  %v6954_v44 = vsub.f32 %v12178_v1, %v6892_v20  ;;  %vm4881_vm8 = vcmp.eq.f32.partialorder %v4880_v3, 8.507059e+37  ;;  %v12986_v29 = vpop.f32.mrf.mxu0  ;;  %v12988_v1 = vpop.eup %8534 }
 0x6d3   : > { %v6985_v48 = vmul.f32 1.442695, %v6953_v23  ;;  %v13021_v3 = vpop.f32.mrf.mxu3 }
 0x6d4   : > { %v4874_v51 = vmul.f32 %v8529_v19, %v4873_v4  ;;  %5282 = vmatmul.f32.gmra.mxu3 %v8531_v5  ;;  %6375 = vmatmul.f32.vlgmr.msrb.gmra.mxu1 %v12966_v6  ;;  %4066 = vst.msk [vmem:[%s12038_s23 + $0x1e0] sm:$0xff] %vm3008_vm0, %v4034_v39  ;;  %v6987_v11 = vmul.f32 1.442695, %v6954_v44 }
 0x6d5   : > { %6917 = vmax.xlane.f32.xlu1 %v12971_v46  ;;  %8536 = vpow2.f32 %v6985_v48  ;;  %5709 = vmax.xlane.f32.xlu2 %v12884_v54 }
 0x6d6   : > { %v4875_v53 = vadd.f32 %v8529_v19, %v4874_v51  ;;  %4655 = vadd.xlane.f32.xlu0 %v12930_v33  ;;  %8538 = vrcp.f32 %v12911_v63  ;;  %v15662_v33 = vld [vmem:[#allocation124_spill] sm:$0xff] }
 0x6d7   : > { %v5696_v13 = vpop.xlane.xlu1 %5695  ;;  %8540 = vpow2.f32 %v6987_v11 }
 0x6d8   : > { %v4879_v0 = vsel %vm4878_vm7, %v8529_v19, %v4875_v53  ;;  %v12982_v15 = vpop.xlane.xlu2 %3430  ;;  %v6955_v19 = vsub.f32 %v15662_v33, %v12926_v16  ;;  %v13008_v16 = vpop.f32.mrf.mxu1 }
 0x6d9   : > { %v4884_v12 = vsel %vm4881_vm8, %v4883_v26, %v4879_v0  ;;  %v12984_v18 = vpop.xlane.xlu0 %3432  ;;  %v13030_v0 = vpop.f32.mrf.mxu2  ;;  %vm3715_vm8 = vweird.f32 %v12982_v15 }
 0x6da   : > { %v5301_v56 = vmul.f32 %v5235_v22, %v4884_v12  ;;  %v6989_v7 = vmul.f32 1.442695, %v6955_v19  ;;  %v13006_v39 = vpop.f32.mrf.mxu0  ;;  %v15664_v12 = vld [vmem:[#allocation143_spill] sm:$0xff] }
 0x6db   : > { %v12990_v30 = vpop.eup %8536 }
 0x6dc   : > { %5333 = vst.msk [vmem:[%s12038_s23 + $0x1e8] sm:$0xff] %vm3008_vm0, %v5301_v56  ;;  %6378 = vmatmul.f32.gmra.mxu1 %v12988_v1  ;;  %7641 = vmatmul.f32.vlgmr.msrb.gmra.mxu3 %v12990_v30  ;;  %v13002_v4 = vpop.eup %8538  ;;  %8542 = vpow2.f32 %v6989_v7  ;;  %v5755_v56 = vsub.f32 %v15664_v12, %v5696_v13  ;;  %v13042_v13 = vpop.f32.mrf.mxu3 }
 0x6dd   : > { %4659 = vadd.xlane.f32.xlu1 %v8531_v5  ;;  %4651 = vadd.xlane.f32.xlu2 %v12868_v41  ;;  %v13004_v23 = vpop.eup %8540  ;;  %vm3688_vm9 = vweird.f32 %v13002_v4 }
 0x6de   : > { %3456 = vadd.xlane.f32.xlu0 %v12953_v36  ;;  %v5791_v19 = vmul.f32 1.442695, %v5755_v56  ;;  %vm3689_vm11 = vmor %vm3687_vm10, %vm3688_vm9  ;;  %vm4904_vm9 = vweird.f32 %v12947_v38 }
 0x6df   : > { %v13017_v36 = vpop.xlane.xlu1 %4641 }
 0x6e0   : > { %v5692_v20 = vpop.xlane.xlu2 %5691  ;;  %15663 = vst [vmem:[#allocation144_spill] sm:$0xff] %v13017_v36  ;;  %v13028_v22 = vpop.f32.mrf.mxu1 }
 0x6e1   : > { %v5694_v59 = vpop.xlane.xlu0 %5693  ;;  %v5753_v49 = vsub.f32 %v12228_v55, %v5692_v20  ;;  %v3683_v55 = vmul.f32 %v13002_v4, %v12911_v63 }
 0x6e2   : > { %v5754_v41 = vsub.f32 %v12300_v47, %v5694_v59  ;;  %v13023_v53 = vpop.eup %8542 }
 0x6e3   : > { %v5787_v8 = vmul.f32 1.442695, %v5753_v49  ;;  %v3684_v44 = vsub.f32 1.0, %v3683_v55 }
 0x6e4   : > { %7644 = vmatmul.f32.gmra.mxu3 %v13004_v23  ;;  %v5789_v48 = vmul.f32 1.442695, %v5754_v41 }
 0x6e5   : > { %5719 = vmax.xlane.f32.xlu1 %v13006_v39  ;;  %8544 = vpow2.f32 %v5787_v8  ;;  %6911 = vmax.xlane.f32.xlu2 %v12870_v35  ;;  %v3693_v8 = vand.u32 2147483648, %v12911_v63 }
 0x6e6   : > { %5717 = vmax.xlane.f32.xlu0 %v12986_v29  ;;  %8546 = vpow2.f32 %v5789_v48 }
 0x6e8   : > { %v13019_v5 = vpop.xlane.xlu2 %4633 }
 0x6e9   : > { %v6896_v51 = vpop.xlane.xlu0 %6895 }
 0x6ea   : > { %v6956_v47 = vsub.f32 %v12288_v45, %v6896_v51  ;;  %v3685_v45 = vmul.f32 %v13002_v4, %v3684_v44  ;;  %v13056_v51 = vpop.f32.mrf.mxu1  ;;  %v3694_v44 = vor.u32 1.1754944e-38, %v3693_v8 }
 0x6eb   : > { %v13026_v26 = vpop.eup %8544 }
 0x6ec   : > { %v6991_v11 = vmul.f32 1.442695, %v6956_v47  ;;  %6381 = vmatmul.f32.gmra.mxu1 %v13026_v26  ;;  %7647 = vmatmul.f32.gmra.mxu3 %v13023_v53  ;;  %v3686_v49 = vadd.f32 %v13002_v4, %v3685_v45 }
 0x6ed   : > { %3454 = vadd.xlane.f32.xlu2 %v12928_v21  ;;  %v13047_v21 = vpop.eup %8546 }
 0x6ee   : > { %6919 = vmax.xlane.f32.xlu0 %v13030_v0  ;;  %8548 = vpow2.f32 %v6991_v11  ;;  %v13038_v33 = vpop.xlane.xlu1 %3440  ;;  %v3690_v48 = vsel %vm3689_vm11, %v13002_v4, %v3686_v49 }
 0x6ef   : > { %15665 = vst [vmem:[#allocation89_spill] sm:$0xff] %v13038_v33  ;;  %8550 = vrcp.f32 %v12858_v61 }
 0x6f0   : > { %v6898_v7 = vpop.xlane.xlu2 %6897  ;;  %8552 = vpow2.f32 %v5791_v19 }
 0x6f1   : > { %v13040_v20 = vpop.xlane.xlu0 %4637  ;;  %v6957_v59 = vsub.f32 %v12357_v10, %v6898_v7  ;;  %v3691_v10 = vand.u32 2147483647, %v12911_v63 }
 0x6f2   : > { %15666 = vst [vmem:[#allocation146_spill] sm:$0xff] %v13040_v20 }
 0x6f3   : > { %v6993_v41 = vmul.f32 1.442695, %v6957_v59  ;;  %vm3692_vm12 = vcmp.eq.f32.partialorder %v3691_v10, 8.507059e+37  ;;  %v13071_v59 = vpop.f32.mrf.mxu3 }
 0x6f4   : > { %v13051_v55 = vpop.eup %8548  ;;  %6384 = vmatmul.f32.gmra.mxu1 %v13047_v21  ;;  %v3695_v45 = vsel %vm3692_vm12, %v3694_v44, %v3690_v48 }
 0x6f5   : > { %8554 = vpow2.f32 %v6993_v41  ;;  %7650 = vmatmul.f32.gmra.mxu3 %v13051_v55  ;;  %5715 = vmax.xlane.f32.xlu2 %v12962_v43  ;;  %v8551_v63 = vpop.eup %8550  ;;  %v4035_v49 = vmul.f32 %v13008_v16, %v3695_v45  ;;  %v13090_v45 = vpop.f32.mrf.mxu0 }
 0x6f6   : > { %5847 = vadd.xlane.f32.xlu0 %v12966_v6  ;;  %v13067_v19 = vpop.eup %8552  ;;  %v4886_v4 = vmul.f32 %v8551_v63, %v12858_v61  ;;  %8556 = vrcp.f32 %v12882_v37  ;;  %vm4891_vm13 = vweird.f32 %v8551_v63 }
 0x6f7   : > { %v13062_v47 = vpop.xlane.xlu1 %5701  ;;  %15667 = vst [vmem:[#allocation147_spill] sm:$0xff] %v13067_v19  ;;  %vm4892_vm15 = vmor %vm4890_vm14, %vm4891_vm13 }
 0x6f8   : > { %v13064_v12 = vpop.xlane.xlu2 %3436  ;;  %v4887_v41 = vsub.f32 1.0, %v4886_v4 }
 0x6f9   : > { %v6900_v56 = vpop.xlane.xlu0 %6899 }
 0x6fa   : > { %v6958_v11 = vsub.f32 %v12421_v42, %v6900_v56  ;;  %v13081_v42 = vpop.f32.mrf.mxu1 }
 0x6fb   : > { %v13069_v7 = vpop.eup %8554 }
 0x6fc   : > { %15668 = vst [vmem:[#allocation149_spill] sm:$0xff] %v13069_v7  ;;  %v6995_v6 = vmul.f32 1.442695, %v6958_v11  ;;  %6387 = vmatmul.f32.gmra.mxu1 %v13067_v19  ;;  %v8557_v16 = vpop.eup %8556 }
 0x6fd   : > { %7653 = vmatmul.f32.gmra.mxu3 %v13069_v7  ;;  %4657 = vadd.xlane.f32.xlu2 %v12949_v27  ;;  %v4888_v27 = vmul.f32 %v8551_v63, %v4887_v41  ;;  %v4896_v41 = vand.u32 2147483648, %v12858_v61  ;;  %vm3702_vm2 = vweird.f32 %v8557_v16 }
 0x6fe   : > { %8558 = vpow2.f32 %v6995_v6  ;;  %7049 = vadd.xlane.f32.xlu0 %v12990_v30  ;;  %4083 = vrot.lane.b32.xlu1 %v4035_v49, %s9215_s18  ;;  %v3697_v30 = vmul.f32 %v8557_v16, %v12882_v37  ;;  %v13093_v6 = vpop.f32.mrf.mxu3  ;;  %vm3703_vm4 = vmor %vm3701_vm3, %vm3702_vm2  ;;  %vm4131_vm3 = vcmask 1048064  }
 0x6ff   : > { %v13083_v8 = vpop.xlane.xlu1 %4647 }
 0x700   : > { %15669 = vst [vmem:[#allocation150_spill] sm:$0xff] %v13083_v8  ;;  %v5698_v48 = vpop.xlane.xlu2 %5697  ;;  %v3698_v8 = vsub.f32 1.0, %v3697_v30  ;;  %v5758_v30 = vsub.f32 %v12573_v58, %v13062_v47  ;;  %v3705_v58 = vand.u32 2147483647, %v12882_v37 }
 0x701   : > { %v13085_v10 = vpop.xlane.xlu0 %3438  ;;  %v5756_v44 = vsub.f32 %v12440_v25, %v5698_v48  ;;  %v4889_v25 = vadd.f32 %v8551_v63, %v4888_v27  ;;  %v4897_v27 = vor.u32 1.1754944e-38, %v4896_v41 }
 0x702   : > { %15670 = vst [vmem:[#allocation152_spill] sm:$0xff] %v13085_v10  ;;  %v13097_v4 = vpop.f32.mrf.mxu1  ;;  %v3699_v19 = vmul.f32 %v8557_v16, %v3698_v8  ;;  %v5797_v41 = vmul.f32 1.442695, %v5758_v30  ;;  %vm3706_vm5 = vcmp.eq.f32.partialorder %v3705_v58, 8.507059e+37 }
 0x703   : > { %v5793_v11 = vmul.f32 1.442695, %v5756_v44  ;;  %v4893_v36 = vsel %vm4892_vm15, %v8551_v63, %v4889_v25  ;;  %v3707_v25 = vand.u32 2147483648, %v12882_v37  ;;  %vm4918_vm15 = vweird.f32 %v13019_v5 }
 0x704   : > { %v13088_v56 = vpop.eup %8558  ;;  %v3700_v63 = vadd.f32 %v8557_v16, %v3699_v19 }
 0x705   : > { %15671 = vst [vmem:[#allocation153_spill] sm:$0xff] %v13088_v56  ;;  %8560 = vpow2.f32 %v5793_v11  ;;  %7656 = vmatmul.f32.gmra.mxu3 %v13088_v56  ;;  %5721 = vmax.xlane.f32.xlu2 %v13090_v45  ;;  %v4894_v11 = vand.u32 2147483647, %v12858_v61  ;;  %v3708_v19 = vor.u32 1.1754944e-38, %v3707_v25 }
 0x706   : > { %v13110_v20 = vpop.f32.mrf.mxu3  ;;  %v3704_v47 = vsel %vm3703_vm4, %v8557_v16, %v3700_v63 }
 0x707   : > { %v13099_v49 = vpop.xlane.xlu1 %6907  ;;  %vm4895_vm1 = vcmp.eq.f32.partialorder %v4894_v11, 8.507059e+37 }
 0x708   : > { %v13101_v48 = vpop.xlane.xlu2 %4639  ;;  %v4898_v56 = vsel %vm4895_vm1, %v4897_v27, %v4893_v36 }
 0x709   : > { %15672 = vst [vmem:[#allocation154_spill] sm:$0xff] %v13101_v48  ;;  %v5700_v44 = vpop.xlane.xlu0 %5699 }
 0x70a   : > { %v5757_v10 = vsub.f32 %v12503_v14, %v5700_v44  ;;  %v5302_v14 = vmul.f32 %v13021_v3, %v4898_v56  ;;  %v3709_v56 = vsel %vm3706_vm5, %v3708_v19, %v3704_v47 }
 0x70b   : > { %v13107_v33 = vpop.eup %8560 }
 0x70c   : > { %v5795_v7 = vmul.f32 1.442695, %v5757_v10  ;;  %6390 = vmatmul.f32.gmra.mxu1 %v13107_v33  ;;  %v13119_v10 = vpop.f32.mrf.mxu1 }
 0x70e   : > { %8562 = vpow2.f32 %v5795_v7 }
 0x70f   : > { %v13114_v61 = vpop.xlane.xlu1 %3446 }
 0x710   : > { %15673 = vst [vmem:[#allocation155_spill] sm:$0xff] %v13114_v61  ;;  %v6902_v44 = vpop.xlane.xlu2 %6901 }
 0x711   : > { %v13117_v48 = vpop.xlane.xlu0 %4643  ;;  %v6959_v8 = vsub.f32 %v12495_v62, %v6902_v44  ;;  %v13129_v62 = vpop.f32.mrf.mxu3 }
 0x712   : > { %15674 = vst [vmem:[#allocation156_spill] sm:$0xff] %v13117_v48  ;;  %5350 = vrot.lane.b32.xlu0 %v5302_v14, %s9215_s18  ;;  %v4036_v14 = vmul.f32 %v13028_v22, %v3709_v56 }
 0x713   : > { %v6997_v36 = vmul.f32 1.442695, %v6959_v8 }
 0x714   : > { %v13126_v3 = vpop.eup %8562  ;;  %v13137_v16 = vpop.f32.mrf.mxu1 }
 0x715   : > { %8564 = vpow2.f32 %v6997_v36  ;;  %6393 = vmatmul.f32.gmra.mxu1 %v13126_v3  ;;  %15676 = vst [vmem:[#allocation158_spill] sm:$0xff] %v13137_v16  ;;  %v13155_v36 = vpop.f32.mrf.mxu2 }
 0x716   : > { %8566 = vpow2.f32 %v5797_v41 }
 0x717   : > { %v5708_v7 = vpop.xlane.xlu1 %5707 }
 0x718   : > { %v6904_v11 = vpop.xlane.xlu2 %6903 }
 0x719   : > { %v13131_v27 = vpop.xlane.xlu0 %3444  ;;  %v6960_v37 = vsub.f32 %v12557_v17, %v6904_v11  ;;  %v13148_v41 = vpop.f32.mrf.mxu3 }
 0x71a   : > { %15675 = vst [vmem:[#allocation157_spill] sm:$0xff] %v13131_v27 }
 0x71b   : > { %v13134_v30 = vpop.eup %8564  ;;  %v6999_v44 = vmul.f32 1.442695, %v6960_v37 }
 0x71c   : > { %v13139_v63 = vpop.eup %8566  ;;  %7659 = vmatmul.f32.gmra.mxu3 %v13134_v30  ;;  %v13152_v58 = vpop.f32.mrf.mxu1 }
 0x71d   : > { %15677 = vst [vmem:[#allocation159_spill] sm:$0xff] %v13139_v63  ;;  %8568 = vpow2.f32 %v6999_v44  ;;  %6396 = vmatmul.f32.gmra.mxu1 %v13139_v63  ;;  %4085 = vrot.lane.b32.xlu2 %v4036_v14, %s9215_s18 }
 0x71f   : > { %v13146_v17 = vpop.xlane.xlu1 %4653 }
 0x720   : > { %v13144_v8 = vpop.xlane.xlu2 %3442  ;;  %15678 = vst [vmem:[#allocation160_spill] sm:$0xff] %v13146_v17 }
 0x721   : > { %v5706_v25 = vpop.xlane.xlu0 %5705  ;;  %v13161_v11 = vpop.f32.mrf.mxu3 }
 0x722   : > { %15681 = vst [vmem:[#allocation163_spill] sm:$0xff] %v13161_v11  ;;  %v5760_v27 = vsub.f32 %v12795_v9, %v5706_v25 }
 0x723   : > { %v13150_v22 = vpop.eup %8568 }
 0x724   : > { %15679 = vst [vmem:[#allocation161_spill] sm:$0xff] %v13150_v22  ;;  %7662 = vmatmul.f32.gmra.mxu3 %v13150_v22  ;;  %v13165_v44 = vpop.f32.mrf.mxu1 }
 0x725   : > { %15682 = vst [vmem:[#allocation164_spill] sm:$0xff] %v13165_v44 }
 0x727   : > { %v13163_v37 = vpop.xlane.xlu1 %6913 }
 0x728   : > { %6921 = vmax.xlane.f32.xlu1 %v13155_v36  ;;  %v5704_v47 = vpop.xlane.xlu2 %5703 }
 0x729   : > { %v13158_v19 = vpop.xlane.xlu0 %4649  ;;  %v5759_v56 = vsub.f32 %v12736_v40, %v5704_v47  ;;  %v5801_v40 = vmul.f32 1.442695, %v5760_v27  ;;  %v13175_v11 = vpop.f32.mrf.mxu3 }
 0x72a   : > { %15680 = vst [vmem:[#allocation162_spill] sm:$0xff] %v13158_v19 }
 0x72b   : > { %v5799_v14 = vmul.f32 1.442695, %v5759_v56  ;;  %15684 = vst [vmem:[#allocation166_spill] sm:$0xff] %v13175_v11  ;;  %v5761_v56 = vsub.f32 %v12851_v57, %v5708_v7 }
 0x72d   : > { %8570 = vpow2.f32 %v5799_v14  ;;  %v5803_v22 = vmul.f32 1.442695, %v5761_v56  ;;  %v6962_v56 = vsub.f32 %v12761_v2, %v13099_v49 }
 0x72e   : > { %8572 = vrcp.f32 %v12982_v15 }
 0x72f   : > { %8574 = vrcp.f32 %v12947_v38  ;;  %v13181_v25 = vpop.xlane.xlu1 %3452  ;;  %v7003_v16 = vmul.f32 1.442695, %v6962_v56  ;;  %v4910_v56 = vand.u32 2147483648, %v12947_v38 }
 0x730   : > { %5849 = vadd.xlane.f32.xlu1 %v12988_v1  ;;  %v13171_v17 = vpop.xlane.xlu2 %4645  ;;  %8576 = vpow2.f32 %v5801_v40  ;;  %15685 = vst [vmem:[#allocation167_spill] sm:$0xff] %v13181_v25  ;;  %v13185_v1 = vpop.f32.mrf.mxu1 }
 0x731   : > { %15683 = vst [vmem:[#allocation165_spill] sm:$0xff] %v13171_v17  ;;  %v6910_v19 = vpop.xlane.xlu0 %6909  ;;  %v13197_v25 = vpop.f32.mrf.mxu0  ;;  %8578 = vpow2.f32 %v5803_v22 }
 0x732   : > { %15686 = vst [vmem:[#allocation168_spill] sm:$0xff] %v13185_v1  ;;  %v6963_v2 = vsub.f32 %v12837_v28, %v6910_v19  ;;  %v3719_v28 = vand.u32 2147483647, %v12982_v15 }
 0x733   : > { %v13173_v47 = vpop.eup %8570 }
 0x734   : > { %6399 = vmatmul.f32.gmra.mxu1 %v13173_v47  ;;  %v13179_v9 = vpop.eup %8572  ;;  %vm3720_vm12 = vcmp.eq.f32.partialorder %v3719_v28, 8.507059e+37 }
 0x735   : > { %v13183_v14 = vpop.eup %8574  ;;  %v3711_v27 = vmul.f32 %v13179_v9, %v12982_v15  ;;  %vm3716_vm6 = vweird.f32 %v13179_v9 }
 0x736   : > { %v4900_v57 = vmul.f32 %v13183_v14, %v12947_v38  ;;  %v13195_v40 = vpop.eup %8576  ;;  %vm4905_vm7 = vweird.f32 %v13183_v14  ;;  %vm13234_vm10 = vmor %vm3715_vm8, %vm3716_vm6 }
 0x737   : > { %15688 = vst [vmem:[#allocation170_spill] sm:$0xff] %v13195_v40  ;;  %v3712_v1 = vsub.f32 1.0, %v3711_v27  ;;  %vm13241_vm11 = vmor %vm4904_vm9, %vm4905_vm7 }
 0x738   : > { %7051 = vadd.xlane.f32.xlu1 %v13004_v23  ;;  %v6906_v63 = vpop.xlane.xlu2 %6905  ;;  %v4901_v23 = vsub.f32 1.0, %v4900_v57  ;;  %v13205_v11 = vpop.f32.mrf.mxu1 }
 0x739   : > { %v13190_v48 = vpop.xlane.xlu0 %3450  ;;  %v6961_v7 = vsub.f32 %v12704_v60, %v6906_v63  ;;  %15690 = vst [vmem:[#allocation172_spill] sm:$0xff] %v13205_v11  ;;  %v13207_v60 = vpop.xlane.xlu1 %5713  ;;  %v3713_v63 = vmul.f32 %v13179_v9, %v3712_v1  ;;  %v3721_v1 = vand.u32 2147483648, %v12982_v15  ;;  %v7005_v11 = vmul.f32 1.442695, %v6963_v2 }
 0x73a   : > { %15687 = vst [vmem:[#allocation169_spill] sm:$0xff] %v13190_v48  ;;  %v13203_v48 = vpop.f32.mrf.mxu3  ;;  %v4902_v27 = vmul.f32 %v13183_v14, %v4901_v23 }
 0x73b   : > { %v7001_v61 = vmul.f32 1.442695, %v6961_v7  ;;  %15689 = vst [vmem:[#allocation171_spill] sm:$0xff] %v13203_v48  ;;  %v3714_v49 = vadd.f32 %v13179_v9, %v3713_v63 }
 0x73c   : > { %5723 = vmax.xlane.f32.xlu0 %v13197_v25  ;;  %6402 = vmatmul.f32.gmra.mxu1 %v13195_v40  ;;  %v13213_v40 = vpop.eup %8578  ;;  %v4903_v23 = vadd.f32 %v13183_v14, %v4902_v27 }
 0x73d   : > { %8580 = vpow2.f32 %v7001_v61  ;;  %15692 = vst [vmem:[#allocation174_spill] sm:$0xff] %v13213_v40  ;;  %v13222_v61 = vpop.f32.mrf.mxu2  ;;  %v3718_v15 = vsel %vm13234_vm10, %v13179_v9, %v3714_v49 }
 0x73e   : > { %8582 = vpow2.f32 %v7003_v16  ;;  %v4908_v16 = vand.u32 2147483647, %v12947_v38  ;;  %v4907_v38 = vsel %vm13241_vm11, %v13183_v14, %v4903_v23 }
 0x73f   : > { %8584 = vrcp.f32 %v13019_v5 }
 0x740   : > { %v13210_v7 = vpop.xlane.xlu2 %3448  ;;  %v13250_v44 = vpop.f32.mrf.mxu1  ;;  %vm4909_vm13 = vcmp.eq.f32.partialorder %v4908_v16, 8.507059e+37  ;;  %8586 = vpow2.f32 %v7005_v11 }
 0x741   : > { %15691 = vst [vmem:[#allocation173_spill] sm:$0xff] %v13210_v7  ;;  %v5712_v22 = vpop.xlane.xlu0 %5711  ;;  %v13256_v17 = vpop.xlane.xlu1 %6915 }
 0x742   : > { %v13238_v63 = vpop.f32.mrf.mxu3 }
 0x743   : > { %v13215_v57 = vpop.eup %8580  ;;  %15696 = vst [vmem:[#allocation27_spill] sm:$0xff] %v13238_v63  ;;  %v4911_v63 = vor.u32 1.1754944e-38, %v4910_v56 }
 0x744   : > { %15693 = vst [vmem:[#allocation175_spill] sm:$0xff] %v13215_v57  ;;  %6405 = vmatmul.f32.gmra.mxu1 %v13213_v40  ;;  %7665 = vmatmul.f32.gmra.mxu3 %v13215_v57  ;;  %v3722_v40 = vor.u32 1.1754944e-38, %v3721_v1  ;;  %v13258_v2 = vpop.eup %8582 }
 0x745   : > { %v4912_v9 = vsel %vm4909_vm13, %v4911_v63, %v4907_v38  ;;  %v6965_v38 = vsub.f32 %v12895_v24, %v13163_v37  ;;  %v6966_v24 = vsub.f32 %v12951_v50, %v13256_v17  ;;  %vm3729_vm13 = vweird.f32 %v12984_v18 }
 0x746   : > { %6923 = vmax.xlane.f32.xlu2 %v13222_v61  ;;  %v3723_v19 = vsel %vm3720_vm12, %v3722_v40, %v3718_v15  ;;  %v8585_v40 = vpop.eup %8584 }
 0x747   : > { %v4037_v14 = vmul.f32 %v13056_v51, %v3723_v19  ;;  %v13272_v1 = vpop.eup %8586  ;;  %vm4919_vm14 = vweird.f32 %v8585_v40 }
 0x748   : > { %v5710_v7 = vpop.xlane.xlu2 %5709  ;;  %vm4920_vm1 = vmor %vm4918_vm15, %vm4919_vm14 }
 0x749   : > { %v13245_v48 = vpop.xlane.xlu0 %4655  ;;  %v5762_v57 = vsub.f32 %v12884_v54, %v5710_v7  ;;  %v5763_v54 = vsub.f32 %v12913_v31, %v5712_v22  ;;  %v5303_v7 = vmul.f32 %v13042_v13, %v4912_v9  ;;  %v5764_v13 = vsub.f32 %v12932_v34, %v13207_v60  ;;  %v6918_v51 = vpop.xlane.xlu1 %6917 }
 0x74a   : > { %15699 = vst [vmem:[#allocation16_spill] sm:$0xff] %v13245_v48  ;;  %v13274_v31 = vpop.f32.mrf.mxu3  ;;  %v4914_v22 = vmul.f32 %v8585_v40, %v13019_v5 }
 0x74b   : > { %v5805_v48 = vmul.f32 1.442695, %v5762_v57  ;;  %v5807_v11 = vmul.f32 1.442695, %v5763_v54  ;;  %v5809_v23 = vmul.f32 1.442695, %v5764_v13 }
 0x74c   : > { %7668 = vmatmul.f32.gmra.mxu3 %v13258_v2  ;;  %v4915_v16 = vsub.f32 1.0, %v4914_v22  ;;  %v7009_v54 = vmul.f32 1.442695, %v6965_v38  ;;  %v4924_v13 = vand.u32 2147483648, %v13019_v5  ;;  %v4922_v22 = vand.u32 2147483647, %v13019_v5 }
 0x74d   : > { %8588 = vpow2.f32 %v5805_v48  ;;  %v6967_v5 = vsub.f32 %v12971_v46, %v6918_v51 }
 0x74e   : > { %5851 = vadd.xlane.f32.xlu2 %v13026_v26  ;;  %v13278_v26 = vpop.f32.mrf.mxu1  ;;  %8590 = vpow2.f32 %v5807_v11  ;;  %vm4923_vm2 = vcmp.eq.f32.partialorder %v4922_v22, 8.507059e+37 }
 0x74f   : > { %8592 = vpow2.f32 %v5809_v23 }
 0x750   : > { %4087 = vrot.lane.b32.xlu0 %v4037_v14, %s9215_s18  ;;  %v13267_v49 = vpop.xlane.xlu2 %4651 }
 0x751   : > { %v13269_v57 = vpop.xlane.xlu0 %3456  ;;  %5352 = vrot.lane.b32.xlu1 %v5303_v7, %s9215_s18  ;;  %v13296_v19 = vpop.xlane.xlu1 %4659 }
 0x752   : > { %15700 = vst [vmem:[#allocation28_spill] sm:$0xff] %v13269_v57  ;;  %v13291_v60 = vpop.f32.mrf.mxu3 }
 0x753   : > { %v13276_v48 = vpop.eup %8588 }
 0x754   : > { %6408 = vmatmul.f32.gmra.mxu1 %v13276_v48  ;;  %7671 = vmatmul.f32.gmra.mxu3 %v13272_v1  ;;  %v13287_v27 = vpop.eup %8590 }
 0x755   : > { %v13302_v14 = vpop.eup %8592 }
 0x756   : > { %7053 = vadd.xlane.f32.xlu2 %v13023_v53  ;;  %v13289_v15 = vpop.f32.mrf.mxu1  ;;  %v4916_v53 = vmul.f32 %v8585_v40, %v4915_v16  ;;  %v7011_v16 = vmul.f32 1.442695, %v6966_v24  ;;  %v7013_v24 = vmul.f32 1.442695, %v6967_v5 }
 0x758   : > { %v6912_v56 = vpop.xlane.xlu2 %6911  ;;  %v4917_v7 = vadd.f32 %v8585_v40, %v4916_v53 }
 0x759   : > { %v5718_v28 = vpop.xlane.xlu0 %5717  ;;  %v6964_v63 = vsub.f32 %v12870_v35, %v6912_v56 }
 0x75a   : > { %v13310_v37 = vpop.f32.mrf.mxu3  ;;  %v4921_v56 = vsel %vm4920_vm1, %v8585_v40, %v4917_v7 }
 0x75b   : > { %v7007_v34 = vmul.f32 1.442695, %v6964_v63  ;;  %15701 = vst [vmem:[#allocation17_spill] sm:$0xff] %v13310_v37  ;;  %v4925_v63 = vor.u32 1.1754944e-38, %v4924_v13 }
 0x75c   : > { %6411 = vmatmul.f32.gmra.mxu1 %v13287_v27 }
 0x75d   : > { %8594 = vpow2.f32 %v7007_v34  ;;  %v5720_v34 = vpop.xlane.xlu1 %5719  ;;  %v4926_v53 = vsel %vm4923_vm2, %v4925_v63, %v4921_v56  ;;  %vm4932_vm2 = vweird.f32 %v12944_v32 }
 0x75e   : > { %8596 = vpow2.f32 %v7009_v54  ;;  %v13315_v23 = vpop.f32.mrf.mxu1  ;;  %v5304_v40 = vmul.f32 %v13071_v59, %v4926_v53  ;;  %v5766_v54 = vsub.f32 %v12986_v29, %v5718_v28 }
 0x760   : > { %v13298_v9 = vpop.xlane.xlu2 %3454  ;;  %v5813_v46 = vmul.f32 1.442695, %v5766_v54 }
 0x761   : > { %v13300_v35 = vpop.xlane.xlu0 %6919 }
 0x762   : > { %v13324_v7 = vpop.f32.mrf.mxu3 }
 0x763   : > { %v13304_v11 = vpop.eup %8594  ;;  %15702 = vst [vmem:[#allocation29_spill] sm:$0xff] %v13324_v7 }
 0x764   : > { %6414 = vmatmul.f32.gmra.mxu1 %v13302_v14  ;;  %7674 = vmatmul.f32.gmra.mxu3 %v13304_v11  ;;  %v13318_v37 = vpop.eup %8596 }
 0x768   : > { %v5716_v38 = vpop.xlane.xlu2 %5715 }
 0x769   : > { %v5765_v50 = vsub.f32 %v12962_v43, %v5716_v38  ;;  %v5848_v17 = vpop.xlane.xlu0 %5847  ;;  %v13327_v43 = vpop.f32.mrf.mxu1 }
 0x76a   : > { %8598 = vrcp.f32 %v5848_v17  ;;  %15703 = vst [vmem:[#allocation18_spill] sm:$0xff] %v13327_v43  ;;  %v5922_v38 = vand.u32 2147483648, %v5848_v17  ;;  %v5920_v53 = vand.u32 2147483647, %v5848_v17  ;;  %vm5916_vm5 = vweird.f32 %v5848_v17 }
 0x76b   : > { %v5811_v57 = vmul.f32 1.442695, %v5765_v50  ;;  %8600 = vpow2.f32 %v7011_v16  ;;  %v6968_v16 = vsub.f32 %v13030_v0, %v13300_v35  ;;  %v13347_v35 = vpop.f32.mrf.mxu2 }
 0x76c   : > { %7677 = vmatmul.f32.gmra.mxu3 %v13318_v37  ;;  %vm5921_vm7 = vcmp.eq.f32.partialorder %v5920_v53, 8.507059e+37 }
 0x76d   : > { %8602 = vpow2.f32 %v5811_v57  ;;  %v5767_v57 = vsub.f32 %v13006_v39, %v5720_v34  ;;  %v7015_v39 = vmul.f32 1.442695, %v6968_v16  ;;  %v5923_v34 = vor.u32 1.1754944e-38, %v5922_v38 }
 0x76e   : > { %5354 = vrot.lane.b32.xlu2 %v5304_v40, %s9215_s18 }
 0x76f   : > { %v5815_v5 = vmul.f32 1.442695, %v5767_v57  ;;  %v13351_v57 = vpop.f32.mrf.mxu0 }
 0x770   : > { %v8599_v13 = vpop.eup %8598  ;;  %v4084_v22 = vpop.permute.xlu1 %4083 }
 0x771   : > { %v13329_v56 = vpop.xlane.xlu2 %4657  ;;  %v5912_v51 = vmul.f32 %v8599_v13, %v5848_v17  ;;  %4132 = vst.msk [vmem:[%s12038_s23] sm:$0xff] %vm4131_vm3, %v4084_v22  ;;  %v7050_v59 = vpop.xlane.xlu0 %7049  ;;  %vm5917_vm4 = vweird.f32 %v8599_v13 }
 0x772   : > { %v13333_v63 = vpop.eup %8600  ;;  %8604 = vrcp.f32 %v7050_v59  ;;  %v13343_v22 = vpop.f32.mrf.mxu3  ;;  %vm5918_vm6 = vmor %vm5916_vm5, %vm5917_vm4  ;;  %v7124_v53 = vand.u32 2147483648, %v7050_v59  ;;  %vm7118_vm9 = vweird.f32 %v7050_v59 }
 0x773   : > { %15704 = vst [vmem:[#allocation30_spill] sm:$0xff] %v13333_v63  ;;  %v13335_v29 = vpop.eup %8602  ;;  %8606 = vrcp.f32 %v12984_v18  ;;  %v5913_v28 = vsub.f32 1.0, %v5912_v51  ;;  %v6376_v17 = vpop.f32.mrf.mxu1 }
 0x774   : > { %15705 = vst [vmem:[#allocation19_spill] sm:$0xff] %v13335_v29  ;;  %8608 = vpow2.f32 %v7013_v24  ;;  %6417 = vmatmul.f32.gmra.mxu1 %v13335_v29  ;;  %7680 = vmatmul.f32.gmra.mxu3 %v13333_v63 }
 0x775   : > { %8610 = vpow2.f32 %v5813_v46  ;;  %v5914_v50 = vmul.f32 %v8599_v13, %v5913_v28 }
 0x776   : > { %8612 = vrcp.f32 %v12944_v32 }
 0x777   : > { %v5915_v40 = vadd.f32 %v8599_v13, %v5914_v50  ;;  %8614 = vpow2.f32 %v5815_v5 }
 0x778   : > { %v8605_v54 = vpop.eup %8604  ;;  %8616 = vpow2.f32 %v7015_v39 }
 0x779   : > { %v5722_v24 = vpop.xlane.xlu2 %5721  ;;  %v13345_v0 = vpop.eup %8606  ;;  %v5919_v51 = vsel %vm5918_vm6, %v8599_v13, %v5915_v40  ;;  %v7114_v46 = vmul.f32 %v8605_v54, %v7050_v59  ;;  %vm7119_vm8 = vweird.f32 %v8605_v54  ;;  %8618 = vrcp.f32 %v12969_v52 }
 0x77a   : > { %v13349_v28 = vpop.eup %8608  ;;  %v5924_v50 = vsel %vm5921_vm7, %v5923_v34, %v5919_v51  ;;  %6925 = vmax.xlane.f32.xlu0 %v13347_v35  ;;  %v3725_v13 = vmul.f32 %v13345_v0, %v12984_v18  ;;  %v7122_v34 = vand.u32 2147483647, %v7050_v59  ;;  %v5768_v5 = vsub.f32 %v13090_v45, %v5722_v24  ;;  %vm7120_vm10 = vmor %vm7118_vm9, %vm7119_vm8  ;;  %v7642_v63 = vpop.f32.mrf.mxu3 }
 0x77b   : > { %v13355_v16 = vpop.eup %8610  ;;  %v6472_v38 = vmul.f32 %v6376_v17, %v5924_v50  ;;  %v7115_v43 = vsub.f32 1.0, %v7114_v46  ;;  %5725 = vmax.xlane.f32.xlu1 %v13351_v57  ;;  %v7125_v50 = vor.u32 1.1754944e-38, %v7124_v53  ;;  %vm3730_vm12 = vweird.f32 %v13345_v0 }
 0x77c   : > { %6420 = vmatmul.f32.gmra.mxu1 %v13355_v16  ;;  %7683 = vmatmul.f32.gmra.mxu3 %v13349_v28  ;;  %v8613_v46 = vpop.eup %8612  ;;  %v3726_v17 = vsub.f32 1.0, %v3725_v13  ;;  %vm7123_vm11 = vcmp.eq.f32.partialorder %v7122_v34, 8.507059e+37  ;;  %vm3731_vm14 = vmor %vm3729_vm13, %vm3730_vm12  ;;  %vm3743_vm7 = vweird.f32 %v12969_v52 }
 0x77d   : > { %6504 = vst.msk [vmem:[%s12038_s23 + $0x10] sm:$0xff] %vm3008_vm0, %v6472_v38  ;;  %v7116_v40 = vmul.f32 %v8605_v54, %v7115_v43  ;;  %v13365_v7 = vpop.eup %8614  ;;  %v5817_v38 = vmul.f32 1.442695, %v5768_v5  ;;  %vm4933_vm1 = vweird.f32 %v8613_v46 }
 0x77e   : > { %v13369_v43 = vpop.eup %8616  ;;  %v3727_v24 = vmul.f32 %v13345_v0, %v3726_v17  ;;  %vm4934_vm4 = vmor %vm4932_vm2, %vm4933_vm1 }
 0x77f   : > { %v7117_v51 = vadd.f32 %v8605_v54, %v7116_v40  ;;  %8620 = vpow2.f32 %v5817_v38  ;;  %v3733_v40 = vand.u32 2147483647, %v12984_v18 }
 0x781   : > { %v4086_v39 = vpop.permute.xlu2 %4085  ;;  %v7121_v29 = vsel %vm7120_vm10, %v8605_v54, %v7117_v51  ;;  %v4928_v54 = vmul.f32 %v8613_v46, %v12944_v32  ;;  %vm3734_vm15 = vcmp.eq.f32.partialorder %v3733_v40, 8.507059e+37 }
 0x782   : > { %4133 = vst.msk [vmem:[%s12038_s23 + $0x20] sm:$0xff] %vm4131_vm3, %v4086_v39  ;;  %v7126_v45 = vsel %vm7123_vm11, %v7125_v50, %v7121_v29  ;;  %5853 = vadd.xlane.f32.xlu0 %v13047_v21  ;;  %v3728_v21 = vadd.f32 %v13345_v0, %v3727_v24  ;;  %v8619_v29 = vpop.eup %8618  ;;  %v4936_v24 = vand.u32 2147483647, %v12944_v32 }
 0x783   : > { %v7738_v59 = vmul.f32 %v7642_v63, %v7126_v45  ;;  %v3735_v63 = vand.u32 2147483648, %v12984_v18  ;;  %v4929_v53 = vsub.f32 1.0, %v4928_v54  ;;  %v3739_v17 = vmul.f32 %v8619_v29, %v12969_v52 }
 0x784   : > { %v5351_v13 = vpop.permute.xlu0 %5350  ;;  %6423 = vmatmul.f32.gmra.mxu1 %v13365_v7  ;;  %7686 = vmatmul.f32.gmra.mxu3 %v13369_v43  ;;  %v3732_v5 = vsel %vm3731_vm14, %v13345_v0, %v3728_v21  ;;  %v4938_v18 = vand.u32 2147483648, %v12944_v32  ;;  %v13399_v0 = vpop.f32.mrf.mxu0  ;;  %vm4937_vm5 = vcmp.eq.f32.partialorder %v4936_v24, 8.507059e+37  ;;  %vm3744_vm6 = vweird.f32 %v8619_v29 }
 0x785   : > { %7770 = vst.msk [vmem:[%s12038_s23 + $0x18] sm:$0xff] %vm3008_vm0, %v7738_v59  ;;  %v13387_v34 = vpop.eup %8620  ;;  %v3736_v51 = vor.u32 1.1754944e-38, %v3735_v63  ;;  %v4930_v50 = vmul.f32 %v8613_v46, %v4929_v53  ;;  %v3740_v38 = vsub.f32 1.0, %v3739_v17  ;;  %v13394_v59 = vpop.f32.mrf.mxu2  ;;  %v3749_v53 = vand.u32 2147483648, %v12969_v52  ;;  %vm3745_vm8 = vmor %vm3743_vm7, %vm3744_vm6 }
 0x786   : > { %5398 = vst.msk [vmem:[%s12038_s23 + $0x8] sm:$0xff] %vm4131_vm3, %v5351_v13  ;;  %v4939_v21 = vor.u32 1.1754944e-38, %v4938_v18  ;;  %v3747_v32 = vand.u32 2147483647, %v12969_v52 }
 0x787   : > { %v3737_v39 = vsel %vm3734_vm15, %v3736_v51, %v3732_v5  ;;  %v4931_v45 = vadd.f32 %v8613_v46, %v4930_v50  ;;  %v3741_v54 = vmul.f32 %v8619_v29, %v3740_v38 }
 0x788   : > { %vm3748_vm9 = vcmp.eq.f32.partialorder %v3747_v32, 8.507059e+37 }
 0x789   : > { %v4935_v13 = vsel %vm4934_vm4, %v8613_v46, %v4931_v45  ;;  %v3742_v63 = vadd.f32 %v8619_v29, %v3741_v54 }
 0x78a   : > { %7055 = vadd.xlane.f32.xlu0 %v13051_v55  ;;  %v4038_v55 = vmul.f32 %v13081_v42, %v3737_v39  ;;  %v4940_v42 = vsel %vm4937_vm5, %v4939_v21, %v4935_v13  ;;  %v3750_v39 = vor.u32 1.1754944e-38, %v3749_v53  ;;  %v15706_v13 = vld [vmem:[#allocation154_spill] sm:$0xff]  ;;  %v15707_v53 = vld [vmem:[#allocation153_spill] sm:$0xff]  ;;  %vm3757_vm5 = vweird.f32 %v13064_v12 }
 0x78b   : > { %v5305_v5 = vmul.f32 %v13093_v6, %v4940_v42  ;;  %v3746_v17 = vsel %vm3745_vm8, %v8619_v29, %v3742_v63 }
 0x78c   : > { %6426 = vmatmul.f32.gmra.mxu1 %v13387_v34  ;;  %v3751_v38 = vsel %vm3748_vm9, %v3750_v39, %v3746_v17  ;;  %vm4960_vm9 = vweird.f32 %v15706_v13 }
 0x78d   : > { %v13407_v46 = vpop.f32.mrf.mxu2  ;;  %v4039_v45 = vmul.f32 %v13097_v4, %v3751_v38 }
 0x794   : > { %4089 = vrot.lane.b32.xlu1 %v4038_v55, %s9215_s18 }
 0x797   : > { %5727 = vmax.xlane.f32.xlu2 %v13399_v0 }
 0x79b   : > { %v6922_v40 = vpop.xlane.xlu1 %6921 }
 0x79c   : > { %v6969_v51 = vsub.f32 %v13155_v36, %v6922_v40 }
 0x79e   : > { %v7017_v50 = vmul.f32 1.442695, %v6969_v51  ;;  %5356 = vrot.lane.b32.xlu0 %v5305_v5, %s9215_s18 }
 0x79f   : > { %6929 = vmax.xlane.f32.xlu2 %v13407_v46 }
 0x7a0   : > { %8622 = vpow2.f32 %v7017_v50 }
 0x7a3   : > { %v5850_v6 = vpop.xlane.xlu1 %5849 }
 0x7a4   : > { %8624 = vrcp.f32 %v5850_v6  ;;  %v5936_v54 = vand.u32 2147483648, %v5850_v6  ;;  %v5934_v42 = vand.u32 2147483647, %v5850_v6  ;;  %vm5930_vm11 = vweird.f32 %v5850_v6 }
 0x7a5   : > { %8626 = vrcp.f32 %v13064_v12 }
 0x7a6   : > { %v13413_v52 = vpop.eup %8622  ;;  %4091 = vrot.lane.b32.xlu0 %v4039_v45, %s9215_s18  ;;  %v5937_v51 = vor.u32 1.1754944e-38, %v5936_v54  ;;  %vm5935_vm13 = vcmp.eq.f32.partialorder %v5934_v42, 8.507059e+37  ;;  %v6379_v45 = vpop.f32.mrf.mxu1 }
 0x7a7   : > { %7689 = vmatmul.f32.gmra.mxu3 %v13413_v52  ;;  %5857 = vadd.xlane.f32.xlu2 %v13107_v33 }
 0x7aa   : > { %v8625_v36 = vpop.eup %8624 }
 0x7ab   : > { %v13418_v29 = vpop.eup %8626  ;;  %v5926_v55 = vmul.f32 %v8625_v36, %v5850_v6  ;;  %v7052_v18 = vpop.xlane.xlu1 %7051  ;;  %vm5931_vm10 = vweird.f32 %v8625_v36 }
 0x7ac   : > { %8628 = vrcp.f32 %v7052_v18  ;;  %v3753_v4 = vmul.f32 %v13418_v29, %v13064_v12  ;;  %vm5932_vm12 = vmor %vm5930_vm11, %vm5931_vm10  ;;  %vm7132_vm15 = vweird.f32 %v7052_v18  ;;  %vm3758_vm1 = vweird.f32 %v13418_v29 }
 0x7ad   : > { %v5927_v24 = vsub.f32 1.0, %v5926_v55  ;;  %8630 = vrcp.f32 %v15706_v13  ;;  %vm3759_vm6 = vmor %vm3757_vm5, %vm3758_vm1 }
 0x7ae   : > { %v3754_v32 = vsub.f32 1.0, %v3753_v4 }
 0x7af   : > { %v5928_v21 = vmul.f32 %v8625_v36, %v5927_v24  ;;  %v5724_v63 = vpop.xlane.xlu0 %5723  ;;  %7059 = vadd.xlane.f32.xlu2 %v15707_v53 }
 0x7b0   : > { %v5769_v33 = vsub.f32 %v13197_v25, %v5724_v63  ;;  %v3755_v25 = vmul.f32 %v13418_v29, %v3754_v32 }
 0x7b1   : > { %v5929_v40 = vadd.f32 %v8625_v36, %v5928_v21  ;;  %v7138_v21 = vand.u32 2147483648, %v7052_v18 }
 0x7b2   : > { %v8629_v5 = vpop.eup %8628  ;;  %v5819_v17 = vmul.f32 1.442695, %v5769_v33 }
 0x7b3   : > { %v5933_v50 = vsel %vm5932_vm12, %v8625_v36, %v5929_v40  ;;  %v7128_v39 = vmul.f32 %v8629_v5, %v7052_v18  ;;  %v13425_v38 = vpop.eup %8630  ;;  %vm7133_vm14 = vweird.f32 %v8629_v5  ;;  %v7136_v36 = vand.u32 2147483647, %v7052_v18  ;;  %v7645_v18 = vpop.f32.mrf.mxu3 }
 0x7b4   : > { %v5938_v55 = vsel %vm5935_vm13, %v5937_v51, %v5933_v50  ;;  %8632 = vpow2.f32 %v5819_v17  ;;  %v4956_v6 = vmul.f32 %v13425_v38, %v15706_v13  ;;  %vm7134_vm2 = vmor %vm7132_vm15, %vm7133_vm14  ;;  %v7139_v33 = vor.u32 1.1754944e-38, %v7138_v21 }
 0x7b5   : > { %v6473_v24 = vmul.f32 %v6379_v45, %v5938_v55  ;;  %v7129_v53 = vsub.f32 1.0, %v7128_v39  ;;  %vm7137_vm4 = vcmp.eq.f32.partialorder %v7136_v36, 8.507059e+37  ;;  %v3756_v17 = vadd.f32 %v13418_v29, %v3755_v25 }
 0x7b6   : > { %v4957_v32 = vsub.f32 1.0, %v4956_v6  ;;  %v3763_v50 = vand.u32 2147483648, %v13064_v12  ;;  %vm4961_vm8 = vweird.f32 %v13425_v38 }
 0x7b7   : > { %6505 = vst.msk [vmem:[%s12038_s23 + $0x30] sm:$0xff] %vm3008_vm0, %v6473_v24  ;;  %v7130_v4 = vmul.f32 %v8629_v5, %v7129_v53  ;;  %v3761_v24 = vand.u32 2147483647, %v13064_v12  ;;  %vm4962_vm10 = vmor %vm4960_vm9, %vm4961_vm8 }
 0x7b8   : > { %v3764_v53 = vor.u32 1.1754944e-38, %v3763_v50 }
 0x7b9   : > { %v7131_v54 = vadd.f32 %v8629_v5, %v7130_v4  ;;  %v6924_v42 = vpop.xlane.xlu2 %6923  ;;  %vm3762_vm7 = vcmp.eq.f32.partialorder %v3761_v24, 8.507059e+37 }
 0x7ba   : > { %v13432_v63 = vpop.eup %8632  ;;  %v6970_v40 = vsub.f32 %v13222_v61, %v6924_v42  ;;  %v4958_v61 = vmul.f32 %v13425_v38, %v4957_v32  ;;  %v4964_v42 = vand.u32 2147483647, %v15706_v13 }
 0x7bb   : > { %v7135_v51 = vsel %vm7134_vm2, %v8629_v5, %v7131_v54  ;;  %6429 = vmatmul.f32.gmra.mxu1 %v13432_v63  ;;  %v3760_v5 = vsel %vm3759_vm6, %v13418_v29, %v3756_v17  ;;  %v4966_v54 = vand.u32 2147483648, %v15706_v13 }
 0x7bc   : > { %v7140_v39 = vsel %vm7137_vm4, %v7139_v33, %v7135_v51  ;;  %v7019_v45 = vmul.f32 1.442695, %v6970_v40  ;;  %v3765_v6 = vsel %vm3762_vm7, %v3764_v53, %v3760_v5  ;;  %v4959_v4 = vadd.f32 %v13425_v38, %v4958_v61  ;;  %v15708_v33 = vld [vmem:[#allocation146_spill] sm:$0xff]  ;;  %v15709_v40 = vld [vmem:[#allocation147_spill] sm:$0xff]  ;;  %v15710_v5 = vld [vmem:[#allocation149_spill] sm:$0xff]  ;;  %v13467_v53 = vpop.f32.mrf.mxu0 }
 0x7bd   : > { %v7739_v55 = vmul.f32 %v7645_v18, %v7140_v39  ;;  %v4040_v29 = vmul.f32 %v13119_v10, %v3765_v6  ;;  %v4967_v17 = vor.u32 1.1754944e-38, %v4966_v54  ;;  %vm4965_vm11 = vcmp.eq.f32.partialorder %v4964_v42, 8.507059e+37 }
 0x7be   : > { %8634 = vpow2.f32 %v7019_v45  ;;  %6927 = vmax.xlane.f32.xlu1 %v13394_v59  ;;  %v4963_v32 = vsel %vm4962_vm10, %v13425_v38, %v4959_v4  ;;  %vm4946_vm7 = vweird.f32 %v15708_v33 }
 0x7bf   : > { %7771 = vst.msk [vmem:[%s12038_s23 + $0x38] sm:$0xff] %vm3008_vm0, %v7739_v55  ;;  %v4968_v39 = vsel %vm4965_vm11, %v4967_v17, %v4963_v32 }
 0x7c0   : > { %v5307_v61 = vmul.f32 %v13129_v62, %v4968_v39 }
 0x7c1   : > { %v5852_v25 = vpop.xlane.xlu2 %5851 }
 0x7c2   : > { %8636 = vrcp.f32 %v5852_v25  ;;  %v4088_v21 = vpop.permute.xlu0 %4087  ;;  %v5950_v55 = vand.u32 2147483648, %v5852_v25  ;;  %v5948_v24 = vand.u32 2147483647, %v5852_v25  ;;  %vm5944_vm13 = vweird.f32 %v5852_v25 }
 0x7c3   : > { %4134 = vst.msk [vmem:[%s12038_s23 + $0x40] sm:$0xff] %vm4131_vm3, %v4088_v21  ;;  %v5353_v12 = vpop.permute.xlu1 %5352  ;;  %8638 = vrcp.f32 %v15708_v33 }
 0x7c4   : > { %v13452_v36 = vpop.eup %8634  ;;  %5399 = vst.msk [vmem:[%s12038_s23 + $0x28] sm:$0xff] %vm4131_vm3, %v5353_v12  ;;  %v5951_v12 = vor.u32 1.1754944e-38, %v5950_v55  ;;  %vm5949_vm15 = vcmp.eq.f32.partialorder %v5948_v24, 8.507059e+37 }
 0x7c5   : > { %7692 = vmatmul.f32.gmra.mxu3 %v13452_v36 }
 0x7c6   : > { %5855 = vadd.xlane.f32.xlu1 %v15709_v40 }
 0x7c7   : > { %4093 = vrot.lane.b32.xlu2 %v4040_v29, %s9215_s18  ;;  %v6382_v29 = vpop.f32.mrf.mxu1 }
 0x7c8   : > { %v8637_v51 = vpop.eup %8636 }
 0x7c9   : > { %v5940_v50 = vmul.f32 %v8637_v51, %v5852_v25  ;;  %v7054_v18 = vpop.xlane.xlu2 %7053  ;;  %v8639_v10 = vpop.eup %8638  ;;  %vm5945_vm12 = vweird.f32 %v8637_v51 }
 0x7ca   : > { %8640 = vrcp.f32 %v7054_v18  ;;  %v4942_v38 = vmul.f32 %v8639_v10, %v15708_v33  ;;  %vm5946_vm14 = vmor %vm5944_vm13, %vm5945_vm12  ;;  %v7152_v25 = vand.u32 2147483648, %v7054_v18  ;;  %v7150_v39 = vand.u32 2147483647, %v7054_v18 }
 0x7cb   : > { %v5941_v45 = vsub.f32 1.0, %v5940_v50  ;;  %vm7146_vm2 = vweird.f32 %v7054_v18  ;;  %vm4947_vm6 = vweird.f32 %v8639_v10 }
 0x7cc   : > { %v4943_v40 = vsub.f32 1.0, %v4942_v38  ;;  %vm7151_vm5 = vcmp.eq.f32.partialorder %v7150_v39, 8.507059e+37  ;;  %vm4948_vm8 = vmor %vm4946_vm7, %vm4947_vm6 }
 0x7cd   : > { %v5942_v13 = vmul.f32 %v8637_v51, %v5941_v45  ;;  %v13476_v45 = vpop.f32.mrf.mxu2 }
 0x7ce   : > { %7057 = vadd.xlane.f32.xlu1 %v15710_v5  ;;  %v4944_v55 = vmul.f32 %v8639_v10, %v4943_v40 }
 0x7cf   : > { %v5943_v21 = vadd.f32 %v8637_v51, %v5942_v13  ;;  %5360 = vrot.lane.b32.xlu2 %v5307_v61, %s9215_s18  ;;  %v7153_v13 = vor.u32 1.1754944e-38, %v7152_v25  ;;  %v7648_v61 = vpop.f32.mrf.mxu3  ;;  %v13492_v25 = vpop.f32.mrf.mxu0 }
 0x7d0   : > { %v8641_v6 = vpop.eup %8640  ;;  %5729 = vmax.xlane.f32.xlu0 %v13467_v53 }
 0x7d1   : > { %v5947_v4 = vsel %vm5946_vm14, %v8637_v51, %v5943_v21  ;;  %v7142_v62 = vmul.f32 %v8641_v6, %v7054_v18  ;;  %v5355_v54 = vpop.permute.xlu2 %5354  ;;  %vm7147_vm1 = vweird.f32 %v8641_v6  ;;  %v4945_v21 = vadd.f32 %v8639_v10, %v4944_v55 }
 0x7d2   : > { %v5952_v42 = vsel %vm5949_vm15, %v5951_v12, %v5947_v4  ;;  %5400 = vst.msk [vmem:[%s12038_s23 + $0x48] sm:$0xff] %vm4131_vm3, %v5355_v54  ;;  %vm7148_vm4 = vmor %vm7146_vm2, %vm7147_vm1  ;;  %v4952_v12 = vand.u32 2147483648, %v15708_v33  ;;  %v15711_v4 = vld [vmem:[#allocation144_spill] sm:$0xff]  ;;  %v4950_v18 = vand.u32 2147483647, %v15708_v33 }
 0x7d3   : > { %v6474_v32 = vmul.f32 %v6382_v29, %v5952_v42  ;;  %v7143_v17 = vsub.f32 1.0, %v7142_v62  ;;  %8642 = vrcp.f32 %v15711_v4  ;;  %v4949_v62 = vsel %vm4948_vm8, %v8639_v10, %v4945_v21  ;;  %v15712_v42 = vld [vmem:[#allocation89_spill] sm:$0xff] }
 0x7d4   : > { %v4953_v54 = vor.u32 1.1754944e-38, %v4952_v12  ;;  %vm4951_vm9 = vcmp.eq.f32.partialorder %v4950_v18, 8.507059e+37  ;;  %8644 = vrcp.f32 %v15712_v42  ;;  %vm4974_vm11 = vweird.f32 %v15711_v4 }
 0x7d5   : > { %6506 = vst.msk [vmem:[%s12038_s23 + $0x50] sm:$0xff] %vm3008_vm0, %v6474_v32  ;;  %v7144_v50 = vmul.f32 %v8641_v6, %v7143_v17  ;;  %v13499_v21 = vpop.f32.mrf.mxu2  ;;  %vm3785_vm15 = vweird.f32 %v15712_v42 }
 0x7d7   : > { %v7145_v51 = vadd.f32 %v8641_v6, %v7144_v50 }
 0x7d8   : > { %6931 = vmax.xlane.f32.xlu0 %v13476_v45 }
 0x7d9   : > { %v7149_v24 = vsel %vm7148_vm4, %v8641_v6, %v7145_v51  ;;  %v4954_v6 = vsel %vm4951_vm9, %v4953_v54, %v4949_v62  ;;  %v8643_v29 = vpop.eup %8642 }
 0x7da   : > { %v7154_v5 = vsel %vm7151_vm5, %v7153_v13, %v7149_v24  ;;  %v5306_v40 = vmul.f32 %v13110_v20, %v4954_v6  ;;  %v4970_v32 = vmul.f32 %v8643_v29, %v15711_v4  ;;  %v8645_v17 = vpop.eup %8644  ;;  %vm4975_vm10 = vweird.f32 %v8643_v29 }
 0x7db   : > { %v7740_v38 = vmul.f32 %v7648_v61, %v7154_v5  ;;  %v3781_v10 = vmul.f32 %v8645_v17, %v15712_v42  ;;  %v4978_v5 = vand.u32 2147483647, %v15711_v4  ;;  %vm4976_vm12 = vmor %vm4974_vm11, %vm4975_vm10  ;;  %vm3786_vm14 = vweird.f32 %v8645_v17 }
 0x7dc   : > { %v4971_v33 = vsub.f32 1.0, %v4970_v32  ;;  %v3789_v32 = vand.u32 2147483647, %v15712_v42  ;;  %vm3787_vm1 = vmor %vm3785_vm15, %vm3786_vm14  ;;  %vm3799_vm14 = vweird.f32 %v13144_v8 }
 0x7dd   : > { %7772 = vst.msk [vmem:[%s12038_s23 + $0x58] sm:$0xff] %vm3008_vm0, %v7740_v38  ;;  %v3782_v20 = vsub.f32 1.0, %v3781_v10  ;;  %vm4979_vm13 = vcmp.eq.f32.partialorder %v4978_v5, 8.507059e+37 }
 0x7de   : > { %v4972_v50 = vmul.f32 %v8643_v29, %v4971_v33  ;;  %vm3790_vm2 = vcmp.eq.f32.partialorder %v3789_v32, 8.507059e+37 }
 0x7df   : > { %v3783_v38 = vmul.f32 %v8645_v17, %v3782_v20 }
 0x7e0   : > { %5859 = vadd.xlane.f32.xlu0 %v13126_v3  ;;  %v4973_v61 = vadd.f32 %v8643_v29, %v4972_v50 }
 0x7e1   : > { %v3784_v54 = vadd.f32 %v8645_v17, %v3783_v38 }
 0x7e2   : > { %v4977_v12 = vsel %vm4976_vm12, %v8643_v29, %v4973_v61 }
 0x7e3   : > { %v3788_v10 = vsel %vm3787_vm1, %v8645_v17, %v3784_v54 }
 0x7e7   : > { %5358 = vrot.lane.b32.xlu1 %v5306_v40, %s9215_s18  ;;  %v3791_v40 = vand.u32 2147483648, %v15712_v42 }
 0x7e8   : > { %7061 = vadd.xlane.f32.xlu0 %v13134_v30  ;;  %v4980_v30 = vand.u32 2147483648, %v15711_v4 }
 0x7ea   : > { %v4981_v18 = vor.u32 1.1754944e-38, %v4980_v30 }
 0x7ec   : > { %v4982_v4 = vsel %vm4979_vm13, %v4981_v18, %v4977_v12  ;;  %v6385_v12 = vpop.f32.mrf.mxu1 }
 0x7ed   : > { %v6926_v3 = vpop.xlane.xlu0 %6925  ;;  %v5308_v29 = vmul.f32 %v13148_v41, %v4982_v4 }
 0x7ee   : > { %v6971_v39 = vsub.f32 %v13347_v35, %v6926_v3  ;;  %v5726_v55 = vpop.xlane.xlu1 %5725  ;;  %v3792_v3 = vor.u32 1.1754944e-38, %v3791_v40 }
 0x7ef   : > { %v5770_v51 = vsub.f32 %v13351_v57, %v5726_v55  ;;  %v13501_v57 = vpop.f32.mrf.mxu0  ;;  %v13515_v55 = vpop.f32.mrf.mxu2 }
 0x7f0   : > { %v7021_v13 = vmul.f32 1.442695, %v6971_v39 }
 0x7f1   : > { %v5821_v24 = vmul.f32 1.442695, %v5770_v51  ;;  %v3793_v51 = vsel %vm3790_vm2, %v3792_v3, %v3788_v10 }
 0x7f2   : > { %8646 = vpow2.f32 %v7021_v13 }
 0x7f3   : > { %8648 = vpow2.f32 %v5821_v24  ;;  %v4042_v24 = vmul.f32 %v13152_v58, %v3793_v51  ;;  %v15714_v58 = vld [vmem:[#allocation152_spill] sm:$0xff] }
 0x7f4   : > { %vm3771_vm15 = vweird.f32 %v15714_v58 }
 0x7f5   : > { %v5854_v35 = vpop.xlane.xlu0 %5853 }
 0x7f6   : > { %8650 = vrcp.f32 %v5854_v35  ;;  %v5964_v20 = vand.u32 2147483648, %v5854_v35  ;;  %v5962_v13 = vand.u32 2147483647, %v5854_v35  ;;  %vm5958_vm5 = vweird.f32 %v5854_v35 }
 0x7f8   : > { %v13503_v62 = vpop.eup %8646  ;;  %5733 = vmax.xlane.f32.xlu2 %v13501_v57  ;;  %v5965_v30 = vor.u32 1.1754944e-38, %v5964_v20  ;;  %vm5963_vm7 = vcmp.eq.f32.partialorder %v5962_v13, 8.507059e+37  ;;  %v7651_v13 = vpop.f32.mrf.mxu3 }
 0x7f9   : > { %v13506_v6 = vpop.eup %8648  ;;  %7695 = vmatmul.f32.gmra.mxu3 %v13503_v62 }
 0x7fa   : > { %15713 = vst [vmem:[#allocation31_spill] sm:$0xff] %v13506_v6  ;;  %6432 = vmatmul.f32.gmra.mxu1 %v13506_v6 }
 0x7fc   : > { %v8651_v33 = vpop.eup %8650  ;;  %5362 = vrot.lane.b32.xlu0 %v5308_v29, %s9215_s18 }
 0x7fd   : > { %v5954_v50 = vmul.f32 %v8651_v33, %v5854_v35  ;;  %v7056_v39 = vpop.xlane.xlu0 %7055  ;;  %vm5959_vm4 = vweird.f32 %v8651_v33 }
 0x7fe   : > { %8652 = vrcp.f32 %v7056_v39  ;;  %vm5960_vm6 = vmor %vm5958_vm5, %vm5959_vm4  ;;  %v7166_v35 = vand.u32 2147483648, %v7056_v39  ;;  %v7164_v32 = vand.u32 2147483647, %v7056_v39  ;;  %vm7160_vm9 = vweird.f32 %v7056_v39 }
 0x7ff   : > { %v5955_v41 = vsub.f32 1.0, %v5954_v50  ;;  %8654 = vrcp.f32 %v13144_v8 }
 0x800   : > { %6935 = vmax.xlane.f32.xlu2 %v13515_v55  ;;  %8656 = vrcp.f32 %v15714_v58  ;;  %v7167_v50 = vor.u32 1.1754944e-38, %v7166_v35  ;;  %vm7165_vm11 = vcmp.eq.f32.partialorder %v7164_v32, 8.507059e+37 }
 0x801   : > { %v5956_v42 = vmul.f32 %v8651_v33, %v5955_v41 }
 0x803   : > { %v5957_v17 = vadd.f32 %v8651_v33, %v5956_v42 }
 0x804   : > { %v8653_v61 = vpop.eup %8652  ;;  %4097 = vrot.lane.b32.xlu0 %v4042_v24, %s9215_s18 }
 0x805   : > { %v5961_v5 = vsel %vm5960_vm6, %v8651_v33, %v5957_v17  ;;  %v7156_v38 = vmul.f32 %v8653_v61, %v7056_v39  ;;  %vm7161_vm8 = vweird.f32 %v8653_v61  ;;  %v8655_v51 = vpop.eup %8654 }
 0x806   : > { %v5966_v18 = vsel %vm5963_vm7, %v5965_v30, %v5961_v5  ;;  %v4090_v54 = vpop.permute.xlu1 %4089  ;;  %vm7162_vm10 = vmor %vm7160_vm9, %vm7161_vm8  ;;  %v8657_v42 = vpop.eup %8656  ;;  %v3795_v30 = vmul.f32 %v8655_v51, %v13144_v8  ;;  %v15716_v5 = vld [vmem:[#allocation175_spill] sm:$0xff]  ;;  %vm3800_vm12 = vweird.f32 %v8655_v51 }
 0x807   : > { %v6475_v4 = vmul.f32 %v6385_v12, %v5966_v18  ;;  %v7157_v40 = vsub.f32 1.0, %v7156_v38  ;;  %4135 = vst.msk [vmem:[%s12038_s23 + $0x60] sm:$0xff] %vm4131_vm3, %v4090_v54  ;;  %vm3772_vm13 = vweird.f32 %v8657_v42  ;;  %vm3801_vm1 = vmor %vm3799_vm14, %vm3800_vm12 }
 0x808   : > { %5863 = vadd.xlane.f32.xlu2 %v13173_v47  ;;  %v15715_v47 = vld [vmem:[#allocation165_spill] sm:$0xff]  ;;  %v3796_v12 = vsub.f32 1.0, %v3795_v30  ;;  %vm13554_vm2 = vmor %vm3771_vm15, %vm3772_vm13 }
 0x809   : > { %6507 = vst.msk [vmem:[%s12038_s23 + $0x70] sm:$0xff] %vm3008_vm0, %v6475_v4  ;;  %v7158_v29 = vmul.f32 %v8653_v61, %v7157_v40  ;;  %8658 = vrcp.f32 %v15715_v47  ;;  %vm5002_vm7 = vweird.f32 %v15715_v47 }
 0x80a   : > { %v5728_v33 = vpop.xlane.xlu2 %5727  ;;  %v3797_v4 = vmul.f32 %v8655_v51, %v3796_v12 }
 0x80b   : > { %v7159_v10 = vadd.f32 %v8653_v61, %v7158_v29  ;;  %v5771_v3 = vsub.f32 %v13399_v0, %v5728_v33  ;;  %v3767_v0 = vmul.f32 %v8657_v42, %v15714_v58 }
 0x80d   : > { %v7163_v41 = vsel %vm7162_vm10, %v8653_v61, %v7159_v10  ;;  %v5823_v20 = vmul.f32 1.442695, %v5771_v3  ;;  %v3768_v54 = vsub.f32 1.0, %v3767_v0  ;;  %v3798_v10 = vadd.f32 %v8655_v51, %v3797_v4  ;;  %v13561_v4 = vpop.f32.mrf.mxu1 }
 0x80e   : > { %v7168_v24 = vsel %vm7165_vm11, %v7167_v50, %v7163_v41  ;;  %v3805_v3 = vand.u32 2147483648, %v13144_v8  ;;  %v3777_v41 = vand.u32 2147483648, %v15714_v58 }
 0x80f   : > { %v7741_v17 = vmul.f32 %v7651_v13, %v7168_v24  ;;  %8660 = vpow2.f32 %v5823_v20  ;;  %v13539_v38 = vpop.eup %8658  ;;  %v3769_v29 = vmul.f32 %v8657_v42, %v3768_v54  ;;  %v3803_v20 = vand.u32 2147483647, %v13144_v8  ;;  %v15722_v24 = vld [vmem:[#allocation158_spill] sm:$0xff] }
 0x810   : > { %v5357_v39 = vpop.permute.xlu0 %5356  ;;  %7065 = vadd.xlane.f32.xlu2 %v15716_v5  ;;  %v4998_v40 = vmul.f32 %v13539_v38, %v15715_v47  ;;  %v3775_v13 = vand.u32 2147483647, %v15714_v58  ;;  %v3802_v30 = vsel %vm3801_vm1, %v8655_v51, %v3798_v10  ;;  %v3806_v5 = vor.u32 1.1754944e-38, %v3805_v3 }
 0x811   : > { %7773 = vst.msk [vmem:[%s12038_s23 + $0x78] sm:$0xff] %vm3008_vm0, %v7741_v17  ;;  %5731 = vmax.xlane.f32.xlu1 %v13492_v25  ;;  %v3770_v50 = vadd.f32 %v8657_v42, %v3769_v29  ;;  %v3778_v12 = vor.u32 1.1754944e-38, %v3777_v41  ;;  %vm3804_vm4 = vcmp.eq.f32.partialorder %v3803_v20, 8.507059e+37  ;;  %vm5003_vm6 = vweird.f32 %v13539_v38 }
 0x812   : > { %5401 = vst.msk [vmem:[%s12038_s23 + $0x68] sm:$0xff] %vm4131_vm3, %v5357_v39  ;;  %v13537_v61 = vpop.xlane.xlu2 %6929  ;;  %v4999_v33 = vsub.f32 1.0, %v4998_v40  ;;  %v3807_v58 = vsel %vm3804_vm4, %v3806_v5, %v3802_v30  ;;  %vm3776_vm5 = vcmp.eq.f32.partialorder %v3775_v13, 8.507059e+37  ;;  %v5008_v29 = vand.u32 2147483648, %v15715_v47  ;;  %vm13569_vm9 = vmor %vm5002_vm7, %vm5003_vm6 }
 0x813   : > { %v3774_v0 = vsel %vm13554_vm2, %v8657_v42, %v3770_v50  ;;  %v15719_v50 = vld [vmem:[#allocation164_spill] sm:$0xff] }
 0x814   : > { %v5000_v17 = vmul.f32 %v13539_v38, %v4999_v33  ;;  %v5006_v33 = vand.u32 2147483647, %v15715_v47  ;;  %v4043_v41 = vmul.f32 %v15719_v50, %v3807_v58  ;;  %v5009_v5 = vor.u32 1.1754944e-38, %v5008_v29  ;;  %v13583_v29 = vpop.f32.mrf.mxu0 }
 0x815   : > { %v13541_v18 = vpop.eup %8660 }
 0x816   : > { %6435 = vmatmul.f32.gmra.mxu1 %v13541_v18  ;;  %v5001_v51 = vadd.f32 %v13539_v38, %v5000_v17  ;;  %vm5007_vm13 = vcmp.eq.f32.partialorder %v5006_v33, 8.507059e+37 }
 0x818   : > { %v4092_v35 = vpop.permute.xlu0 %4091  ;;  %v5005_v47 = vsel %vm13569_vm9, %v13539_v38, %v5001_v51 }
 0x819   : > { %4136 = vst.msk [vmem:[%s12038_s23 + $0x80] sm:$0xff] %vm4131_vm3, %v4092_v35  ;;  %v3779_v35 = vsel %vm3776_vm5, %v3778_v12, %v3774_v0  ;;  %v13578_v0 = vpop.f32.mrf.mxu3 }
 0x81a   : > { %v5858_v32 = vpop.xlane.xlu2 %5857  ;;  %v4041_v17 = vmul.f32 %v15722_v24, %v3779_v35 }
 0x81b   : > { %8662 = vrcp.f32 %v5858_v32  ;;  %v5992_v42 = vand.u32 2147483648, %v5858_v32  ;;  %v5990_v3 = vand.u32 2147483647, %v5858_v32  ;;  %vm5986_vm10 = vweird.f32 %v5858_v32 }
 0x81d   : > { %v5993_v12 = vor.u32 1.1754944e-38, %v5992_v42  ;;  %vm5991_vm12 = vcmp.eq.f32.partialorder %v5990_v3, 8.507059e+37  ;;  %v15723_v3 = vld [vmem:[#allocation166_spill] sm:$0xff] }
 0x821   : > { %v8663_v39 = vpop.eup %8662 }
 0x822   : > { %v5982_v54 = vmul.f32 %v8663_v39, %v5858_v32  ;;  %v7060_v8 = vpop.xlane.xlu2 %7059  ;;  %vm5987_vm8 = vweird.f32 %v8663_v39 }
 0x823   : > { %8664 = vrcp.f32 %v7060_v8  ;;  %vm5988_vm11 = vmor %vm5986_vm10, %vm5987_vm8  ;;  %v7194_v50 = vand.u32 2147483648, %v7060_v8  ;;  %vm7188_vm15 = vweird.f32 %v7060_v8 }
 0x824   : > { %v5983_v40 = vsub.f32 1.0, %v5982_v54 }
 0x825   : > { %v7195_v20 = vor.u32 1.1754944e-38, %v7194_v50 }
 0x826   : > { %v5984_v10 = vmul.f32 %v8663_v39, %v5983_v40  ;;  %v6391_v40 = vpop.f32.mrf.mxu1 }
 0x828   : > { %v5985_v13 = vadd.f32 %v8663_v39, %v5984_v10  ;;  %4099 = vrot.lane.b32.xlu2 %v4043_v41, %s9215_s18  ;;  %v5010_v10 = vsel %vm5007_vm13, %v5009_v5, %v5005_v47  ;;  %v7657_v5 = vpop.f32.mrf.mxu3 }
 0x829   : > { %v8665_v30 = vpop.eup %8664  ;;  %v5310_v33 = vmul.f32 %v15723_v3, %v5010_v10 }
 0x82a   : > { %v5989_v54 = vsel %vm5988_vm11, %v8663_v39, %v5985_v13  ;;  %v7184_v58 = vmul.f32 %v8665_v30, %v7060_v8  ;;  %4095 = vrot.lane.b32.xlu1 %v4041_v17, %s9215_s18  ;;  %v4094_v32 = vpop.permute.xlu2 %4093  ;;  %vm7189_vm14 = vweird.f32 %v8665_v30  ;;  %v7192_v39 = vand.u32 2147483647, %v7060_v8 }
 0x82b   : > { %v5994_v35 = vsel %vm5991_vm12, %v5993_v12, %v5989_v54  ;;  %4137 = vst.msk [vmem:[%s12038_s23 + $0xa0] sm:$0xff] %vm4131_vm3, %v4094_v32  ;;  %vm7190_vm1 = vmor %vm7188_vm15, %vm7189_vm14  ;;  %v13593_v32 = vpop.f32.mrf.mxu2  ;;  %v6973_v8 = vsub.f32 %v13407_v46, %v13537_v61 }
 0x82c   : > { %v6477_v38 = vmul.f32 %v6391_v40, %v5994_v35  ;;  %v7185_v51 = vsub.f32 1.0, %v7184_v58  ;;  %vm7193_vm2 = vcmp.eq.f32.partialorder %v7192_v39, 8.507059e+37  ;;  %v15724_v35 = vld [vmem:[#allocation170_spill] sm:$0xff] }
 0x82d   : > { %v7025_v40 = vmul.f32 1.442695, %v6973_v8 }
 0x82e   : > { %6509 = vst.msk [vmem:[%s12038_s23 + $0xb0] sm:$0xff] %vm3008_vm0, %v6477_v38  ;;  %v7186_v42 = vmul.f32 %v8665_v30, %v7185_v51  ;;  %5735 = vmax.xlane.f32.xlu0 %v13583_v29  ;;  %v15725_v38 = vld [vmem:[#allocation150_spill] sm:$0xff] }
 0x82f   : > { %vm5016_vm13 = vweird.f32 %v15725_v38 }
 0x830   : > { %v7187_v41 = vadd.f32 %v8665_v30, %v7186_v42  ;;  %5366 = vrot.lane.b32.xlu2 %v5310_v33, %s9215_s18 }
 0x831   : > { %v6928_v13 = vpop.xlane.xlu1 %6927 }
 0x832   : > { %v7191_v24 = vsel %vm7190_vm1, %v8665_v30, %v7187_v41  ;;  %v6972_v17 = vsub.f32 %v13394_v59, %v6928_v13  ;;  %v5361_v47 = vpop.permute.xlu2 %5360 }
 0x833   : > { %v7196_v12 = vsel %vm7193_vm2, %v7195_v20, %v7191_v24  ;;  %5403 = vst.msk [vmem:[%s12038_s23 + $0xa8] sm:$0xff] %vm4131_vm3, %v5361_v47 }
 0x834   : > { %v7743_v54 = vmul.f32 %v7657_v5, %v7196_v12  ;;  %v7023_v58 = vmul.f32 1.442695, %v6972_v17  ;;  %v15726_v5 = vld [vmem:[#allocation155_spill] sm:$0xff] }
 0x836   : > { %7775 = vst.msk [vmem:[%s12038_s23 + $0xb8] sm:$0xff] %vm3008_vm0, %v7743_v54  ;;  %8666 = vpow2.f32 %v7023_v58  ;;  %6937 = vmax.xlane.f32.xlu0 %v13593_v32 }
 0x839   : > { %v5856_v30 = vpop.xlane.xlu1 %5855 }
 0x83a   : > { %8668 = vrcp.f32 %v5856_v30  ;;  %v5978_v39 = vand.u32 2147483648, %v5856_v30  ;;  %v5976_v41 = vand.u32 2147483647, %v5856_v30  ;;  %vm5972_vm5 = vweird.f32 %v5856_v30 }
 0x83b   : > { %8670 = vpow2.f32 %v7025_v40 }
 0x83c   : > { %v13600_v59 = vpop.eup %8666  ;;  %8672 = vrcp.f32 %v15725_v38  ;;  %v5979_v47 = vor.u32 1.1754944e-38, %v5978_v39  ;;  %vm5977_vm7 = vcmp.eq.f32.partialorder %v5976_v41, 8.507059e+37 }
 0x83d   : > { %7698 = vmatmul.f32.gmra.mxu3 %v13600_v59 }
 0x83e   : > { %5865 = vadd.xlane.f32.xlu0 %v15724_v35 }
 0x840   : > { %v8669_v10 = vpop.eup %8668 }
 0x841   : > { %v5968_v51 = vmul.f32 %v8669_v10, %v5856_v30  ;;  %v7058_v46 = vpop.xlane.xlu1 %7057  ;;  %v13605_v42 = vpop.eup %8670  ;;  %vm5973_vm4 = vweird.f32 %v8669_v10 }
 0x842   : > { %8674 = vrcp.f32 %v7058_v46  ;;  %v13610_v13 = vpop.eup %8672  ;;  %vm5974_vm6 = vmor %vm5972_vm5, %vm5973_vm4  ;;  %v7180_v35 = vand.u32 2147483648, %v7058_v46  ;;  %vm7174_vm9 = vweird.f32 %v7058_v46  ;;  %vm3827_vm4 = vweird.f32 %v15726_v5 }
 0x843   : > { %v5969_v61 = vsub.f32 1.0, %v5968_v51  ;;  %v5730_v50 = vpop.xlane.xlu0 %5729  ;;  %v5012_v58 = vmul.f32 %v13610_v13, %v15725_v38  ;;  %vm5017_vm12 = vweird.f32 %v13610_v13 }
 0x844   : > { %v5772_v3 = vsub.f32 %v13467_v53, %v5730_v50  ;;  %vm5018_vm14 = vmor %vm5016_vm13, %vm5017_vm12 }
 0x845   : > { %v5970_v33 = vmul.f32 %v8669_v10, %v5969_v61  ;;  %7701 = vmatmul.f32.gmra.mxu3 %v13605_v42  ;;  %v7178_v61 = vand.u32 2147483647, %v7058_v46 }
 0x846   : > { %v5825_v20 = vmul.f32 1.442695, %v5772_v3  ;;  %7067 = vadd.xlane.f32.xlu0 %v13258_v2  ;;  %v15727_v3 = vld [vmem:[#allocation174_spill] sm:$0xff] }
 0x847   : > { %v5971_v24 = vadd.f32 %v8669_v10, %v5970_v33  ;;  %vm7179_vm11 = vcmp.eq.f32.partialorder %v7178_v61, 8.507059e+37  ;;  %v15729_v61 = vld [vmem:[#allocation156_spill] sm:$0xff] }
 0x848   : > { %v8675_v17 = vpop.eup %8674  ;;  %8676 = vpow2.f32 %v5825_v20 }
 0x849   : > { %8678 = vrcp.f32 %v15726_v5  ;;  %v5975_v53 = vsel %vm5974_vm6, %v8669_v10, %v5971_v24  ;;  %v7170_v12 = vmul.f32 %v8675_v17, %v7058_v46  ;;  %vm7175_vm8 = vweird.f32 %v8675_v17  ;;  %v13621_v10 = vpop.f32.mrf.mxu0 }
 0x84a   : > { %v5980_v54 = vsel %vm5977_vm7, %v5979_v47, %v5975_v53  ;;  %vm7176_vm10 = vmor %vm7174_vm9, %vm7175_vm8 }
 0x84b   : > { %v6476_v2 = vmul.f32 %v13561_v4, %v5980_v54  ;;  %v7171_v8 = vsub.f32 1.0, %v7170_v12  ;;  %v6932_v40 = vpop.xlane.xlu0 %6931  ;;  %v5013_v4 = vsub.f32 1.0, %v5012_v58  ;;  %v13636_v58 = vpop.f32.mrf.mxu2 }
 0x84c   : > { %v6974_v30 = vsub.f32 %v13476_v45, %v6932_v40  ;;  %v7181_v45 = vor.u32 1.1754944e-38, %v7180_v35  ;;  %v5020_v40 = vand.u32 2147483647, %v15725_v38 }
 0x84d   : > { %6508 = vst.msk [vmem:[%s12038_s23 + $0x90] sm:$0xff] %vm3008_vm0, %v6476_v2  ;;  %v7172_v51 = vmul.f32 %v8675_v17, %v7171_v8  ;;  %v5014_v53 = vmul.f32 %v13610_v13, %v5013_v4 }
 0x84e   : > { %v13619_v50 = vpop.eup %8676  ;;  %v7027_v39 = vmul.f32 1.442695, %v6974_v30  ;;  %5867 = vadd.xlane.f32.xlu0 %v15727_v3  ;;  %vm5021_vm15 = vcmp.eq.f32.partialorder %v5020_v40, 8.507059e+37  ;;  %v3831_v40 = vand.u32 2147483647, %v15726_v5 }
 0x84f   : > { %v13624_v33 = vpop.eup %8678  ;;  %v7173_v41 = vadd.f32 %v8675_v17, %v7172_v51  ;;  %6438 = vmatmul.f32.gmra.mxu1 %v13619_v50  ;;  %v5015_v2 = vadd.f32 %v13610_v13, %v5014_v53  ;;  %v3833_v53 = vand.u32 2147483648, %v15726_v5 }
 0x850   : > { %8680 = vpow2.f32 %v7027_v39  ;;  %v3823_v24 = vmul.f32 %v13624_v33, %v15726_v5  ;;  %vm3828_vm1 = vweird.f32 %v13624_v33  ;;  %vm3832_vm9 = vcmp.eq.f32.partialorder %v3831_v40, 8.507059e+37 }
 0x851   : > { %v7177_v20 = vsel %vm7176_vm10, %v8675_v17, %v7173_v41  ;;  %v13641_v8 = vpop.f32.mrf.mxu0  ;;  %v5019_v39 = vsel %vm5018_vm14, %v13610_v13, %v5015_v2  ;;  %v15731_v2 = vld [vmem:[#allocation171_spill] sm:$0xff]  ;;  %vm13663_vm5 = vmor %vm3827_vm4, %vm3828_vm1  ;;  %v3834_v5 = vor.u32 1.1754944e-38, %v3833_v53 }
 0x852   : > { %v7182_v47 = vsel %vm7179_vm11, %v7181_v45, %v7177_v20  ;;  %v3824_v17 = vsub.f32 1.0, %v3823_v24  ;;  %v15730_v45 = vld [vmem:[#allocation159_spill] sm:$0xff] }
 0x853   : > { %v7742_v12 = vmul.f32 %v13578_v0, %v7182_v47  ;;  %v5860_v54 = vpop.xlane.xlu0 %5859  ;;  %v5022_v0 = vand.u32 2147483648, %v15725_v38  ;;  %v13656_v13 = vpop.f32.mrf.mxu2 }
 0x854   : > { %8682 = vrcp.f32 %v5860_v54  ;;  %6933 = vmax.xlane.f32.xlu1 %v13499_v21  ;;  %v3825_v51 = vmul.f32 %v13624_v33, %v3824_v17  ;;  %v6006_v47 = vand.u32 2147483648, %v5860_v54  ;;  %v6004_v17 = vand.u32 2147483647, %v5860_v54 }
 0x855   : > { %7774 = vst.msk [vmem:[%s12038_s23 + $0x98] sm:$0xff] %vm3008_vm0, %v7742_v12  ;;  %8684 = vrcp.f32 %v15729_v61  ;;  %v5023_v41 = vor.u32 1.1754944e-38, %v5022_v0  ;;  %vm6000_vm6 = vweird.f32 %v5860_v54 }
 0x856   : > { %v13634_v46 = vpop.eup %8680  ;;  %v3826_v24 = vadd.f32 %v13624_v33, %v3825_v51  ;;  %vm6005_vm8 = vcmp.eq.f32.partialorder %v6004_v17, 8.507059e+37 }
 0x857   : > { %15728 = vst [vmem:[#allocation20_spill] sm:$0xff] %v13634_v46  ;;  %7704 = vmatmul.f32.gmra.mxu3 %v13634_v46  ;;  %v5024_v20 = vsel %vm5021_vm15, %v5023_v41, %v5019_v39  ;;  %vm4988_vm15 = vweird.f32 %v15729_v61 }
 0x858   : > { %v5311_v0 = vmul.f32 %v15731_v2, %v5024_v20  ;;  %v3830_v41 = vsel %vm13663_vm5, %v13624_v33, %v3826_v24  ;;  %v6394_v2 = vpop.f32.mrf.mxu1 }
 0x859   : > { %v5359_v35 = vpop.permute.xlu1 %5358  ;;  %5739 = vmax.xlane.f32.xlu2 %v13641_v8  ;;  %v3835_v6 = vsel %vm3832_vm9, %v3834_v5, %v3830_v41  ;;  %v13678_v17 = vpop.f32.mrf.mxu0 }
 0x85a   : > { %v8683_v30 = vpop.eup %8682  ;;  %5402 = vst.msk [vmem:[%s12038_s23 + $0x88] sm:$0xff] %vm4131_vm3, %v5359_v35 }
 0x85b   : > { %v5996_v3 = vmul.f32 %v8683_v30, %v5860_v54  ;;  %v7062_v4 = vpop.xlane.xlu0 %7061  ;;  %vm6001_vm2 = vweird.f32 %v8683_v30  ;;  %v13661_v35 = vpop.eup %8684  ;;  %v15734_v54 = vld [vmem:[#allocation161_spill] sm:$0xff] }
 0x85c   : > { %8686 = vrcp.f32 %v7062_v4  ;;  %5861 = vadd.xlane.f32.xlu1 %v15730_v45  ;;  %vm6002_vm7 = vmor %vm6000_vm6, %vm6001_vm2  ;;  %v6007_v45 = vor.u32 1.1754944e-38, %v6006_v47  ;;  %v4984_v46 = vmul.f32 %v13661_v35, %v15729_v61  ;;  %v7208_v24 = vand.u32 2147483648, %v7062_v4  ;;  %v15735_v47 = vld [vmem:[#allocation173_spill] sm:$0xff] }
 0x85d   : > { %v5997_v38 = vsub.f32 1.0, %v5996_v3  ;;  %8688 = vrcp.f32 %v15735_v47  ;;  %vm7202_vm11 = vweird.f32 %v7062_v4  ;;  %vm4989_vm14 = vweird.f32 %v13661_v35 }
 0x85e   : > { %v7209_v41 = vor.u32 1.1754944e-38, %v7208_v24  ;;  %v4992_v24 = vand.u32 2147483647, %v15729_v61  ;;  %vm4990_vm1 = vmor %vm4988_vm15, %vm4989_vm14  ;;  %vm3841_vm5 = vweird.f32 %v15735_v47 }
 0x85f   : > { %v5998_v12 = vmul.f32 %v8683_v30, %v5997_v38 }
 0x860   : > { %vm4993_vm2 = vcmp.eq.f32.partialorder %v4992_v24, 8.507059e+37 }
 0x861   : > { %v5999_v39 = vadd.f32 %v8683_v30, %v5998_v12  ;;  %6941 = vmax.xlane.f32.xlu2 %v13656_v13 }
 0x862   : > { %v8687_v3 = vpop.eup %8686  ;;  %5368 = vrot.lane.b32.xlu0 %v5311_v0, %s9215_s18  ;;  %v15736_v0 = vld [vmem:[#allocation172_spill] sm:$0xff] }
 0x863   : > { %v6003_v38 = vsel %vm6002_vm7, %v8683_v30, %v5999_v39  ;;  %v7198_v20 = vmul.f32 %v8687_v3, %v7062_v4  ;;  %vm7203_vm10 = vweird.f32 %v8687_v3  ;;  %v7206_v30 = vand.u32 2147483647, %v7062_v4 }
 0x864   : > { %v6008_v12 = vsel %vm6005_vm8, %v6007_v45, %v6003_v38  ;;  %7063 = vadd.xlane.f32.xlu1 %v15734_v54  ;;  %v4045_v40 = vmul.f32 %v15736_v0, %v3835_v6  ;;  %v4985_v39 = vsub.f32 1.0, %v4984_v46  ;;  %vm7204_vm12 = vmor %vm7202_vm11, %vm7203_vm10 }
 0x865   : > { %v6478_v51 = vmul.f32 %v6394_v2, %v6008_v12  ;;  %v7199_v33 = vsub.f32 1.0, %v7198_v20  ;;  %vm7207_vm13 = vcmp.eq.f32.partialorder %v7206_v30, 8.507059e+37  ;;  %v7660_v20 = vpop.f32.mrf.mxu3  ;;  %v8689_v12 = vpop.eup %8688 }
 0x866   : > { %v4986_v6 = vmul.f32 %v13661_v35, %v4985_v39  ;;  %v3837_v4 = vmul.f32 %v8689_v12, %v15735_v47  ;;  %vm3842_vm4 = vweird.f32 %v8689_v12 }
 0x867   : > { %6510 = vst.msk [vmem:[%s12038_s23 + $0xd0] sm:$0xff] %vm3008_vm0, %v6478_v51  ;;  %v7200_v53 = vmul.f32 %v8687_v3, %v7199_v33  ;;  %v4994_v51 = vand.u32 2147483648, %v15729_v61  ;;  %v3845_v61 = vand.u32 2147483647, %v15735_v47  ;;  %vm3843_vm6 = vmor %vm3841_vm5, %vm3842_vm4 }
 0x869   : > { %v7201_v45 = vadd.f32 %v8687_v3, %v7200_v53  ;;  %5741 = vmax.xlane.f32.xlu2 %v13678_v17  ;;  %v3838_v53 = vsub.f32 1.0, %v3837_v4  ;;  %v4995_v0 = vor.u32 1.1754944e-38, %v4994_v51  ;;  %vm3846_vm7 = vcmp.eq.f32.partialorder %v3845_v61, 8.507059e+37  ;;  %v13707_v51 = vpop.f32.mrf.mxu1 }
 0x86a   : > { %4103 = vrot.lane.b32.xlu0 %v4045_v40, %s9215_s18 }
 0x86b   : > { %v7205_v5 = vsel %vm7204_vm12, %v8687_v3, %v7201_v45  ;;  %v13683_v38 = vpop.xlane.xlu2 %5733  ;;  %v4987_v3 = vadd.f32 %v13661_v35, %v4986_v6 }
 0x86c   : > { %v7210_v2 = vsel %vm7207_vm13, %v7209_v41, %v7205_v5  ;;  %v15737_v41 = vld [vmem:[#allocation163_spill] sm:$0xff] }
 0x86d   : > { %v7744_v46 = vmul.f32 %v7660_v20, %v7210_v2  ;;  %v4991_v30 = vsel %vm4990_vm1, %v13661_v35, %v4987_v3  ;;  %v3847_v2 = vand.u32 2147483648, %v15735_v47  ;;  %v13714_v61 = vpop.f32.mrf.mxu3 }
 0x86e   : > { %v5363_v54 = vpop.permute.xlu0 %5362  ;;  %v4996_v39 = vsel %vm4993_vm2, %v4995_v0, %v4991_v30 }
 0x86f   : > { %7776 = vst.msk [vmem:[%s12038_s23 + $0xd8] sm:$0xff] %vm3008_vm0, %v7744_v46  ;;  %v5309_v5 = vmul.f32 %v15737_v41, %v4996_v39  ;;  %v3848_v6 = vor.u32 1.1754944e-38, %v3847_v2  ;;  %v5774_v39 = vsub.f32 %v13501_v57, %v13683_v38 }
 0x870   : > { %5404 = vst.msk [vmem:[%s12038_s23 + $0xc8] sm:$0xff] %vm4131_vm3, %v5363_v54 }
 0x871   : > { %7071 = vadd.xlane.f32.xlu2 %v13304_v11  ;;  %v3839_v11 = vmul.f32 %v8689_v12, %v3838_v53  ;;  %v5829_v57 = vmul.f32 1.442695, %v5774_v39 }
 0x873   : > { %v13696_v33 = vpop.xlane.xlu2 %6935  ;;  %v3840_v20 = vadd.f32 %v8689_v12, %v3839_v11 }
 0x875   : > { %v3844_v35 = vsel %vm3843_vm6, %v8689_v12, %v3840_v20 }
 0x876   : > { %v4098_v40 = vpop.permute.xlu0 %4097  ;;  %v3849_v3 = vsel %vm3846_vm7, %v3848_v6, %v3844_v35  ;;  %v6400_v35 = vpop.f32.mrf.mxu1 }
 0x877   : > { %4139 = vst.msk [vmem:[%s12038_s23 + $0xe0] sm:$0xff] %vm4131_vm3, %v4098_v40  ;;  %v4046_v40 = vmul.f32 %v13250_v44, %v3849_v3 }
 0x87b   : > { %v5864_v45 = vpop.xlane.xlu2 %5863 }
 0x87c   : > { %8690 = vrcp.f32 %v5864_v45  ;;  %v6034_v0 = vand.u32 2147483648, %v5864_v45  ;;  %v6032_v47 = vand.u32 2147483647, %v5864_v45  ;;  %vm6028_vm9 = vweird.f32 %v5864_v45 }
 0x87d   : > { %5364 = vrot.lane.b32.xlu1 %v5309_v5, %s9215_s18 }
 0x87e   : > { %vm6033_vm11 = vcmp.eq.f32.partialorder %v6032_v47, 8.507059e+37  ;;  %v7666_v47 = vpop.f32.mrf.mxu3 }
 0x882   : > { %v8691_v46 = vpop.eup %8690 }
 0x883   : > { %v6024_v54 = vmul.f32 %v8691_v46, %v5864_v45  ;;  %v7066_v4 = vpop.xlane.xlu2 %7065  ;;  %vm6029_vm8 = vweird.f32 %v8691_v46 }
 0x884   : > { %v5732_v24 = vpop.xlane.xlu1 %5731  ;;  %8692 = vrcp.f32 %v7066_v4  ;;  %vm6030_vm10 = vmor %vm6028_vm9, %vm6029_vm8  ;;  %vm7230_vm13 = vweird.f32 %v7066_v4 }
 0x885   : > { %v6025_v53 = vsub.f32 1.0, %v6024_v54  ;;  %v5773_v30 = vsub.f32 %v13492_v25, %v5732_v24  ;;  %v6035_v25 = vor.u32 1.1754944e-38, %v6034_v0  ;;  %v7236_v54 = vand.u32 2147483648, %v7066_v4  ;;  %v13723_v0 = vpop.f32.mrf.mxu2 }
 0x887   : > { %v6026_v11 = vmul.f32 %v8691_v46, %v6025_v53  ;;  %v5827_v12 = vmul.f32 1.442695, %v5773_v30  ;;  %v7237_v30 = vor.u32 1.1754944e-38, %v7236_v54 }
 0x889   : > { %v6027_v41 = vadd.f32 %v8691_v46, %v6026_v11  ;;  %8694 = vpow2.f32 %v5827_v12  ;;  %4105 = vrot.lane.b32.xlu2 %v4046_v40, %s9215_s18 }
 0x88a   : > { %v8693_v5 = vpop.eup %8692  ;;  %8696 = vpow2.f32 %v5829_v57 }
 0x88b   : > { %v6031_v20 = vsel %vm6030_vm10, %v8691_v46, %v6027_v41  ;;  %v7226_v44 = vmul.f32 %v8693_v5, %v7066_v4  ;;  %v4100_v2 = vpop.permute.xlu2 %4099  ;;  %vm7231_vm12 = vweird.f32 %v8693_v5  ;;  %v7234_v46 = vand.u32 2147483647, %v7066_v4  ;;  %v15739_v4 = vld [vmem:[#allocation160_spill] sm:$0xff] }
 0x88c   : > { %v6036_v6 = vsel %vm6033_vm11, %v6035_v25, %v6031_v20  ;;  %4140 = vst.msk [vmem:[%s12038_s23 + $0x100] sm:$0xff] %vm4131_vm3, %v4100_v2  ;;  %vm7232_vm14 = vmor %vm7230_vm13, %vm7231_vm12  ;;  %8698 = vrcp.f32 %v15739_v4  ;;  %vm5058_vm2 = vweird.f32 %v15739_v4 }
 0x88d   : > { %v6480_v38 = vmul.f32 %v6400_v35, %v6036_v6  ;;  %v7227_v45 = vsub.f32 1.0, %v7226_v44  ;;  %vm7235_vm15 = vcmp.eq.f32.partialorder %v7234_v46, 8.507059e+37  ;;  %v15741_v44 = vld [vmem:[#allocation167_spill] sm:$0xff] }
 0x88e   : > { %vm3869_vm10 = vweird.f32 %v15741_v44 }
 0x88f   : > { %v13718_v3 = vpop.eup %8694  ;;  %6512 = vst.msk [vmem:[%s12038_s23 + $0x110] sm:$0xff] %vm3008_vm0, %v6480_v38  ;;  %v7228_v24 = vmul.f32 %v8693_v5, %v7227_v45 }
 0x890   : > { %15738 = vst [vmem:[#allocation32_spill] sm:$0xff] %v13718_v3  ;;  %6441 = vmatmul.f32.gmra.mxu1 %v13718_v3  ;;  %v13728_v41 = vpop.eup %8696 }
 0x891   : > { %v7229_v53 = vadd.f32 %v8693_v5, %v7228_v24 }
 0x892   : > { %v8699_v20 = vpop.eup %8698 }
 0x893   : > { %v7233_v40 = vsel %vm7232_vm14, %v8693_v5, %v7229_v53  ;;  %v5367_v11 = vpop.permute.xlu2 %5366  ;;  %v15740_v5 = vld [vmem:[#allocation157_spill] sm:$0xff]  ;;  %v5054_v35 = vmul.f32 %v8699_v20, %v15739_v4  ;;  %vm5059_vm1 = vweird.f32 %v8699_v20 }
 0x894   : > { %v7238_v12 = vsel %vm7235_vm15, %v7237_v30, %v7233_v40  ;;  %5406 = vst.msk [vmem:[%s12038_s23 + $0x108] sm:$0xff] %vm4131_vm3, %v5367_v11  ;;  %6943 = vmax.xlane.f32.xlu0 %v13723_v0  ;;  %8700 = vrcp.f32 %v15740_v5  ;;  %v5064_v11 = vand.u32 2147483648, %v15739_v4  ;;  %vm5060_vm4 = vmor %vm5058_vm2, %vm5059_vm1  ;;  %vm3813_vm8 = vweird.f32 %v15740_v5 }
 0x895   : > { %v7746_v39 = vmul.f32 %v7666_v47, %v7238_v12  ;;  %8702 = vrcp.f32 %v15741_v44  ;;  %v5055_v54 = vsub.f32 1.0, %v5054_v35  ;;  %v5062_v12 = vand.u32 2147483647, %v15739_v4 }
 0x896   : > { %v5065_v35 = vor.u32 1.1754944e-38, %v5064_v11  ;;  %v3819_v4 = vand.u32 2147483648, %v15740_v5 }
 0x897   : > { %7778 = vst.msk [vmem:[%s12038_s23 + $0x118] sm:$0xff] %vm3008_vm0, %v7746_v39  ;;  %v5056_v53 = vmul.f32 %v8699_v20, %v5055_v54  ;;  %vm5063_vm6 = vcmp.eq.f32.partialorder %v5062_v12, 8.507059e+37 }
 0x898   : > { %6444 = vmatmul.f32.gmra.mxu1 %v13728_v41 }
 0x89a   : > { %v13741_v57 = vpop.eup %8700 }
 0x89b   : > { %v8703_v45 = vpop.eup %8702  ;;  %vm3814_vm5 = vweird.f32 %v13741_v57 }
 0x89c   : > { %v4096_v25 = vpop.permute.xlu1 %4095  ;;  %7073 = vadd.xlane.f32.xlu0 %v13318_v37  ;;  %v3809_v37 = vmul.f32 %v13741_v57, %v15740_v5  ;;  %v3865_v24 = vmul.f32 %v8703_v45, %v15741_v44  ;;  %vm3870_vm7 = vweird.f32 %v8703_v45  ;;  %vm13764_vm9 = vmor %vm3813_vm8, %vm3814_vm5 }
 0x89d   : > { %4138 = vst.msk [vmem:[%s12038_s23 + $0xc0] sm:$0xff] %vm4131_vm3, %v4096_v25  ;;  %vm13774_vm11 = vmor %vm3869_vm10, %vm3870_vm7  ;;  %vm5044_vm7 = vweird.f32 %v13267_v49 }
 0x89e   : > { %v3866_v40 = vsub.f32 1.0, %v3865_v24  ;;  %v3873_v24 = vand.u32 2147483647, %v15741_v44 }
 0x8a0   : > { %v3867_v39 = vmul.f32 %v8703_v45, %v3866_v40  ;;  %vm3874_vm12 = vcmp.eq.f32.partialorder %v3873_v24, 8.507059e+37 }
 0x8a1   : > { %v5736_v2 = vpop.xlane.xlu0 %5735 }
 0x8a2   : > { %v5775_v6 = vsub.f32 %v13583_v29, %v5736_v2  ;;  %v3810_v29 = vsub.f32 1.0, %v3809_v37  ;;  %v3875_v37 = vand.u32 2147483648, %v15741_v44  ;;  %v3820_v44 = vor.u32 1.1754944e-38, %v3819_v4 }
 0x8a4   : > { %v5831_v38 = vmul.f32 1.442695, %v5775_v6  ;;  %5873 = vadd.xlane.f32.xlu0 %v13302_v14  ;;  %v5057_v14 = vadd.f32 %v8699_v20, %v5056_v53  ;;  %v3811_v47 = vmul.f32 %v13741_v57, %v3810_v29  ;;  %v3868_v6 = vadd.f32 %v8703_v45, %v3867_v39 }
 0x8a5   : > { %v3817_v53 = vand.u32 2147483647, %v15740_v5  ;;  %v3876_v5 = vor.u32 1.1754944e-38, %v3875_v37  ;;  %v15746_v37 = vld [vmem:[#allocation168_spill] sm:$0xff] }
 0x8a6   : > { %8704 = vpow2.f32 %v5831_v38  ;;  %v5061_v2 = vsel %vm5060_vm4, %v8699_v20, %v5057_v14  ;;  %v3812_v38 = vadd.f32 %v13741_v57, %v3811_v47  ;;  %v3872_v11 = vsel %vm13774_vm11, %v8703_v45, %v3868_v6  ;;  %v13784_v47 = vpop.f32.mrf.mxu0 }
 0x8a7   : > { %5737 = vmax.xlane.f32.xlu1 %v13621_v10  ;;  %8706 = vrcp.f32 %v13267_v49  ;;  %v5066_v54 = vsel %vm5063_vm6, %v5065_v35, %v5061_v2  ;;  %vm3818_vm13 = vcmp.eq.f32.partialorder %v3817_v53, 8.507059e+37  ;;  %v3877_v45 = vsel %vm3874_vm12, %v3876_v5, %v3872_v11 }
 0x8a9   : > { %v13748_v46 = vpop.xlane.xlu0 %6937 }
 0x8ac   : > { %v13750_v30 = vpop.eup %8704 }
 0x8ad   : > { %6447 = vmatmul.f32.gmra.mxu1 %v13750_v30  ;;  %v13772_v29 = vpop.eup %8706 }
 0x8ae   : > { %v5040_v2 = vmul.f32 %v13772_v29, %v13267_v49  ;;  %vm5045_vm5 = vweird.f32 %v13772_v29 }
 0x8b0   : > { %v5041_v4 = vsub.f32 1.0, %v5040_v2 }
 0x8b1   : > { %v5866_v25 = vpop.xlane.xlu0 %5865 }
 0x8b2   : > { %8708 = vrcp.f32 %v5866_v25  ;;  %5871 = vadd.xlane.f32.xlu2 %v13287_v27  ;;  %v5314_v27 = vmul.f32 %v13291_v60, %v5066_v54  ;;  %v3816_v60 = vsel %vm13764_vm9, %v13741_v57, %v3812_v38  ;;  %v6048_v54 = vand.u32 2147483648, %v5866_v25  ;;  %vm13802_vm9 = vmor %vm5044_vm7, %vm5045_vm5 }
 0x8b3   : > { %v3821_v6 = vsel %vm3818_vm13, %v3820_v44, %v3816_v60  ;;  %v6046_v57 = vand.u32 2147483647, %v5866_v25  ;;  %v4048_v38 = vmul.f32 %v13289_v15, %v3877_v45  ;;  %vm6042_vm15 = vweird.f32 %v5866_v25  ;;  %v6403_v15 = vpop.f32.mrf.mxu1 }
 0x8b4   : > { %v6049_v3 = vor.u32 1.1754944e-38, %v6048_v54  ;;  %v5042_v44 = vmul.f32 %v13772_v29, %v5041_v4  ;;  %v5048_v4 = vand.u32 2147483647, %v13267_v49 }
 0x8b5   : > { %vm6047_vm2 = vcmp.eq.f32.partialorder %v6046_v57, 8.507059e+37 }
 0x8b6   : > { %vm5049_vm11 = vcmp.eq.f32.partialorder %v5048_v4, 8.507059e+37 }
 0x8b8   : > { %v8709_v14 = vpop.eup %8708  ;;  %5374 = vrot.lane.b32.xlu0 %v5314_v27, %s9215_s18  ;;  %v4044_v27 = vmul.f32 %v15746_v37, %v3821_v6  ;;  %v5050_v6 = vand.u32 2147483648, %v13267_v49  ;;  %v6976_v49 = vsub.f32 %v13515_v55, %v13696_v33 }
 0x8b9   : > { %v6038_v12 = vmul.f32 %v8709_v14, %v5866_v25  ;;  %v7068_v39 = vpop.xlane.xlu0 %7067  ;;  %vm6043_vm14 = vweird.f32 %v8709_v14 }
 0x8ba   : > { %8710 = vrcp.f32 %v7068_v39  ;;  %5743 = vmax.xlane.f32.xlu2 %v13784_v47  ;;  %vm6044_vm1 = vmor %vm6042_vm15, %vm6043_vm14  ;;  %v7250_v25 = vand.u32 2147483648, %v7068_v39  ;;  %vm7244_vm6 = vweird.f32 %v7068_v39 }
 0x8bb   : > { %v6039_v35 = vsub.f32 1.0, %v6038_v12 }
 0x8bd   : > { %v6040_v20 = vmul.f32 %v8709_v14, %v6039_v35  ;;  %v7248_v35 = vand.u32 2147483647, %v7068_v39 }
 0x8bf   : > { %v6041_v24 = vadd.f32 %v8709_v14, %v6040_v20  ;;  %vm7249_vm10 = vcmp.eq.f32.partialorder %v7248_v35, 8.507059e+37 }
 0x8c0   : > { %v8711_v40 = vpop.eup %8710  ;;  %4109 = vrot.lane.b32.xlu0 %v4048_v38, %s9215_s18  ;;  %4101 = vrot.lane.b32.xlu1 %v4044_v27, %s9215_s18 }
 0x8c1   : > { %v6045_v53 = vsel %vm6044_vm1, %v8709_v14, %v6041_v24  ;;  %v7240_v11 = vmul.f32 %v8711_v40, %v7068_v39  ;;  %v5868_v60 = vpop.xlane.xlu0 %5867  ;;  %vm7245_vm4 = vweird.f32 %v8711_v40  ;;  %v5043_v14 = vadd.f32 %v13772_v29, %v5042_v44 }
 0x8c2   : > { %v6050_v5 = vsel %vm6047_vm2, %v6049_v3, %v6045_v53  ;;  %8712 = vrcp.f32 %v5868_v60  ;;  %vm7246_vm8 = vmor %vm7244_vm6, %vm7245_vm4  ;;  %v7251_v3 = vor.u32 1.1754944e-38, %v7250_v25  ;;  %v7669_v53 = vpop.f32.mrf.mxu3  ;;  %v6060_v25 = vand.u32 2147483647, %v5868_v60 }
 0x8c3   : > { %v6481_v12 = vmul.f32 %v6403_v15, %v6050_v5  ;;  %v7241_v2 = vsub.f32 1.0, %v7240_v11  ;;  %v5047_v44 = vsel %vm13802_vm9, %v13772_v29, %v5043_v14  ;;  %v5051_v15 = vor.u32 1.1754944e-38, %v5050_v6 }
 0x8c4   : > { %vm6056_vm13 = vweird.f32 %v5868_v60  ;;  %v7031_v14 = vmul.f32 1.442695, %v6976_v49  ;;  %vm6061_vm15 = vcmp.eq.f32.partialorder %v6060_v25, 8.507059e+37 }
 0x8c5   : > { %6513 = vst.msk [vmem:[%s12038_s23 + $0x130] sm:$0xff] %vm3008_vm0, %v6481_v12  ;;  %v7242_v45 = vmul.f32 %v8711_v40, %v7241_v2  ;;  %v6062_v12 = vand.u32 2147483648, %v5868_v60 }
 0x8c7   : > { %v7243_v54 = vadd.f32 %v8711_v40, %v7242_v45  ;;  %v6934_v20 = vpop.xlane.xlu1 %6933  ;;  %v5052_v45 = vsel %vm5049_vm11, %v5051_v15, %v5047_v44  ;;  %v6063_v6 = vor.u32 1.1754944e-38, %v6062_v12  ;;  %v13835_v12 = vpop.f32.mrf.mxu2 }
 0x8c8   : > { %v8713_v57 = vpop.eup %8712  ;;  %v6975_v38 = vsub.f32 %v13499_v21, %v6934_v20  ;;  %v5313_v55 = vmul.f32 %v13274_v31, %v5052_v45  ;;  %v6406_v20 = vpop.f32.mrf.mxu1 }
 0x8c9   : > { %v7247_v27 = vsel %vm7246_vm8, %v8711_v40, %v7243_v54  ;;  %v6052_v24 = vmul.f32 %v8713_v57, %v5868_v60  ;;  %vm6057_vm12 = vweird.f32 %v8713_v57  ;;  %v6977_v60 = vsub.f32 %v13593_v32, %v13748_v46 }
 0x8ca   : > { %v7252_v39 = vsel %vm7249_vm10, %v7251_v3, %v7247_v27  ;;  %v7029_v11 = vmul.f32 1.442695, %v6975_v38  ;;  %vm6058_vm14 = vmor %vm6056_vm13, %vm6057_vm12 }
 0x8cb   : > { %v7747_v5 = vmul.f32 %v7669_v53, %v7252_v39  ;;  %v6053_v21 = vsub.f32 1.0, %v6052_v24  ;;  %v7033_v24 = vmul.f32 1.442695, %v6977_v60 }
 0x8cc   : > { %8714 = vpow2.f32 %v7029_v11  ;;  %v13811_v2 = vpop.xlane.xlu2 %5739 }
 0x8cd   : > { %7779 = vst.msk [vmem:[%s12038_s23 + $0x138] sm:$0xff] %vm3008_vm0, %v7747_v5  ;;  %v6054_v40 = vmul.f32 %v8713_v57, %v6053_v21 }
 0x8cf   : > { %v6055_v35 = vadd.f32 %v8713_v57, %v6054_v40  ;;  %v5862_v29 = vpop.xlane.xlu1 %5861 }
 0x8d0   : > { %8716 = vrcp.f32 %v5862_v29  ;;  %v6020_v11 = vand.u32 2147483648, %v5862_v29  ;;  %v6018_v32 = vand.u32 2147483647, %v5862_v29  ;;  %vm6014_vm2 = vweird.f32 %v5862_v29 }
 0x8d1   : > { %v6059_v33 = vsel %vm6058_vm14, %v8713_v57, %v6055_v35  ;;  %8718 = vpow2.f32 %v7031_v14 }
 0x8d2   : > { %v13816_v54 = vpop.eup %8714  ;;  %v6064_v3 = vsel %vm6061_vm15, %v6063_v6, %v6059_v33  ;;  %5372 = vrot.lane.b32.xlu2 %v5313_v55, %s9215_s18  ;;  %v6021_v49 = vor.u32 1.1754944e-38, %v6020_v11  ;;  %vm6019_vm5 = vcmp.eq.f32.partialorder %v6018_v32, 8.507059e+37  ;;  %v13853_v11 = vpop.f32.mrf.mxu3  ;;  %vm5100_vm15 = vweird.f32 %v13296_v19 }
 0x8d3   : > { %v6482_v38 = vmul.f32 %v6406_v20, %v6064_v3  ;;  %7707 = vmatmul.f32.gmra.mxu3 %v13816_v54 }
 0x8d4   : > { %v5369_v4 = vpop.permute.xlu0 %5368  ;;  %v13822_v37 = vpop.xlane.xlu2 %6941 }
 0x8d5   : > { %6514 = vst.msk [vmem:[%s12038_s23 + $0x150] sm:$0xff] %vm3008_vm0, %v6482_v38 }
 0x8d6   : > { %v8717_v31 = vpop.eup %8716  ;;  %5407 = vst.msk [vmem:[%s12038_s23 + $0x128] sm:$0xff] %vm4131_vm3, %v5369_v4 }
 0x8d7   : > { %v6010_v57 = vmul.f32 %v8717_v31, %v5862_v29  ;;  %v7064_v27 = vpop.xlane.xlu1 %7063  ;;  %v13828_v39 = vpop.eup %8718  ;;  %vm6015_vm1 = vweird.f32 %v8717_v31 }
 0x8d8   : > { %8720 = vrcp.f32 %v7064_v27  ;;  %vm6016_vm4 = vmor %vm6014_vm2, %vm6015_vm1  ;;  %v7222_v55 = vand.u32 2147483648, %v7064_v27  ;;  %v7220_v33 = vand.u32 2147483647, %v7064_v27  ;;  %vm7216_vm7 = vweird.f32 %v7064_v27 }
 0x8d9   : > { %v6011_v53 = vsub.f32 1.0, %v6010_v57  ;;  %8722 = vpow2.f32 %v7033_v24 }
 0x8da   : > { %v7223_v38 = vor.u32 1.1754944e-38, %v7222_v55  ;;  %vm7221_vm9 = vcmp.eq.f32.partialorder %v7220_v33, 8.507059e+37 }
 0x8db   : > { %v6012_v44 = vmul.f32 %v8717_v31, %v6011_v53  ;;  %7710 = vmatmul.f32.gmra.mxu3 %v13828_v39 }
 0x8dc   : > { %v4104_v46 = vpop.permute.xlu0 %4103  ;;  %v13831_v15 = vpop.xlane.xlu2 %5741 }
 0x8dd   : > { %v6013_v5 = vadd.f32 %v8717_v31, %v6012_v44  ;;  %4142 = vst.msk [vmem:[%s12038_s23 + $0x140] sm:$0xff] %vm4131_vm3, %v4104_v46 }
 0x8de   : > { %v8721_v21 = vpop.eup %8720 }
 0x8df   : > { %v6017_v40 = vsel %vm6016_vm4, %v8717_v31, %v6013_v5  ;;  %v7212_v25 = vmul.f32 %v8721_v21, %v7064_v27  ;;  %v13838_v6 = vpop.eup %8722  ;;  %vm7217_vm6 = vweird.f32 %v8721_v21  ;;  %v13845_v31 = vpop.f32.mrf.mxu2 }
 0x8e0   : > { %v6022_v45 = vsel %vm6019_vm5, %v6021_v49, %v6017_v40  ;;  %vm7218_vm8 = vmor %vm7216_vm7, %vm7217_vm6  ;;  %v15749_v49 = vld [vmem:[#allocation162_spill] sm:$0xff] }
 0x8e1   : > { %v6479_v35 = vmul.f32 %v13707_v51, %v6022_v45  ;;  %v7213_v14 = vsub.f32 1.0, %v7212_v25  ;;  %v13843_v51 = vpop.f32.mrf.mxu0  ;;  %vm5030_vm5 = vweird.f32 %v15749_v49 }
 0x8e3   : > { %6511 = vst.msk [vmem:[%s12038_s23 + $0xf0] sm:$0xff] %vm3008_vm0, %v6479_v35  ;;  %v7214_v29 = vmul.f32 %v8721_v21, %v7213_v14  ;;  %7713 = vmatmul.f32.gmra.mxu3 %v13838_v6  ;;  %v7675_v14 = vpop.f32.mrf.mxu3 }
 0x8e4   : > { %v7072_v20 = vpop.xlane.xlu2 %7071 }
 0x8e5   : > { %v7215_v3 = vadd.f32 %v8721_v21, %v7214_v29  ;;  %8724 = vrcp.f32 %v7072_v20  ;;  %v7278_v32 = vand.u32 2147483648, %v7072_v20  ;;  %v7276_v5 = vand.u32 2147483647, %v7072_v20 }
 0x8e6   : > { %8726 = vrcp.f32 %v13296_v19  ;;  %vm7272_vm11 = vweird.f32 %v7072_v20 }
 0x8e7   : > { %v7219_v60 = vsel %vm7218_vm8, %v8721_v21, %v7215_v3  ;;  %8728 = vrcp.f32 %v15749_v49  ;;  %v7279_v45 = vor.u32 1.1754944e-38, %v7278_v32  ;;  %vm7277_vm13 = vcmp.eq.f32.partialorder %v7276_v5, 8.507059e+37 }
 0x8e8   : > { %v7224_v4 = vsel %vm7221_vm9, %v7223_v38, %v7219_v60  ;;  %8730 = vrcp.f32 %v13298_v9  ;;  %v15750_v60 = vld [vmem:[#allocation169_spill] sm:$0xff]  ;;  %vm3883_vm8 = vweird.f32 %v13298_v9 }
 0x8e9   : > { %v7745_v57 = vmul.f32 %v13714_v61, %v7224_v4  ;;  %v13859_v21 = vpop.f32.mrf.mxu0  ;;  %8732 = vrcp.f32 %v15750_v60 }
 0x8ea   : > { %6947 = vmax.xlane.f32.xlu0 %v13845_v31  ;;  %6939 = vmax.xlane.f32.xlu1 %v13636_v58 }
 0x8eb   : > { %v8725_v24 = vpop.eup %8724  ;;  %7777 = vst.msk [vmem:[%s12038_s23 + $0xf8] sm:$0xff] %vm3008_vm0, %v7745_v57 }
 0x8ec   : > { %v7268_v27 = vmul.f32 %v8725_v24, %v7072_v20  ;;  %v4106_v53 = vpop.permute.xlu2 %4105  ;;  %vm7273_vm10 = vweird.f32 %v8725_v24  ;;  %v8727_v25 = vpop.eup %8726 }
 0x8ed   : > { %4143 = vst.msk [vmem:[%s12038_s23 + $0x160] sm:$0xff] %vm4131_vm3, %v4106_v53  ;;  %vm7274_vm12 = vmor %vm7272_vm11, %vm7273_vm10  ;;  %v5096_v29 = vmul.f32 %v8727_v25, %v13296_v19  ;;  %v8729_v3 = vpop.eup %8728  ;;  %vm5101_vm14 = vweird.f32 %v8727_v25 }
 0x8ee   : > { %v7269_v44 = vsub.f32 1.0, %v7268_v27  ;;  %v8731_v38 = vpop.eup %8730  ;;  %v5026_v20 = vmul.f32 %v8729_v3, %v15749_v49  ;;  %vm5102_vm1 = vmor %vm5100_vm15, %vm5101_vm14  ;;  %vm5031_vm2 = vweird.f32 %v8729_v3 }
 0x8ef   : > { %v5365_v46 = vpop.permute.xlu1 %5364  ;;  %v3879_v4 = vmul.f32 %v8731_v38, %v13298_v9  ;;  %v8733_v53 = vpop.eup %8732  ;;  %vm3884_vm4 = vweird.f32 %v8731_v38  ;;  %vm13883_vm7 = vmor %vm5030_vm5, %vm5031_vm2 }
 0x8f0   : > { %v7270_v61 = vmul.f32 %v8725_v24, %v7269_v44  ;;  %5405 = vst.msk [vmem:[%s12038_s23 + $0xe8] sm:$0xff] %vm4131_vm3, %v5365_v46  ;;  %v5027_v57 = vsub.f32 1.0, %v5026_v20  ;;  %v3851_v46 = vmul.f32 %v8733_v53, %v15750_v60  ;;  %v3887_v20 = vand.u32 2147483647, %v13298_v9  ;;  %vm3885_vm9 = vmor %vm3883_vm8, %vm3884_vm4 }
 0x8f1   : > { %v3880_v27 = vsub.f32 1.0, %v3879_v4 }
 0x8f2   : > { %v7271_v40 = vadd.f32 %v8725_v24, %v7270_v61  ;;  %7069 = vadd.xlane.f32.xlu1 %v13272_v1  ;;  %5747 = vmax.xlane.f32.xlu0 %v13859_v21  ;;  %v5097_v1 = vsub.f32 1.0, %v5096_v29  ;;  %v5028_v44 = vmul.f32 %v8729_v3, %v5027_v57  ;;  %v5106_v61 = vand.u32 2147483648, %v13296_v19 }
 0x8f3   : > { %v3881_v5 = vmul.f32 %v8731_v38, %v3880_v27  ;;  %v3889_v29 = vand.u32 2147483648, %v13298_v9  ;;  %vm3888_vm11 = vcmp.eq.f32.partialorder %v3887_v20, 8.507059e+37  ;;  %v3861_v9 = vand.u32 2147483648, %v15750_v60 }
 0x8f4   : > { %v7275_v35 = vsel %vm7274_vm12, %v8725_v24, %v7271_v40  ;;  %v5098_v24 = vmul.f32 %v8727_v25, %v5097_v1  ;;  %v3852_v40 = vsub.f32 1.0, %v3851_v46  ;;  %vm3856_vm12 = vweird.f32 %v8733_v53 }
 0x8f5   : > { %v7280_v55 = vsel %vm7277_vm13, %v7279_v45, %v7275_v35  ;;  %v5107_v45 = vor.u32 1.1754944e-38, %v5106_v61  ;;  %vm3855_vm13 = vweird.f32 %v15750_v60 }
 0x8f6   : > { %v7749_v33 = vmul.f32 %v7675_v14, %v7280_v55  ;;  %v5099_v32 = vadd.f32 %v8727_v25, %v5098_v24  ;;  %v3882_v14 = vadd.f32 %v8731_v38, %v3881_v5  ;;  %v5036_v55 = vand.u32 2147483648, %v15749_v49  ;;  %vm3857_vm14 = vmor %vm3855_vm13, %vm3856_vm12 }
 0x8f7   : > { %v3853_v1 = vmul.f32 %v8733_v53, %v3852_v40 }
 0x8f8   : > { %7781 = vst.msk [vmem:[%s12038_s23 + $0x178] sm:$0xff] %vm3008_vm0, %v7749_v33  ;;  %v3886_v57 = vsel %vm3885_vm9, %v8731_v38, %v3882_v14  ;;  %v5037_v24 = vor.u32 1.1754944e-38, %v5036_v55 }
 0x8f9   : > { %v3854_v61 = vadd.f32 %v8733_v53, %v3853_v1 }
 0x8fa   : > { %5869 = vadd.xlane.f32.xlu1 %v13276_v48  ;;  %7079 = vadd.xlane.f32.xlu0 %v13369_v43  ;;  %v5104_v48 = vand.u32 2147483647, %v13296_v19  ;;  %v5103_v43 = vsel %vm5102_vm1, %v8727_v25, %v5099_v32  ;;  %v5034_v25 = vand.u32 2147483647, %v15749_v49 }
 0x8fb   : > { %7077 = vadd.xlane.f32.xlu2 %v13349_v28  ;;  %v5029_v28 = vadd.f32 %v8729_v3, %v5028_v44  ;;  %v3890_v44 = vor.u32 1.1754944e-38, %v3889_v29 }
 0x8fc   : > { %vm5105_vm6 = vcmp.eq.f32.partialorder %v5104_v48, 8.507059e+37  ;;  %vm5035_vm10 = vcmp.eq.f32.partialorder %v5034_v25, 8.507059e+37  ;;  %v3858_v48 = vsel %vm3857_vm14, %v8733_v53, %v3854_v61 }
 0x8fd   : > { %v5108_v19 = vsel %vm5105_vm6, %v5107_v45, %v5103_v43  ;;  %v5033_v4 = vsel %vm13883_vm7, %v8729_v3, %v5029_v28  ;;  %v3891_v46 = vsel %vm3888_vm11, %v3890_v44, %v3886_v57  ;;  %v15753_v3 = vld [vmem:[#allocation27_spill] sm:$0xff]  ;;  %v3862_v43 = vor.u32 1.1754944e-38, %v3861_v9  ;;  %v13901_v28 = vpop.f32.mrf.mxu1 }
 0x8fe   : > { %v5317_v27 = vmul.f32 %v13343_v22, %v5108_v19  ;;  %v5038_v32 = vsel %vm5035_vm10, %v5037_v24, %v5033_v4  ;;  %v4049_v5 = vmul.f32 %v13315_v23, %v3891_v46  ;;  %v3859_v22 = vand.u32 2147483647, %v15750_v60 }
 0x8ff   : > { %v5312_v38 = vmul.f32 %v15753_v3, %v5038_v32  ;;  %v5777_v24 = vsub.f32 %v13641_v8, %v13811_v2  ;;  %v7678_v32 = vpop.f32.mrf.mxu3 }
 0x900   : > { %vm3860_vm15 = vcmp.eq.f32.partialorder %v3859_v22, 8.507059e+37 }
 0x901   : > { %v3863_v45 = vsel %vm3860_vm15, %v3862_v43, %v3858_v48  ;;  %v5778_v48 = vsub.f32 %v13678_v17, %v13831_v15  ;;  %vm5086_vm15 = vweird.f32 %v13329_v56 }
 0x902   : > { %v4047_v23 = vmul.f32 %v13278_v26, %v3863_v45 }
 0x905   : > { %v13906_v57 = vpop.f32.mrf.mxu1 }
 0x907   : > { %v13878_v35 = vpop.xlane.xlu0 %6943 }
 0x90e   : > { %5380 = vrot.lane.b32.xlu0 %v5317_v27, %s9215_s18 }
 0x90f   : > { %v7074_v49 = vpop.xlane.xlu0 %7073 }
 0x910   : > { %8734 = vrcp.f32 %v7074_v49  ;;  %v7292_v33 = vand.u32 2147483648, %v7074_v49  ;;  %v7290_v25 = vand.u32 2147483647, %v7074_v49  ;;  %vm7286_vm2 = vweird.f32 %v7074_v49 }
 0x912   : > { %v7293_v26 = vor.u32 1.1754944e-38, %v7292_v33  ;;  %vm7291_vm5 = vcmp.eq.f32.partialorder %v7290_v25, 8.507059e+37 }
 0x913   : > { %5370 = vrot.lane.b32.xlu1 %v5312_v38, %s9215_s18  ;;  %4111 = vrot.lane.b32.xlu2 %v4049_v5, %s9215_s18 }
 0x916   : > { %v8735_v40 = vpop.eup %8734 }
 0x917   : > { %v7282_v14 = vmul.f32 %v8735_v40, %v7074_v49  ;;  %v5874_v55 = vpop.xlane.xlu0 %5873  ;;  %vm7287_vm1 = vweird.f32 %v8735_v40  ;;  %v5835_v49 = vmul.f32 1.442695, %v5777_v24 }
 0x918   : > { %8736 = vrcp.f32 %v5874_v55  ;;  %vm7288_vm4 = vmor %vm7286_vm2, %vm7287_vm1  ;;  %v6104_v9 = vand.u32 2147483648, %v5874_v55  ;;  %v6102_v38 = vand.u32 2147483647, %v5874_v55  ;;  %vm6098_vm7 = vweird.f32 %v5874_v55 }
 0x919   : > { %v7283_v29 = vsub.f32 1.0, %v7282_v14 }
 0x91a   : > { %v5738_v60 = vpop.xlane.xlu1 %5737  ;;  %v6105_v22 = vor.u32 1.1754944e-38, %v6104_v9  ;;  %vm6103_vm9 = vcmp.eq.f32.partialorder %v6102_v38, 8.507059e+37 }
 0x91b   : > { %v7284_v19 = vmul.f32 %v8735_v40, %v7283_v29  ;;  %v5776_v20 = vsub.f32 %v13621_v10, %v5738_v60  ;;  %4107 = vrot.lane.b32.xlu1 %v4047_v23, %s9215_s18  ;;  %v5837_v23 = vmul.f32 1.442695, %v5778_v48 }
 0x91d   : > { %v7285_v53 = vadd.f32 %v8735_v40, %v7284_v19  ;;  %v5833_v1 = vmul.f32 1.442695, %v5776_v20 }
 0x91e   : > { %v8737_v4 = vpop.eup %8736 }
 0x91f   : > { %v7289_v27 = vsel %vm7288_vm4, %v8735_v40, %v7285_v53  ;;  %v6094_v44 = vmul.f32 %v8737_v4, %v5874_v55  ;;  %8738 = vpow2.f32 %v5833_v1  ;;  %vm6099_vm6 = vweird.f32 %v8737_v4  ;;  %v6415_v40 = vpop.f32.mrf.mxu1 }
 0x920   : > { %v7294_v10 = vsel %vm7291_vm5, %v7293_v26, %v7289_v27  ;;  %vm6100_vm8 = vmor %vm6098_vm7, %vm6099_vm6 }
 0x921   : > { %v7750_v46 = vmul.f32 %v7678_v32, %v7294_v10  ;;  %v6095_v61 = vsub.f32 1.0, %v6094_v44 }
 0x923   : > { %7782 = vst.msk [vmem:[%s12038_s23 + $0x198] sm:$0xff] %vm3008_vm0, %v7750_v46  ;;  %v6096_v3 = vmul.f32 %v8737_v4, %v6095_v61  ;;  %v13938_v61 = vpop.f32.mrf.mxu2 }
 0x925   : > { %v13912_v5 = vpop.eup %8738  ;;  %v6097_v8 = vadd.f32 %v8737_v4, %v6096_v3  ;;  %v5872_v2 = vpop.xlane.xlu2 %5871 }
 0x926   : > { %6450 = vmatmul.f32.gmra.mxu1 %v13912_v5  ;;  %8740 = vrcp.f32 %v5872_v2  ;;  %v6090_v25 = vand.u32 2147483648, %v5872_v2  ;;  %v6088_v53 = vand.u32 2147483647, %v5872_v2  ;;  %vm6084_vm11 = vweird.f32 %v5872_v2 }
 0x927   : > { %8742 = vpow2.f32 %v5835_v49  ;;  %v6101_v43 = vsel %vm6100_vm8, %v8737_v4, %v6097_v8  ;;  %v15756_v8 = vld [vmem:[#allocation30_spill] sm:$0xff] }
 0x928   : > { %v6106_v45 = vsel %vm6103_vm9, %v6105_v22, %v6101_v43  ;;  %8744 = vpow2.f32 %v5837_v23  ;;  %v6091_v27 = vor.u32 1.1754944e-38, %v6090_v25  ;;  %vm6089_vm13 = vcmp.eq.f32.partialorder %v6088_v53, 8.507059e+37 }
 0x929   : > { %v6485_v14 = vmul.f32 %v6415_v40, %v6106_v45  ;;  %v6979_v22 = vsub.f32 %v13656_v13, %v13822_v37 }
 0x92a   : > { %v5375_v29 = vpop.permute.xlu0 %5374 }
 0x92b   : > { %6517 = vst.msk [vmem:[%s12038_s23 + $0x1b0] sm:$0xff] %vm3008_vm0, %v6485_v14  ;;  %v7037_v14 = vmul.f32 1.442695, %v6979_v22 }
 0x92c   : > { %v8741_v55 = vpop.eup %8740  ;;  %5410 = vst.msk [vmem:[%s12038_s23 + $0x188] sm:$0xff] %vm4131_vm3, %v5375_v29 }
 0x92d   : > { %v13921_v33 = vpop.eup %8742  ;;  %v6080_v60 = vmul.f32 %v8741_v55, %v5872_v2  ;;  %v5744_v19 = vpop.xlane.xlu2 %5743  ;;  %vm6085_vm10 = vweird.f32 %v8741_v55  ;;  %v5092_v2 = vand.u32 2147483648, %v13329_v56 }
 0x92e   : > { %6453 = vmatmul.f32.gmra.mxu1 %v13921_v33  ;;  %v5779_v15 = vsub.f32 %v13784_v47, %v5744_v19  ;;  %vm6086_vm12 = vmor %vm6084_vm11, %vm6085_vm10  ;;  %v13929_v44 = vpop.eup %8744 }
 0x92f   : > { %v6081_v17 = vsub.f32 1.0, %v6080_v60 }
 0x930   : > { %v5839_v26 = vmul.f32 1.442695, %v5779_v15  ;;  %v15758_v15 = vld [vmem:[#allocation29_spill] sm:$0xff] }
 0x931   : > { %v6082_v20 = vmul.f32 %v8741_v55, %v6081_v17 }
 0x932   : > { %v4110_v1 = vpop.permute.xlu0 %4109  ;;  %v4102_v4 = vpop.permute.xlu1 %4101  ;;  %8746 = vpow2.f32 %v5839_v26 }
 0x933   : > { %v6083_v24 = vadd.f32 %v8741_v55, %v6082_v20  ;;  %4145 = vst.msk [vmem:[%s12038_s23 + $0x1a0] sm:$0xff] %vm4131_vm3, %v4110_v1  ;;  %8748 = vrcp.f32 %v13329_v56 }
 0x934   : > { %4141 = vst.msk [vmem:[%s12038_s23 + $0x120] sm:$0xff] %vm4131_vm3, %v4102_v4 }
 0x935   : > { %v6087_v47 = vsel %vm6086_vm12, %v8741_v55, %v6083_v24  ;;  %v5373_v32 = vpop.permute.xlu2 %5372  ;;  %v15757_v55 = vld [vmem:[#allocation19_spill] sm:$0xff] }
 0x936   : > { %v6092_v10 = vsel %vm6089_vm13, %v6091_v27, %v6087_v47  ;;  %6456 = vmatmul.f32.gmra.mxu1 %v13929_v44  ;;  %5409 = vst.msk [vmem:[%s12038_s23 + $0x168] sm:$0xff] %vm4131_vm3, %v5373_v32 }
 0x937   : > { %v6484_v46 = vmul.f32 %v13906_v57, %v6092_v10  ;;  %v13949_v57 = vpop.f32.mrf.mxu0 }
 0x938   : > { %7083 = vadd.xlane.f32.xlu0 %v13452_v36  ;;  %v13941_v9 = vpop.eup %8746 }
 0x939   : > { %6516 = vst.msk [vmem:[%s12038_s23 + $0x190] sm:$0xff] %vm3008_vm0, %v6484_v46  ;;  %v8749_v36 = vpop.eup %8748  ;;  %v13991_v46 = vpop.f32.mrf.mxu3 }
 0x93a   : > { %v5082_v49 = vmul.f32 %v8749_v36, %v13329_v56  ;;  %vm5087_vm14 = vweird.f32 %v8749_v36 }
 0x93b   : > { %vm5088_vm1 = vmor %vm5086_vm15, %vm5087_vm14 }
 0x93c   : > { %6949 = vmax.xlane.f32.xlu2 %v13938_v61  ;;  %v5083_v3 = vsub.f32 1.0, %v5082_v49 }
 0x93e   : > { %6459 = vmatmul.f32.gmra.mxu1 %v13941_v9  ;;  %v5084_v38 = vmul.f32 %v8749_v36, %v5083_v3 }
 0x940   : > { %5883 = vadd.xlane.f32.xlu0 %v13432_v63  ;;  %v15754_v63 = vld [vmem:[#allocation16_spill] sm:$0xff] }
 0x941   : > { %8750 = vrcp.f32 %v15754_v63  ;;  %v5076_v32 = vand.u32 2147483647, %v15754_v63  ;;  %vm5072_vm6 = vweird.f32 %v15754_v63 }
 0x943   : > { %vm5077_vm10 = vcmp.eq.f32.partialorder %v5076_v32, 8.507059e+37 }
 0x944   : > { %5877 = vadd.xlane.f32.xlu2 %v13355_v16  ;;  %v15755_v16 = vld [vmem:[#allocation28_spill] sm:$0xff] }
 0x945   : > { %6945 = vmax.xlane.f32.xlu1 %v13835_v12  ;;  %8752 = vrcp.f32 %v15755_v16  ;;  %v3903_v47 = vand.u32 2147483648, %v15755_v16  ;;  %vm3897_vm8 = vweird.f32 %v15755_v16  ;;  %v3901_v3 = vand.u32 2147483647, %v15755_v16 }
 0x946   : > { %8754 = vpow2.f32 %v7037_v14 }
 0x947   : > { %v13962_v48 = vpop.eup %8750  ;;  %vm3902_vm11 = vcmp.eq.f32.partialorder %v3901_v3, 8.507059e+37 }
 0x948   : > { %7089 = vadd.xlane.f32.xlu0 %v13605_v42  ;;  %v5085_v42 = vadd.f32 %v8749_v36, %v5084_v38  ;;  %v5068_v45 = vmul.f32 %v13962_v48, %v15754_v63  ;;  %vm5073_vm4 = vweird.f32 %v13962_v48 }
 0x949   : > { %vm13995_vm7 = vmor %vm5072_vm6, %vm5073_vm4 }
 0x94a   : > { %v5089_v40 = vsel %vm5088_vm1, %v8749_v36, %v5085_v42  ;;  %v5069_v19 = vsub.f32 1.0, %v5068_v45  ;;  %v6980_v36 = vsub.f32 %v13723_v0, %v13878_v35  ;;  %v3904_v35 = vor.u32 1.1754944e-38, %v3903_v47 }
 0x94b   : > { %v13966_v43 = vpop.eup %8752 }
 0x94c   : > { %5749 = vmax.xlane.f32.xlu2 %v13949_v57  ;;  %v3893_v13 = vmul.f32 %v13966_v43, %v15755_v16  ;;  %v5070_v20 = vmul.f32 %v13962_v48, %v5069_v19  ;;  %vm3898_vm5 = vweird.f32 %v13966_v43 }
 0x94d   : > { %5745 = vmax.xlane.f32.xlu1 %v13843_v51  ;;  %vm14001_vm9 = vmor %vm3897_vm8, %vm3898_vm5 }
 0x94e   : > { %v3894_v17 = vsub.f32 1.0, %v3893_v13  ;;  %v5071_v27 = vadd.f32 %v13962_v48, %v5070_v20 }
 0x950   : > { %5889 = vadd.xlane.f32.xlu0 %v13619_v50  ;;  %v5090_v50 = vand.u32 2147483647, %v13329_v56  ;;  %v3895_v4 = vmul.f32 %v13966_v43, %v3894_v17  ;;  %v5075_v0 = vsel %vm13995_vm7, %v13962_v48, %v5071_v27 }
 0x952   : > { %vm5091_vm2 = vcmp.eq.f32.partialorder %v5090_v50, 8.507059e+37  ;;  %v3896_v10 = vadd.f32 %v13966_v43, %v3895_v4  ;;  %v15764_v4 = vld [vmem:[#allocation18_spill] sm:$0xff] }
 0x954   : > { %v3900_v16 = vsel %vm14001_vm9, %v13966_v43, %v3896_v10 }
 0x955   : > { %7075 = vadd.xlane.f32.xlu1 %v15756_v8 }
 0x958   : > { %7095 = vadd.xlane.f32.xlu0 %v13828_v39  ;;  %v5093_v39 = vor.u32 1.1754944e-38, %v5092_v2 }
 0x95a   : > { %v5094_v56 = vsel %vm5091_vm2, %v5093_v39, %v5089_v40  ;;  %v7039_v40 = vmul.f32 1.442695, %v6980_v36 }
 0x95b   : > { %v5316_v25 = vmul.f32 %v15758_v15, %v5094_v56  ;;  %v15763_v56 = vld [vmem:[#allocation17_spill] sm:$0xff] }
 0x95d   : > { %v6948_v29 = vpop.xlane.xlu0 %6947  ;;  %v6940_v23 = vpop.xlane.xlu1 %6939  ;;  %5875 = vadd.xlane.f32.xlu1 %v15757_v55  ;;  %v3905_v55 = vsel %vm3902_vm11, %v3904_v35, %v3900_v16 }
 0x95e   : > { %v6978_v37 = vsub.f32 %v13636_v58, %v6940_v23  ;;  %v8755_v58 = vpop.eup %8754  ;;  %v6982_v26 = vsub.f32 %v13845_v31, %v6948_v29 }
 0x960   : > { %v7035_v60 = vmul.f32 1.442695, %v6978_v37  ;;  %5895 = vadd.xlane.f32.xlu0 %v13750_v30  ;;  %v5078_v30 = vand.u32 2147483648, %v15754_v63  ;;  %v7043_v63 = vmul.f32 1.442695, %v6982_v26 }
 0x962   : > { %8756 = vpow2.f32 %v7035_v60  ;;  %v5079_v38 = vor.u32 1.1754944e-38, %v5078_v30 }
 0x964   : > { %5378 = vrot.lane.b32.xlu2 %v5316_v25, %s9215_s18  ;;  %v5080_v48 = vsel %vm5077_vm10, %v5079_v38, %v5075_v0 }
 0x965   : > { %v7070_v53 = vpop.xlane.xlu1 %7069  ;;  %v5748_v1 = vpop.xlane.xlu0 %5747  ;;  %v5315_v60 = vmul.f32 %v15763_v56, %v5080_v48 }
 0x966   : > { %8758 = vrcp.f32 %v7070_v53  ;;  %v5781_v39 = vsub.f32 %v13859_v21, %v5748_v1  ;;  %v7264_v14 = vand.u32 2147483648, %v7070_v53  ;;  %v7262_v23 = vand.u32 2147483647, %v7070_v53 }
 0x967   : > { %vm7258_vm13 = vweird.f32 %v7070_v53 }
 0x968   : > { %7101 = vadd.xlane.f32.xlu0 %v8755_v58  ;;  %v13979_v24 = vpop.eup %8756  ;;  %v5843_v13 = vmul.f32 1.442695, %v5781_v39  ;;  %v7265_v37 = vor.u32 1.1754944e-38, %v7264_v14  ;;  %vm7263_vm15 = vcmp.eq.f32.partialorder %v7262_v23, 8.507059e+37 }
 0x969   : > { %7716 = vmatmul.f32.gmra.mxu3 %v13979_v24 }
 0x96c   : > { %v8759_v31 = vpop.eup %8758 }
 0x96d   : > { %v7254_v42 = vmul.f32 %v8759_v31, %v7070_v53  ;;  %v14005_v2 = vpop.xlane.xlu1 %5869  ;;  %v14007_v22 = vpop.xlane.xlu0 %7079  ;;  %vm7259_vm12 = vweird.f32 %v8759_v31 }
 0x96e   : > { %8760 = vrcp.f32 %v14005_v2  ;;  %v14013_v50 = vpop.xlane.xlu2 %7077  ;;  %vm7260_vm14 = vmor %vm7258_vm13, %vm7259_vm12  ;;  %vm6070_vm1 = vweird.f32 %v14005_v2  ;;  %v6074_v32 = vand.u32 2147483647, %v14005_v2  ;;  %v6076_v10 = vand.u32 2147483648, %v14005_v2 }
 0x96f   : > { %v7255_v45 = vsub.f32 1.0, %v7254_v42  ;;  %8762 = vrcp.f32 %v14007_v22  ;;  %v7334_v49 = vand.u32 2147483648, %v14007_v22  ;;  %v7332_v8 = vand.u32 2147483647, %v14007_v22 }
 0x970   : > { %8764 = vrcp.f32 %v14013_v50  ;;  %5901 = vadd.xlane.f32.xlu0 %v13929_v44  ;;  %v7684_v44 = vpop.f32.mrf.mxu3  ;;  %v7318_v35 = vand.u32 2147483647, %v14013_v50  ;;  %vm6075_vm7 = vcmp.eq.f32.partialorder %v6074_v32, 8.507059e+37  ;;  %v6077_v16 = vor.u32 1.1754944e-38, %v6076_v10  ;;  %v15765_v10 = vld [vmem:[#allocation31_spill] sm:$0xff] }
 0x971   : > { %8766 = vpow2.f32 %v7043_v63  ;;  %v7256_v29 = vmul.f32 %v8759_v31, %v7255_v45  ;;  %7719 = vmatmul.f32.gmra.mxu3 %v8755_v58  ;;  %v4050_v58 = vmul.f32 %v15764_v4, %v3905_v55  ;;  %v7320_v63 = vand.u32 2147483648, %v14013_v50 }
 0x972   : > { %8768 = vpow2.f32 %v7039_v40  ;;  %vm7328_vm8 = vweird.f32 %v14007_v22  ;;  %v7335_v14 = vor.u32 1.1754944e-38, %v7334_v49  ;;  %vm7314_vm10 = vweird.f32 %v14013_v50 }
 0x973   : > { %v7257_v43 = vadd.f32 %v8759_v31, %v7256_v29  ;;  %8770 = vpow2.f32 %v5843_v13  ;;  %vm7333_vm11 = vcmp.eq.f32.partialorder %v7332_v8, 8.507059e+37  ;;  %vm7319_vm13 = vcmp.eq.f32.partialorder %v7318_v35, 8.507059e+37 }
 0x974   : > { %v8761_v21 = vpop.eup %8760 }
 0x975   : > { %v8763_v19 = vpop.eup %8762  ;;  %v7261_v17 = vsel %vm7260_vm14, %v8759_v31, %v7257_v43  ;;  %v6066_v15 = vmul.f32 %v8761_v21, %v14005_v2  ;;  %vm6071_vm2 = vweird.f32 %v8761_v21  ;;  %v7321_v2 = vor.u32 1.1754944e-38, %v7320_v63 }
 0x976   : > { %v8765_v25 = vpop.eup %8764  ;;  %v7266_v20 = vsel %vm7263_vm15, %v7265_v37, %v7261_v17  ;;  %v7324_v1 = vmul.f32 %v8763_v19, %v14007_v22  ;;  %5376 = vrot.lane.b32.xlu1 %v5315_v60, %s9215_s18  ;;  %v4112_v53 = vpop.permute.xlu2 %4111  ;;  %vm7329_vm4 = vweird.f32 %v8763_v19  ;;  %vm6072_vm6 = vmor %vm6070_vm1, %vm6071_vm2 }
 0x977   : > { %v14027_v30 = vpop.eup %8766  ;;  %v7748_v26 = vmul.f32 %v13853_v11, %v7266_v20  ;;  %v6067_v27 = vsub.f32 1.0, %v6066_v15  ;;  %v7310_v47 = vmul.f32 %v8765_v25, %v14013_v50  ;;  %4146 = vst.msk [vmem:[%s12038_s23 + $0x1c0] sm:$0xff] %vm4131_vm3, %v4112_v53  ;;  %vm7315_vm5 = vweird.f32 %v8765_v25  ;;  %vm7330_vm9 = vmor %vm7328_vm8, %vm7329_vm4 }
 0x978   : > { %v7325_v36 = vsub.f32 1.0, %v7324_v1  ;;  %7107 = vadd.xlane.f32.xlu0 %v14027_v30  ;;  %v14037_v31 = vpop.eup %8768  ;;  %vm7316_vm12 = vmor %vm7314_vm10, %vm7315_vm5  ;;  %v7687_v22 = vpop.f32.mrf.mxu3 }
 0x979   : > { %7780 = vst.msk [vmem:[%s12038_s23 + $0x158] sm:$0xff] %vm3008_vm0, %v7748_v26  ;;  %v6068_v11 = vmul.f32 %v8761_v21, %v6067_v27  ;;  %v7311_v3 = vsub.f32 1.0, %v7310_v47  ;;  %7722 = vmatmul.f32.gmra.mxu3 %v14037_v31  ;;  %v14049_v45 = vpop.eup %8770 }
 0x97a   : > { %v7326_v38 = vmul.f32 %v8763_v19, %v7325_v36 }
 0x97b   : > { %v6069_v42 = vadd.f32 %v8761_v21, %v6068_v11  ;;  %v7312_v0 = vmul.f32 %v8765_v25, %v7311_v3 }
 0x97c   : > { %v7327_v40 = vadd.f32 %v8763_v19, %v7326_v38 }
 0x97d   : > { %v6073_v39 = vsel %vm6072_vm6, %v8761_v21, %v6069_v42  ;;  %v7313_v48 = vadd.f32 %v8765_v25, %v7312_v0 }
 0x97e   : > { %v6078_v29 = vsel %vm6075_vm7, %v6077_v16, %v6073_v39  ;;  %v7331_v23 = vsel %vm7330_vm9, %v8763_v19, %v7327_v40  ;;  %4113 = vrot.lane.b32.xlu1 %v4050_v58, %s9215_s18  ;;  %v14072_v19 = vpop.f32.mrf.mxu1 }
 0x97f   : > { %v6483_v55 = vmul.f32 %v13901_v28, %v6078_v29  ;;  %v7336_v43 = vsel %vm7333_vm11, %v7335_v14, %v7331_v23  ;;  %v7317_v13 = vsel %vm7316_vm12, %v8765_v25, %v7313_v48  ;;  %v15766_v29 = vld [vmem:[#allocation20_spill] sm:$0xff] }
 0x980   : > { %v7753_v50 = vmul.f32 %v7687_v22, %v7336_v43  ;;  %v7322_v21 = vsel %vm7319_vm13, %v7321_v2, %v7317_v13  ;;  %5907 = vadd.xlane.f32.xlu0 %v14049_v45  ;;  %v5381_v56 = vpop.permute.xlu0 %5380 }
 0x981   : > { %6515 = vst.msk [vmem:[%s12038_s23 + $0x170] sm:$0xff] %vm3008_vm0, %v6483_v55  ;;  %v7752_v37 = vmul.f32 %v7684_v44, %v7322_v21  ;;  %v14075_v44 = vpop.f32.mrf.mxu2 }
 0x982   : > { %7785 = vst.msk [vmem:[%s12038_s23 + $0x1f8] sm:$0xff] %vm3008_vm0, %v7753_v50  ;;  %v15767_v50 = vld [vmem:[#allocation32_spill] sm:$0xff] }
 0x983   : > { %7784 = vst.msk [vmem:[%s12038_s23 + $0x1d8] sm:$0xff] %vm3008_vm0, %v7752_v37 }
 0x984   : > { %5413 = vst.msk [vmem:[%s12038_s23 + $0x1e8] sm:$0xff] %vm4131_vm3, %v5381_v56 }
 0x985   : > { %v5371_v60 = vpop.permute.xlu1 %5370 }
 0x986   : > { %5408 = vst.msk [vmem:[%s12038_s23 + $0x148] sm:$0xff] %vm4131_vm3, %v5371_v60  ;;  %v14078_v17 = vpop.f32.mrf.mxu1 }
 0x98d   : > { %v4108_v28 = vpop.permute.xlu1 %4107  ;;  %7081 = vadd.xlane.f32.xlu2 %v13413_v52 }
 0x98e   : > { %4144 = vst.msk [vmem:[%s12038_s23 + $0x180] sm:$0xff] %vm4131_vm3, %v4108_v28  ;;  %v14084_v25 = vpop.f32.mrf.mxu1 }
 0x995   : > { %5881 = vadd.xlane.f32.xlu2 %v13387_v34 }
 0x99d   : > { %7087 = vadd.xlane.f32.xlu2 %v13600_v59 }
 0x9a5   : > { %5887 = vadd.xlane.f32.xlu2 %v13541_v18 }
 0x9a8   : > { %6951 = vmax.xlane.f32.xlu1 %v14075_v44 }
 0x9ab   : > { %v14080_v15 = vpop.xlane.xlu0 %7083 }
 0x9ad   : > { %7093 = vadd.xlane.f32.xlu2 %v13816_v54  ;;  %v14090_v54 = vpop.f32.mrf.mxu1 }
 0x9af   : > { %v6950_v52 = vpop.xlane.xlu2 %6949 }
 0x9b0   : > { %5879 = vadd.xlane.f32.xlu1 %v13365_v7  ;;  %v6983_v63 = vsub.f32 %v13938_v61, %v6950_v52 }
 0x9b2   : > { %v7045_v2 = vmul.f32 1.442695, %v6983_v63 }
 0x9b3   : > { %v5884_v34 = vpop.xlane.xlu0 %5883 }
 0x9b4   : > { %8772 = vrcp.f32 %v5884_v34  ;;  %v6172_v47 = vand.u32 2147483647, %v5884_v34  ;;  %v6174_v32 = vand.u32 2147483648, %v5884_v34  ;;  %vm6168_vm15 = vweird.f32 %v5884_v34 }
 0x9b5   : > { %5893 = vadd.xlane.f32.xlu2 %v13728_v41  ;;  %v6430_v35 = vpop.f32.mrf.mxu1 }
 0x9b6   : > { %vm6173_vm4 = vcmp.eq.f32.partialorder %v6172_v47, 8.507059e+37  ;;  %v6175_v42 = vor.u32 1.1754944e-38, %v6174_v32 }
 0x9b7   : > { %v5878_v18 = vpop.xlane.xlu2 %5877 }
 0x9b8   : > { %v6946_v59 = vpop.xlane.xlu1 %6945  ;;  %8774 = vrcp.f32 %v5878_v18  ;;  %7085 = vadd.xlane.f32.xlu1 %v13503_v62  ;;  %v6132_v49 = vand.u32 2147483648, %v5878_v18  ;;  %v6130_v38 = vand.u32 2147483647, %v5878_v18  ;;  %vm6126_vm5 = vweird.f32 %v5878_v18 }
 0x9b9   : > { %v6981_v20 = vsub.f32 %v13835_v12, %v6946_v59 }
 0x9ba   : > { %v8773_v1 = vpop.eup %8772  ;;  %v6133_v16 = vor.u32 1.1754944e-38, %v6132_v49  ;;  %vm6131_vm7 = vcmp.eq.f32.partialorder %v6130_v38, 8.507059e+37 }
 0x9bb   : > { %v7041_v53 = vmul.f32 1.442695, %v6981_v20  ;;  %v6164_v4 = vmul.f32 %v8773_v1, %v5884_v34  ;;  %vm6169_vm14 = vweird.f32 %v8773_v1  ;;  %v14118_v32 = vpop.xlane.xlu0 %7089 }
 0x9bc   : > { %vm6170_vm2 = vmor %vm6168_vm15, %vm6169_vm14 }
 0x9bd   : > { %8776 = vpow2.f32 %v7041_v53  ;;  %7099 = vadd.xlane.f32.xlu2 %v13979_v24  ;;  %v6165_v58 = vsub.f32 1.0, %v6164_v4 }
 0x9be   : > { %v8775_v7 = vpop.eup %8774 }
 0x9bf   : > { %v6122_v26 = vmul.f32 %v8775_v7, %v5878_v18  ;;  %v5750_v27 = vpop.xlane.xlu2 %5749  ;;  %v6166_v41 = vmul.f32 %v8773_v1, %v6165_v58  ;;  %vm6127_vm1 = vweird.f32 %v8775_v7 }
 0x9c0   : > { %5885 = vadd.xlane.f32.xlu1 %v15765_v10  ;;  %v5746_v62 = vpop.xlane.xlu1 %5745  ;;  %vm6128_vm6 = vmor %vm6126_vm5, %vm6127_vm1  ;;  %v5782_v55 = vsub.f32 %v13949_v57, %v5750_v27  ;;  %vm7356_vm1 = vweird.f32 %v14080_v15 }
 0x9c1   : > { %v6123_v12 = vsub.f32 1.0, %v6122_v26  ;;  %v5780_v36 = vsub.f32 %v13843_v51, %v5746_v62  ;;  %v6167_v11 = vadd.f32 %v8773_v1, %v6166_v41  ;;  %v14123_v62 = vpop.f32.mrf.mxu3 }
 0x9c2   : > { %v5845_v37 = vmul.f32 1.442695, %v5782_v55 }
 0x9c3   : > { %v8777_v24 = vpop.eup %8776  ;;  %v6124_v3 = vmul.f32 %v8775_v7, %v6123_v12  ;;  %v5841_v8 = vmul.f32 1.442695, %v5780_v36  ;;  %v6171_v51 = vsel %vm6170_vm2, %v8773_v1, %v6167_v11 }
 0x9c4   : > { %7725 = vmatmul.f32.gmra.mxu3 %v8777_v24  ;;  %v6176_v40 = vsel %vm6173_vm4, %v6175_v42, %v6171_v51 }
 0x9c5   : > { %v6125_v0 = vadd.f32 %v8775_v7, %v6124_v3  ;;  %8778 = vpow2.f32 %v5841_v8  ;;  %5899 = vadd.xlane.f32.xlu2 %v13921_v33  ;;  %v6490_v14 = vmul.f32 %v6430_v35, %v6176_v40  ;;  %v14142_v3 = vpop.f32.mrf.mxu1 }
 0x9c7   : > { %v6129_v39 = vsel %vm6128_vm6, %v8775_v7, %v6125_v0  ;;  %v5379_v61 = vpop.permute.xlu2 %5378  ;;  %6540 = vrot.lane.b32.xlu0 %v6490_v14, %s9215_s18  ;;  %vm7398_vm6 = vweird.f32 %v14118_v32 }
 0x9c8   : > { %v6134_v48 = vsel %vm6131_vm7, %v6133_v16, %v6129_v39  ;;  %7091 = vadd.xlane.f32.xlu1 %v15766_v29  ;;  %v7076_v23 = vpop.xlane.xlu1 %7075  ;;  %5412 = vst.msk [vmem:[%s12038_s23 + $0x1c8] sm:$0xff] %vm4131_vm3, %v5379_v61 }
 0x9c9   : > { %v6487_v22 = vmul.f32 %v14078_v17, %v6134_v48  ;;  %8780 = vrcp.f32 %v7076_v23  ;;  %v7306_v28 = vand.u32 2147483648, %v7076_v23  ;;  %v7304_v52 = vand.u32 2147483647, %v7076_v23 }
 0x9ca   : > { %8782 = vpow2.f32 %v7045_v2  ;;  %vm7300_vm9 = vweird.f32 %v7076_v23 }
 0x9cb   : > { %v8779_v33 = vpop.eup %8778  ;;  %6519 = vst.msk [vmem:[%s12038_s23 + $0x1f0] sm:$0xff] %vm3008_vm0, %v6487_v22  ;;  %v7307_v34 = vor.u32 1.1754944e-38, %v7306_v28  ;;  %vm7305_vm11 = vcmp.eq.f32.partialorder %v7304_v52, 8.507059e+37  ;;  %v7404_v52 = vand.u32 2147483648, %v14118_v32 }
 0x9cc   : > { %6462 = vmatmul.f32.gmra.mxu1 %v8779_v33  ;;  %7728 = vmatmul.f32.gmra.mxu3 %v14027_v30 }
 0x9cd   : > { %7105 = vadd.xlane.f32.xlu2 %v8777_v24  ;;  %v14160_v39 = vpop.f32.mrf.mxu1 }
 0x9cf   : > { %v8781_v43 = vpop.eup %8780 }
 0x9d0   : > { %v7296_v13 = vmul.f32 %v8781_v43, %v7076_v23  ;;  %5891 = vadd.xlane.f32.xlu1 %v15767_v50  ;;  %v5876_v21 = vpop.xlane.xlu1 %5875  ;;  %v8783_v60 = vpop.eup %8782  ;;  %vm7301_vm8 = vweird.f32 %v8781_v43 }
 0x9d1   : > { %8784 = vrcp.f32 %v5876_v21  ;;  %vm7302_vm10 = vmor %vm7300_vm9, %vm7301_vm8  ;;  %v6116_v58 = vand.u32 2147483647, %v5876_v21  ;;  %vm6112_vm13 = vweird.f32 %v5876_v21 }
 0x9d2   : > { %v7297_v56 = vsub.f32 1.0, %v7296_v13  ;;  %8786 = vpow2.f32 %v5845_v37 }
 0x9d3   : > { %vm6117_vm15 = vcmp.eq.f32.partialorder %v6116_v58, 8.507059e+37  ;;  %8788 = vrcp.f32 %v14080_v15 }
 0x9d4   : > { %v7298_v17 = vmul.f32 %v8781_v43, %v7297_v56  ;;  %6465 = vmatmul.f32.gmra.mxu1 %v14049_v45  ;;  %7731 = vmatmul.f32.gmra.mxu3 %v8783_v60  ;;  %v6118_v45 = vand.u32 2147483648, %v5876_v21  ;;  %8790 = vrcp.f32 %v14118_v32 }
 0x9d5   : > { %5905 = vadd.xlane.f32.xlu2 %v8779_v33  ;;  %v14185_v28 = vpop.f32.mrf.mxu1 }
 0x9d6   : > { %v7299_v57 = vadd.f32 %v8781_v43, %v7298_v17  ;;  %v6119_v27 = vor.u32 1.1754944e-38, %v6118_v45 }
 0x9d7   : > { %v8785_v30 = vpop.eup %8784 }
 0x9d8   : > { %v7303_v18 = vsel %vm7302_vm10, %v8781_v43, %v7299_v57  ;;  %v6108_v59 = vmul.f32 %v8785_v30, %v5876_v21  ;;  %7097 = vadd.xlane.f32.xlu1 %v13838_v6  ;;  %v8787_v4 = vpop.eup %8786  ;;  %vm6113_vm12 = vweird.f32 %v8785_v30  ;;  %v7362_v43 = vand.u32 2147483648, %v14080_v15 }
 0x9d9   : > { %v7308_v20 = vsel %vm7305_vm11, %v7307_v34, %v7303_v18  ;;  %vm6114_vm14 = vmor %vm6112_vm13, %vm6113_vm12  ;;  %v8789_v49 = vpop.eup %8788  ;;  %v7360_v21 = vand.u32 2147483647, %v14080_v15 }
 0x9da   : > { %v7751_v1 = vmul.f32 %v13991_v46, %v7308_v20  ;;  %v6109_v53 = vsub.f32 1.0, %v6108_v59  ;;  %v7352_v24 = vmul.f32 %v8789_v49, %v14080_v15  ;;  %v14145_v38 = vpop.eup %8790  ;;  %v7363_v57 = vor.u32 1.1754944e-38, %v7362_v43 }
 0x9db   : > { %v7394_v42 = vmul.f32 %v14145_v38, %v14118_v32  ;;  %vm7399_vm4 = vweird.f32 %v14145_v38  ;;  %vm7361_vm5 = vcmp.eq.f32.partialorder %v7360_v21, 8.507059e+37  ;;  %v7402_v20 = vand.u32 2147483647, %v14118_v32 }
 0x9dc   : > { %7783 = vst.msk [vmem:[%s12038_s23 + $0x1b8] sm:$0xff] %vm3008_vm0, %v7751_v1  ;;  %v6110_v7 = vmul.f32 %v8785_v30, %v6109_v53  ;;  %6468 = vmatmul.f32.gmra.mxu1 %v8787_v4  ;;  %v7353_v63 = vsub.f32 1.0, %v7352_v24  ;;  %vm14197_vm7 = vmor %vm7398_vm6, %vm7399_vm4 }
 0x9dd   : > { %v7395_v14 = vsub.f32 1.0, %v7394_v42  ;;  %vm7403_vm10 = vcmp.eq.f32.partialorder %v7402_v20, 8.507059e+37  ;;  %v14226_v24 = vpop.f32.mrf.mxu1 }
 0x9de   : > { %v6111_v26 = vadd.f32 %v8785_v30, %v6110_v7  ;;  %v7354_v40 = vmul.f32 %v8789_v49, %v7353_v63 }
 0x9df   : > { %v7396_v2 = vmul.f32 %v14145_v38, %v7395_v14 }
 0x9e0   : > { %v6115_v6 = vsel %vm6114_vm14, %v8785_v30, %v6111_v26  ;;  %5897 = vadd.xlane.f32.xlu1 %v13912_v5  ;;  %v14125_v5 = vpop.xlane.xlu0 %5889  ;;  %v7355_v29 = vadd.f32 %v8789_v49, %v7354_v40 }
 0x9e1   : > { %v6120_v46 = vsel %vm6117_vm15, %v6119_v27, %v6115_v6  ;;  %8792 = vrcp.f32 %v14125_v5  ;;  %v7397_v17 = vadd.f32 %v14145_v38, %v7396_v2  ;;  %v6214_v45 = vand.u32 2147483647, %v14125_v5 }
 0x9e2   : > { %v6486_v41 = vmul.f32 %v14072_v19, %v6120_v46  ;;  %v14127_v19 = vpop.f32.mrf.mxu3  ;;  %v6216_v46 = vand.u32 2147483648, %v14125_v5  ;;  %vm6210_vm11 = vweird.f32 %v14125_v5 }
 0x9e3   : > { %v7401_v7 = vsel %vm14197_vm7, %v14145_v38, %v7397_v17  ;;  %vm14238_vm14 = vcmp.eq.f32.partialorder %v6214_v45, 8.507059e+37 }
 0x9e4   : > { %6518 = vst.msk [vmem:[%s12038_s23 + $0x1d0] sm:$0xff] %vm3008_vm0, %v6486_v41  ;;  %vm7357_vm0 = vweird.f32 %v8789_v49 }
 0x9e5   : > { %vm14176_vm2 = vmor %vm7356_vm1, %vm7357_vm0 }
 0x9e7   : > { %v14156_v35 = vpop.eup %8792 }
 0x9e8   : > { %7103 = vadd.xlane.f32.xlu1 %v14037_v31  ;;  %v5377_v47 = vpop.permute.xlu1 %5376  ;;  %v14129_v12 = vpop.xlane.xlu0 %7095  ;;  %v6206_v61 = vmul.f32 %v14156_v35, %v14125_v5  ;;  %vm6211_vm8 = vweird.f32 %v14156_v35 }
 0x9e9   : > { %5411 = vst.msk [vmem:[%s12038_s23 + $0x1a8] sm:$0xff] %vm4131_vm3, %v5377_v47  ;;  %8794 = vrcp.f32 %v14129_v12  ;;  %vm14230_vm12 = vmor %vm6210_vm11, %vm6211_vm8  ;;  %vm7440_vm13 = vweird.f32 %v14129_v12 }
 0x9ea   : > { %v14131_v31 = vpop.f32.mrf.mxu3  ;;  %v6207_v13 = vsub.f32 1.0, %v6206_v61 }
 0x9ec   : > { %v6208_v30 = vmul.f32 %v14156_v35, %v6207_v13 }
 0x9ee   : > { %v6209_v26 = vadd.f32 %v14156_v35, %v6208_v30 }
 0x9ef   : > { %v14158_v16 = vpop.eup %8794 }
 0x9f0   : > { %5903 = vadd.xlane.f32.xlu1 %v13941_v9  ;;  %v4114_v10 = vpop.permute.xlu1 %4113  ;;  %v14139_v11 = vpop.xlane.xlu0 %5895  ;;  %v7436_v48 = vmul.f32 %v14158_v16, %v14129_v12  ;;  %vm7441_vm9 = vweird.f32 %v14158_v16 }
 0x9f1   : > { %4147 = vst.msk [vmem:[%s12038_s23 + $0x1e0] sm:$0xff] %vm4131_vm3, %v4114_v10  ;;  %8796 = vrcp.f32 %v14139_v11  ;;  %v7444_v10 = vand.u32 2147483647, %v14129_v12  ;;  %vm14244_vm15 = vmor %vm7440_vm13, %vm7441_vm9  ;;  %vm6252_vm1 = vweird.f32 %v14139_v11  ;;  %v6256_v21 = vand.u32 2147483647, %v14139_v11 }
 0x9f2   : > { %v14136_v9 = vpop.f32.mrf.mxu3  ;;  %v7437_v37 = vsub.f32 1.0, %v7436_v48  ;;  %v6217_v48 = vor.u32 1.1754944e-38, %v6216_v46 }
 0x9f3   : > { %vm7445_vm0 = vcmp.eq.f32.partialorder %v7444_v10, 8.507059e+37 }
 0x9f4   : > { %v7438_v34 = vmul.f32 %v14158_v16, %v7437_v37 }
 0x9f6   : > { %v7439_v41 = vadd.f32 %v14158_v16, %v7438_v34 }
 0x9f7   : > { %v14191_v15 = vpop.eup %8796 }
 0x9f8   : > { %7109 = vadd.xlane.f32.xlu1 %v8783_v60  ;;  %v14154_v51 = vpop.xlane.xlu0 %7101  ;;  %v6248_v27 = vmul.f32 %v14191_v15, %v14139_v11  ;;  %v7443_v2 = vsel %vm14244_vm15, %v14158_v16, %v7439_v41  ;;  %vm6253_vm4 = vweird.f32 %v14191_v15  ;;  %v14306_v41 = vpop.f32.mrf.mxu1 }
 0x9f9   : > { %vm14336_vm8 = vmor %vm6252_vm1, %vm6253_vm4 }
 0x9fa   : > { %v14152_v0 = vpop.f32.mrf.mxu3  ;;  %v6249_v14 = vsub.f32 1.0, %v6248_v27 }
 0x9fc   : > { %v6250_v37 = vmul.f32 %v14191_v15, %v6249_v14 }
 0x9fe   : > { %v14298_v27 = vadd.f32 %v14191_v15, %v6250_v37 }
 0xa00   : > { %5909 = vadd.xlane.f32.xlu1 %v8787_v4  ;;  %v14134_v36 = vpop.xlane.xlu2 %7081  ;;  %v14181_v60 = vpop.xlane.xlu0 %5901  ;;  %v7405_v4 = vor.u32 1.1754944e-38, %v7404_v52  ;;  %v6255_v37 = vsel %vm14336_vm8, %v14191_v15, %v14298_v27 }
 0xa01   : > { %8798 = vrcp.f32 %v14134_v36  ;;  %vm7342_vm9 = vweird.f32 %v14134_v36 }
 0xa02   : > { %v14171_v55 = vpop.f32.mrf.mxu3  ;;  %v7406_v5 = vsel %vm7403_vm10, %v7405_v4, %v7401_v7  ;;  %v7486_v4 = vand.u32 2147483647, %v14154_v51 }
 0xa07   : > { %v14195_v18 = vpop.eup %8798 }
 0xa08   : > { %v14148_v8 = vpop.xlane.xlu2 %5881  ;;  %v7338_v47 = vmul.f32 %v14195_v18, %v14134_v36  ;;  %v14249_v61 = vpop.xlane.xlu0 %7107  ;;  %vm7343_vm6 = vweird.f32 %v14195_v18 }
 0xa09   : > { %vm14345_vm11 = vmor %vm7342_vm9, %vm7343_vm6 }
 0xa0a   : > { %v14209_v58 = vpop.f32.mrf.mxu3 }
 0xa10   : > { %v14168_v22 = vpop.xlane.xlu2 %7087 }
 0xa12   : > { %v7711_v34 = vpop.f32.mrf.mxu3 }
 0xa18   : > { %v14221_v32 = vpop.xlane.xlu2 %5887 }
 0xa1b   : > { %v6952_v23 = vpop.xlane.xlu1 %6951 }
 0xa1c   : > { %v6984_v33 = vsub.f32 %v14075_v44, %v6952_v23  ;;  %v7359_v44 = vsel %vm14176_vm2, %v8789_v49, %v7355_v29  ;;  %v7446_v49 = vand.u32 2147483648, %v14129_v12  ;;  %v6258_v29 = vand.u32 2147483648, %v14139_v11 }
 0xa1d   : > { %v7364_v53 = vsel %vm7361_vm5, %v7363_v57, %v7359_v44  ;;  %v7339_v23 = vsub.f32 1.0, %v7338_v47 }
 0xa1e   : > { %v7047_v56 = vmul.f32 1.442695, %v6984_v33  ;;  %v14236_v63 = vmul.f32 %v14127_v19, %v7364_v53  ;;  %v6213_v19 = vsel %vm14230_vm12, %v14156_v35, %v6209_v26  ;;  %v7447_v43 = vor.u32 1.1754944e-38, %v7446_v49 }
 0xa1f   : > { %v14267_v35 = vmul.f32 %v14152_v0, %v7406_v5  ;;  %v6218_v16 = vsel %vm14238_vm14, %v6217_v48, %v6213_v19  ;;  %v14276_v52 = vor.u32 1.1754944e-38, %v6258_v29  ;;  %v7340_v0 = vmul.f32 %v14195_v18, %v7339_v23 }
 0xa20   : > { %8800 = vpow2.f32 %v7047_v56  ;;  %v7488_v56 = vand.u32 2147483648, %v14154_v51  ;;  %v7448_v17 = vsel %vm7445_vm0, %v7447_v43, %v7443_v2  ;;  %v14288_v53 = vmul.f32 %v14185_v28, %v6218_v16  ;;  %v14292_v45 = vpop.xlane.xlu2 %7093 }
 0xa21   : > { %v14295_v26 = vmul.f32 %v7711_v34, %v7448_v17  ;;  %v7341_v10 = vadd.f32 %v14195_v18, %v7340_v0  ;;  %v7348_v29 = vand.u32 2147483648, %v14134_v36  ;;  %v7346_v23 = vand.u32 2147483647, %v14134_v36 }
 0xa22   : > { %vm14360_vm12 = vcmp.eq.f32.partialorder %v6256_v21, 8.507059e+37  ;;  %v6300_v17 = vand.u32 2147483648, %v14181_v60  ;;  %vm6154_vm0 = vweird.f32 %v14148_v8  ;;  %v6158_v48 = vand.u32 2147483647, %v14148_v8 }
 0xa23   : > { %v14202_v1 = vpop.xlane.xlu1 %5879  ;;  %v7345_v16 = vsel %vm14345_vm11, %v14195_v18, %v7341_v10  ;;  %v6298_v18 = vand.u32 2147483647, %v14181_v60  ;;  %v7349_v0 = vor.u32 1.1754944e-38, %v7348_v29  ;;  %vm7347_vm14 = vcmp.eq.f32.partialorder %v7346_v23, 8.507059e+37 }
 0xa24   : > { %8802 = vrcp.f32 %v14202_v1  ;;  %v6146_v20 = vand.u32 2147483648, %v14202_v1  ;;  %v6144_v7 = vand.u32 2147483647, %v14202_v1  ;;  %vm6140_vm5 = vweird.f32 %v14202_v1 }
 0xa25   : > { %8804 = vrcp.f32 %v14148_v8  ;;  %v6160_v29 = vand.u32 2147483648, %v14148_v8 }
 0xa26   : > { %v8801_v6 = vpop.eup %8800  ;;  %8806 = vrcp.f32 %v14154_v51  ;;  %v6147_v5 = vor.u32 1.1754944e-38, %v6146_v20  ;;  %vm6145_vm10 = vcmp.eq.f32.partialorder %v6144_v7, 8.507059e+37  ;;  %v14380_v20 = vpop.f32.mrf.mxu1 }
 0xa27   : > { %7734 = vmatmul.f32.gmra.mxu3 %v8801_v6  ;;  %7111 = vadd.xlane.f32.xlu2 %v8801_v6  ;;  %v14300_v6 = vor.u32 1.1754944e-38, %v7488_v56 }
 0xa28   : > { %v14385_v27 = vpop.xlane.xlu2 %5893 }
 0xa2a   : > { %v14254_v12 = vpop.eup %8802 }
 0xa2b   : > { %v14260_v33 = vpop.eup %8804  ;;  %v6136_v13 = vmul.f32 %v14254_v12, %v14202_v1  ;;  %v14264_v50 = vpop.xlane.xlu1 %7085  ;;  %vm6141_vm2 = vweird.f32 %v14254_v12 }
 0xa2c   : > { %8808 = vrcp.f32 %v14264_v50  ;;  %v6150_v57 = vmul.f32 %v14260_v33, %v14148_v8  ;;  %v14282_v30 = vpop.eup %8806  ;;  %vm14316_vm7 = vmor %vm6140_vm5, %vm6141_vm2  ;;  %v14321_v1 = vpop.xlane.xlu0 %5907  ;;  %v7374_v15 = vand.u32 2147483647, %v14264_v50  ;;  %vm7370_vm15 = vweird.f32 %v14264_v50 }
 0xa2d   : > { %v6137_v44 = vsub.f32 1.0, %v6136_v13  ;;  %8810 = vrcp.f32 %v14168_v22  ;;  %v14310_v47 = vmul.f32 %v14282_v30, %v14154_v51  ;;  %vm6155_vm1 = vweird.f32 %v14260_v33 }
 0xa2e   : > { %v6151_v49 = vsub.f32 1.0, %v6150_v57  ;;  %8812 = vrcp.f32 %v14181_v60  ;;  %vm7375_vm4 = vcmp.eq.f32.partialorder %v7374_v15, 8.507059e+37  ;;  %vm14411_vm5 = vmor %vm6154_vm0, %vm6155_vm1  ;;  %v14453_v56 = vpop.f32.mrf.mxu1  ;;  %vm7483_vm11 = vweird.f32 %v14282_v30 }
 0xa2f   : > { %v6138_v59 = vmul.f32 %v14254_v12, %v6137_v44  ;;  %v7479_v57 = vsub.f32 1.0, %v14310_v47 }
 0xa30   : > { %v6152_v43 = vmul.f32 %v14260_v33, %v6151_v49 }
 0xa31   : > { %v6139_v46 = vadd.f32 %v14254_v12, %v6138_v59 }
 0xa32   : > { %v14304_v28 = vpop.eup %8808  ;;  %v6153_v7 = vadd.f32 %v14260_v33, %v6152_v43 }
 0xa33   : > { %v7366_v42 = vmul.f32 %v14304_v28, %v14264_v50  ;;  %v14325_v40 = vpop.xlane.xlu1 %5885  ;;  %v6143_v14 = vsel %vm14316_vm7, %v14254_v12, %v6139_v46  ;;  %v14330_v19 = vpop.eup %8810  ;;  %vm7371_vm13 = vweird.f32 %v14304_v28  ;;  %vm6159_vm7 = vcmp.eq.f32.partialorder %v6158_v48, 8.507059e+37 }
 0xa34   : > { %8814 = vrcp.f32 %v14325_v40  ;;  %v6148_v2 = vsel %vm6145_vm10, %v6147_v5, %v6143_v14  ;;  %v7380_v36 = vmul.f32 %v14330_v19, %v14168_v22  ;;  %v14373_v21 = vpop.eup %8812  ;;  %vm14389_vm2 = vmor %vm7370_vm15, %vm7371_vm13  ;;  %v6157_v8 = vsel %vm14411_vm5, %v14260_v33, %v6153_v7 }
 0xa35   : > { %8816 = vrcp.f32 %v14221_v32  ;;  %v7367_v11 = vsub.f32 1.0, %v7366_v42  ;;  %v6488_v13 = vmul.f32 %v14084_v25, %v6148_v2  ;;  %v7376_v25 = vand.u32 2147483648, %v14264_v50 }
 0xa36   : > { %v7350_v50 = vsel %vm7347_vm14, %v7349_v0, %v7345_v16  ;;  %v7381_v10 = vsub.f32 1.0, %v7380_v36  ;;  %v6290_v2 = vmul.f32 %v14373_v21, %v14181_v60  ;;  %v6186_v0 = vand.u32 2147483647, %v14325_v40 }
 0xa37   : > { %v7368_v44 = vmul.f32 %v14304_v28, %v7367_v11  ;;  %6536 = vrot.lane.b32.xlu1 %v6488_v13, %s9215_s18  ;;  %v7377_v49 = vor.u32 1.1754944e-38, %v7376_v25  ;;  %v7754_v11 = vmul.f32 %v14123_v62, %v7350_v50  ;;  %v6188_v62 = vand.u32 2147483648, %v14325_v40 }
 0xa38   : > { %v7382_v16 = vmul.f32 %v14330_v19, %v7381_v10  ;;  %v6161_v25 = vor.u32 1.1754944e-38, %v6160_v29  ;;  %v7480_v33 = vmul.f32 %v14282_v30, %v7479_v57  ;;  %vm6182_vm8 = vweird.f32 %v14325_v40 }
 0xa39   : > { %v7369_v34 = vadd.f32 %v14304_v28, %v7368_v44  ;;  %v6541_v5 = vpop.permute.xlu0 %6540  ;;  %v14430_v44 = vor.u32 1.1754944e-38, %v6300_v17  ;;  %vm7385_vm9 = vweird.f32 %v14330_v19  ;;  %vm6187_vm13 = vcmp.eq.f32.partialorder %v6186_v0, 8.507059e+37 }
 0xa3a   : > { %v14378_v59 = vpop.eup %8814  ;;  %6586 = vst.msk [vmem:[%s12038_s23 + $0x50] sm:$0xff] %vm4131_vm3, %v6541_v5  ;;  %v7383_v57 = vadd.f32 %v14330_v19, %v7382_v16  ;;  %v7388_v5 = vand.u32 2147483647, %v14168_v22  ;;  %vm7482_vm14 = vweird.f32 %v14154_v51 }
 0xa3b   : > { %v14393_v47 = vpop.eup %8816  ;;  %v6178_v38 = vmul.f32 %v14378_v59, %v14325_v40  ;;  %v14397_v42 = vpop.xlane.xlu1 %7091  ;;  %v7373_v14 = vsel %vm14389_vm2, %v14304_v28, %v7369_v34  ;;  %vm6183_vm6 = vweird.f32 %v14378_v59  ;;  %v6291_v34 = vsub.f32 1.0, %v6290_v2 }
 0xa3c   : > { %8818 = vrcp.f32 %v14397_v42  ;;  %v7378_v23 = vsel %vm7375_vm4, %v7377_v49, %v7373_v14  ;;  %v6192_v43 = vmul.f32 %v14393_v47, %v14221_v32  ;;  %vm14447_vm10 = vmor %vm6182_vm8, %vm6183_vm6  ;;  %v6189_v40 = vor.u32 1.1754944e-38, %v6188_v62 }
 0xa3d   : > { %8820 = vrcp.f32 %v14292_v45  ;;  %v6179_v28 = vsub.f32 1.0, %v6178_v38  ;;  %v7756_v13 = vmul.f32 %v14131_v31, %v7378_v23  ;;  %v6260_v31 = vsel %vm14360_vm12, %v14276_v52, %v6255_v37  ;;  %v14466_v38 = vpop.xlane.xlu2 %7099 }
 0xa3e   : > { %v6193_v7 = vsub.f32 1.0, %v6192_v43  ;;  %v6162_v52 = vsel %vm6159_vm7, %v6161_v25, %v6157_v8  ;;  %vm7384_vm12 = vweird.f32 %v14168_v22  ;;  %v7390_v49 = vand.u32 2147483648, %v14168_v22 }
 0xa3f   : > { %v6180_v36 = vmul.f32 %v14378_v59, %v6179_v28  ;;  %7802 = vrot.lane.b32.xlu2 %v7754_v11, %s9215_s18  ;;  %7806 = vrot.lane.b32.xlu0 %v7756_v13, %s9215_s18  ;;  %v6489_v29 = vmul.f32 %v14090_v54, %v6162_v52  ;;  %vm14474_vm15 = vmor %vm7384_vm12, %vm7385_vm9  ;;  %v7418_v54 = vand.u32 2147483648, %v14397_v42  ;;  %v14491_v2 = vadd.f32 %v14282_v30, %v7480_v33 }
 0xa40   : > { %7804 = vrot.lane.b32.xlu1 %v14236_v63, %s9215_s18  ;;  %v6194_v12 = vmul.f32 %v14393_v47, %v6193_v7  ;;  %v7387_v11 = vsel %vm14474_vm15, %v14330_v19, %v7383_v57  ;;  %v7391_v43 = vor.u32 1.1754944e-38, %v7390_v49  ;;  %v7416_v13 = vand.u32 2147483647, %v14397_v42  ;;  %v14527_v7 = vpop.f32.mrf.mxu3  ;;  %v14529_v63 = vpop.f32.mrf.mxu1 }
 0xa41   : > { %v6181_v15 = vadd.f32 %v14378_v59, %v6180_v36  ;;  %v6292_v8 = vmul.f32 %v14373_v21, %v6291_v34  ;;  %vm7389_vm1 = vcmp.eq.f32.partialorder %v7388_v5, 8.507059e+37  ;;  %vm7412_vm2 = vweird.f32 %v14397_v42 }
 0xa42   : > { %v14442_v17 = vpop.eup %8818  ;;  %v6195_v36 = vadd.f32 %v14393_v47, %v6194_v12  ;;  %vm6197_vm4 = vweird.f32 %v14393_v47  ;;  %vm6196_vm6 = vweird.f32 %v14221_v32  ;;  %v7419_v25 = vor.u32 1.1754944e-38, %v7418_v54 }
 0xa43   : > { %v14451_v37 = vpop.eup %8820  ;;  %v7408_v46 = vmul.f32 %v14442_v17, %v14397_v42  ;;  %v14458_v50 = vpop.xlane.xlu1 %5891  ;;  %v6185_v10 = vsel %vm14447_vm10, %v14378_v59, %v6181_v15  ;;  %vm7413_vm0 = vweird.f32 %v14442_v17  ;;  %vm6295_vm7 = vweird.f32 %v14373_v21  ;;  %vm14539_vm10 = vmor %vm6196_vm6, %vm6197_vm4 }
 0xa44   : > { %8822 = vrcp.f32 %v14458_v50  ;;  %v6190_v48 = vsel %vm6187_vm13, %v6189_v40, %v6185_v10  ;;  %v7422_v28 = vmul.f32 %v14451_v37, %v14292_v45  ;;  %vm14509_vm5 = vmor %vm7412_vm2, %vm7413_vm0  ;;  %v6200_v15 = vand.u32 2147483647, %v14221_v32 }
 0xa45   : > { %v7409_v14 = vsub.f32 1.0, %v7408_v46  ;;  %8824 = vrcp.f32 %v14385_v27  ;;  %v6491_v22 = vmul.f32 %v14142_v3, %v6190_v48  ;;  %v14498_v3 = vmul.f32 %v14380_v20, %v6260_v31  ;;  %v14548_v46 = vpop.xlane.xlu2 %5899  ;;  %vm14558_vm13 = vmor %vm7482_vm14, %vm7483_vm11 }
 0xa46   : > { %v7423_v62 = vsub.f32 1.0, %v7422_v28  ;;  %v7392_v20 = vsel %vm7389_vm1, %v7391_v43, %v7387_v11  ;;  %v6202_v34 = vand.u32 2147483648, %v14221_v32  ;;  %vm7417_vm8 = vcmp.eq.f32.partialorder %v7416_v13, 8.507059e+37 }
 0xa47   : > { %v7410_v23 = vmul.f32 %v14442_v17, %v7409_v14  ;;  %6538 = vrot.lane.b32.xlu2 %v6489_v29, %s9215_s18  ;;  %6542 = vrot.lane.b32.xlu0 %v6491_v22, %s9215_s18  ;;  %vm14533_vm9 = vcmp.eq.f32.partialorder %v7486_v4, 8.507059e+37  ;;  %v7757_v40 = vmul.f32 %v14136_v9, %v7392_v20  ;;  %vm6294_vm12 = vweird.f32 %v14181_v60 }
 0xa48   : > { %7810 = vrot.lane.b32.xlu1 %v14267_v35, %s9215_s18  ;;  %v7424_v4 = vmul.f32 %v14451_v37, %v7423_v62  ;;  %v6199_v49 = vsel %vm14539_vm10, %v14393_v47, %v6195_v36  ;;  %v14569_v47 = vadd.f32 %v14373_v21, %v6292_v8  ;;  %v7485_v51 = vsel %vm14558_vm13, %v14282_v30, %v14491_v2  ;;  %vm14638_vm6 = vmor %vm6294_vm12, %vm6295_vm7 }
 0xa49   : > { %v7411_v16 = vadd.f32 %v14442_v17, %v7410_v23  ;;  %v6203_v48 = vor.u32 1.1754944e-38, %v6202_v34  ;;  %v6228_v29 = vand.u32 2147483647, %v14458_v50  ;;  %vm6201_vm11 = vcmp.eq.f32.partialorder %v6200_v15, 8.507059e+37  ;;  %v14632_v15 = vpop.f32.mrf.mxu1 }
 0xa4a   : > { %v14503_v19 = vpop.eup %8822  ;;  %vm6224_vm14 = vweird.f32 %v14458_v50  ;;  %v7425_v28 = vadd.f32 %v14451_v37, %v7424_v4  ;;  %vm7426_vm0 = vweird.f32 %v14292_v45  ;;  %vm7427_vm1 = vweird.f32 %v14451_v37 }
 0xa4b   : > { %v6220_v42 = vmul.f32 %v14503_v19, %v14458_v50  ;;  %v14516_v0 = vpop.xlane.xlu1 %7097  ;;  %v7415_v31 = vsel %vm14509_vm5, %v14442_v17, %v7411_v16  ;;  %v14521_v33 = vpop.eup %8824  ;;  %vm6225_vm15 = vweird.f32 %v14503_v19  ;;  %v7430_v13 = vand.u32 2147483647, %v14292_v45  ;;  %vm14613_vm5 = vmor %vm7426_vm0, %vm7427_vm1 }
 0xa4c   : > { %8826 = vrcp.f32 %v14516_v0  ;;  %v7420_v57 = vsel %vm7417_vm8, %v7419_v25, %v7415_v31  ;;  %v6234_v5 = vmul.f32 %v14521_v33, %v14385_v27  ;;  %vm14589_vm2 = vmor %vm6224_vm14, %vm6225_vm15  ;;  %v7432_v8 = vand.u32 2147483648, %v14292_v45  ;;  %v14607_v16 = vpop.f32.mrf.mxu3 }
 0xa4d   : > { %8828 = vrcp.f32 %v14466_v38  ;;  %v6221_v32 = vsub.f32 1.0, %v6220_v42  ;;  %v7759_v10 = vmul.f32 %v14171_v55, %v7420_v57  ;;  %v6230_v55 = vand.u32 2147483648, %v14458_v50  ;;  %v14657_v60 = vpop.xlane.xlu2 %7105 }
 0xa4e   : > { %8830 = vrcp.f32 %v14249_v61  ;;  %v6235_v23 = vsub.f32 1.0, %v6234_v5  ;;  %vm6229_vm4 = vcmp.eq.f32.partialorder %v6228_v29, 8.507059e+37  ;;  %v14622_v20 = vsel %vm14533_vm9, %v14300_v6, %v7485_v51 }
 0xa4f   : > { %v6222_v14 = vmul.f32 %v14503_v19, %v6221_v32  ;;  %7808 = vrot.lane.b32.xlu2 %v7757_v40, %s9215_s18  ;;  %7812 = vrot.lane.b32.xlu0 %v7759_v10, %s9215_s18  ;;  %8832 = vrcp.f32 %v14321_v1  ;;  %v6231_v54 = vor.u32 1.1754944e-38, %v6230_v55  ;;  %v7429_v42 = vsel %vm14613_vm5, %v14451_v37, %v7425_v28 }
 0xa50   : > { %6546 = vrot.lane.b32.xlu1 %v14288_v53, %s9215_s18  ;;  %v6204_v53 = vsel %vm6201_vm11, %v6203_v48, %v6199_v49  ;;  %vm14644_vm8 = vcmp.eq.f32.partialorder %v6298_v18, 8.507059e+37  ;;  %v6236_v6 = vmul.f32 %v14521_v33, %v6235_v23  ;;  %v7460_v34 = vand.u32 2147483648, %v14516_v0 }
 0xa51   : > { %v6223_v59 = vadd.f32 %v14503_v19, %v6222_v14  ;;  %v6492_v35 = vmul.f32 %v14160_v39, %v6204_v53  ;;  %v7433_v17 = vor.u32 1.1754944e-38, %v7432_v8  ;;  %v7458_v18 = vand.u32 2147483647, %v14516_v0  ;;  %v14718_v8 = vpop.f32.mrf.mxu1 }
 0xa52   : > { %v14582_v12 = vpop.eup %8826  ;;  %v6297_v32 = vsel %vm14638_vm6, %v14373_v21, %v14569_v47  ;;  %vm7431_vm7 = vcmp.eq.f32.partialorder %v7430_v13, 8.507059e+37  ;;  %vm7454_vm10 = vweird.f32 %v14516_v0  ;;  %v6340_v40 = vand.u32 2147483647, %v14321_v1 }
 0xa53   : > { %v14593_v22 = vpop.eup %8828  ;;  %v7450_v50 = vmul.f32 %v14582_v12, %v14516_v0  ;;  %v14597_v11 = vpop.xlane.xlu1 %5897  ;;  %v6227_v2 = vsel %vm14589_vm2, %v14503_v19, %v6223_v59  ;;  %vm7455_vm9 = vweird.f32 %v14582_v12  ;;  %vm6239_vm12 = vweird.f32 %v14521_v33 }
 0xa54   : > { %v14602_v43 = vpop.eup %8830  ;;  %8834 = vrcp.f32 %v14597_v11  ;;  %v6232_v62 = vsel %vm6229_vm4, %v6231_v54, %v6227_v2  ;;  %v7464_v25 = vmul.f32 %v14593_v22, %v14466_v38  ;;  %vm7456_vm13 = vmor %vm7454_vm10, %vm7455_vm9  ;;  %v7434_v21 = vsel %vm7431_vm7, %v7433_v17, %v7429_v42 }
 0xa55   : > { %8836 = vrcp.f32 %v14548_v46  ;;  %v7451_v19 = vsub.f32 1.0, %v7450_v50  ;;  %v6494_v45 = vmul.f32 %v14226_v24, %v6232_v62  ;;  %v14630_v31 = vpop.eup %8832  ;;  %v14655_v52 = vmul.f32 %v14602_v43, %v14249_v61 }
 0xa56   : > { %v14674_v10 = vmul.f32 %v14630_v31, %v14321_v1  ;;  %v6237_v9 = vadd.f32 %v14521_v33, %v6236_v6  ;;  %v7461_v0 = vor.u32 1.1754944e-38, %v7460_v34  ;;  %vm6238_vm15 = vweird.f32 %v14385_v27 }
 0xa57   : > { %v7452_v37 = vmul.f32 %v14582_v12, %v7451_v19  ;;  %6544 = vrot.lane.b32.xlu2 %v6492_v35, %s9215_s18  ;;  %6548 = vrot.lane.b32.xlu0 %v6494_v45, %s9215_s18  ;;  %v6244_v47 = vand.u32 2147483648, %v14385_v27  ;;  %vm7459_vm11 = vcmp.eq.f32.partialorder %v7458_v18, 8.507059e+37  ;;  %v6242_v51 = vand.u32 2147483647, %v14385_v27  ;;  %vm14694_vm14 = vmor %vm6238_vm15, %vm6239_vm12  ;;  %v7720_v27 = vpop.f32.mrf.mxu3  ;;  %v14727_v35 = vpop.xlane.xlu2 %5905 }
 0xa58   : > { %7816 = vrot.lane.b32.xlu1 %v14295_v26, %s9215_s18  ;;  %v7465_v26 = vsub.f32 1.0, %v7464_v25  ;;  %v7760_v59 = vmul.f32 %v14209_v58, %v7434_v21  ;;  %v6272_v58 = vand.u32 2147483648, %v14597_v11  ;;  %v6241_v54 = vsel %vm14694_vm14, %v14521_v33, %v6237_v9 }
 0xa59   : > { %v7453_v57 = vadd.f32 %v14582_v12, %v7452_v37  ;;  %v6245_v50 = vor.u32 1.1754944e-38, %v6244_v47  ;;  %v6342_v2 = vand.u32 2147483648, %v14321_v1  ;;  %v6270_v13 = vand.u32 2147483647, %v14597_v11 }
 0xa5a   : > { %v14670_v4 = vpop.eup %8834  ;;  %v6333_v36 = vsub.f32 1.0, %v14674_v10  ;;  %vm6243_vm1 = vcmp.eq.f32.partialorder %v6242_v51, 8.507059e+37  ;;  %vm6266_vm2 = vweird.f32 %v14597_v11  ;;  %vm7469_vm4 = vweird.f32 %v14593_v22 }
 0xa5b   : > { %v14679_v49 = vpop.eup %8836  ;;  %v6262_v5 = vmul.f32 %v14670_v4, %v14597_v11  ;;  %v14684_v14 = vpop.xlane.xlu1 %7103  ;;  %v7457_v55 = vsel %vm7456_vm13, %v14582_v12, %v7453_v57  ;;  %v7466_v12 = vmul.f32 %v14593_v22, %v7465_v26  ;;  %vm6267_vm0 = vweird.f32 %v14670_v4 }
 0xa5c   : > { %8838 = vrcp.f32 %v14684_v14  ;;  %v7462_v29 = vsel %vm7459_vm11, %v7461_v0, %v7457_v55  ;;  %v6276_v30 = vmul.f32 %v14679_v49, %v14548_v46  ;;  %vm14731_vm5 = vmor %vm6266_vm2, %vm6267_vm0  ;;  %v6246_v25 = vsel %vm6243_vm1, %v6245_v50, %v6241_v54 }
 0xa5d   : > { %v6263_v48 = vsub.f32 1.0, %v6262_v5  ;;  %8840 = vrcp.f32 %v14657_v60  ;;  %v7762_v53 = vmul.f32 %v14527_v7, %v7462_v29  ;;  %v6302_v7 = vsel %vm14644_vm8, %v14430_v44, %v6297_v32  ;;  %v14774_v5 = vpop.f32.mrf.mxu1 }
 0xa5e   : > { %v7467_v62 = vadd.f32 %v14593_v22, %v7466_v12  ;;  %vm7468_vm6 = vweird.f32 %v14466_v38  ;;  %v6273_v45 = vor.u32 1.1754944e-38, %v6272_v58  ;;  %v7472_v6 = vand.u32 2147483647, %v14466_v38 }
 0xa5f   : > { %v6264_v23 = vmul.f32 %v14670_v4, %v6263_v48  ;;  %7814 = vrot.lane.b32.xlu2 %v7760_v59, %s9215_s18  ;;  %7818 = vrot.lane.b32.xlu0 %v7762_v53, %s9215_s18  ;;  %v7474_v37 = vand.u32 2147483648, %v14466_v38  ;;  %vm6271_vm8 = vcmp.eq.f32.partialorder %v6270_v13, 8.507059e+37  ;;  %vm14750_vm9 = vmor %vm7468_vm6, %vm7469_vm4  ;;  %v6495_v32 = vmul.f32 %v14306_v41, %v6246_v25  ;;  %v7723_v0 = vpop.f32.mrf.mxu3 }
 0xa60   : > { %6552 = vrot.lane.b32.xlu1 %v14498_v3, %s9215_s18  ;;  %v6277_v3 = vsub.f32 1.0, %v6276_v30  ;;  %v7764_v57 = vmul.f32 %v7720_v27, %v14622_v20  ;;  %v7471_v10 = vsel %vm14750_vm9, %v14593_v22, %v7467_v62  ;;  %vm6336_vm7 = vweird.f32 %v14321_v1 }
 0xa61   : > { %v6265_v33 = vadd.f32 %v14670_v4, %v6264_v23  ;;  %v7502_v41 = vand.u32 2147483648, %v14684_v14  ;;  %v7521_v20 = vsub.f32 1.0, %v14655_v52  ;;  %v6334_v9 = vmul.f32 %v14630_v31, %v6333_v36 }
 0xa62   : > { %v14723_v19 = vpop.eup %8838  ;;  %v7500_v22 = vand.u32 2147483647, %v14684_v14  ;;  %vm7473_vm12 = vcmp.eq.f32.partialorder %v7472_v6, 8.507059e+37  ;;  %vm7496_vm13 = vweird.f32 %v14684_v14  ;;  %v6499_v47 = vmul.f32 %v14632_v15, %v6302_v7 }
 0xa63   : > { %v7492_v11 = vmul.f32 %v14723_v19, %v14684_v14  ;;  %v14738_v42 = vpop.xlane.xlu1 %5903  ;;  %v6269_v39 = vsel %vm14731_vm5, %v14670_v4, %v6265_v33  ;;  %v14743_v24 = vpop.eup %8840  ;;  %v6278_v4 = vmul.f32 %v14679_v49, %v6277_v3  ;;  %vm7497_vm10 = vweird.f32 %v14723_v19 }
 0xa64   : > { %8842 = vrcp.f32 %v14738_v42  ;;  %v6274_v18 = vsel %vm6271_vm8, %v6273_v45, %v6269_v39  ;;  %v7506_v26 = vmul.f32 %v14743_v24, %v14657_v60  ;;  %vm6281_vm15 = vweird.f32 %v14679_v49  ;;  %vm14784_vm14 = vmor %vm7496_vm13, %vm7497_vm10 }
 0xa65   : > { %8844 = vrcp.f32 %v14727_v35  ;;  %v7493_v17 = vsub.f32 1.0, %v7492_v11  ;;  %v6497_v38 = vmul.f32 %v14453_v56, %v6274_v18  ;;  %v7475_v56 = vor.u32 1.1754944e-38, %v7474_v37 }
 0xa66   : > { %v6279_v51 = vadd.f32 %v14679_v49, %v6278_v4  ;;  %vm6337_vm11 = vweird.f32 %v14630_v31  ;;  %v7507_v28 = vsub.f32 1.0, %v7506_v26  ;;  %v7503_v14 = vor.u32 1.1754944e-38, %v7502_v41 }
 0xa67   : > { %v7494_v21 = vmul.f32 %v14723_v19, %v7493_v17  ;;  %6550 = vrot.lane.b32.xlu2 %v6495_v32, %s9215_s18  ;;  %6554 = vrot.lane.b32.xlu0 %v6497_v38, %s9215_s18  ;;  %v7476_v29 = vsel %vm7473_vm12, %v7475_v56, %v7471_v10  ;;  %vm6280_vm0 = vweird.f32 %v14548_v46  ;;  %v6286_v53 = vand.u32 2147483648, %v14548_v46  ;;  %vm14819_vm6 = vmor %vm6336_vm7, %vm6337_vm11  ;;  %v7726_v25 = vpop.f32.mrf.mxu3 }
 0xa68   : > { %7822 = vrot.lane.b32.xlu1 %v7764_v57, %s9215_s18  ;;  %v6335_v27 = vadd.f32 %v14630_v31, %v6334_v9  ;;  %vm7501_vm1 = vcmp.eq.f32.partialorder %v7500_v22, 8.507059e+37  ;;  %vm14799_vm2 = vmor %vm6280_vm0, %vm6281_vm15  ;;  %v6284_v58 = vand.u32 2147483647, %v14548_v46  ;;  %v7763_v13 = vmul.f32 %v14607_v16, %v7476_v29 }
 0xa69   : > { %v7495_v55 = vadd.f32 %v14723_v19, %v7494_v21  ;;  %v6283_v33 = vsel %vm14799_vm2, %v14679_v49, %v6279_v51  ;;  %v6314_v46 = vand.u32 2147483648, %v14738_v42  ;;  %v6287_v3 = vor.u32 1.1754944e-38, %v6286_v53 }
 0xa6a   : > { %v8843_v52 = vpop.eup %8842  ;;  %vm7525_vm5 = vweird.f32 %v14602_v43  ;;  %vm14825_vm8 = vcmp.eq.f32.partialorder %v6340_v40, 8.507059e+37  ;;  %v6312_v44 = vand.u32 2147483647, %v14738_v42  ;;  %vm6285_vm9 = vcmp.eq.f32.partialorder %v6284_v58, 8.507059e+37 }
 0xa6b   : > { %v14788_v59 = vpop.eup %8844  ;;  %v6304_v15 = vmul.f32 %v8843_v52, %v14738_v42  ;;  %v14791_v12 = vpop.xlane.xlu1 %7109  ;;  %v7499_v30 = vsel %vm14784_vm14, %v14723_v19, %v7495_v55  ;;  %v7508_v19 = vmul.f32 %v14743_v24, %v7507_v28  ;;  %vm6309_vm4 = vweird.f32 %v8843_v52 }
 0xa6c   : > { %v7504_v50 = vsel %vm7501_vm1, %v7503_v14, %v7499_v30  ;;  %v6318_v7 = vmul.f32 %v14788_v59, %v14727_v35  ;;  %8846 = vrcp.f32 %v14791_v12  ;;  %v6339_v45 = vsel %vm14819_vm6, %v14630_v31, %v6335_v27  ;;  %v6466_v31 = vpop.f32.mrf.mxu1 }
 0xa6d   : > { %v6305_v54 = vsub.f32 1.0, %v6304_v15  ;;  %v7765_v36 = vmul.f32 %v7723_v0, %v7504_v50  ;;  %vm6308_vm7 = vweird.f32 %v14738_v42  ;;  %v7522_v40 = vmul.f32 %v14602_v43, %v7521_v20 }
 0xa6e   : > { %v6319_v39 = vsub.f32 1.0, %v6318_v7  ;;  %v6343_v6 = vor.u32 1.1754944e-38, %v6342_v2  ;;  %vm14840_vm10 = vmor %vm6308_vm7, %vm6309_vm4  ;;  %v6288_v34 = vsel %vm6285_vm9, %v6287_v3, %v6283_v33  ;;  %v7509_v17 = vadd.f32 %v14743_v24, %v7508_v19 }
 0xa6f   : > { %v6306_v62 = vmul.f32 %v8843_v52, %v6305_v54  ;;  %7820 = vrot.lane.b32.xlu2 %v7763_v13, %s9215_s18  ;;  %7824 = vrot.lane.b32.xlu0 %v7765_v36, %s9215_s18  ;;  %vm7511_vm12 = vweird.f32 %v14743_v24  ;;  %v6315_v18 = vor.u32 1.1754944e-38, %v6314_v46  ;;  %v7516_v1 = vand.u32 2147483648, %v14657_v60  ;;  %v7729_v51 = vpop.f32.mrf.mxu3 }
 0xa70   : > { %6558 = vrot.lane.b32.xlu1 %v6499_v47, %s9215_s18  ;;  %v6344_v2 = vsel %vm14825_vm8, %v6343_v6, %v6339_v45  ;;  %vm6313_vm13 = vcmp.eq.f32.partialorder %v6312_v44, 8.507059e+37  ;;  %vm7510_vm15 = vweird.f32 %v14657_v60  ;;  %v7514_v4 = vand.u32 2147483647, %v14657_v60 }
 0xa71   : > { %v6307_v11 = vadd.f32 %v8843_v52, %v6306_v62  ;;  %v6498_v10 = vmul.f32 %v14529_v63, %v6288_v34  ;;  %vm14856_vm11 = vmor %vm7510_vm15, %vm7511_vm12  ;;  %v6320_v21 = vmul.f32 %v14788_v59, %v6319_v39  ;;  %v7523_v41 = vadd.f32 %v14602_v43, %v7522_v40 }
 0xa72   : > { %v14848_v57 = vpop.eup %8846  ;;  %v6502_v20 = vmul.f32 %v6466_v31, %v6344_v2  ;;  %v7513_v9 = vsel %vm14856_vm11, %v14743_v24, %v7509_v17  ;;  %v7530_v60 = vand.u32 2147483648, %v14249_v61  ;;  %v7517_v22 = vor.u32 1.1754944e-38, %v7516_v1 }
 0xa73   : > { %v5910_v32 = vpop.xlane.xlu1 %5909  ;;  %v6311_v42 = vsel %vm14840_vm10, %v8843_v52, %v6307_v11  ;;  %v7534_v63 = vmul.f32 %v14848_v57, %v14791_v12  ;;  %vm7524_vm14 = vweird.f32 %v14249_v61  ;;  %v7528_v0 = vand.u32 2147483647, %v14249_v61 }
 0xa74   : > { %8848 = vrcp.f32 %v5910_v32  ;;  %v6316_v38 = vsel %vm6313_vm13, %v6315_v18, %v6311_v42  ;;  %vm7515_vm0 = vcmp.eq.f32.partialorder %v7514_v4, 8.507059e+37  ;;  %vm14876_vm1 = vmor %vm7524_vm14, %vm7525_vm5  ;;  %v6321_v47 = vadd.f32 %v14788_v59, %v6320_v21  ;;  %v6469_v62 = vpop.f32.mrf.mxu1 }
 0xa75   : > { %v6500_v56 = vmul.f32 %v14718_v8, %v6316_v38  ;;  %v7518_v55 = vsel %vm7515_vm0, %v7517_v22, %v7513_v9  ;;  %vm6323_vm2 = vweird.f32 %v14788_v59  ;;  %v7527_v61 = vsel %vm14876_vm1, %v14602_v43, %v7523_v41 }
 0xa76   : > { %v7531_v52 = vor.u32 1.1754944e-38, %v7530_v60  ;;  %v7535_v48 = vsub.f32 1.0, %v7534_v63  ;;  %vm6322_vm4 = vweird.f32 %v14727_v35  ;;  %v6328_v28 = vand.u32 2147483648, %v14727_v35 }
 0xa77   : > { %6556 = vrot.lane.b32.xlu2 %v6498_v10, %s9215_s18  ;;  %6560 = vrot.lane.b32.xlu0 %v6500_v56, %s9215_s18  ;;  %vm7529_vm5 = vcmp.eq.f32.partialorder %v7528_v0, 8.507059e+37  ;;  %v7766_v14 = vmul.f32 %v7726_v25, %v7518_v55  ;;  %vm14887_vm6 = vmor %vm6322_vm4, %vm6323_vm2  ;;  %v6326_v30 = vand.u32 2147483647, %v14727_v35  ;;  %v6356_v43 = vand.u32 2147483648, %v5910_v32  ;;  %v7732_v39 = vpop.f32.mrf.mxu3 }
 0xa78   : > { %6564 = vrot.lane.b32.xlu1 %v6502_v20, %s9215_s18  ;;  %v7532_v53 = vsel %vm7529_vm5, %v7531_v52, %v7527_v61  ;;  %v6325_v58 = vsel %vm14887_vm6, %v14788_v59, %v6321_v47  ;;  %v7536_v54 = vmul.f32 %v14848_v57, %v7535_v48  ;;  %v6354_v13 = vand.u32 2147483647, %v5910_v32 }
 0xa79   : > { %v7767_v23 = vmul.f32 %v7729_v51, %v7532_v53  ;;  %v6329_v7 = vor.u32 1.1754944e-38, %v6328_v28  ;;  %vm6327_vm9 = vcmp.eq.f32.partialorder %v6326_v30, 8.507059e+37  ;;  %vm6350_vm7 = vweird.f32 %v5910_v32 }
 0xa7a   : > { %v8849_v24 = vpop.eup %8848  ;;  %v6357_v36 = vor.u32 1.1754944e-38, %v6356_v43  ;;  %v7537_v19 = vadd.f32 %v14848_v57, %v7536_v54  ;;  %vm7539_vm12 = vweird.f32 %v14848_v57  ;;  %vm6355_vm13 = vcmp.eq.f32.partialorder %v6354_v13, 8.507059e+37 }
 0xa7b   : > { %v6346_v29 = vmul.f32 %v8849_v24, %v5910_v32  ;;  %vm6351_vm8 = vweird.f32 %v8849_v24  ;;  %v6330_v33 = vsel %vm6327_vm9, %v6329_v7, %v6325_v58  ;;  %v7544_v46 = vand.u32 2147483648, %v14791_v12 }
 0xa7c   : > { %vm6352_vm10 = vmor %vm6350_vm7, %vm6351_vm8  ;;  %vm7538_vm15 = vweird.f32 %v14791_v12  ;;  %v7542_v16 = vand.u32 2147483647, %v14791_v12  ;;  %v6501_v44 = vmul.f32 %v14774_v5, %v6330_v33 }
 0xa7d   : > { %v6347_v27 = vsub.f32 1.0, %v6346_v29  ;;  %vm7540_vm11 = vmor %vm7538_vm15, %vm7539_vm12  ;;  %v7545_v45 = vor.u32 1.1754944e-38, %v7544_v46 }
 0xa7e   : > { %v7541_v25 = vsel %vm7540_vm11, %v14848_v57, %v7537_v19  ;;  %vm7543_vm14 = vcmp.eq.f32.partialorder %v7542_v16, 8.507059e+37 }
 0xa7f   : > { %v6348_v50 = vmul.f32 %v8849_v24, %v6347_v27  ;;  %7826 = vrot.lane.b32.xlu2 %v7766_v14, %s9215_s18  ;;  %v7546_v11 = vsel %vm7543_vm14, %v7545_v45, %v7541_v25 }
 0xa80   : > { %7828 = vrot.lane.b32.xlu1 %v7767_v23, %s9215_s18  ;;  %v7768_v40 = vmul.f32 %v7732_v39, %v7546_v11 }
 0xa81   : > { %v6349_v35 = vadd.f32 %v8849_v24, %v6348_v50 }
 0xa83   : > { %v6353_v59 = vsel %vm6352_vm10, %v8849_v24, %v6349_v35 }
 0xa84   : > { %v6358_v3 = vsel %vm6355_vm13, %v6357_v36, %v6353_v59 }
 0xa85   : > { %v6503_v49 = vmul.f32 %v6469_v62, %v6358_v3 }
 0xa87   : > { %6566 = vrot.lane.b32.xlu0 %v6503_v49, %s9215_s18  ;;  %6562 = vrot.lane.b32.xlu2 %v6501_v44, %s9215_s18 }
 0xa8f   : > { %7830 = vrot.lane.b32.xlu0 %v7768_v40, %s9215_s18 }
 0xa9a   : > { %v7112_v6 = vpop.xlane.xlu2 %7111 }
 0xa9b   : > { %8850 = vrcp.f32 %v7112_v6  ;;  %v7558_v17 = vand.u32 2147483648, %v7112_v6  ;;  %v7556_v18 = vand.u32 2147483647, %v7112_v6  ;;  %vm7552_vm1 = vweird.f32 %v7112_v6 }
 0xa9d   : > { %v7559_v42 = vor.u32 1.1754944e-38, %v7558_v17  ;;  %vm7557_vm4 = vcmp.eq.f32.partialorder %v7556_v18, 8.507059e+37 }
 0xaa1   : > { %v8851_v12 = vpop.eup %8850 }
 0xaa2   : > { %v7548_v37 = vmul.f32 %v8851_v12, %v7112_v6  ;;  %v7803_v5 = vpop.permute.xlu2 %7802  ;;  %vm7553_vm0 = vweird.f32 %v8851_v12 }
 0xaa3   : > { %7850 = vst.msk [vmem:[%s12038_s23 + $0x18] sm:$0xff] %vm4131_vm3, %v7803_v5  ;;  %vm7554_vm2 = vmor %vm7552_vm1, %vm7553_vm0 }
 0xaa4   : > { %v7549_v34 = vsub.f32 1.0, %v7548_v37 }
 0xaa6   : > { %v7550_v31 = vmul.f32 %v8851_v12, %v7549_v34 }
 0xaa8   : > { %v7551_v32 = vadd.f32 %v8851_v12, %v7550_v31 }
 0xaa9   : > { %v6537_v57 = vpop.permute.xlu1 %6536 }
 0xaaa   : > { %v7555_v1 = vsel %vm7554_vm2, %v8851_v12, %v7551_v32  ;;  %v7735_v2 = vpop.f32.mrf.mxu3  ;;  %6584 = vst.msk [vmem:[%s12038_s23 + $0x10] sm:$0xff] %vm4131_vm3, %v6537_v57  ;;  %v6539_v38 = vpop.permute.xlu2 %6538 }
 0xaab   : > { %v7560_v4 = vsel %vm7557_vm4, %v7559_v42, %v7555_v1  ;;  %6585 = vst.msk [vmem:[%s12038_s23 + $0x30] sm:$0xff] %vm4131_vm3, %v6539_v38 }
 0xaac   : > { %v7769_v10 = vmul.f32 %v7735_v2, %v7560_v4 }
 0xaae   : > { %7832 = vrot.lane.b32.xlu2 %v7769_v10, %s9215_s18 }
 0xab1   : > { %v7807_v26 = vpop.permute.xlu0 %7806 }
 0xab2   : > { %v7805_v21 = vpop.permute.xlu1 %7804  ;;  %7852 = vst.msk [vmem:[%s12038_s23 + $0x58] sm:$0xff] %vm4131_vm3, %v7807_v26  ;;  %v7809_v41 = vpop.permute.xlu2 %7808 }
 0xab3   : > { %7851 = vst.msk [vmem:[%s12038_s23 + $0x38] sm:$0xff] %vm4131_vm3, %v7805_v21 }
 0xab4   : > { %7853 = vst.msk [vmem:[%s12038_s23 + $0x78] sm:$0xff] %vm4131_vm3, %v7809_v41 }
 0xab9   : > { %v6543_v20 = vpop.permute.xlu0 %6542 }
 0xaba   : > { %v7811_v56 = vpop.permute.xlu1 %7810  ;;  %6587 = vst.msk [vmem:[%s12038_s23 + $0x70] sm:$0xff] %vm4131_vm3, %v6543_v20  ;;  %v6545_v9 = vpop.permute.xlu2 %6544 }
 0xabb   : > { %7854 = vst.msk [vmem:[%s12038_s23 + $0x98] sm:$0xff] %vm4131_vm3, %v7811_v56 }
 0xabc   : > { %6588 = vst.msk [vmem:[%s12038_s23 + $0x90] sm:$0xff] %vm4131_vm3, %v6545_v9 }
 0xac1   : > { %v7813_v60 = vpop.permute.xlu0 %7812 }
 0xac2   : > { %v6547_v63 = vpop.permute.xlu1 %6546  ;;  %7855 = vst.msk [vmem:[%s12038_s23 + $0xb8] sm:$0xff] %vm4131_vm3, %v7813_v60  ;;  %v7815_v22 = vpop.permute.xlu2 %7814 }
 0xac3   : > { %6589 = vst.msk [vmem:[%s12038_s23 + $0xb0] sm:$0xff] %vm4131_vm3, %v6547_v63 }
 0xac4   : > { %7856 = vst.msk [vmem:[%s12038_s23 + $0xd8] sm:$0xff] %vm4131_vm3, %v7815_v22 }
 0xac9   : > { %v6549_v0 = vpop.permute.xlu0 %6548 }
 0xaca   : > { %v7817_v8 = vpop.permute.xlu1 %7816  ;;  %6590 = vst.msk [vmem:[%s12038_s23 + $0xd0] sm:$0xff] %vm4131_vm3, %v6549_v0  ;;  %v6551_v24 = vpop.permute.xlu2 %6550 }
 0xacb   : > { %7857 = vst.msk [vmem:[%s12038_s23 + $0xf8] sm:$0xff] %vm4131_vm3, %v7817_v8 }
 0xacc   : > { %6591 = vst.msk [vmem:[%s12038_s23 + $0xf0] sm:$0xff] %vm4131_vm3, %v6551_v24 }
 0xad1   : > { %v7819_v55 = vpop.permute.xlu0 %7818 }
 0xad2   : > { %v6553_v47 = vpop.permute.xlu1 %6552  ;;  %7858 = vst.msk [vmem:[%s12038_s23 + $0x118] sm:$0xff] %vm4131_vm3, %v7819_v55  ;;  %v7821_v61 = vpop.permute.xlu2 %7820 }
 0xad3   : > { %6592 = vst.msk [vmem:[%s12038_s23 + $0x110] sm:$0xff] %vm4131_vm3, %v6553_v47 }
 0xad4   : > { %7859 = vst.msk [vmem:[%s12038_s23 + $0x138] sm:$0xff] %vm4131_vm3, %v7821_v61 }
 0xad9   : > { %v6555_v52 = vpop.permute.xlu0 %6554 }
 0xada   : > { %v7823_v51 = vpop.permute.xlu1 %7822  ;;  %6593 = vst.msk [vmem:[%s12038_s23 + $0x130] sm:$0xff] %vm4131_vm3, %v6555_v52  ;;  %v6557_v48 = vpop.permute.xlu2 %6556 }
 0xadb   : > { %7860 = vst.msk [vmem:[%s12038_s23 + $0x158] sm:$0xff] %vm4131_vm3, %v7823_v51 }
 0xadc   : > { %6594 = vst.msk [vmem:[%s12038_s23 + $0x150] sm:$0xff] %vm4131_vm3, %v6557_v48 }
 0xae1   : > { %v7825_v29 = vpop.permute.xlu0 %7824 }
 0xae2   : > { %v6559_v28 = vpop.permute.xlu1 %6558  ;;  %7861 = vst.msk [vmem:[%s12038_s23 + $0x178] sm:$0xff] %vm4131_vm3, %v7825_v29  ;;  %v7827_v14 = vpop.permute.xlu2 %7826 }
 0xae3   : > { %6595 = vst.msk [vmem:[%s12038_s23 + $0x170] sm:$0xff] %vm4131_vm3, %v6559_v28 }
 0xae4   : > { %7862 = vst.msk [vmem:[%s12038_s23 + $0x198] sm:$0xff] %vm4131_vm3, %v7827_v14 }
 0xae9   : > { %v6561_v15 = vpop.permute.xlu0 %6560 }
 0xaea   : > { %v6565_v30 = vpop.permute.xlu1 %6564  ;;  %6596 = vst.msk [vmem:[%s12038_s23 + $0x190] sm:$0xff] %vm4131_vm3, %v6561_v15  ;;  %v6563_v53 = vpop.permute.xlu2 %6562 }
 0xaeb   : > { %6598 = vst.msk [vmem:[%s12038_s23 + $0x1d0] sm:$0xff] %vm4131_vm3, %v6565_v30 }
 0xaec   : > { %6597 = vst.msk [vmem:[%s12038_s23 + $0x1b0] sm:$0xff] %vm4131_vm3, %v6563_v53 }
 0xaf2   : > { %v7829_v27 = vpop.permute.xlu1 %7828 }
 0xaf3   : > { %7863 = vst.msk [vmem:[%s12038_s23 + $0x1b8] sm:$0xff] %vm4131_vm3, %v7829_v27 }
 0xaf9   : > { %v6567_v23 = vpop.permute.xlu0 %6566 }
 0xafa   : > { %6599 = vst.msk [vmem:[%s12038_s23 + $0x1f0] sm:$0xff] %vm4131_vm3, %v6567_v23 }
 0xb01   : > { %v7831_v43 = vpop.permute.xlu0 %7830 }
 0xb02   : > { %7864 = vst.msk [vmem:[%s12038_s23 + $0x1d8] sm:$0xff] %vm4131_vm3, %v7831_v43 }
 0xb08   : > { %v7833_v58 = vpop.permute.xlu2 %7832 }
 0xb09   : > { %7865 = vst.msk [vmem:[%s12038_s23 + $0x1f8] sm:$0xff] %vm4131_vm3, %v7833_v58 }
 0xb0a   : > { %9164 = shalt.err (!%p9161_p10)
}
 0xb0b   : > { %s9216_s22 = smov 512   ;;  %s9217_s25 = smov 32  }
 0xb0c   : > { %8196 = dma.vmem_to_hbm [thread:$0]  (%p9304_p3), %s7880_s4, 8192, %s7882_s5, %s7867_s7, %s9216_s22, %s9216_s22, %s9217_s25  }
 0xb0d PF: > { %s7896_s30 = sand.u32 1, %s9195_s12   ;;  %p15832_p12 = scmp.ge.s32.totalorder %s9207_s15, 2 }
 0xb0e   : > { %s7897_s18 = scalar_lea.sflag [#allocation4], %s7896_s30 }
 0xb0f   : > { %p8210_p13 = pnand %p15832_p12, %p9273_p6 }
 0xb11   : > { %p8211_p0 = pneg %p8210_p13 }
 0xb13   : > { %9190 = dma.done.wait (%p8211_p0), %s7897_s18, 8192  }
 0xb14   : > { %9192 = vsyncadd (%p8211_p0), %s7897_s18, 4294959104  ;;  %p17_p5 = scmp.ge.s32.totalorder %s9294_s6, 4   ;;  %s15833_s12 = smov %s9199_s13 }
 0xb15   : > { %s15834_s13 = smov %s9203_s14  ;;  %s15835_s14 = smov %s9310_s10 }
 0xb16   : > { %s15836_s15 = smov %s9294_s6  ;;  %19 = sbr.rel (!%p17_p5) target bundleno = 6 (0x6), region = 85 }
 0xb1b   :  { %7903 = vsyncpa [#allocation3], 1 }
 0xb1c   :  { %7905 = vsyncpa [#allocation3 + $0x1], 1 }
 0xb1d   :  { %7906 = vsyncpa [#allocation6], 1 }
 0xb1e   :  { %7907 = vsyncpa [#allocation4], 1 }
 0xb1f   :  { %7909 = vsyncpa [#allocation4 + $0x1], 1 }

</bundles_post_ra>
